<compile_context>
chip_gen: v5e
topology: v5e:2x2
jax: 0.10.0
libtpu: 0.0.40
codegen_flags: <defaults>
</compile_context>

<pallas_src>
import functools

import jax
import jax.numpy as jnp
import numpy as np
from jax.experimental import pallas as pl
from jax.experimental.pallas import tpu as pltpu


# --------------------------------------------------------------------------------------
# Fused kernel: per (batch_chunk, time_chunk) tile -> chunk input projection (one GEMM)
# followed by the serial LiGRU recurrence with the hidden state carried in VMEM.
# --------------------------------------------------------------------------------------
def _ligru_fused_kernel(x_ref, w_ref, b_ref, u_ref, h0_ref, out_ref,
                        h_scratch, wx_scratch, *, nonlinearity, compute_dtype):
    bc, tc, d = x_ref.shape
    h2 = w_ref.shape[1]
    hd = h2 // 2

    # Re-initialize the carried hidden state at the first time chunk of each batch chunk.
    @pl.when(pl.program_id(1) == 0)
    def _():
        h_scratch[...] = h0_ref[...].astype(jnp.float32)

    # ---- Fused input projection + folded BatchNorm bias for the whole chunk:
    #      one lane/sublane-dense MXU GEMM, result kept in VMEM (no HBM round trip).
    x = x_ref[...].reshape(bc * tc, d)
    wx = jnp.dot(x, w_ref[...], preferred_element_type=jnp.float32) + b_ref[...]
    wx_scratch[...] = wx.reshape(bc, tc, h2)

    u = u_ref[...]                       # [H, 2H] concatenated Ua|Uz, chunk-resident

    def act(a):
        if nonlinearity == "tanh":
            return jnp.tanh(a)
        if nonlinearity == "sin":
            return jnp.sin(a)
        if nonlinearity == "leaky_relu":
            return jnp.where(a >= 0.0, a, 0.01 * a)
        return jnp.maximum(a, 0.0)       # 'relu' (default)

    # ---- Serial recurrence, fully unrolled (all slices / stores use static indices).
    h = h_scratch[...]                   # f32 carried state, (bc, H)
    for i in range(tc):
        gates = wx_scratch[:, i, :] + jnp.dot(h.astype(compute_dtype), u,
                                              preferred_element_type=jnp.float32)
        at = gates[:, :hd]               # lane-aligned split at column H
        zt = jax.nn.sigmoid(gates[:, hd:])
        # drop_mask == 1.0 in eval mode -> no-op multiply (omitted).
        h = zt * h + (1.0 - zt) * act(at)
        out_ref[:, i, :] = h.astype(out_ref.dtype)
    h_scratch[...] = h


# --------------------------------------------------------------------------------------
# Wrapper
# --------------------------------------------------------------------------------------
def ligru_forward(x, w, u, gamma, beta, running_mean, running_var, h0=None, *,
                  eps=1e-5, nonlinearity="relu", time_chunk=32, batch_chunk=None,
                  compute_dtype=jnp.bfloat16, vmem_limit_bytes=None):
    """Pallas LiGRU layer forward (eval mode, unidirectional).

    x : [B, T, D] float32
    w : [2H, D]   (nn.Linear(D, 2H).weight)
    u : [2H, H]   (nn.Linear(H, 2H).weight)
    gamma, beta, running_mean, running_var : [2H]  (BatchNorm1d params / buffers)
    returns: [B, T, H]
    """
    B, T, D = x.shape
    H2 = w.shape[0]
    H = H2 // 2
    f32 = jnp.float32

    # Block-shape hygiene: time_chunk is the second-to-last dim of the (bf16-capable)
    # x / out blocks -> keep it a multiple of 16; batch_chunk must divide B and be a
    # multiple of 8 (sublane rule) unless it equals B.
    time_chunk = int(-(-int(time_chunk) // 16) * 16)
    if batch_chunk is None:
        batch_chunk = B // 2 if (B % 16 == 0) else B   # >=2 parallel entries when possible
    assert B % batch_chunk == 0, "batch_chunk must divide B"
    assert batch_chunk == B or batch_chunk % 8 == 0, "batch_chunk must be a multiple of 8"

    T_pad = pl.cdiv(T, time_chunk) * time_chunk

    # ---- Fold eval-mode BatchNorm into the input projection (done once, in XLA). ----
    scale = jnp.asarray(gamma, f32) * jax.lax.rsqrt(jnp.asarray(running_var, f32) + eps)
    w_cat = (jnp.asarray(w, f32).T * scale[None, :]).astype(compute_dtype)        # [D, 2H]
    bias = (jnp.asarray(beta, f32)
            - jnp.asarray(running_mean, f32) * scale).reshape(1, H2)              # [1, 2H] f32
    u_cat = jnp.asarray(u, f32).T.astype(compute_dtype)                           # [H, 2H]

    if h0 is None:
        h0 = jnp.zeros((B, H), f32)
    h0 = jnp.asarray(h0, f32)

    # Batch-major end-to-end (no wrapper transposes); pad time up to a chunk multiple.
    x_c = jnp.asarray(x).astype(compute_dtype)
    if T_pad != T:
        x_c = jnp.pad(x_c, ((0, 0), (0, T_pad - T), (0, 0)))

    n_b = B // batch_chunk
    n_t = T_pad // time_chunk
    kernel = functools.partial(_ligru_fused_kernel, nonlinearity=nonlinearity,
                               compute_dtype=compute_dtype)
    wfull = lambda b, t: (0, 0)

    out = pl.pallas_call(
        kernel,
        out_shape=jax.ShapeDtypeStruct((B, T_pad, H), f32),
        grid_spec=pltpu.PrefetchScalarGridSpec(
            num_scalar_prefetch=0,
            grid=(n_b, n_t),
            in_specs=[
                pl.BlockSpec((batch_chunk, time_chunk, D), lambda b, t: (b, t, 0)),  # x
                pl.BlockSpec((D, H2), wfull),                                        # folded W
                pl.BlockSpec((1, H2), wfull),                                        # folded bias
                pl.BlockSpec((H, H2), wfull),                                        # Ua|Uz
                pl.BlockSpec((batch_chunk, H), lambda b, t: (b, 0)),                 # h0
            ],
            out_specs=pl.BlockSpec((batch_chunk, time_chunk, H),
                                   lambda b, t: (b, t, 0)),
            scratch_shapes=[
                pltpu.VMEM((batch_chunk, H), jnp.float32),             # carried hidden state
                pltpu.VMEM((batch_chunk, time_chunk, H2), jnp.float32),  # chunk gate pre-acts
            ],
        ),
        compiler_params=pltpu.CompilerParams(
            dimension_semantics=("parallel", "arbitrary"),
            vmem_limit_bytes=vmem_limit_bytes),
    )(x_c, w_cat, bias, u_cat, h0)

    return out[:, :T, :].astype(x.dtype)


# --------------------------------------------------------------------------------------
# Pure-JAX references
# --------------------------------------------------------------------------------------
def _act_ref(a, nonlinearity):
    if nonlinearity == "tanh":
        return jnp.tanh(a)
    if nonlinearity == "sin":
        return jnp.sin(a)
    if nonlinearity == "leaky_relu":
        return jnp.where(a >= 0.0, a, 0.01 * a)
    return jnp.maximum(a, 0.0)


def ligru_reference(x, w, u, gamma, beta, running_mean, running_var, *,
                    eps=1e-5, nonlinearity="relu"):
    """f32 reference mirroring the PyTorch eval-mode forward (un-folded BatchNorm)."""
    B, T, D = x.shape
    H = w.shape[0] // 2
    wx = jnp.einsum("btd,kd->btk", x, w)
    wx = (wx - running_mean) / jnp.sqrt(running_var + eps) * gamma + beta
    h = jnp.zeros((B, H), jnp.float32)
    outs = []
    for t in range(T):
        gates = wx[:, t] + h @ u.T
        at, zt = gates[:, :H], jax.nn.sigmoid(gates[:, H:])
        h = zt * h + (1.0 - zt) * _act_ref(at, nonlinearity)
        outs.append(h)
    return jnp.stack(outs, axis=1)


def ligru_reference_quantized(x, w, u, gamma, beta, running_mean, running_var, *,
                              eps=1e-5, nonlinearity="relu",
                              compute_dtype=jnp.bfloat16):
    """Reference with the same BN-folding / dtype-rounding points as the kernel."""
    B, T, D = x.shape
    H = w.shape[0] // 2
    scale = gamma * jax.lax.rsqrt(running_var + eps)
    wt = (w.T * scale[None, :]).astype(compute_dtype)
    bias = beta - running_mean * scale
    ut = u.T.astype(compute_dtype)
    wx = jnp.dot(x.astype(compute_dtype).reshape(B * T, D), wt,
                 preferred_element_type=jnp.float32).reshape(B, T, 2 * H) + bias
    h = jnp.zeros((B, H), jnp.float32)
    outs = []
    for t in range(T):
        gates = wx[:, t] + jnp.dot(h.astype(compute_dtype), ut,
                                   preferred_element_type=jnp.float32)
        at, zt = gates[:, :H], jax.nn.sigmoid(gates[:, H:])
        h = zt * h + (1.0 - zt) * _act_ref(at, nonlinearity)
        outs.append(h)
    return jnp.stack(outs, axis=1)


# --------------------------------------------------------------------------------------
if __name__ == "__main__":
    # Small deterministic configuration. T deliberately not a multiple of the time chunk
    # (padding path); B=16 with batch_chunk=8 exercises the parallel batch-chunk axis.
    B, T, D, H = 16, 28, 64, 128
    key = jax.random.PRNGKey(0)
    kx, kw, ku, kg, kb, km, kv = jax.random.split(key, 7)

    x = jax.random.normal(kx, (B, T, D), dtype=jnp.float32)
    w = jax.random.normal(kw, (2 * H, D), dtype=jnp.float32) * (1.0 / np.sqrt(D))
    u = jax.random.normal(ku, (2 * H, H), dtype=jnp.float32) * (1.0 / np.sqrt(H))
    gamma = 1.0 + 0.1 * jax.random.normal(kg, (2 * H,), dtype=jnp.float32)
    beta = 0.1 * jax.random.normal(kb, (2 * H,), dtype=jnp.float32)
    running_mean = 0.1 * jax.random.normal(km, (2 * H,), dtype=jnp.float32)
    running_var = 1.0 + 0.1 * jnp.abs(jax.random.normal(kv, (2 * H,), dtype=jnp.float32))

    # f32 path with small chunks: validates BN folding, multi-time-chunk state carry,
    # batch chunking, padding and the batch-major layout plumbing against PyTorch order.
    out_f32 = ligru_forward(x, w, u, gamma, beta, running_mean, running_var,
                            compute_dtype=jnp.float32, time_chunk=16, batch_chunk=8)
    out_f32 = jax.block_until_ready(out_f32)
    ref = ligru_reference(x, w, u, gamma, beta, running_mean, running_var)
    np.testing.assert_allclose(np.asarray(out_f32), np.asarray(ref),
                               rtol=1e-4, atol=1e-4)

    # bf16-MXU path (defaults: time_chunk=32, batch_chunk=B//2): matches an identically
    # quantized reference.
    out_bf16 = ligru_forward(x, w, u, gamma, beta, running_mean, running_var)
    out_bf16 = jax.block_until_ready(out_bf16)
    ref_q = ligru_reference_quantized(x, w, u, gamma, beta, running_mean, running_var)
    np.testing.assert_allclose(np.asarray(out_bf16), np.asarray(ref_q),
                               rtol=5e-3, atol=5e-3)

    print("KERNEL_OK")
</pallas_src>

<mosaic_0001>
module attributes {stable_mosaic.version = 11 : i64} {
  func.func @_ligru_fused_kernel(%arg0: i32, %arg1: i32, %arg2: memref<8x16x64xf32, #tpu.memory_space<vmem>>, %arg3: memref<64x256xf32, #tpu.memory_space<vmem>>, %arg4: memref<1x256xf32, #tpu.memory_space<vmem>>, %arg5: memref<128x256xf32, #tpu.memory_space<vmem>>, %arg6: memref<8x128xf32, #tpu.memory_space<vmem>>, %arg7: memref<8x16x128xf32, #tpu.memory_space<vmem>>, %arg8: memref<8x128xf32, #tpu.memory_space<vmem>>, %arg9: memref<8x16x256xf32, #tpu.memory_space<vmem>>) attributes {dimension_semantics = [#tpu.dimension_semantics<parallel>, #tpu.dimension_semantics<arbitrary>], iteration_bounds = array<i64: 2, 2>, scalar_prefetch = 0 : i64, scratch_operands = 2 : i64, tpu.core_type = #tpu.core_type<tc>, window_params = [{transform_indices = @transform_0, window_bounds = array<i64: 8, 16, 64>}, {pipeline_mode = #tpu.pipeline_mode<synchronous>, transform_indices = @transform_1, window_bounds = array<i64: 64, 256>}, {pipeline_mode = #tpu.pipeline_mode<synchronous>, transform_indices = @transform_2, window_bounds = array<i64: 1, 256>}, {pipeline_mode = #tpu.pipeline_mode<synchronous>, transform_indices = @transform_3, window_bounds = array<i64: 128, 256>}, {transform_indices = @transform_4, window_bounds = array<i64: 8, 128>}, {transform_indices = @transform_5, window_bounds = array<i64: 8, 16, 128>}]} {
    %c0_i32 = arith.constant 0 : i32
    %0 = arith.cmpi eq, %arg1, %c0_i32 : i32
    %1 = arith.extui %0 : i1 to i32
    %c0_i32_0 = arith.constant 0 : i32
    %2 = arith.cmpi ne, %1, %c0_i32_0 : i32
    scf.if %2 {
      %c0_161 = arith.constant 0 : index
      %c0_162 = arith.constant 0 : index
      %351 = vector.load %arg6[%c0_161, %c0_162] : memref<8x128xf32, #tpu.memory_space<vmem>>, vector<8x128xf32>
      %c0_163 = arith.constant 0 : index
      %c0_164 = arith.constant 0 : index
      %352 = vector.load %arg8[%c0_163, %c0_164] : memref<8x128xf32, #tpu.memory_space<vmem>>, vector<8x128xf32>
      tpu.vector_store %arg8[%c0_163, %c0_164], %351 {strides = array<i32>} : memref<8x128xf32, #tpu.memory_space<vmem>>, vector<8x128xf32>,
    } else {
    }
    %c0 = arith.constant 0 : index
    %c0_1 = arith.constant 0 : index
    %c0_2 = arith.constant 0 : index
    %3 = vector.load %arg2[%c0, %c0_1, %c0_2] : memref<8x16x64xf32, #tpu.memory_space<vmem>>, vector<8x16x64xf32>
    %4 = vector.shape_cast %3 : vector<8x16x64xf32> to vector<128x64xf32>
    %c0_3 = arith.constant 0 : index
    %c0_4 = arith.constant 0 : index
    %5 = vector.load %arg3[%c0_3, %c0_4] : memref<64x256xf32, #tpu.memory_space<vmem>>, vector<64x256xf32>
    %cst = arith.constant dense<0.000000e+00> : vector<128x256xf32>
    %6 = tpu.matmul %4, %5, %cst {dimension_numbers = #tpu.dot_dimension_numbers<[1], [0], [0], [1], [0, 0, 1, 1], [], []>} : vector<128x64xf32>, vector<64x256xf32>, vector<128x256xf32> -> vector<128x256xf32>
    %c0_5 = arith.constant 0 : index
    %c0_6 = arith.constant 0 : index
    %7 = vector.load %arg4[%c0_5, %c0_6] : memref<1x256xf32, #tpu.memory_space<vmem>>, vector<1x256xf32>
    %8 = vector.broadcast %7 : vector<1x256xf32> to vector<128x256xf32>
    %9 = arith.addf %6, %8 : vector<128x256xf32>
    %10 = vector.shape_cast %9 : vector<128x256xf32> to vector<8x16x256xf32>
    %c0_7 = arith.constant 0 : index
    %c0_8 = arith.constant 0 : index
    %c0_9 = arith.constant 0 : index
    %11 = vector.load %arg9[%c0_7, %c0_8, %c0_9] : memref<8x16x256xf32, #tpu.memory_space<vmem>>, vector<8x16x256xf32>
    tpu.vector_store %arg9[%c0_7, %c0_8, %c0_9], %10 {strides = array<i32>} : memref<8x16x256xf32, #tpu.memory_space<vmem>>, vector<8x16x256xf32>,
    %c0_10 = arith.constant 0 : index
    %c0_11 = arith.constant 0 : index
    %12 = vector.load %arg5[%c0_10, %c0_11] : memref<128x256xf32, #tpu.memory_space<vmem>>, vector<128x256xf32>
    %c0_12 = arith.constant 0 : index
    %c0_13 = arith.constant 0 : index
    %13 = vector.load %arg8[%c0_12, %c0_13] : memref<8x128xf32, #tpu.memory_space<vmem>>, vector<8x128xf32>
    %c0_14 = arith.constant 0 : index
    %c0_15 = arith.constant 0 : index
    %c0_16 = arith.constant 0 : index
    %14 = vector.load %arg9[%c0_14, %c0_15, %c0_16] : memref<8x16x256xf32, #tpu.memory_space<vmem>>, vector<8x1x256xf32>
    %15 = vector.shape_cast %14 : vector<8x1x256xf32> to vector<8x256xf32>
    %cst_17 = arith.constant dense<0.000000e+00> : vector<8x256xf32>
    %16 = tpu.matmul %13, %12, %cst_17 {dimension_numbers = #tpu.dot_dimension_numbers<[1], [0], [0], [1], [0, 0, 1, 1], [], []>} : vector<8x128xf32>, vector<128x256xf32>, vector<8x256xf32> -> vector<8x256xf32>
    %17 = arith.addf %15, %16 : vector<8x256xf32>
    %18 = vector.extract_strided_slice %17 {offsets = [0, 0], sizes = [8, 128], strides = [1, 1]} : vector<8x256xf32> to vector<8x128xf32>
    %19 = vector.extract_strided_slice %17 {offsets = [0, 128], sizes = [8, 128], strides = [1, 1]} : vector<8x256xf32> to vector<8x128xf32>
    %20 = arith.negf %19 : vector<8x128xf32>
    %21 = math.exp %20 : vector<8x128xf32>
    %cst_18 = arith.constant 1.000000e+00 : f32
    %22 = vector.broadcast %cst_18 : f32 to vector<8x128xf32>
    %23 = arith.addf %22, %21 : vector<8x128xf32>
    %24 = arith.divf %22, %23 : vector<8x128xf32>
    %25 = arith.mulf %24, %13 : vector<8x128xf32>
    %cst_19 = arith.constant 1.000000e+00 : f32
    %26 = vector.broadcast %cst_19 : f32 to vector<8x128xf32>
    %27 = arith.subf %26, %24 : vector<8x128xf32>
    %cst_20 = arith.constant 0.000000e+00 : f32
    %28 = vector.broadcast %cst_20 : f32 to vector<8x128xf32>
    %29 = arith.maximumf %18, %28 : vector<8x128xf32>
    %30 = arith.mulf %27, %29 : vector<8x128xf32>
    %31 = arith.addf %25, %30 : vector<8x128xf32>
    %c0_21 = arith.constant 0 : index
    %c0_22 = arith.constant 0 : index
    %c0_23 = arith.constant 0 : index
    %32 = vector.load %arg7[%c0_21, %c0_22, %c0_23] : memref<8x16x128xf32, #tpu.memory_space<vmem>>, vector<8x1x128xf32>
    %33 = vector.shape_cast %32 : vector<8x1x128xf32> to vector<8x128xf32>
    %34 = vector.shape_cast %31 : vector<8x128xf32> to vector<8x1x128xf32>
    tpu.vector_store %arg7[%c0_21, %c0_22, %c0_23], %34 {strides = array<i32>} : memref<8x16x128xf32, #tpu.memory_space<vmem>>, vector<8x1x128xf32>,
    %c0_24 = arith.constant 0 : index
    %c1 = arith.constant 1 : index
    %c0_25 = arith.constant 0 : index
    %35 = vector.load %arg9[%c0_24, %c1, %c0_25] : memref<8x16x256xf32, #tpu.memory_space<vmem>>, vector<8x1x256xf32>
    %36 = vector.shape_cast %35 : vector<8x1x256xf32> to vector<8x256xf32>
    %cst_26 = arith.constant dense<0.000000e+00> : vector<8x256xf32>
    %37 = tpu.matmul %31, %12, %cst_26 {dimension_numbers = #tpu.dot_dimension_numbers<[1], [0], [0], [1], [0, 0, 1, 1], [], []>} : vector<8x128xf32>, vector<128x256xf32>, vector<8x256xf32> -> vector<8x256xf32>
    %38 = arith.addf %36, %37 : vector<8x256xf32>
    %39 = vector.extract_strided_slice %38 {offsets = [0, 0], sizes = [8, 128], strides = [1, 1]} : vector<8x256xf32> to vector<8x128xf32>
    %40 = vector.extract_strided_slice %38 {offsets = [0, 128], sizes = [8, 128], strides = [1, 1]} : vector<8x256xf32> to vector<8x128xf32>
    %41 = arith.negf %40 : vector<8x128xf32>
    %42 = math.exp %41 : vector<8x128xf32>
    %cst_27 = arith.constant 1.000000e+00 : f32
    %43 = vector.broadcast %cst_27 : f32 to vector<8x128xf32>
    %44 = arith.addf %43, %42 : vector<8x128xf32>
    %45 = arith.divf %43, %44 : vector<8x128xf32>
    %46 = arith.mulf %45, %31 : vector<8x128xf32>
    %cst_28 = arith.constant 1.000000e+00 : f32
    %47 = vector.broadcast %cst_28 : f32 to vector<8x128xf32>
    %48 = arith.subf %47, %45 : vector<8x128xf32>
    %cst_29 = arith.constant 0.000000e+00 : f32
    %49 = vector.broadcast %cst_29 : f32 to vector<8x128xf32>
    %50 = arith.maximumf %39, %49 : vector<8x128xf32>
    %51 = arith.mulf %48, %50 : vector<8x128xf32>
    %52 = arith.addf %46, %51 : vector<8x128xf32>
    %c0_30 = arith.constant 0 : index
    %c1_31 = arith.constant 1 : index
    %c0_32 = arith.constant 0 : index
    %53 = vector.load %arg7[%c0_30, %c1_31, %c0_32] : memref<8x16x128xf32, #tpu.memory_space<vmem>>, vector<8x1x128xf32>
    %54 = vector.shape_cast %53 : vector<8x1x128xf32> to vector<8x128xf32>
    %55 = vector.shape_cast %52 : vector<8x128xf32> to vector<8x1x128xf32>
    tpu.vector_store %arg7[%c0_30, %c1_31, %c0_32], %55 {strides = array<i32>} : memref<8x16x128xf32, #tpu.memory_space<vmem>>, vector<8x1x128xf32>,
    %c0_33 = arith.constant 0 : index
    %c2 = arith.constant 2 : index
    %c0_34 = arith.constant 0 : index
    %56 = vector.load %arg9[%c0_33, %c2, %c0_34] : memref<8x16x256xf32, #tpu.memory_space<vmem>>, vector<8x1x256xf32>
    %57 = vector.shape_cast %56 : vector<8x1x256xf32> to vector<8x256xf32>
    %cst_35 = arith.constant dense<0.000000e+00> : vector<8x256xf32>
    %58 = tpu.matmul %52, %12, %cst_35 {dimension_numbers = #tpu.dot_dimension_numbers<[1], [0], [0], [1], [0, 0, 1, 1], [], []>} : vector<8x128xf32>, vector<128x256xf32>, vector<8x256xf32> -> vector<8x256xf32>
    %59 = arith.addf %57, %58 : vector<8x256xf32>
    %60 = vector.extract_strided_slice %59 {offsets = [0, 0], sizes = [8, 128], strides = [1, 1]} : vector<8x256xf32> to vector<8x128xf32>
    %61 = vector.extract_strided_slice %59 {offsets = [0, 128], sizes = [8, 128], strides = [1, 1]} : vector<8x256xf32> to vector<8x128xf32>
    %62 = arith.negf %61 : vector<8x128xf32>
    %63 = math.exp %62 : vector<8x128xf32>
    %cst_36 = arith.constant 1.000000e+00 : f32
    %64 = vector.broadcast %cst_36 : f32 to vector<8x128xf32>
    %65 = arith.addf %64, %63 : vector<8x128xf32>
    %66 = arith.divf %64, %65 : vector<8x128xf32>
    %67 = arith.mulf %66, %52 : vector<8x128xf32>
    %cst_37 = arith.constant 1.000000e+00 : f32
    %68 = vector.broadcast %cst_37 : f32 to vector<8x128xf32>
    %69 = arith.subf %68, %66 : vector<8x128xf32>
    %cst_38 = arith.constant 0.000000e+00 : f32
    %70 = vector.broadcast %cst_38 : f32 to vector<8x128xf32>
    %71 = arith.maximumf %60, %70 : vector<8x128xf32>
    %72 = arith.mulf %69, %71 : vector<8x128xf32>
    %73 = arith.addf %67, %72 : vector<8x128xf32>
    %c0_39 = arith.constant 0 : index
    %c2_40 = arith.constant 2 : index
    %c0_41 = arith.constant 0 : index
    %74 = vector.load %arg7[%c0_39, %c2_40, %c0_41] : memref<8x16x128xf32, #tpu.memory_space<vmem>>, vector<8x1x128xf32>
    %75 = vector.shape_cast %74 : vector<8x1x128xf32> to vector<8x128xf32>
    %76 = vector.shape_cast %73 : vector<8x128xf32> to vector<8x1x128xf32>
    tpu.vector_store %arg7[%c0_39, %c2_40, %c0_41], %76 {strides = array<i32>} : memref<8x16x128xf32, #tpu.memory_space<vmem>>, vector<8x1x128xf32>,
    %c0_42 = arith.constant 0 : index
    %c3 = arith.constant 3 : index
    %c0_43 = arith.constant 0 : index
    %77 = vector.load %arg9[%c0_42, %c3, %c0_43] : memref<8x16x256xf32, #tpu.memory_space<vmem>>, vector<8x1x256xf32>
    %78 = vector.shape_cast %77 : vector<8x1x256xf32> to vector<8x256xf32>
    %cst_44 = arith.constant dense<0.000000e+00> : vector<8x256xf32>
    %79 = tpu.matmul %73, %12, %cst_44 {dimension_numbers = #tpu.dot_dimension_numbers<[1], [0], [0], [1], [0, 0, 1, 1], [], []>} : vector<8x128xf32>, vector<128x256xf32>, vector<8x256xf32> -> vector<8x256xf32>
    %80 = arith.addf %78, %79 : vector<8x256xf32>
    %81 = vector.extract_strided_slice %80 {offsets = [0, 0], sizes = [8, 128], strides = [1, 1]} : vector<8x256xf32> to vector<8x128xf32>
    %82 = vector.extract_strided_slice %80 {offsets = [0, 128], sizes = [8, 128], strides = [1, 1]} : vector<8x256xf32> to vector<8x128xf32>
    %83 = arith.negf %82 : vector<8x128xf32>
    %84 = math.exp %83 : vector<8x128xf32>
    %cst_45 = arith.constant 1.000000e+00 : f32
    %85 = vector.broadcast %cst_45 : f32 to vector<8x128xf32>
    %86 = arith.addf %85, %84 : vector<8x128xf32>
    %87 = arith.divf %85, %86 : vector<8x128xf32>
    %88 = arith.mulf %87, %73 : vector<8x128xf32>
    %cst_46 = arith.constant 1.000000e+00 : f32
    %89 = vector.broadcast %cst_46 : f32 to vector<8x128xf32>
    %90 = arith.subf %89, %87 : vector<8x128xf32>
    %cst_47 = arith.constant 0.000000e+00 : f32
    %91 = vector.broadcast %cst_47 : f32 to vector<8x128xf32>
    %92 = arith.maximumf %81, %91 : vector<8x128xf32>
    %93 = arith.mulf %90, %92 : vector<8x128xf32>
    %94 = arith.addf %88, %93 : vector<8x128xf32>
    %c0_48 = arith.constant 0 : index
    %c3_49 = arith.constant 3 : index
    %c0_50 = arith.constant 0 : index
    %95 = vector.load %arg7[%c0_48, %c3_49, %c0_50] : memref<8x16x128xf32, #tpu.memory_space<vmem>>, vector<8x1x128xf32>
    %96 = vector.shape_cast %95 : vector<8x1x128xf32> to vector<8x128xf32>
    %97 = vector.shape_cast %94 : vector<8x128xf32> to vector<8x1x128xf32>
    tpu.vector_store %arg7[%c0_48, %c3_49, %c0_50], %97 {strides = array<i32>} : memref<8x16x128xf32, #tpu.memory_space<vmem>>, vector<8x1x128xf32>,
    %c0_51 = arith.constant 0 : index
    %c4 = arith.constant 4 : index
    %c0_52 = arith.constant 0 : index
    %98 = vector.load %arg9[%c0_51, %c4, %c0_52] : memref<8x16x256xf32, #tpu.memory_space<vmem>>, vector<8x1x256xf32>
    %99 = vector.shape_cast %98 : vector<8x1x256xf32> to vector<8x256xf32>
    %cst_53 = arith.constant dense<0.000000e+00> : vector<8x256xf32>
    %100 = tpu.matmul %94, %12, %cst_53 {dimension_numbers = #tpu.dot_dimension_numbers<[1], [0], [0], [1], [0, 0, 1, 1], [], []>} : vector<8x128xf32>, vector<128x256xf32>, vector<8x256xf32> -> vector<8x256xf32>
    %101 = arith.addf %99, %100 : vector<8x256xf32>
    %102 = vector.extract_strided_slice %101 {offsets = [0, 0], sizes = [8, 128], strides = [1, 1]} : vector<8x256xf32> to vector<8x128xf32>
    %103 = vector.extract_strided_slice %101 {offsets = [0, 128], sizes = [8, 128], strides = [1, 1]} : vector<8x256xf32> to vector<8x128xf32>
    %104 = arith.negf %103 : vector<8x128xf32>
    %105 = math.exp %104 : vector<8x128xf32>
    %cst_54 = arith.constant 1.000000e+00 : f32
    %106 = vector.broadcast %cst_54 : f32 to vector<8x128xf32>
    %107 = arith.addf %106, %105 : vector<8x128xf32>
    %108 = arith.divf %106, %107 : vector<8x128xf32>
    %109 = arith.mulf %108, %94 : vector<8x128xf32>
    %cst_55 = arith.constant 1.000000e+00 : f32
    %110 = vector.broadcast %cst_55 : f32 to vector<8x128xf32>
    %111 = arith.subf %110, %108 : vector<8x128xf32>
    %cst_56 = arith.constant 0.000000e+00 : f32
    %112 = vector.broadcast %cst_56 : f32 to vector<8x128xf32>
    %113 = arith.maximumf %102, %112 : vector<8x128xf32>
    %114 = arith.mulf %111, %113 : vector<8x128xf32>
    %115 = arith.addf %109, %114 : vector<8x128xf32>
    %c0_57 = arith.constant 0 : index
    %c4_58 = arith.constant 4 : index
    %c0_59 = arith.constant 0 : index
    %116 = vector.load %arg7[%c0_57, %c4_58, %c0_59] : memref<8x16x128xf32, #tpu.memory_space<vmem>>, vector<8x1x128xf32>
    %117 = vector.shape_cast %116 : vector<8x1x128xf32> to vector<8x128xf32>
    %118 = vector.shape_cast %115 : vector<8x128xf32> to vector<8x1x128xf32>
    tpu.vector_store %arg7[%c0_57, %c4_58, %c0_59], %118 {strides = array<i32>} : memref<8x16x128xf32, #tpu.memory_space<vmem>>, vector<8x1x128xf32>,
    %c0_60 = arith.constant 0 : index
    %c5 = arith.constant 5 : index
    %c0_61 = arith.constant 0 : index
    %119 = vector.load %arg9[%c0_60, %c5, %c0_61] : memref<8x16x256xf32, #tpu.memory_space<vmem>>, vector<8x1x256xf32>
    %120 = vector.shape_cast %119 : vector<8x1x256xf32> to vector<8x256xf32>
    %cst_62 = arith.constant dense<0.000000e+00> : vector<8x256xf32>
    %121 = tpu.matmul %115, %12, %cst_62 {dimension_numbers = #tpu.dot_dimension_numbers<[1], [0], [0], [1], [0, 0, 1, 1], [], []>} : vector<8x128xf32>, vector<128x256xf32>, vector<8x256xf32> -> vector<8x256xf32>
    %122 = arith.addf %120, %121 : vector<8x256xf32>
    %123 = vector.extract_strided_slice %122 {offsets = [0, 0], sizes = [8, 128], strides = [1, 1]} : vector<8x256xf32> to vector<8x128xf32>
    %124 = vector.extract_strided_slice %122 {offsets = [0, 128], sizes = [8, 128], strides = [1, 1]} : vector<8x256xf32> to vector<8x128xf32>
    %125 = arith.negf %124 : vector<8x128xf32>
    %126 = math.exp %125 : vector<8x128xf32>
    %cst_63 = arith.constant 1.000000e+00 : f32
    %127 = vector.broadcast %cst_63 : f32 to vector<8x128xf32>
    %128 = arith.addf %127, %126 : vector<8x128xf32>
    %129 = arith.divf %127, %128 : vector<8x128xf32>
    %130 = arith.mulf %129, %115 : vector<8x128xf32>
    %cst_64 = arith.constant 1.000000e+00 : f32
    %131 = vector.broadcast %cst_64 : f32 to vector<8x128xf32>
    %132 = arith.subf %131, %129 : vector<8x128xf32>
    %cst_65 = arith.constant 0.000000e+00 : f32
    %133 = vector.broadcast %cst_65 : f32 to vector<8x128xf32>
    %134 = arith.maximumf %123, %133 : vector<8x128xf32>
    %135 = arith.mulf %132, %134 : vector<8x128xf32>
    %136 = arith.addf %130, %135 : vector<8x128xf32>
    %c0_66 = arith.constant 0 : index
    %c5_67 = arith.constant 5 : index
    %c0_68 = arith.constant 0 : index
    %137 = vector.load %arg7[%c0_66, %c5_67, %c0_68] : memref<8x16x128xf32, #tpu.memory_space<vmem>>, vector<8x1x128xf32>
    %138 = vector.shape_cast %137 : vector<8x1x128xf32> to vector<8x128xf32>
    %139 = vector.shape_cast %136 : vector<8x128xf32> to vector<8x1x128xf32>
    tpu.vector_store %arg7[%c0_66, %c5_67, %c0_68], %139 {strides = array<i32>} : memref<8x16x128xf32, #tpu.memory_space<vmem>>, vector<8x1x128xf32>,
    %c0_69 = arith.constant 0 : index
    %c6 = arith.constant 6 : index
    %c0_70 = arith.constant 0 : index
    %140 = vector.load %arg9[%c0_69, %c6, %c0_70] : memref<8x16x256xf32, #tpu.memory_space<vmem>>, vector<8x1x256xf32>
    %141 = vector.shape_cast %140 : vector<8x1x256xf32> to vector<8x256xf32>
    %cst_71 = arith.constant dense<0.000000e+00> : vector<8x256xf32>
    %142 = tpu.matmul %136, %12, %cst_71 {dimension_numbers = #tpu.dot_dimension_numbers<[1], [0], [0], [1], [0, 0, 1, 1], [], []>} : vector<8x128xf32>, vector<128x256xf32>, vector<8x256xf32> -> vector<8x256xf32>
    %143 = arith.addf %141, %142 : vector<8x256xf32>
    %144 = vector.extract_strided_slice %143 {offsets = [0, 0], sizes = [8, 128], strides = [1, 1]} : vector<8x256xf32> to vector<8x128xf32>
    %145 = vector.extract_strided_slice %143 {offsets = [0, 128], sizes = [8, 128], strides = [1, 1]} : vector<8x256xf32> to vector<8x128xf32>
    %146 = arith.negf %145 : vector<8x128xf32>
    %147 = math.exp %146 : vector<8x128xf32>
    %cst_72 = arith.constant 1.000000e+00 : f32
    %148 = vector.broadcast %cst_72 : f32 to vector<8x128xf32>
    %149 = arith.addf %148, %147 : vector<8x128xf32>
    %150 = arith.divf %148, %149 : vector<8x128xf32>
    %151 = arith.mulf %150, %136 : vector<8x128xf32>
    %cst_73 = arith.constant 1.000000e+00 : f32
    %152 = vector.broadcast %cst_73 : f32 to vector<8x128xf32>
    %153 = arith.subf %152, %150 : vector<8x128xf32>
    %cst_74 = arith.constant 0.000000e+00 : f32
    %154 = vector.broadcast %cst_74 : f32 to vector<8x128xf32>
    %155 = arith.maximumf %144, %154 : vector<8x128xf32>
    %156 = arith.mulf %153, %155 : vector<8x128xf32>
    %157 = arith.addf %151, %156 : vector<8x128xf32>
    %c0_75 = arith.constant 0 : index
    %c6_76 = arith.constant 6 : index
    %c0_77 = arith.constant 0 : index
    %158 = vector.load %arg7[%c0_75, %c6_76, %c0_77] : memref<8x16x128xf32, #tpu.memory_space<vmem>>, vector<8x1x128xf32>
    %159 = vector.shape_cast %158 : vector<8x1x128xf32> to vector<8x128xf32>
    %160 = vector.shape_cast %157 : vector<8x128xf32> to vector<8x1x128xf32>
    tpu.vector_store %arg7[%c0_75, %c6_76, %c0_77], %160 {strides = array<i32>} : memref<8x16x128xf32, #tpu.memory_space<vmem>>, vector<8x1x128xf32>,
    %c0_78 = arith.constant 0 : index
    %c7 = arith.constant 7 : index
    %c0_79 = arith.constant 0 : index
    %161 = vector.load %arg9[%c0_78, %c7, %c0_79] : memref<8x16x256xf32, #tpu.memory_space<vmem>>, vector<8x1x256xf32>
    %162 = vector.shape_cast %161 : vector<8x1x256xf32> to vector<8x256xf32>
    %cst_80 = arith.constant dense<0.000000e+00> : vector<8x256xf32>
    %163 = tpu.matmul %157, %12, %cst_80 {dimension_numbers = #tpu.dot_dimension_numbers<[1], [0], [0], [1], [0, 0, 1, 1], [], []>} : vector<8x128xf32>, vector<128x256xf32>, vector<8x256xf32> -> vector<8x256xf32>
    %164 = arith.addf %162, %163 : vector<8x256xf32>
    %165 = vector.extract_strided_slice %164 {offsets = [0, 0], sizes = [8, 128], strides = [1, 1]} : vector<8x256xf32> to vector<8x128xf32>
    %166 = vector.extract_strided_slice %164 {offsets = [0, 128], sizes = [8, 128], strides = [1, 1]} : vector<8x256xf32> to vector<8x128xf32>
    %167 = arith.negf %166 : vector<8x128xf32>
    %168 = math.exp %167 : vector<8x128xf32>
    %cst_81 = arith.constant 1.000000e+00 : f32
    %169 = vector.broadcast %cst_81 : f32 to vector<8x128xf32>
    %170 = arith.addf %169, %168 : vector<8x128xf32>
    %171 = arith.divf %169, %170 : vector<8x128xf32>
    %172 = arith.mulf %171, %157 : vector<8x128xf32>
    %cst_82 = arith.constant 1.000000e+00 : f32
    %173 = vector.broadcast %cst_82 : f32 to vector<8x128xf32>
    %174 = arith.subf %173, %171 : vector<8x128xf32>
    %cst_83 = arith.constant 0.000000e+00 : f32
    %175 = vector.broadcast %cst_83 : f32 to vector<8x128xf32>
    %176 = arith.maximumf %165, %175 : vector<8x128xf32>
    %177 = arith.mulf %174, %176 : vector<8x128xf32>
    %178 = arith.addf %172, %177 : vector<8x128xf32>
    %c0_84 = arith.constant 0 : index
    %c7_85 = arith.constant 7 : index
    %c0_86 = arith.constant 0 : index
    %179 = vector.load %arg7[%c0_84, %c7_85, %c0_86] : memref<8x16x128xf32, #tpu.memory_space<vmem>>, vector<8x1x128xf32>
    %180 = vector.shape_cast %179 : vector<8x1x128xf32> to vector<8x128xf32>
    %181 = vector.shape_cast %178 : vector<8x128xf32> to vector<8x1x128xf32>
    tpu.vector_store %arg7[%c0_84, %c7_85, %c0_86], %181 {strides = array<i32>} : memref<8x16x128xf32, #tpu.memory_space<vmem>>, vector<8x1x128xf32>,
    %c0_87 = arith.constant 0 : index
    %c8 = arith.constant 8 : index
    %c0_88 = arith.constant 0 : index
    %182 = vector.load %arg9[%c0_87, %c8, %c0_88] : memref<8x16x256xf32, #tpu.memory_space<vmem>>, vector<8x1x256xf32>
    %183 = vector.shape_cast %182 : vector<8x1x256xf32> to vector<8x256xf32>
    %cst_89 = arith.constant dense<0.000000e+00> : vector<8x256xf32>
    %184 = tpu.matmul %178, %12, %cst_89 {dimension_numbers = #tpu.dot_dimension_numbers<[1], [0], [0], [1], [0, 0, 1, 1], [], []>} : vector<8x128xf32>, vector<128x256xf32>, vector<8x256xf32> -> vector<8x256xf32>
    %185 = arith.addf %183, %184 : vector<8x256xf32>
    %186 = vector.extract_strided_slice %185 {offsets = [0, 0], sizes = [8, 128], strides = [1, 1]} : vector<8x256xf32> to vector<8x128xf32>
    %187 = vector.extract_strided_slice %185 {offsets = [0, 128], sizes = [8, 128], strides = [1, 1]} : vector<8x256xf32> to vector<8x128xf32>
    %188 = arith.negf %187 : vector<8x128xf32>
    %189 = math.exp %188 : vector<8x128xf32>
    %cst_90 = arith.constant 1.000000e+00 : f32
    %190 = vector.broadcast %cst_90 : f32 to vector<8x128xf32>
    %191 = arith.addf %190, %189 : vector<8x128xf32>
    %192 = arith.divf %190, %191 : vector<8x128xf32>
    %193 = arith.mulf %192, %178 : vector<8x128xf32>
    %cst_91 = arith.constant 1.000000e+00 : f32
    %194 = vector.broadcast %cst_91 : f32 to vector<8x128xf32>
    %195 = arith.subf %194, %192 : vector<8x128xf32>
    %cst_92 = arith.constant 0.000000e+00 : f32
    %196 = vector.broadcast %cst_92 : f32 to vector<8x128xf32>
    %197 = arith.maximumf %186, %196 : vector<8x128xf32>
    %198 = arith.mulf %195, %197 : vector<8x128xf32>
    %199 = arith.addf %193, %198 : vector<8x128xf32>
    %c0_93 = arith.constant 0 : index
    %c8_94 = arith.constant 8 : index
    %c0_95 = arith.constant 0 : index
    %200 = vector.load %arg7[%c0_93, %c8_94, %c0_95] : memref<8x16x128xf32, #tpu.memory_space<vmem>>, vector<8x1x128xf32>
    %201 = vector.shape_cast %200 : vector<8x1x128xf32> to vector<8x128xf32>
    %202 = vector.shape_cast %199 : vector<8x128xf32> to vector<8x1x128xf32>
    tpu.vector_store %arg7[%c0_93, %c8_94, %c0_95], %202 {strides = array<i32>} : memref<8x16x128xf32, #tpu.memory_space<vmem>>, vector<8x1x128xf32>,
    %c0_96 = arith.constant 0 : index
    %c9 = arith.constant 9 : index
    %c0_97 = arith.constant 0 : index
    %203 = vector.load %arg9[%c0_96, %c9, %c0_97] : memref<8x16x256xf32, #tpu.memory_space<vmem>>, vector<8x1x256xf32>
    %204 = vector.shape_cast %203 : vector<8x1x256xf32> to vector<8x256xf32>
    %cst_98 = arith.constant dense<0.000000e+00> : vector<8x256xf32>
    %205 = tpu.matmul %199, %12, %cst_98 {dimension_numbers = #tpu.dot_dimension_numbers<[1], [0], [0], [1], [0, 0, 1, 1], [], []>} : vector<8x128xf32>, vector<128x256xf32>, vector<8x256xf32> -> vector<8x256xf32>
    %206 = arith.addf %204, %205 : vector<8x256xf32>
    %207 = vector.extract_strided_slice %206 {offsets = [0, 0], sizes = [8, 128], strides = [1, 1]} : vector<8x256xf32> to vector<8x128xf32>
    %208 = vector.extract_strided_slice %206 {offsets = [0, 128], sizes = [8, 128], strides = [1, 1]} : vector<8x256xf32> to vector<8x128xf32>
    %209 = arith.negf %208 : vector<8x128xf32>
    %210 = math.exp %209 : vector<8x128xf32>
    %cst_99 = arith.constant 1.000000e+00 : f32
    %211 = vector.broadcast %cst_99 : f32 to vector<8x128xf32>
    %212 = arith.addf %211, %210 : vector<8x128xf32>
    %213 = arith.divf %211, %212 : vector<8x128xf32>
    %214 = arith.mulf %213, %199 : vector<8x128xf32>
    %cst_100 = arith.constant 1.000000e+00 : f32
    %215 = vector.broadcast %cst_100 : f32 to vector<8x128xf32>
    %216 = arith.subf %215, %213 : vector<8x128xf32>
    %cst_101 = arith.constant 0.000000e+00 : f32
    %217 = vector.broadcast %cst_101 : f32 to vector<8x128xf32>
    %218 = arith.maximumf %207, %217 : vector<8x128xf32>
    %219 = arith.mulf %216, %218 : vector<8x128xf32>
    %220 = arith.addf %214, %219 : vector<8x128xf32>
    %c0_102 = arith.constant 0 : index
    %c9_103 = arith.constant 9 : index
    %c0_104 = arith.constant 0 : index
    %221 = vector.load %arg7[%c0_102, %c9_103, %c0_104] : memref<8x16x128xf32, #tpu.memory_space<vmem>>, vector<8x1x128xf32>
    %222 = vector.shape_cast %221 : vector<8x1x128xf32> to vector<8x128xf32>
    %223 = vector.shape_cast %220 : vector<8x128xf32> to vector<8x1x128xf32>
    tpu.vector_store %arg7[%c0_102, %c9_103, %c0_104], %223 {strides = array<i32>} : memref<8x16x128xf32, #tpu.memory_space<vmem>>, vector<8x1x128xf32>,
    %c0_105 = arith.constant 0 : index
    %c10 = arith.constant 10 : index
    %c0_106 = arith.constant 0 : index
    %224 = vector.load %arg9[%c0_105, %c10, %c0_106] : memref<8x16x256xf32, #tpu.memory_space<vmem>>, vector<8x1x256xf32>
    %225 = vector.shape_cast %224 : vector<8x1x256xf32> to vector<8x256xf32>
    %cst_107 = arith.constant dense<0.000000e+00> : vector<8x256xf32>
    %226 = tpu.matmul %220, %12, %cst_107 {dimension_numbers = #tpu.dot_dimension_numbers<[1], [0], [0], [1], [0, 0, 1, 1], [], []>} : vector<8x128xf32>, vector<128x256xf32>, vector<8x256xf32> -> vector<8x256xf32>
    %227 = arith.addf %225, %226 : vector<8x256xf32>
    %228 = vector.extract_strided_slice %227 {offsets = [0, 0], sizes = [8, 128], strides = [1, 1]} : vector<8x256xf32> to vector<8x128xf32>
    %229 = vector.extract_strided_slice %227 {offsets = [0, 128], sizes = [8, 128], strides = [1, 1]} : vector<8x256xf32> to vector<8x128xf32>
    %230 = arith.negf %229 : vector<8x128xf32>
    %231 = math.exp %230 : vector<8x128xf32>
    %cst_108 = arith.constant 1.000000e+00 : f32
    %232 = vector.broadcast %cst_108 : f32 to vector<8x128xf32>
    %233 = arith.addf %232, %231 : vector<8x128xf32>
    %234 = arith.divf %232, %233 : vector<8x128xf32>
    %235 = arith.mulf %234, %220 : vector<8x128xf32>
    %cst_109 = arith.constant 1.000000e+00 : f32
    %236 = vector.broadcast %cst_109 : f32 to vector<8x128xf32>
    %237 = arith.subf %236, %234 : vector<8x128xf32>
    %cst_110 = arith.constant 0.000000e+00 : f32
    %238 = vector.broadcast %cst_110 : f32 to vector<8x128xf32>
    %239 = arith.maximumf %228, %238 : vector<8x128xf32>
    %240 = arith.mulf %237, %239 : vector<8x128xf32>
    %241 = arith.addf %235, %240 : vector<8x128xf32>
    %c0_111 = arith.constant 0 : index
    %c10_112 = arith.constant 10 : index
    %c0_113 = arith.constant 0 : index
    %242 = vector.load %arg7[%c0_111, %c10_112, %c0_113] : memref<8x16x128xf32, #tpu.memory_space<vmem>>, vector<8x1x128xf32>
    %243 = vector.shape_cast %242 : vector<8x1x128xf32> to vector<8x128xf32>
    %244 = vector.shape_cast %241 : vector<8x128xf32> to vector<8x1x128xf32>
    tpu.vector_store %arg7[%c0_111, %c10_112, %c0_113], %244 {strides = array<i32>} : memref<8x16x128xf32, #tpu.memory_space<vmem>>, vector<8x1x128xf32>,
    %c0_114 = arith.constant 0 : index
    %c11 = arith.constant 11 : index
    %c0_115 = arith.constant 0 : index
    %245 = vector.load %arg9[%c0_114, %c11, %c0_115] : memref<8x16x256xf32, #tpu.memory_space<vmem>>, vector<8x1x256xf32>
    %246 = vector.shape_cast %245 : vector<8x1x256xf32> to vector<8x256xf32>
    %cst_116 = arith.constant dense<0.000000e+00> : vector<8x256xf32>
    %247 = tpu.matmul %241, %12, %cst_116 {dimension_numbers = #tpu.dot_dimension_numbers<[1], [0], [0], [1], [0, 0, 1, 1], [], []>} : vector<8x128xf32>, vector<128x256xf32>, vector<8x256xf32> -> vector<8x256xf32>
    %248 = arith.addf %246, %247 : vector<8x256xf32>
    %249 = vector.extract_strided_slice %248 {offsets = [0, 0], sizes = [8, 128], strides = [1, 1]} : vector<8x256xf32> to vector<8x128xf32>
    %250 = vector.extract_strided_slice %248 {offsets = [0, 128], sizes = [8, 128], strides = [1, 1]} : vector<8x256xf32> to vector<8x128xf32>
    %251 = arith.negf %250 : vector<8x128xf32>
    %252 = math.exp %251 : vector<8x128xf32>
    %cst_117 = arith.constant 1.000000e+00 : f32
    %253 = vector.broadcast %cst_117 : f32 to vector<8x128xf32>
    %254 = arith.addf %253, %252 : vector<8x128xf32>
    %255 = arith.divf %253, %254 : vector<8x128xf32>
    %256 = arith.mulf %255, %241 : vector<8x128xf32>
    %cst_118 = arith.constant 1.000000e+00 : f32
    %257 = vector.broadcast %cst_118 : f32 to vector<8x128xf32>
    %258 = arith.subf %257, %255 : vector<8x128xf32>
    %cst_119 = arith.constant 0.000000e+00 : f32
    %259 = vector.broadcast %cst_119 : f32 to vector<8x128xf32>
    %260 = arith.maximumf %249, %259 : vector<8x128xf32>
    %261 = arith.mulf %258, %260 : vector<8x128xf32>
    %262 = arith.addf %256, %261 : vector<8x128xf32>
    %c0_120 = arith.constant 0 : index
    %c11_121 = arith.constant 11 : index
    %c0_122 = arith.constant 0 : index
    %263 = vector.load %arg7[%c0_120, %c11_121, %c0_122] : memref<8x16x128xf32, #tpu.memory_space<vmem>>, vector<8x1x128xf32>
    %264 = vector.shape_cast %263 : vector<8x1x128xf32> to vector<8x128xf32>
    %265 = vector.shape_cast %262 : vector<8x128xf32> to vector<8x1x128xf32>
    tpu.vector_store %arg7[%c0_120, %c11_121, %c0_122], %265 {strides = array<i32>} : memref<8x16x128xf32, #tpu.memory_space<vmem>>, vector<8x1x128xf32>,
    %c0_123 = arith.constant 0 : index
    %c12 = arith.constant 12 : index
    %c0_124 = arith.constant 0 : index
    %266 = vector.load %arg9[%c0_123, %c12, %c0_124] : memref<8x16x256xf32, #tpu.memory_space<vmem>>, vector<8x1x256xf32>
    %267 = vector.shape_cast %266 : vector<8x1x256xf32> to vector<8x256xf32>
    %cst_125 = arith.constant dense<0.000000e+00> : vector<8x256xf32>
    %268 = tpu.matmul %262, %12, %cst_125 {dimension_numbers = #tpu.dot_dimension_numbers<[1], [0], [0], [1], [0, 0, 1, 1], [], []>} : vector<8x128xf32>, vector<128x256xf32>, vector<8x256xf32> -> vector<8x256xf32>
    %269 = arith.addf %267, %268 : vector<8x256xf32>
    %270 = vector.extract_strided_slice %269 {offsets = [0, 0], sizes = [8, 128], strides = [1, 1]} : vector<8x256xf32> to vector<8x128xf32>
    %271 = vector.extract_strided_slice %269 {offsets = [0, 128], sizes = [8, 128], strides = [1, 1]} : vector<8x256xf32> to vector<8x128xf32>
    %272 = arith.negf %271 : vector<8x128xf32>
    %273 = math.exp %272 : vector<8x128xf32>
    %cst_126 = arith.constant 1.000000e+00 : f32
    %274 = vector.broadcast %cst_126 : f32 to vector<8x128xf32>
    %275 = arith.addf %274, %273 : vector<8x128xf32>
    %276 = arith.divf %274, %275 : vector<8x128xf32>
    %277 = arith.mulf %276, %262 : vector<8x128xf32>
    %cst_127 = arith.constant 1.000000e+00 : f32
    %278 = vector.broadcast %cst_127 : f32 to vector<8x128xf32>
    %279 = arith.subf %278, %276 : vector<8x128xf32>
    %cst_128 = arith.constant 0.000000e+00 : f32
    %280 = vector.broadcast %cst_128 : f32 to vector<8x128xf32>
    %281 = arith.maximumf %270, %280 : vector<8x128xf32>
    %282 = arith.mulf %279, %281 : vector<8x128xf32>
    %283 = arith.addf %277, %282 : vector<8x128xf32>
    %c0_129 = arith.constant 0 : index
    %c12_130 = arith.constant 12 : index
    %c0_131 = arith.constant 0 : index
    %284 = vector.load %arg7[%c0_129, %c12_130, %c0_131] : memref<8x16x128xf32, #tpu.memory_space<vmem>>, vector<8x1x128xf32>
    %285 = vector.shape_cast %284 : vector<8x1x128xf32> to vector<8x128xf32>
    %286 = vector.shape_cast %283 : vector<8x128xf32> to vector<8x1x128xf32>
    tpu.vector_store %arg7[%c0_129, %c12_130, %c0_131], %286 {strides = array<i32>} : memref<8x16x128xf32, #tpu.memory_space<vmem>>, vector<8x1x128xf32>,
    %c0_132 = arith.constant 0 : index
    %c13 = arith.constant 13 : index
    %c0_133 = arith.constant 0 : index
    %287 = vector.load %arg9[%c0_132, %c13, %c0_133] : memref<8x16x256xf32, #tpu.memory_space<vmem>>, vector<8x1x256xf32>
    %288 = vector.shape_cast %287 : vector<8x1x256xf32> to vector<8x256xf32>
    %cst_134 = arith.constant dense<0.000000e+00> : vector<8x256xf32>
    %289 = tpu.matmul %283, %12, %cst_134 {dimension_numbers = #tpu.dot_dimension_numbers<[1], [0], [0], [1], [0, 0, 1, 1], [], []>} : vector<8x128xf32>, vector<128x256xf32>, vector<8x256xf32> -> vector<8x256xf32>
    %290 = arith.addf %288, %289 : vector<8x256xf32>
    %291 = vector.extract_strided_slice %290 {offsets = [0, 0], sizes = [8, 128], strides = [1, 1]} : vector<8x256xf32> to vector<8x128xf32>
    %292 = vector.extract_strided_slice %290 {offsets = [0, 128], sizes = [8, 128], strides = [1, 1]} : vector<8x256xf32> to vector<8x128xf32>
    %293 = arith.negf %292 : vector<8x128xf32>
    %294 = math.exp %293 : vector<8x128xf32>
    %cst_135 = arith.constant 1.000000e+00 : f32
    %295 = vector.broadcast %cst_135 : f32 to vector<8x128xf32>
    %296 = arith.addf %295, %294 : vector<8x128xf32>
    %297 = arith.divf %295, %296 : vector<8x128xf32>
    %298 = arith.mulf %297, %283 : vector<8x128xf32>
    %cst_136 = arith.constant 1.000000e+00 : f32
    %299 = vector.broadcast %cst_136 : f32 to vector<8x128xf32>
    %300 = arith.subf %299, %297 : vector<8x128xf32>
    %cst_137 = arith.constant 0.000000e+00 : f32
    %301 = vector.broadcast %cst_137 : f32 to vector<8x128xf32>
    %302 = arith.maximumf %291, %301 : vector<8x128xf32>
    %303 = arith.mulf %300, %302 : vector<8x128xf32>
    %304 = arith.addf %298, %303 : vector<8x128xf32>
    %c0_138 = arith.constant 0 : index
    %c13_139 = arith.constant 13 : index
    %c0_140 = arith.constant 0 : index
    %305 = vector.load %arg7[%c0_138, %c13_139, %c0_140] : memref<8x16x128xf32, #tpu.memory_space<vmem>>, vector<8x1x128xf32>
    %306 = vector.shape_cast %305 : vector<8x1x128xf32> to vector<8x128xf32>
    %307 = vector.shape_cast %304 : vector<8x128xf32> to vector<8x1x128xf32>
    tpu.vector_store %arg7[%c0_138, %c13_139, %c0_140], %307 {strides = array<i32>} : memref<8x16x128xf32, #tpu.memory_space<vmem>>, vector<8x1x128xf32>,
    %c0_141 = arith.constant 0 : index
    %c14 = arith.constant 14 : index
    %c0_142 = arith.constant 0 : index
    %308 = vector.load %arg9[%c0_141, %c14, %c0_142] : memref<8x16x256xf32, #tpu.memory_space<vmem>>, vector<8x1x256xf32>
    %309 = vector.shape_cast %308 : vector<8x1x256xf32> to vector<8x256xf32>
    %cst_143 = arith.constant dense<0.000000e+00> : vector<8x256xf32>
    %310 = tpu.matmul %304, %12, %cst_143 {dimension_numbers = #tpu.dot_dimension_numbers<[1], [0], [0], [1], [0, 0, 1, 1], [], []>} : vector<8x128xf32>, vector<128x256xf32>, vector<8x256xf32> -> vector<8x256xf32>
    %311 = arith.addf %309, %310 : vector<8x256xf32>
    %312 = vector.extract_strided_slice %311 {offsets = [0, 0], sizes = [8, 128], strides = [1, 1]} : vector<8x256xf32> to vector<8x128xf32>
    %313 = vector.extract_strided_slice %311 {offsets = [0, 128], sizes = [8, 128], strides = [1, 1]} : vector<8x256xf32> to vector<8x128xf32>
    %314 = arith.negf %313 : vector<8x128xf32>
    %315 = math.exp %314 : vector<8x128xf32>
    %cst_144 = arith.constant 1.000000e+00 : f32
    %316 = vector.broadcast %cst_144 : f32 to vector<8x128xf32>
    %317 = arith.addf %316, %315 : vector<8x128xf32>
    %318 = arith.divf %316, %317 : vector<8x128xf32>
    %319 = arith.mulf %318, %304 : vector<8x128xf32>
    %cst_145 = arith.constant 1.000000e+00 : f32
    %320 = vector.broadcast %cst_145 : f32 to vector<8x128xf32>
    %321 = arith.subf %320, %318 : vector<8x128xf32>
    %cst_146 = arith.constant 0.000000e+00 : f32
    %322 = vector.broadcast %cst_146 : f32 to vector<8x128xf32>
    %323 = arith.maximumf %312, %322 : vector<8x128xf32>
    %324 = arith.mulf %321, %323 : vector<8x128xf32>
    %325 = arith.addf %319, %324 : vector<8x128xf32>
    %c0_147 = arith.constant 0 : index
    %c14_148 = arith.constant 14 : index
    %c0_149 = arith.constant 0 : index
    %326 = vector.load %arg7[%c0_147, %c14_148, %c0_149] : memref<8x16x128xf32, #tpu.memory_space<vmem>>, vector<8x1x128xf32>
    %327 = vector.shape_cast %326 : vector<8x1x128xf32> to vector<8x128xf32>
    %328 = vector.shape_cast %325 : vector<8x128xf32> to vector<8x1x128xf32>
    tpu.vector_store %arg7[%c0_147, %c14_148, %c0_149], %328 {strides = array<i32>} : memref<8x16x128xf32, #tpu.memory_space<vmem>>, vector<8x1x128xf32>,
    %c0_150 = arith.constant 0 : index
    %c15 = arith.constant 15 : index
    %c0_151 = arith.constant 0 : index
    %329 = vector.load %arg9[%c0_150, %c15, %c0_151] : memref<8x16x256xf32, #tpu.memory_space<vmem>>, vector<8x1x256xf32>
    %330 = vector.shape_cast %329 : vector<8x1x256xf32> to vector<8x256xf32>
    %cst_152 = arith.constant dense<0.000000e+00> : vector<8x256xf32>
    %331 = tpu.matmul %325, %12, %cst_152 {dimension_numbers = #tpu.dot_dimension_numbers<[1], [0], [0], [1], [0, 0, 1, 1], [], []>} : vector<8x128xf32>, vector<128x256xf32>, vector<8x256xf32> -> vector<8x256xf32>
    %332 = arith.addf %330, %331 : vector<8x256xf32>
    %333 = vector.extract_strided_slice %332 {offsets = [0, 0], sizes = [8, 128], strides = [1, 1]} : vector<8x256xf32> to vector<8x128xf32>
    %334 = vector.extract_strided_slice %332 {offsets = [0, 128], sizes = [8, 128], strides = [1, 1]} : vector<8x256xf32> to vector<8x128xf32>
    %335 = arith.negf %334 : vector<8x128xf32>
    %336 = math.exp %335 : vector<8x128xf32>
    %cst_153 = arith.constant 1.000000e+00 : f32
    %337 = vector.broadcast %cst_153 : f32 to vector<8x128xf32>
    %338 = arith.addf %337, %336 : vector<8x128xf32>
    %339 = arith.divf %337, %338 : vector<8x128xf32>
    %340 = arith.mulf %339, %325 : vector<8x128xf32>
    %cst_154 = arith.constant 1.000000e+00 : f32
    %341 = vector.broadcast %cst_154 : f32 to vector<8x128xf32>
    %342 = arith.subf %341, %339 : vector<8x128xf32>
    %cst_155 = arith.constant 0.000000e+00 : f32
    %343 = vector.broadcast %cst_155 : f32 to vector<8x128xf32>
    %344 = arith.maximumf %333, %343 : vector<8x128xf32>
    %345 = arith.mulf %342, %344 : vector<8x128xf32>
    %346 = arith.addf %340, %345 : vector<8x128xf32>
    %c0_156 = arith.constant 0 : index
    %c15_157 = arith.constant 15 : index
    %c0_158 = arith.constant 0 : index
    %347 = vector.load %arg7[%c0_156, %c15_157, %c0_158] : memref<8x16x128xf32, #tpu.memory_space<vmem>>, vector<8x1x128xf32>
    %348 = vector.shape_cast %347 : vector<8x1x128xf32> to vector<8x128xf32>
    %349 = vector.shape_cast %346 : vector<8x128xf32> to vector<8x1x128xf32>
    tpu.vector_store %arg7[%c0_156, %c15_157, %c0_158], %349 {strides = array<i32>} : memref<8x16x128xf32, #tpu.memory_space<vmem>>, vector<8x1x128xf32>,
    %c0_159 = arith.constant 0 : index
    %c0_160 = arith.constant 0 : index
    %350 = vector.load %arg8[%c0_159, %c0_160] : memref<8x128xf32, #tpu.memory_space<vmem>>, vector<8x128xf32>
    tpu.vector_store %arg8[%c0_159, %c0_160], %346 {strides = array<i32>} : memref<8x128xf32, #tpu.memory_space<vmem>>, vector<8x128xf32>,
    return
  }
  func.func @transform_0(%arg0: i32, %arg1: i32) -> (i32, i32, i32) {
    %c0_i32 = arith.constant 0 : i32
    %c0_i32_0 = arith.constant 0 : i32
    return %arg0, %arg1, %c0_i32 : i32, i32, i32
  }
  func.func @transform_1(%arg0: i32, %arg1: i32) -> (i32, i32) {
    %c0_i32 = arith.constant 0 : i32
    %c0_i32_0 = arith.constant 0 : i32
    %c0_i32_1 = arith.constant 0 : i32
    return %c0_i32, %c0_i32_0 : i32, i32
  }
  func.func @transform_2(%arg0: i32, %arg1: i32) -> (i32, i32) {
    %c0_i32 = arith.constant 0 : i32
    %c0_i32_0 = arith.constant 0 : i32
    %c0_i32_1 = arith.constant 0 : i32
    return %c0_i32, %c0_i32_0 : i32, i32
  }
  func.func @transform_3(%arg0: i32, %arg1: i32) -> (i32, i32) {
    %c0_i32 = arith.constant 0 : i32
    %c0_i32_0 = arith.constant 0 : i32
    %c0_i32_1 = arith.constant 0 : i32
    return %c0_i32, %c0_i32_0 : i32, i32
  }
  func.func @transform_4(%arg0: i32, %arg1: i32) -> (i32, i32) {
    %c0_i32 = arith.constant 0 : i32
    %c0_i32_0 = arith.constant 0 : i32
    return %arg0, %c0_i32 : i32, i32
  }
  func.func @transform_5(%arg0: i32, %arg1: i32) -> (i32, i32, i32) {
    %c0_i32 = arith.constant 0 : i32
    %c0_i32_0 = arith.constant 0 : i32
    return %arg0, %arg1, %c0_i32 : i32, i32, i32
  }
}

</mosaic_0001>

<bundles_post_ra>
// kernel: tpu_custom_call.1
= control target key start
LH: loop header
LB: loop body
LE: loop exit
PB: predicated region body
PF: predicated region fallthrough
CT: control target
= control target key end

     0   :  { %s13014_s0 = inlined_call_operand.hbm [shape: f32[16,32,64], index: 0, kind: input, shape index: {}]   ;;  %s13015_s1 = inlined_call_operand.hbm [shape: f32[64,256], index: 1, kind: input, shape index: {}]   ;;  %s13016_s2 = inlined_call_operand.hbm [shape: f32[1,256], index: 2, kind: input, shape index: {}]   ;;  %s13017_s3 = inlined_call_operand.hbm [shape: f32[128,256], index: 3, kind: input, shape index: {}]   ;;  %s13018_s4 = inlined_call_operand.hbm [shape: f32[16,128], index: 4, kind: input, shape index: {}]   ;;  %s13019_s5 = inlined_call_operand.hbm [shape: f32[16,32,128], index: 5, kind: output, shape index: {}]  }
   0x1   :  { %13141 = sst [smem:[#allocation56_spill]] %s13014_s0 }
   0x2   :  { %13142 = sst [smem:[#allocation57_spill]] %s13015_s1 }
   0x3   :  { %13143 = sst [smem:[#allocation58_spill]] %s13016_s2 }
   0x4   :  { %13144 = sst [smem:[#allocation59_spill]] %s13017_s3 }
   0x5   :  { %13145 = sst [smem:[#allocation60_spill]] %s13019_s5 }
   0x6   :  { %10 = vsyncpa [#allocation5], 0 }
   0x7   :  { %12 = vsyncpa [#allocation5 + $0x1], 0 }
   0x8   :  { %13 = vsyncpa [#allocation8], 0 }
   0x9   :  { %14 = vsyncpa [#allocation11], 0 }
   0xa   :  { %15 = vsyncpa [#allocation6], 0 }
   0xb   :  { %17 = vsyncpa [#allocation6 + $0x1], 0  ;;  %s7623_s18 = smov 0   ;;  %s7625_s19 = smov 0  }
   0xc   :  { %s7627_s20 = smov 0   ;;  %s7629_s21 = smov 0  }
   0xd   :  { %s7631_s22 = smov 0   ;;  %s7633_s23 = smov 0  }
   0xe   :  { %s7635_s24 = smov 0   ;;  %s7637_s25 = smov 0  }
   0xf   :  { %s7639_s26 = smov 0   ;;  %s7641_s27 = smov 0  }
  0x10   :  { %s7643_s28 = smov 0  }
  0x11 LB: > { %13146 = sst [smem:[#allocation24_spill]] %s7545_s21  ;;  %s7679_s29 = sadd.s32 4294967295, %s7573_s28   ;;  %s7573_s28 = sphi %s7643_s28, %s23_s28   ;;  %s7569_s27 = sphi %s7641_s27, %s13882_s27   ;;  %s7565_s26 = sphi %s7639_s26, %s13873_s26   ;;  %s7561_s25 = sphi %s7637_s25, %s13881_s25   ;;  %s7557_s24 = sphi %s7635_s24, %s13872_s24   ;;  %s7553_s23 = sphi %s7633_s23, %s13880_s23   ;;  %s7549_s22 = sphi %s7631_s22, %s13879_s22   ;;  %s7545_s21 = sphi %s7629_s21, %s13878_s21   ;;  %s7541_s20 = sphi %s7627_s20, %s13877_s20   ;;  %s7537_s19 = sphi %s7625_s19, %s13876_s19   ;;  %s7533_s18 = sphi %s7623_s18, %s13875_s18  }
  0x12   : > { %13147 = sst [smem:[#allocation25_spill]] %s7561_s25  ;;  %s6294_s30 = sadd.s32 4294967294, %s7573_s28  }
  0x13   : > { %13148 = sst [smem:[#allocation26_spill]] %s7565_s26  ;;  %s32_s6 = sadd.s32 1, %s7565_s26 }
  0x14   : > { %s35_s7 = sadd.s32 1, %s7569_s27  ;;  %p33_p0 = scmp.ge.s32.totalorder %s32_s6, 2 }
  0x15   : > { %s44_s8 = sadd.s32 1, %s7553_s23  ;;  %p51_p1 = scmp.ne.s32.totalorder %s7553_s23, %s7549_s22 }
  0x16   : > { %p52_p2 = scmp.eq.s32.totalorder %s7573_s28, 0  ;;  %s13884_s6 = smov (%p33_p0, %s32_s6), 0 }
  0x17   : > { %13149 = sst [smem:[#allocation27_spill]] %s13884_s6  ;;  %s13886_s7 = smov (!%p33_p0, %s35_s7), %s7569_s27 }
  0x18   : > { %s40_s9 = ssub.s32 %s7565_s26, %s13884_s6  ;;  %p7698_p3 = por %p52_p2, %p51_p1 }
  0x19   : > { %p37_p4 = scmp.ge.s32.totalorder %s13886_s7, 2  ;;  %p13021_p5 = scmp.ne.s32.totalorder %s7549_s22, %s7545_s21 }
  0x1a   : > { %p58_p6 = scmp.eq.s32.totalorder %s7679_s29, 0  ;;  %s133_s11 = sadd.s32 1, %s7541_s20 }
  0x1b   : > { %s13888_s7 = smov (%p37_p4, %s13886_s7), 0  ;;  %p140_p8 = scmp.ne.s32.totalorder %s7541_s20, %s7537_s19 }
  0x1c   : > { %13151 = sst [smem:[#allocation28_spill]] %s13888_s7  ;;  %p7713_p7 = por %p58_p6, %p13021_p5 }
  0x1d   : > { %s39_s13 = ssub.s32 %s7569_s27, %s13888_s7  ;;  %p146_p9 = scmp.ne.s32.totalorder %s7537_s19, %s7533_s18 }
  0x1e   : > { %s13152_s12 = scalar_select %p7713_p7, 1, 0 }
  0x1f   : > { %s41_s14 = sor.u32 %s40_s9, %s39_s13  ;;  %p131_p10 = scmp.eq.s32.totalorder %s39_s13, 0 }
  0x20   : > { %p42_p11 = scmp.eq.s32.totalorder %s41_s14, 0  ;;  %p7725_p12 = por %p140_p8, %p52_p2 }
  0x21   : > { %s7730_s16 = scalar_select %p131_p10, %s7541_s20, %s133_s11  }
  0x22   : > { %s7733_s17 = scalar_select %p42_p11, %s7553_s23, %s44_s8  }
  0x23   : > { %13154 = sst [smem:[#allocation29_spill]] %s7730_s16  ;;  %p7737_p13 = por %p146_p9, %p58_p6 }
  0x24   : > { %13155 = sst [smem:[#allocation30_spill]] %s7733_s17  ;;  %p172_p0 = scmp.eq.s32.totalorder %s7679_s29, 3 }
  0x25   : > { %p178_p4 = scmp.eq.s32.totalorder %s6294_s30, 3  ;;  %p6295_p5 = scmp.ge.s32.totalorder %s7573_s28, 1 }
  0x26   : > { %p7746_p7 = por %p172_p0, %p51_p1  ;;  %p185_p2 = scmp.lt.s32.totalorder %s7573_s28, 5 }
  0x27   : > { %p13159_p8 = scmp.ne.s32.totalorder %s7549_s22, %s7545_s21  ;;  %s13163_s1 = sld [smem:[#allocation57_spill]] }
  0x28   : > { %s13157_s18 = scalar_select %p7746_p7, 1, 0 }
  0x29   : > { %p7754_p10 = por %p178_p4, %p13159_p8  ;;  %p7758_p11 = pnand %p6295_p5, %p185_p2 }
  0x2a   : > { %13158 = sst [smem:[#allocation31_spill]] %s13157_s18  ;;  %s7575_s14 = smov [#allocation7]  }
  0x2b   : > { %s13160_s9 = scalar_select %p7754_p10, 1, 0 }
  0x2c   : > { %p6517_p1 = pneg %p7758_p11  ;;  %s198_s7 = sshll.u32 %s7575_s14, 4  ;;  %s199_s7 = int_to_ptr.vmem [resolvable:$true] %s198_s7 }
  0x2d   : > { %13161 = sst [smem:[#allocation32_spill]] %s13160_s9  ;;  %s196_s30 = sshll.u32 %s13163_s1, 4  ;;  %s197_s30 = int_to_ptr.hbm [resolvable:$true] %s196_s30 }
  0x2e   : > { %p7769_p9 = pnand %p6517_p1, %p58_p6  ;;  %s13165_s2 = sld [smem:[#allocation58_spill]] }
  0x2f   : > { %s7576_s13 = smov 256   ;;  %s7577_s1 = smov 16  }
  0x30   : > { %6520 = dma.hbm_to_vmem [thread:$0]  (!%p7769_p9), %s197_s30, 2048, %s199_s7, [#allocation8], %s7576_s13, %s7576_s13, %s7577_s1  }
  0x31   : > { %s7578_s21 = smov [#allocation9]   ;;  %s13166_s3 = sld [smem:[#allocation59_spill]] }
  0x32   : > { %s213_s14 = sshll.u32 %s7578_s21, 4  ;;  %s7579_s16 = smov [#allocation10]   ;;  %s214_s14 = int_to_ptr.vmem [resolvable:$true] %s213_s14 }
  0x33   : > { %s224_s9 = sshll.u32 %s7579_s16, 4  ;;  %p6299_p5 = scmp.ge.s32.totalorder %s7573_s28, 4  ;;  %s225_s9 = int_to_ptr.vmem [resolvable:$true] %s224_s9 }
  0x34   : > { %s211_s11 = sshll.u32 %s13165_s2, 4  ;;  %s212_s11 = int_to_ptr.hbm [resolvable:$true] %s211_s11 }
  0x35   : > { %6523 = dma.hbm_to_vmem [thread:$0]  (!%p7769_p9), %s212_s11, 32, %s214_s14, [#allocation8]  }
  0x36   : > { %234 = sbr.rel (%p6299_p5) target bundleno = 80 (0x50), region = 28 }
  0x37   : > { %s222_s25 = sshll.u32 %s13166_s3, 4  ;;  %s223_s25 = int_to_ptr.hbm [resolvable:$true] %s222_s25 }
  0x38   : > { %6526 = dma.hbm_to_vmem [thread:$0]  (!%p7769_p9), %s223_s25, 4096, %s225_s9, [#allocation11], %s7576_s13, %s7576_s13, %s7577_s1  }
  0x3b   : > { %s238_s5 = sand.u32 1, %s7573_s28   ;;  %s240_s21 = sand.u32 1, %s7553_s23  }
  0x3c   : > { %s6300_s7 = sshll.u32 %s240_s21, 7  ;;  %s6302_s18 = sshll.u32 %s7565_s26, 1 }
  0x3d   : > { %s6484_s30 = sshll.u32 %s7569_s27, 5  ;;  %s242_s17 = scalar_lea.vmem [#allocation4], %s6300_s7 }
  0x3e   : > { %s248_s11 = sadd.s32 %s6484_s30, %s6302_s18  ;;  %s265_s1 = sshll.u32 %s242_s17, 4  ;;  %s266_s1 = int_to_ptr.vmem [resolvable:$true] %s265_s1 }
  0x3f   : > { %s6304_s25 = sshll.u32 %s248_s11, 3  ;;  %s13167_s0 = sld [smem:[#allocation56_spill]] }
  0x40   : > { %s7580_s9 = smov 512   ;;  %s7581_s18 = smov 256  }
  0x41   : > { %6493 = sst [smem:[#allocation15]] (%p7698_p3), %s7580_s9  ;;  %s7582_s7 = smov 2  }
  0x42   : > { %s6492_s2 = scalar_select %p7698_p3, [#allocation0], [#allocation18] }
  0x43   : > { %6494 = sst [smem:[#allocation15 + $0x1]] (%p7698_p3), %s7581_s18  ;;  %s7583_s30 = smov 128  }
  0x44   : > { %s255_s21 = sld [smem:[%s6492_s2]]   ;;  %s7584_s11 = smov 8  }
  0x45   : > { %s250_s16 = scalar_lea.hbm %s13167_s0, %s6304_s25  ;;  %6495 = sst [smem:[#allocation15 + $0x2]] (%p7698_p3), %s7582_s7 }
  0x46   : > { %s263_s3 = sshll.u32 %s250_s16, 4  ;;  %6496 = sst [smem:[#allocation15 + $0x3]] (%p7698_p3), %s7583_s30  ;;  %s264_s3 = int_to_ptr.hbm [resolvable:$true] %s263_s3 }
  0x47   : > { %6497 = sst [smem:[#allocation15 + $0x4]] (%p7698_p3), %s7583_s30  ;;  %s239_s2 = scalar_lea.sflag [#allocation5], %s238_s5 }
  0x48   : > { %6498 = sst [smem:[#allocation15 + $0x5]] (%p7698_p3), %s7584_s11  ;;  %s7585_s13 = smov [#allocation14]  }
  0x49   : > { %s290_s14 = sand.u32 1, %s7541_s20   ;;  %s6308_s16 = sshll.u32 %s7569_s27, 3 }
  0x4a   : > { %s6305_s17 = sshll.u32 %s255_s21, 26  ;;  %s6307_s9 = sshll.u32 %s290_s14, 3 }
  0x4b   : > { %s6306_s25 = sadd.s32 134217728, %s6305_s17  ;;  %s296_s0 = scalar_lea.hbm %s13018_s4, %s6308_s16 }
  0x4c   : > { %6499 = dma.general (%p7698_p3), %s264_s3, 2048, %s266_s1, %s239_s2, %s7585_s13, [#allocation15], %s6306_s25, 0  }
  0x4d   : > { %s298_s30 = sshll.u32 %s296_s0, 4  ;;  %s292_s26 = scalar_lea.vmem [#allocation12], %s6307_s9  ;;  %s299_s30 = int_to_ptr.hbm [resolvable:$true] %s298_s30 }
  0x4e   : > { %s300_s11 = sshll.u32 %s292_s26, 4  ;;  %s301_s11 = int_to_ptr.vmem [resolvable:$true] %s300_s11 }
  0x4f   : > { %6500 = dma.hbm_to_vmem [thread:$0]  (%p7725_p12), %s299_s30, 128, %s301_s11, %s239_s2  }
  0x50 PF: > { %309 = sbr.rel (%p7758_p11) target bundleno = 3512 (0xdb8), region = 40 }
  0x55   : > { %s311_s3 = sand.u32 1, %s7679_s29   ;;  %s313_s10 = sand.u32 1, %s7549_s22  }
  0x56   : > { %s6310_s5 = sshll.u32 %s313_s10, 7  ;;  %s312_s1 = scalar_lea.sflag [#allocation5], %s311_s3 }
  0x57   : > { %s7822_s0 = scalar_lea.vmem [#allocation4], %s6310_s5  ;;  %p13168_p3 = scmp.ne.s32.totalorder %s13152_s12, 0 }
  0x59   : > { %7512 = dma.done.wait (%p13168_p3), %s312_s1, 2048  }
  0x5a   : > { %7514 = vsyncadd (%p13168_p3), %s312_s1, 4294965248 }
  0x5b   : > { %7516 = dma.done.wait (%p58_p6), [#allocation8], 2080  }
  0x5c   : > { %7518 = vsyncadd (%p58_p6), [#allocation8], 4294965216 }
  0x5d   : > { %7520 = dma.done.wait (%p58_p6), [#allocation11], 4096  }
  0x5e   : > { %7522 = vsyncadd (%p58_p6), [#allocation11], 4294963200  ;;  %s338_s26 = sand.u32 1, %s7537_s19  }
  0x5f   : > { %s6314_s15 = sshll.u32 %s338_s26, 3 }
  0x60   : > { %s340_s8 = scalar_lea.vmem [#allocation12], %s6314_s15 }
  0x61   : > { %7524 = dma.done.wait (%p7737_p13), %s312_s1, 128  }
  0x62   : > { %7526 = vsyncadd (%p7737_p13), %s312_s1, 4294967168  ;;  %s7841_s12 = scalar_lea.vmem [#allocation13], %s6310_s5  ;;  %p6316_p12 = scmp.ne.s32.totalorder %s7557_s24, 0 }
  0x64   : > { %380 = sbr.rel (%p6316_p12) target bundleno = 107 (0x6b), region = 64 }
  0x69   : > { %v381_v0 = vld [vmem:[%s340_s8] sm:$0xff] }
  0x6a   : > { %382 = vst [vmem:[#allocation2] sm:$0xff] %v381_v0 }
  0x6b PF: > { %v413_v1 = vld [vmem:[#allocation7 + $0x70] sm:$0xff]  ;;  %v414_v2 = vld [vmem:[#allocation7 + $0x78] sm:$0xff]  ;;  %v411_v4 = vld [vmem:[#allocation7 + $0x60] sm:$0xff]  ;;  %vm13043_vm0 = vcmask 523264   ;;  %vm13059_vm1 = vcmask 1040384   ;;  %vm13057_vm2 = vcmask 1041409  }
  0x6c   : > { %v7844_v3 = vld [vmem:[#allocation10 + $0xf8] sm:$0xff]  ;;  %478 = vmatpush.msra.mxu0 %v413_v1  ;;  %543 = vmatpush.msra.mxu1 %v414_v2  ;;  %v412_v5 = vld [vmem:[#allocation7 + $0x68] sm:$0xff]  ;;  %v7846_v6 = vld [vmem:[#allocation10 + $0xf0] sm:$0xff]  ;;  %vm13056_vm3 = vcmask 1042434   ;;  %vm13054_vm4 = vcmask 1043459   ;;  %vm13051_vm14 = vcmask 1044484  }
  0x6d   : > { %700 = vmatpush.msra.mxu3 %v7844_v3  ;;  %680 = vmatpush.msra.mxu2 %v7846_v6  ;;  %v7850_v7 = vld [vmem:[#allocation10 + $0xe8] sm:$0xff]  ;;  %v410_v9 = vld [vmem:[#allocation7 + $0x58] sm:$0xff]  ;;  %v7852_v10 = vld [vmem:[#allocation10 + $0xe0] sm:$0xff]  ;;  %s6113_s29 = scalar_lea.sflag [#allocation6], %s313_s10 }
  0x6e   : > { %v409_v8 = vld [vmem:[#allocation7 + $0x50] sm:$0xff]  ;;  %479 = vmatpush.msra.mxu0 %v411_v4  ;;  %544 = vmatpush.msra.mxu1 %v412_v5  ;;  %v7854_v11 = vld [vmem:[#allocation10 + $0xd8] sm:$0xff]  ;;  %v408_v13 = vld [vmem:[#allocation7 + $0x48] sm:$0xff] }
  0x6f   : > { %701 = vmatpush.msra.mxu3 %v7850_v7  ;;  %681 = vmatpush.msra.mxu2 %v7852_v10  ;;  %v407_v12 = vld [vmem:[#allocation7 + $0x40] sm:$0xff]  ;;  %v7858_v14 = vld [vmem:[#allocation10 + $0xd0] sm:$0xff]  ;;  %v7860_v15 = vld [vmem:[#allocation10 + $0xc8] sm:$0xff] }
  0x70   : > { %480 = vmatpush.msra.mxu0 %v409_v8  ;;  %545 = vmatpush.msra.mxu1 %v410_v9  ;;  %v7862_v16 = vld [vmem:[#allocation10 + $0xc0] sm:$0xff]  ;;  %v405_v17 = vld [vmem:[#allocation7 + $0x30] sm:$0xff]  ;;  %v406_v18 = vld [vmem:[#allocation7 + $0x38] sm:$0xff] }
  0x71   : > { %702 = vmatpush.msra.mxu3 %v7854_v11  ;;  %682 = vmatpush.msra.mxu2 %v7858_v14  ;;  %v7866_v19 = vld [vmem:[#allocation10 + $0xb8] sm:$0xff]  ;;  %v7868_v20 = vld [vmem:[#allocation10 + $0xb0] sm:$0xff]  ;;  %v404_v22 = vld [vmem:[#allocation7 + $0x28] sm:$0xff] }
  0x72   : > { %481 = vmatpush.msra.mxu0 %v407_v12  ;;  %546 = vmatpush.msra.mxu1 %v408_v13  ;;  %v403_v21 = vld [vmem:[#allocation7 + $0x20] sm:$0xff]  ;;  %v7872_v23 = vld [vmem:[#allocation10 + $0xa8] sm:$0xff]  ;;  %v402_v26 = vld [vmem:[#allocation7 + $0x18] sm:$0xff] }
  0x73   : > { %703 = vmatpush.msra.mxu3 %v7860_v15  ;;  %683 = vmatpush.msra.mxu2 %v7862_v16  ;;  %v7874_v24 = vld [vmem:[#allocation10 + $0xa0] sm:$0xff]  ;;  %v401_v25 = vld [vmem:[#allocation7 + $0x10] sm:$0xff]  ;;  %v7878_v27 = vld [vmem:[#allocation10 + $0x98] sm:$0xff] }
  0x74   : > { %482 = vmatpush.msra.mxu0 %v405_v17  ;;  %547 = vmatpush.msra.mxu1 %v406_v18  ;;  %v7880_v28 = vld [vmem:[#allocation10 + $0x90] sm:$0xff]  ;;  %v399_v29 = vld [vmem:[#allocation7] sm:$0xff]  ;;  %v400_v30 = vld [vmem:[#allocation7 + $0x8] sm:$0xff] }
  0x75   : > { %704 = vmatpush.msra.mxu3 %v7866_v19  ;;  %684 = vmatpush.msra.mxu2 %v7868_v20  ;;  %v7884_v31 = vld [vmem:[#allocation10 + $0x88] sm:$0xff]  ;;  %v383_v32 = vld [vmem:[%s7822_s0] sm:$0xff]  ;;  %v7895_v35 = vld [vmem:[#allocation10 + $0x70] sm:$0xff] }
  0x76   : > { %483 = vmatpush.msra.mxu0 %v403_v21  ;;  %548 = vmatpush.msra.mxu1 %v404_v22  ;;  %v7889_v33 = vld [vmem:[#allocation10 + $0x80] sm:$0xff]  ;;  %v7891_v34 = vld [vmem:[#allocation10 + $0x78] sm:$0xff]  ;;  %v7899_v36 = vld [vmem:[#allocation10 + $0x68] sm:$0xff] }
  0x77   : > { %705 = vmatpush.msra.mxu3 %v7872_v23  ;;  %685 = vmatpush.msra.mxu2 %v7874_v24  ;;  %v7902_v37 = vld [vmem:[#allocation10 + $0x60] sm:$0xff]  ;;  %v7906_v38 = vld [vmem:[#allocation10 + $0x58] sm:$0xff]  ;;  %v7910_v39 = vld [vmem:[#allocation10 + $0x50] sm:$0xff] }
  0x78   : > { %484 = vmatpush.msra.mxu0 %v401_v25  ;;  %549 = vmatpush.msra.mxu1 %v402_v26  ;;  %v7914_v40 = vld [vmem:[#allocation10 + $0x48] sm:$0xff]  ;;  %v7919_v42 = vld [vmem:[#allocation10 + $0x40] sm:$0xff]  ;;  %v7923_v43 = vld [vmem:[#allocation10 + $0x38] sm:$0xff] }
  0x79   : > { %706 = vmatpush.msra.mxu3 %v7878_v27  ;;  %686 = vmatpush.msra.mxu2 %v7880_v28  ;;  %v384_v41 = vld [vmem:[%s7822_s0 + $0x8] sm:$0xff]  ;;  %v7928_v44 = vld [vmem:[#allocation10 + $0x30] sm:$0xff]  ;;  %v7939_v47 = vld [vmem:[#allocation10 + $0x18] sm:$0xff] }
  0x7a   : > { %485 = vmatpush.msra.mxu0 %v399_v29  ;;  %550 = vmatpush.msra.mxu1 %v400_v30  ;;  %v7932_v45 = vld [vmem:[#allocation10 + $0x28] sm:$0xff]  ;;  %v7935_v46 = vld [vmem:[#allocation10 + $0x20] sm:$0xff]  ;;  %v7943_v48 = vld [vmem:[#allocation10 + $0x10] sm:$0xff] }
  0x7b   : > { %707 = vmatpush.msra.mxu3 %v7884_v31  ;;  %6317 = vmatmul.msk.f32.vlgmr.msra.gmra.mxu0 %vm13043_vm0, %v383_v32  ;;  %v7947_v49 = vld [vmem:[#allocation10 + $0x8] sm:$0xff]  ;;  %v7952_v51 = vld [vmem:[#allocation2] sm:$0xff]  ;;  %v7956_v52 = vld [vmem:[#allocation10] sm:$0xff] }
  0x7c   : > { %6333 = vmatmul.msk.f32.vlgmr.msra.gmra.mxu1 %vm13043_vm0, %v383_v32  ;;  %687 = vmatpush.msra.mxu2 %v7889_v33  ;;  %v385_v50 = vld [vmem:[%s7822_s0 + $0x10] sm:$0xff]  ;;  %v386_v53 = vld [vmem:[%s7822_s0 + $0x18] sm:$0xff]  ;;  %v387_v54 = vld [vmem:[%s7822_s0 + $0x20] sm:$0xff] }
  0x7d   : > { %708 = vmatpush.msra.mxu3 %v7891_v34  ;;  %2079 = vmatpush.msrb.mxu1 %v7844_v3  ;;  %v388_v55 = vld [vmem:[%s7822_s0 + $0x28] sm:$0xff]  ;;  %v389_v56 = vld [vmem:[%s7822_s0 + $0x30] sm:$0xff]  ;;  %v390_v57 = vld [vmem:[%s7822_s0 + $0x38] sm:$0xff] }
  0x7e   : > { %688 = vmatpush.msra.mxu2 %v7895_v35  ;;  %2059 = vmatpush.msrb.mxu0 %v7846_v6  ;;  %v391_v58 = vld [vmem:[%s7822_s0 + $0x40] sm:$0xff]  ;;  %v392_v59 = vld [vmem:[%s7822_s0 + $0x48] sm:$0xff]  ;;  %v393_v60 = vld [vmem:[%s7822_s0 + $0x50] sm:$0xff] }
  0x7f   : > { %709 = vmatpush.msra.mxu3 %v7899_v36  ;;  %2080 = vmatpush.msrb.mxu1 %v7850_v7  ;;  %v394_v61 = vld [vmem:[%s7822_s0 + $0x58] sm:$0xff]  ;;  %v395_v62 = vld [vmem:[%s7822_s0 + $0x60] sm:$0xff]  ;;  %v396_v63 = vld [vmem:[%s7822_s0 + $0x68] sm:$0xff] }
  0x80   : > { %689 = vmatpush.msra.mxu2 %v7902_v37  ;;  %2060 = vmatpush.msrb.mxu0 %v7852_v10  ;;  %v397_v0 = vld [vmem:[%s7822_s0 + $0x70] sm:$0xff]  ;;  %v415_v1 = vld [vmem:[#allocation9] sm:$0x3] }
  0x81   : > { %710 = vmatpush.msra.mxu3 %v7906_v38  ;;  %2081 = vmatpush.msrb.mxu1 %v7854_v11  ;;  %v8117_v2 = vperm.slane %v415_v1, 0 }
  0x82   : > { %690 = vmatpush.msra.mxu2 %v7910_v39  ;;  %2061 = vmatpush.msrb.mxu0 %v7858_v14 }
  0x83   : > { %711 = vmatpush.msra.mxu3 %v7914_v40  ;;  %6318 = vmatmul.msk.f32.gmra.mxu0 %vm13043_vm0, %v384_v41  ;;  %13169 = vst [vmem:[#allocation33_spill] sm:$0xff] %v8117_v2 }
  0x84   : > { %6334 = vmatmul.msk.f32.gmra.mxu1 %vm13043_vm0, %v384_v41  ;;  %691 = vmatpush.msra.mxu2 %v7919_v42 }
  0x85   : > { %712 = vmatpush.msra.mxu3 %v7923_v43  ;;  %2082 = vmatpush.msrb.mxu1 %v7860_v15 }
  0x86   : > { %692 = vmatpush.msra.mxu2 %v7928_v44  ;;  %2062 = vmatpush.msrb.mxu0 %v7862_v16 }
  0x87   : > { %713 = vmatpush.msra.mxu3 %v7932_v45  ;;  %2083 = vmatpush.msrb.mxu1 %v7866_v19 }
  0x88   : > { %693 = vmatpush.msra.mxu2 %v7935_v46  ;;  %2063 = vmatpush.msrb.mxu0 %v7868_v20 }
  0x89   : > { %714 = vmatpush.msra.mxu3 %v7939_v47  ;;  %2084 = vmatpush.msrb.mxu1 %v7872_v23 }
  0x8a   : > { %694 = vmatpush.msra.mxu2 %v7943_v48  ;;  %2064 = vmatpush.msrb.mxu0 %v7874_v24 }
  0x8b   : > { %715 = vmatpush.msra.mxu3 %v7947_v49  ;;  %6319 = vmatmul.msk.f32.gmra.mxu0 %vm13043_vm0, %v385_v50 }
  0x8c   : > { %6335 = vmatmul.msk.f32.gmra.mxu1 %vm13043_vm0, %v385_v50  ;;  %716 = vmatmul.f32.vlgmr.msra.gmra.mxu3 %v7952_v51 }
  0x8d   : > { %695 = vmatpush.msra.mxu2 %v7956_v52  ;;  %1062 = vmatpush.msrb.mxu3 %v7844_v3 }
  0x8e   : > { %696 = vmatmul.f32.vlgmr.msra.gmra.mxu2 %v7952_v51  ;;  %2085 = vmatpush.msrb.mxu1 %v7878_v27 }
  0x8f   : > { %1042 = vmatpush.msrb.mxu2 %v7846_v6  ;;  %1063 = vmatpush.msrb.mxu3 %v7850_v7 }
  0x90   : > { %2065 = vmatpush.msrb.mxu0 %v7880_v28  ;;  %2086 = vmatpush.msrb.mxu1 %v7884_v31 }
  0x91   : > { %1043 = vmatpush.msrb.mxu2 %v7852_v10  ;;  %1064 = vmatpush.msrb.mxu3 %v7854_v11 }
  0x92   : > { %2066 = vmatpush.msrb.mxu0 %v7889_v33  ;;  %2087 = vmatpush.msrb.mxu1 %v7891_v34 }
  0x93   : > { %6320 = vmatmul.msk.f32.gmra.mxu0 %vm13043_vm0, %v386_v53  ;;  %1044 = vmatpush.msrb.mxu2 %v7858_v14 }
  0x94   : > { %6336 = vmatmul.msk.f32.gmra.mxu1 %vm13043_vm0, %v386_v53  ;;  %1065 = vmatpush.msrb.mxu3 %v7860_v15 }
  0x95   : > { %1045 = vmatpush.msrb.mxu2 %v7862_v16  ;;  %2067 = vmatpush.msrb.mxu0 %v7895_v35 }
  0x96   : > { %1066 = vmatpush.msrb.mxu3 %v7866_v19  ;;  %2088 = vmatpush.msrb.mxu1 %v7899_v36 }
  0x97   : > { %1046 = vmatpush.msrb.mxu2 %v7868_v20  ;;  %2068 = vmatpush.msrb.mxu0 %v7902_v37 }
  0x98   : > { %1067 = vmatpush.msrb.mxu3 %v7872_v23  ;;  %2089 = vmatpush.msrb.mxu1 %v7906_v38 }
  0x99   : > { %1047 = vmatpush.msrb.mxu2 %v7874_v24  ;;  %2069 = vmatpush.msrb.mxu0 %v7910_v39 }
  0x9a   : > { %1068 = vmatpush.msrb.mxu3 %v7878_v27  ;;  %2090 = vmatpush.msrb.mxu1 %v7914_v40 }
  0x9b   : > { %6321 = vmatmul.msk.f32.gmra.mxu0 %vm13043_vm0, %v387_v54  ;;  %1048 = vmatpush.msrb.mxu2 %v7880_v28 }
  0x9c   : > { %6337 = vmatmul.msk.f32.gmra.mxu1 %vm13043_vm0, %v387_v54  ;;  %1069 = vmatpush.msrb.mxu3 %v7884_v31 }
  0x9d   : > { %1049 = vmatpush.msrb.mxu2 %v7889_v33  ;;  %2070 = vmatpush.msrb.mxu0 %v7919_v42 }
  0x9e   : > { %1070 = vmatpush.msrb.mxu3 %v7891_v34  ;;  %2091 = vmatpush.msrb.mxu1 %v7923_v43 }
  0x9f   : > { %1050 = vmatpush.msrb.mxu2 %v7895_v35  ;;  %2071 = vmatpush.msrb.mxu0 %v7928_v44 }
  0xa0   : > { %1071 = vmatpush.msrb.mxu3 %v7899_v36  ;;  %2092 = vmatpush.msrb.mxu1 %v7932_v45 }
  0xa1   : > { %1051 = vmatpush.msrb.mxu2 %v7902_v37  ;;  %2072 = vmatpush.msrb.mxu0 %v7935_v46 }
  0xa2   : > { %1072 = vmatpush.msrb.mxu3 %v7906_v38  ;;  %2093 = vmatpush.msrb.mxu1 %v7939_v47 }
  0xa3   : > { %6322 = vmatmul.msk.f32.gmra.mxu0 %vm13043_vm0, %v388_v55  ;;  %1052 = vmatpush.msrb.mxu2 %v7910_v39 }
  0xa4   : > { %6338 = vmatmul.msk.f32.gmra.mxu1 %vm13043_vm0, %v388_v55  ;;  %1073 = vmatpush.msrb.mxu3 %v7914_v40 }
  0xa5   : > { %1053 = vmatpush.msrb.mxu2 %v7919_v42  ;;  %2073 = vmatpush.msrb.mxu0 %v7943_v48 }
  0xa6   : > { %1074 = vmatpush.msrb.mxu3 %v7923_v43  ;;  %2094 = vmatpush.msrb.mxu1 %v7947_v49 }
  0xa7   : > { %1054 = vmatpush.msrb.mxu2 %v7928_v44  ;;  %2074 = vmatpush.msrb.mxu0 %v7956_v52 }
  0xa8   : > { %1075 = vmatpush.msrb.mxu3 %v7932_v45  ;;  %2757 = vmatpush.msra.mxu1 %v7844_v3 }
  0xa9   : > { %2737 = vmatpush.msra.mxu0 %v7846_v6  ;;  %1055 = vmatpush.msrb.mxu2 %v7935_v46 }
  0xaa   : > { %1076 = vmatpush.msrb.mxu3 %v7939_v47  ;;  %2758 = vmatpush.msra.mxu1 %v7850_v7 }
  0xab   : > { %2738 = vmatpush.msra.mxu0 %v7852_v10  ;;  %1056 = vmatpush.msrb.mxu2 %v7943_v48 }
  0xac   : > { %6323 = vmatmul.msk.f32.gmra.mxu0 %vm13043_vm0, %v389_v56  ;;  %6339 = vmatmul.msk.f32.gmra.mxu1 %vm13043_vm0, %v389_v56 }
  0xad   : > { %1077 = vmatpush.msrb.mxu3 %v7947_v49  ;;  %1057 = vmatpush.msrb.mxu2 %v7956_v52 }
  0xae   : > { %2739 = vmatpush.msra.mxu0 %v7858_v14  ;;  %2759 = vmatpush.msra.mxu1 %v7854_v11 }
  0xaf   : > { %1401 = vmatpush.msra.mxu3 %v7844_v3  ;;  %1381 = vmatpush.msra.mxu2 %v7846_v6  ;;  %v8119_v3 = vperm.slane %v415_v1, 1 }
  0xb0   : > { %2740 = vmatpush.msra.mxu0 %v7862_v16  ;;  %2760 = vmatpush.msra.mxu1 %v7860_v15 }
  0xb1   : > { %1402 = vmatpush.msra.mxu3 %v7850_v7  ;;  %1382 = vmatpush.msra.mxu2 %v7852_v10  ;;  %13170 = vst [vmem:[#allocation34_spill] sm:$0xff] %v8119_v3 }
  0xb2   : > { %2741 = vmatpush.msra.mxu0 %v7868_v20  ;;  %2761 = vmatpush.msra.mxu1 %v7866_v19 }
  0xb3   : > { %1403 = vmatpush.msra.mxu3 %v7854_v11  ;;  %1383 = vmatpush.msra.mxu2 %v7858_v14 }
  0xb4   : > { %6324 = vmatmul.msk.f32.gmra.mxu0 %vm13043_vm0, %v390_v57  ;;  %6340 = vmatmul.msk.f32.gmra.mxu1 %vm13043_vm0, %v390_v57 }
  0xb5   : > { %1404 = vmatpush.msra.mxu3 %v7860_v15  ;;  %1384 = vmatpush.msra.mxu2 %v7862_v16 }
  0xb6   : > { %2742 = vmatpush.msra.mxu0 %v7874_v24  ;;  %2762 = vmatpush.msra.mxu1 %v7872_v23 }
  0xb7   : > { %1405 = vmatpush.msra.mxu3 %v7866_v19  ;;  %1385 = vmatpush.msra.mxu2 %v7868_v20 }
  0xb8   : > { %2743 = vmatpush.msra.mxu0 %v7880_v28  ;;  %2763 = vmatpush.msra.mxu1 %v7878_v27 }
  0xb9   : > { %1406 = vmatpush.msra.mxu3 %v7872_v23  ;;  %1386 = vmatpush.msra.mxu2 %v7874_v24 }
  0xba   : > { %2744 = vmatpush.msra.mxu0 %v7889_v33  ;;  %2764 = vmatpush.msra.mxu1 %v7884_v31 }
  0xbb   : > { %1407 = vmatpush.msra.mxu3 %v7878_v27  ;;  %1387 = vmatpush.msra.mxu2 %v7880_v28 }
  0xbc   : > { %6325 = vmatmul.msk.f32.gmra.mxu0 %vm13043_vm0, %v391_v58  ;;  %6341 = vmatmul.msk.f32.gmra.mxu1 %vm13043_vm0, %v391_v58 }
  0xbd   : > { %1408 = vmatpush.msra.mxu3 %v7884_v31  ;;  %1388 = vmatpush.msra.mxu2 %v7889_v33 }
  0xbe   : > { %2745 = vmatpush.msra.mxu0 %v7895_v35  ;;  %2765 = vmatpush.msra.mxu1 %v7891_v34 }
  0xbf   : > { %1409 = vmatpush.msra.mxu3 %v7891_v34  ;;  %1389 = vmatpush.msra.mxu2 %v7895_v35 }
  0xc0   : > { %2746 = vmatpush.msra.mxu0 %v7902_v37  ;;  %2766 = vmatpush.msra.mxu1 %v7899_v36 }
  0xc1   : > { %1410 = vmatpush.msra.mxu3 %v7899_v36  ;;  %1390 = vmatpush.msra.mxu2 %v7902_v37 }
  0xc2   : > { %2747 = vmatpush.msra.mxu0 %v7910_v39  ;;  %2767 = vmatpush.msra.mxu1 %v7906_v38 }
  0xc3   : > { %1411 = vmatpush.msra.mxu3 %v7906_v38  ;;  %1391 = vmatpush.msra.mxu2 %v7910_v39 }
  0xc4   : > { %6326 = vmatmul.msk.f32.gmra.mxu0 %vm13043_vm0, %v392_v59  ;;  %6342 = vmatmul.msk.f32.gmra.mxu1 %vm13043_vm0, %v392_v59 }
  0xc5   : > { %1412 = vmatpush.msra.mxu3 %v7914_v40  ;;  %1392 = vmatpush.msra.mxu2 %v7919_v42 }
  0xc6   : > { %2748 = vmatpush.msra.mxu0 %v7919_v42  ;;  %2768 = vmatpush.msra.mxu1 %v7914_v40 }
  0xc7   : > { %1413 = vmatpush.msra.mxu3 %v7923_v43  ;;  %1393 = vmatpush.msra.mxu2 %v7928_v44 }
  0xc8   : > { %2749 = vmatpush.msra.mxu0 %v7928_v44  ;;  %2769 = vmatpush.msra.mxu1 %v7923_v43 }
  0xc9   : > { %1414 = vmatpush.msra.mxu3 %v7932_v45  ;;  %1394 = vmatpush.msra.mxu2 %v7935_v46 }
  0xca   : > { %2750 = vmatpush.msra.mxu0 %v7935_v46  ;;  %2770 = vmatpush.msra.mxu1 %v7932_v45 }
  0xcb   : > { %1415 = vmatpush.msra.mxu3 %v7939_v47  ;;  %1395 = vmatpush.msra.mxu2 %v7943_v48 }
  0xcc   : > { %6327 = vmatmul.msk.f32.gmra.mxu0 %vm13043_vm0, %v393_v60  ;;  %6343 = vmatmul.msk.f32.gmra.mxu1 %vm13043_vm0, %v393_v60 }
  0xcd   : > { %1416 = vmatpush.msra.mxu3 %v7947_v49  ;;  %1396 = vmatpush.msra.mxu2 %v7956_v52 }
  0xce   : > { %2751 = vmatpush.msra.mxu0 %v7943_v48  ;;  %2771 = vmatpush.msra.mxu1 %v7939_v47 }
  0xd0   : > { %2752 = vmatpush.msra.mxu0 %v7956_v52  ;;  %2772 = vmatpush.msra.mxu1 %v7947_v49 }
  0xd4   : > { %6328 = vmatmul.msk.f32.gmra.mxu0 %vm13043_vm0, %v394_v61  ;;  %6344 = vmatmul.msk.f32.gmra.mxu1 %vm13043_vm0, %v394_v61 }
  0xdc   : > { %6329 = vmatmul.msk.f32.gmra.mxu0 %vm13043_vm0, %v395_v62  ;;  %6345 = vmatmul.msk.f32.gmra.mxu1 %vm13043_vm0, %v395_v62 }
  0xe4   : > { %6330 = vmatmul.msk.f32.gmra.mxu0 %vm13043_vm0, %v396_v63  ;;  %6346 = vmatmul.msk.f32.gmra.mxu1 %vm13043_vm0, %v396_v63 }
  0xec   : > { %6331 = vmatmul.msk.f32.gmra.mxu0 %vm13043_vm0, %v397_v0  ;;  %6347 = vmatmul.msk.f32.gmra.mxu1 %vm13043_vm0, %v397_v0 }
  0xf8   : > { %v487_v4 = vpop.f32.mrf.mxu0 }
  0xf9   : > { %v488_v5 = vadd.f32 %v487_v4, %v8117_v2  ;;  %v552_v6 = vpop.f32.mrf.mxu1 }
  0xfa   : > { %v553_v7 = vadd.f32 %v552_v6, %v8119_v3 }
  0xfb   : > { %600 = vst [vmem:[#allocation3] sm:$0xff] %v488_v5 }
  0xfc   : > { %601 = vst [vmem:[#allocation3 + $0x8] sm:$0xff] %v553_v7 }
 0x100   : > { %v490_v8 = vpop.f32.mrf.mxu0 }
 0x101   : > { %v555_v9 = vpop.f32.mrf.mxu1  ;;  %v491_v10 = vadd.f32 %v490_v8, %v8117_v2 }
 0x102   : > { %v556_v11 = vadd.f32 %v555_v9, %v8119_v3 }
 0x103   : > { %602 = vst [vmem:[#allocation3 + $0x10] sm:$0xff] %v491_v10  ;;  %v665_v25 = vld [vmem:[#allocation3] ss:$8 sm:$0x3] }
 0x104   : > { %603 = vst [vmem:[#allocation3 + $0x18] sm:$0xff] %v556_v11 }
 0x108   : > { %v493_v12 = vpop.f32.mrf.mxu0 }
 0x109   : > { %v494_v13 = vadd.f32 %v493_v12, %v8117_v2  ;;  %v558_v14 = vpop.f32.mrf.mxu1 }
 0x10a   : > { %v559_v15 = vadd.f32 %v558_v14, %v8119_v3 }
 0x10b   : > { %604 = vst [vmem:[#allocation3 + $0x20] sm:$0xff] %v494_v13 }
 0x10c   : > { %605 = vst [vmem:[#allocation3 + $0x28] sm:$0xff] %v559_v15 }
 0x10f   : > { %v717_v16 = vpop.f32.mrf.mxu3 }
 0x110   : > { %v496_v17 = vpop.f32.mrf.mxu0  ;;  %v8129_v20 = vrot.slane %v717_v16, 7 }
 0x111   : > { %v561_v18 = vpop.f32.mrf.mxu1  ;;  %v8127_v19 = vpop.f32.mrf.mxu2  ;;  %v497_v21 = vadd.f32 %v496_v17, %v8117_v2 }
 0x112   : > { %v562_v22 = vadd.f32 %v561_v18, %v8119_v3  ;;  %v724_v23 = vsel %vm13059_vm1, %v8127_v19, %v8129_v20  ;;  %v726_v24 = vsel %vm13057_vm2, %v8127_v19, %v8129_v20  ;;  %v729_v38 = vsel %vm13056_vm3, %v8127_v19, %v8129_v20 }
 0x113   : > { %606 = vst [vmem:[#allocation3 + $0x30] sm:$0xff] %v497_v21  ;;  %v727_v26 = vrot.slane %v726_v24, 1  ;;  %v8139_v27 = vadd.f32 %v724_v23, %v665_v25  ;;  %v667_v28 = vld [vmem:[#allocation3 + $0x20] ss:$8 sm:$0x3]  ;;  %v730_v39 = vrot.slane %v729_v38, 2  ;;  %v732_v62 = vsel %vm13054_vm4, %v8127_v19, %v8129_v20 }
 0x114   : > { %607 = vst [vmem:[#allocation3 + $0x38] sm:$0xff] %v562_v22  ;;  %v733_v15 = vrot.slane %v732_v62, 3  ;;  %v939_v24 = vrot.slane %v7952_v51, 1 }
 0x115   : > { %v8141_v29 = vadd.f32 %v727_v26, %v667_v28  ;;  %v770_v31 = vrot.slane %v8139_v27, 1 }
 0x117   : > { %v771_v34 = vrot.slane %v8141_v29, 1  ;;  %v6349_v36 = vmul.f32 -1.442695, %v770_v31 }
 0x118   : > { %v499_v30 = vpop.f32.mrf.mxu0 }
 0x119   : > { %v500_v32 = vadd.f32 %v499_v30, %v8117_v2  ;;  %v564_v33 = vpop.f32.mrf.mxu1  ;;  %v6350_v37 = vmul.f32 -1.442695, %v771_v34  ;;  %6644 = vpow2.f32 %v6349_v36  ;;  %v969_v30 = vmax.f32 %v8139_v27, 0.0 }
 0x11a   : > { %v565_v35 = vadd.f32 %v564_v33, %v8119_v3 }
 0x11b   : > { %608 = vst [vmem:[#allocation3 + $0x40] sm:$0xff] %v500_v32  ;;  %6646 = vpow2.f32 %v6350_v37  ;;  %v970_v32 = vmax.f32 %v8141_v29, 0.0 }
 0x11c   : > { %609 = vst [vmem:[#allocation3 + $0x48] sm:$0xff] %v565_v35 }
 0x11f   : > { %v6645_v44 = vpop.eup %6644 }
 0x120   : > { %v502_v40 = vpop.f32.mrf.mxu0  ;;  %v810_v47 = vadd.f32 1.0, %v6645_v44 }
 0x121   : > { %v503_v41 = vadd.f32 %v502_v40, %v8117_v2  ;;  %v567_v42 = vpop.f32.mrf.mxu1  ;;  %v6647_v46 = vpop.eup %6646 }
 0x122   : > { %v568_v43 = vadd.f32 %v567_v42, %v8119_v3  ;;  %v811_v49 = vadd.f32 1.0, %v6647_v46  ;;  %6648 = vrcp.f32 %v810_v47  ;;  %v827_v63 = vand.u32 2147483647, %v810_v47 }
 0x123   : > { %v669_v45 = vld [vmem:[#allocation3 + $0x40] ss:$8 sm:$0x3]  ;;  %610 = vst [vmem:[#allocation3 + $0x50] sm:$0xff] %v503_v41  ;;  %v829_v0 = vand.u32 2147483648, %v810_v47  ;;  %vm823_vm7 = vweird.f32 %v810_v47 }
 0x124   : > { %v8152_v48 = vadd.f32 %v730_v39, %v669_v45  ;;  %611 = vst [vmem:[#allocation3 + $0x58] sm:$0xff] %v568_v43  ;;  %6650 = vrcp.f32 %v811_v49  ;;  %v844_v6 = vand.u32 2147483648, %v811_v49  ;;  %v842_v11 = vand.u32 2147483647, %v811_v49 }
 0x125   : > { %v830_v16 = vor.u32 1.1754944e-38, %v829_v0  ;;  %vm838_vm9 = vweird.f32 %v811_v49  ;;  %vm828_vm10 = vcmp.eq.f32.partialorder %v827_v63, 8.507059e+37 }
 0x126   : > { %v772_v50 = vrot.slane %v8152_v48, 1  ;;  %v845_v21 = vor.u32 1.1754944e-38, %v844_v6  ;;  %vm843_vm12 = vcmp.eq.f32.partialorder %v842_v11, 8.507059e+37 }
 0x128   : > { %v6351_v55 = vmul.f32 -1.442695, %v772_v50  ;;  %v6649_v57 = vpop.eup %6648 }
 0x129   : > { %v505_v52 = vpop.f32.mrf.mxu0  ;;  %v570_v54 = vpop.f32.mrf.mxu1  ;;  %v819_v59 = vmul.f32 %v6649_v57, %v810_v47  ;;  %vm824_vm5 = vweird.f32 %v6649_v57 }
 0x12a   : > { %v506_v53 = vadd.f32 %v505_v52, %v8117_v2  ;;  %v571_v56 = vadd.f32 %v570_v54, %v8119_v3  ;;  %6652 = vpow2.f32 %v6351_v55  ;;  %v6651_v58 = vpop.eup %6650  ;;  %vm825_vm8 = vmor %vm823_vm7, %vm824_vm5  ;;  %vm13050_vm7 = vcmask 1045509  }
 0x12b   : > { %v834_v60 = vmul.f32 %v6651_v58, %v811_v49  ;;  %v820_v61 = vsub.f32 1.0, %v819_v59  ;;  %vm839_vm6 = vweird.f32 %v6651_v58  ;;  %v735_v59 = vsel %vm13051_vm14, %v8127_v19, %v8129_v20 }
 0x12c   : > { %612 = vst [vmem:[#allocation3 + $0x60] sm:$0xff] %v506_v53  ;;  %vm840_vm11 = vmor %vm838_vm9, %vm839_vm6 }
 0x12d   : > { %613 = vst [vmem:[#allocation3 + $0x68] sm:$0xff] %v571_v56  ;;  %v835_v1 = vsub.f32 1.0, %v834_v60  ;;  %v821_v5 = vmul.f32 %v6649_v57, %v820_v61  ;;  %v940_v61 = vrot.slane %v7952_v51, 2 }
 0x12f   : > { %v836_v10 = vmul.f32 %v6651_v58, %v835_v1  ;;  %v822_v13 = vadd.f32 %v6649_v57, %v821_v5  ;;  %v971_v1 = vmax.f32 %v8152_v48, 0.0 }
 0x130   : > { %v6653_v9 = vpop.eup %6652 }
 0x131   : > { %v508_v4 = vpop.f32.mrf.mxu0  ;;  %v573_v8 = vpop.f32.mrf.mxu1  ;;  %v8162_v14 = vadd.f32 1.0, %v6653_v9  ;;  %v837_v17 = vadd.f32 %v6651_v58, %v836_v10  ;;  %v826_v18 = vsel %vm825_vm8, %v6649_v57, %v822_v13 }
 0x132   : > { %v509_v7 = vadd.f32 %v508_v4, %v8117_v2  ;;  %v574_v12 = vadd.f32 %v573_v8, %v8119_v3  ;;  %v831_v22 = vsel %vm828_vm10, %v830_v16, %v826_v18  ;;  %v736_v4 = vrot.slane %v735_v59, 4 }
 0x133   : > { %6654 = vrcp.f32 %v8162_v14  ;;  %v841_v23 = vsel %vm840_vm11, %v6651_v58, %v837_v17  ;;  %v961_v28 = vsub.f32 1.0, %v831_v22  ;;  %v953_v35 = vmul.f32 %v831_v22, %v7952_v51 }
 0x134   : > { %614 = vst [vmem:[#allocation3 + $0x70] sm:$0xff] %v509_v7  ;;  %v671_v25 = vld [vmem:[#allocation3 + $0x60] ss:$8 sm:$0x3]  ;;  %v846_v26 = vsel %vm843_vm12, %v845_v21, %v841_v23  ;;  %v859_v46 = vand.u32 2147483648, %v8162_v14  ;;  %vm853_vm15 = vweird.f32 %v8162_v14  ;;  %v738_v21 = vsel %vm13050_vm7, %v8127_v19, %v8129_v20 }
 0x135   : > { %615 = vst [vmem:[#allocation3 + $0x78] sm:$0xff] %v574_v12  ;;  %v962_v31 = vsub.f32 1.0, %v846_v26  ;;  %v8169_v33 = vadd.f32 %v733_v15, %v671_v25  ;;  %v977_v36 = vmul.f32 %v969_v30, %v961_v28  ;;  %v954_v39 = vmul.f32 %v939_v24, %v846_v26 }
 0x136   : > { %v857_v50 = vand.u32 2147483647, %v8162_v14  ;;  %v860_v57 = vor.u32 1.1754944e-38, %v859_v46  ;;  %v739_v30 = vrot.slane %v738_v21, 5  ;;  %vm13048_vm12 = vcmask 1046534  }
 0x137   : > { %v978_v40 = vmul.f32 %v970_v32, %v962_v31  ;;  %v773_v41 = vrot.slane %v8169_v33, 1  ;;  %v8174_v27 = vadd.f32 %v977_v36, %v953_v35  ;;  %v941_v35 = vrot.slane %v7952_v51, 3 }
 0x138   : > { %vm858_vm6 = vcmp.eq.f32.partialorder %v857_v50, 8.507059e+37 }
 0x139   : > { %v511_v34 = vpop.f32.mrf.mxu0  ;;  %v576_v38 = vpop.f32.mrf.mxu1  ;;  %v8176_v43 = vadd.f32 %v978_v40, %v954_v39  ;;  %v6352_v44 = vmul.f32 -1.442695, %v773_v41  ;;  %993 = vst [vmem:[%s7841_s12] sm:$0x1] %v8174_v27  ;;  %v972_v40 = vmax.f32 %v8169_v33, 0.0 }
 0x13a   : > { %v512_v37 = vadd.f32 %v511_v34, %v8117_v2  ;;  %v6655_v42 = vpop.eup %6654  ;;  %1025 = vst [vmem:[#allocation1] ss:$9 sm:$0xff] %v8174_v27  ;;  %v577_v47 = vadd.f32 %v576_v38, %v8119_v3 }
 0x13b   : > { %v849_v29 = vmul.f32 %v6655_v42, %v8162_v14  ;;  %994 = vst [vmem:[%s7841_s12 + $0x10] sm:$0x1] %v8176_v43  ;;  %6656 = vpow2.f32 %v6352_v44  ;;  %vm854_vm13 = vweird.f32 %v6655_v42 }
 0x13c   : > { %616 = vst [vmem:[#allocation3 + $0x80] sm:$0xff] %v512_v37  ;;  %vm855_vm5 = vmor %vm853_vm15, %vm854_vm13 }
 0x13d   : > { %v850_v45 = vsub.f32 1.0, %v849_v29  ;;  %1027 = vst [vmem:[#allocation1 + $0x1] ss:$9 sm:$0xff] %v8176_v43 }
 0x13e   : > { %617 = vst [vmem:[#allocation3 + $0x88] sm:$0xff] %v577_v47 }
 0x13f   : > { %v851_v49 = vmul.f32 %v6655_v42, %v850_v45 }
 0x141   : > { %v514_v52 = vpop.f32.mrf.mxu0  ;;  %v579_v54 = vpop.f32.mrf.mxu1  ;;  %v852_v55 = vadd.f32 %v6655_v42, %v851_v49 }
 0x142   : > { %v515_v53 = vadd.f32 %v514_v52, %v8117_v2  ;;  %v580_v56 = vadd.f32 %v579_v54, %v8119_v3  ;;  %v6657_v58 = vpop.eup %6656 }
 0x143   : > { %v856_v60 = vsel %vm855_vm5, %v6655_v42, %v852_v55  ;;  %v813_v63 = vadd.f32 1.0, %v6657_v58 }
 0x144   : > { %618 = vst [vmem:[#allocation3 + $0x90] sm:$0xff] %v515_v53  ;;  %v861_v62 = vsel %vm858_vm6, %v860_v57, %v856_v60  ;;  %v741_v60 = vsel %vm13048_vm12, %v8127_v19, %v8129_v20 }
 0x145   : > { %619 = vst [vmem:[#allocation3 + $0x98] sm:$0xff] %v580_v56  ;;  %v963_v0 = vsub.f32 1.0, %v861_v62  ;;  %6658 = vrcp.f32 %v813_v63  ;;  %v955_v5 = vmul.f32 %v940_v61, %v861_v62  ;;  %v673_v10 = vld [vmem:[#allocation3 + $0x80] ss:$8 sm:$0x3]  ;;  %v874_v22 = vand.u32 2147483648, %v813_v63 }
 0x146   : > { %v8198_v11 = vadd.f32 %v736_v4, %v673_v10  ;;  %v872_v26 = vand.u32 2147483647, %v813_v63  ;;  %vm868_vm9 = vweird.f32 %v813_v63  ;;  %v742_v4 = vrot.slane %v741_v60, 6 }
 0x147   : > { %v979_v6 = vmul.f32 %v971_v1, %v963_v0  ;;  %v875_v32 = vor.u32 1.1754944e-38, %v874_v22  ;;  %v942_v10 = vrot.slane %v7952_v51, 4 }
 0x148   : > { %v774_v48 = vrot.slane %v8198_v11, 1  ;;  %vm873_vm11 = vcmp.eq.f32.partialorder %v872_v26, 8.507059e+37 }
 0x149   : > { %v517_v7 = vpop.f32.mrf.mxu0  ;;  %v582_v8 = vpop.f32.mrf.mxu1  ;;  %v8196_v9 = vadd.f32 %v979_v6, %v955_v5 }
 0x14a   : > { %v518_v12 = vadd.f32 %v517_v7, %v8117_v2  ;;  %v583_v13 = vadd.f32 %v582_v8, %v8119_v3  ;;  %v6353_v16 = vmul.f32 -1.442695, %v774_v48 }
 0x14b   : > { %995 = vst [vmem:[%s7841_s12 + $0x20] sm:$0x1] %v8196_v9  ;;  %v6659_v14 = vpop.eup %6658 }
 0x14c   : > { %1029 = vst [vmem:[#allocation1 + $0x2] ss:$9 sm:$0xff] %v8196_v9  ;;  %v864_v15 = vmul.f32 %v6659_v14, %v813_v63  ;;  %6660 = vpow2.f32 %v6353_v16  ;;  %vm869_vm8 = vweird.f32 %v6659_v14  ;;  %v973_v16 = vmax.f32 %v8198_v11, 0.0 }
 0x14d   : > { %620 = vst [vmem:[#allocation3 + $0xa0] sm:$0xff] %v518_v12  ;;  %vm870_vm10 = vmor %vm868_vm9, %vm869_vm8  ;;  %vm13045_vm8 = vcmask 1046528  }
 0x14e   : > { %v865_v17 = vsub.f32 1.0, %v864_v15  ;;  %621 = vst [vmem:[#allocation3 + $0xa8] sm:$0xff] %v583_v13 }
 0x150   : > { %v866_v25 = vmul.f32 %v6659_v14, %v865_v17 }
 0x151   : > { %v520_v18 = vpop.f32.mrf.mxu0  ;;  %v585_v24 = vpop.f32.mrf.mxu1 }
 0x152   : > { %v521_v23 = vadd.f32 %v520_v18, %v8117_v2  ;;  %v586_v28 = vadd.f32 %v585_v24, %v8119_v3  ;;  %v867_v31 = vadd.f32 %v6659_v14, %v866_v25  ;;  %v6661_v36 = vpop.eup %6660  ;;  %v744_v25 = vsel %vm13045_vm8, %v8129_v20, %v8127_v19 }
 0x153   : > { %v814_v41 = vadd.f32 1.0, %v6661_v36 }
 0x154   : > { %622 = vst [vmem:[#allocation3 + $0xb0] sm:$0xff] %v521_v23  ;;  %v871_v34 = vsel %vm870_vm10, %v6659_v14, %v867_v31  ;;  %v745_v31 = vrot.slane %v744_v25, 7 }
 0x155   : > { %623 = vst [vmem:[#allocation3 + $0xb8] sm:$0xff] %v586_v28  ;;  %v876_v37 = vsel %vm873_vm11, %v875_v32, %v871_v34  ;;  %v675_v38 = vld [vmem:[#allocation3 + $0xa0] ss:$8 sm:$0x3]  ;;  %6662 = vrcp.f32 %v814_v41  ;;  %v889_v61 = vand.u32 2147483648, %v814_v41  ;;  %vm883_vm15 = vweird.f32 %v814_v41 }
 0x156   : > { %v964_v39 = vsub.f32 1.0, %v876_v37  ;;  %v8213_v42 = vadd.f32 %v739_v30, %v675_v38  ;;  %v956_v46 = vmul.f32 %v941_v35, %v876_v37  ;;  %v887_v0 = vand.u32 2147483647, %v814_v41 }
 0x157   : > { %v890_v6 = vor.u32 1.1754944e-38, %v889_v61 }
 0x158   : > { %v980_v47 = vmul.f32 %v972_v40, %v964_v39  ;;  %v775_v49 = vrot.slane %v8213_v42, 1  ;;  %vm888_vm6 = vcmp.eq.f32.partialorder %v887_v0, 8.507059e+37  ;;  %v943_v40 = vrot.slane %v7952_v51, 5 }
 0x159   : > { %v523_v29 = vpop.f32.mrf.mxu0  ;;  %v588_v45 = vpop.f32.mrf.mxu1 }
 0x15a   : > { %v524_v44 = vadd.f32 %v523_v29, %v8117_v2  ;;  %v8217_v50 = vadd.f32 %v980_v47, %v956_v46  ;;  %v6354_v52 = vmul.f32 -1.442695, %v775_v49  ;;  %v589_v33 = vadd.f32 %v588_v45, %v8119_v3 }
 0x15b   : > { %v6663_v53 = vpop.eup %6662  ;;  %v974_v46 = vmax.f32 %v8213_v42, 0.0 }
 0x15c   : > { %624 = vst [vmem:[#allocation3 + $0xc0] sm:$0xff] %v524_v44  ;;  %6664 = vpow2.f32 %v6354_v52  ;;  %v879_v55 = vmul.f32 %v6663_v53, %v814_v41  ;;  %vm884_vm13 = vweird.f32 %v6663_v53 }
 0x15d   : > { %996 = vst [vmem:[%s7841_s12 + $0x30] sm:$0x1] %v8217_v50  ;;  %vm885_vm5 = vmor %vm883_vm15, %vm884_vm13 }
 0x15e   : > { %1031 = vst [vmem:[#allocation1 + $0x3] ss:$9 sm:$0xff] %v8217_v50  ;;  %v880_v59 = vsub.f32 1.0, %v879_v55 }
 0x15f   : > { %625 = vst [vmem:[#allocation3 + $0xc8] sm:$0xff] %v589_v33 }
 0x160   : > { %v881_v63 = vmul.f32 %v6663_v53, %v880_v59 }
 0x161   : > { %v526_v54 = vpop.f32.mrf.mxu0  ;;  %v591_v57 = vpop.f32.mrf.mxu1 }
 0x162   : > { %v527_v56 = vadd.f32 %v526_v54, %v8117_v2  ;;  %v592_v58 = vadd.f32 %v591_v57, %v8119_v3  ;;  %v6665_v62 = vpop.eup %6664  ;;  %v882_v5 = vadd.f32 %v6663_v53, %v881_v63  ;;  %v944_v63 = vrot.slane %v7952_v51, 6 }
 0x163   : > { %v815_v1 = vadd.f32 1.0, %v6665_v62 }
 0x164   : > { %626 = vst [vmem:[#allocation3 + $0xd0] sm:$0xff] %v527_v56  ;;  %v886_v8 = vsel %vm885_vm5, %v6663_v53, %v882_v5 }
 0x165   : > { %627 = vst [vmem:[#allocation3 + $0xd8] sm:$0xff] %v592_v58  ;;  %6666 = vrcp.f32 %v815_v1  ;;  %v891_v14 = vsel %vm888_vm6, %v890_v6, %v886_v8  ;;  %v904_v32 = vand.u32 2147483648, %v815_v1  ;;  %v902_v35 = vand.u32 2147483647, %v815_v1 }
 0x166   : > { %v677_v48 = vld [vmem:[#allocation3 + $0xc0] ss:$8 sm:$0x3]  ;;  %v965_v15 = vsub.f32 1.0, %v891_v14  ;;  %v957_v21 = vmul.f32 %v942_v10, %v891_v14  ;;  %vm898_vm10 = vweird.f32 %v815_v1 }
 0x167   : > { %v8231_v17 = vadd.f32 %v742_v4, %v677_v48  ;;  %v905_v19 = vor.u32 1.1754944e-38, %v904_v32  ;;  %vm903_vm13 = vcmp.eq.f32.partialorder %v902_v35, 8.507059e+37  ;;  %v8272_v32 = vld [vmem:[#allocation10 + $0xe0] sm:$0xff]  ;;  %v8278_v35 = vld [vmem:[#allocation10 + $0xd0] sm:$0xff] }
 0x168   : > { %v981_v22 = vmul.f32 %v973_v16, %v965_v15 }
 0x169   : > { %v529_v7 = vpop.f32.mrf.mxu0  ;;  %v594_v13 = vpop.f32.mrf.mxu1  ;;  %v776_v23 = vrot.slane %v8231_v17, 1  ;;  %v975_v4 = vmax.f32 %v8231_v17, 0.0  ;;  %v7156_v17 = vld [vmem:[#allocation2] sm:$0xff] }
 0x16a   : > { %v530_v12 = vadd.f32 %v529_v7, %v8117_v2  ;;  %v595_v18 = vadd.f32 %v594_v13, %v8119_v3  ;;  %v8238_v26 = vadd.f32 %v981_v22, %v957_v21 }
 0x16b   : > { %v6667_v24 = vpop.eup %6666  ;;  %v6355_v11 = vmul.f32 -1.442695, %v776_v23 }
 0x16c   : > { %628 = vst [vmem:[#allocation3 + $0xe0] sm:$0xff] %v530_v12  ;;  %v894_v28 = vmul.f32 %v6667_v24, %v815_v1  ;;  %vm899_vm9 = vweird.f32 %v6667_v24 }
 0x16d   : > { %629 = vst [vmem:[#allocation3 + $0xe8] sm:$0xff] %v595_v18  ;;  %6668 = vpow2.f32 %v6355_v11  ;;  %vm900_vm11 = vmor %vm898_vm10, %vm899_vm9  ;;  %v945_v18 = vrot.slane %v7156_v17, 7 }
 0x16e   : > { %997 = vst [vmem:[%s7841_s12 + $0x40] sm:$0x1] %v8238_v26  ;;  %v895_v30 = vsub.f32 1.0, %v894_v28 }
 0x16f   : > { %1033 = vst [vmem:[#allocation1 + $0x4] ss:$9 sm:$0xff] %v8238_v26 }
 0x170   : > { %v896_v34 = vmul.f32 %v6667_v24, %v895_v30  ;;  %v8266_v30 = vld [vmem:[#allocation10 + $0xf0] sm:$0xff] }
 0x172   : > { %v897_v36 = vadd.f32 %v6667_v24, %v896_v34  ;;  %v8275_v34 = vld [vmem:[#allocation10 + $0xe8] sm:$0xff] }
 0x173   : > { %v6669_v38 = vpop.eup %6668 }
 0x174   : > { %v679_v37 = vld [vmem:[#allocation3 + $0xe0] ss:$8 sm:$0x3]  ;;  %v901_v39 = vsel %vm900_vm11, %v6667_v24, %v897_v36  ;;  %v816_v29 = vadd.f32 1.0, %v6669_v38 }
 0x175   : > { %v8243_v20 = vadd.f32 %v745_v31, %v679_v37  ;;  %v906_v41 = vsel %vm903_vm13, %v905_v19, %v901_v39  ;;  %v8269_v31 = vld [vmem:[#allocation10 + $0xf8] sm:$0xff]  ;;  %v8284_v37 = vld [vmem:[#allocation10 + $0xc0] sm:$0xff]  ;;  %v8287_v19 = vld [vmem:[#allocation10 + $0xc8] sm:$0xff] }
 0x176   : > { %v966_v45 = vsub.f32 1.0, %v906_v41  ;;  %6670 = vrcp.f32 %v816_v29  ;;  %v958_v47 = vmul.f32 %v943_v40, %v906_v41  ;;  %v919_v57 = vand.u32 2147483648, %v816_v29  ;;  %v8281_v36 = vld [vmem:[#allocation10 + $0xd8] sm:$0xff]  ;;  %v8296_v39 = vld [vmem:[#allocation10 + $0xa0] sm:$0xff]  ;;  %v8299_v40 = vld [vmem:[#allocation10 + $0xa8] sm:$0xff] }
 0x177   : > { %v777_v44 = vrot.slane %v8243_v20, 1  ;;  %v917_v42 = vand.u32 2147483647, %v816_v29  ;;  %vm913_vm5 = vweird.f32 %v816_v29  ;;  %v976_v23 = vmax.f32 %v8243_v20, 0.0  ;;  %v8290_v20 = vld [vmem:[#allocation10 + $0xb0] sm:$0xff]  ;;  %v8293_v38 = vld [vmem:[#allocation10 + $0xb8] sm:$0xff] }
 0x178   : > { %v982_v49 = vmul.f32 %v974_v46, %v966_v45  ;;  %v920_v61 = vor.u32 1.1754944e-38, %v919_v57  ;;  %v8302_v41 = vld [vmem:[#allocation10 + $0x90] sm:$0xff]  ;;  %v8311_v45 = vld [vmem:[#allocation10 + $0x88] sm:$0xff] }
 0x179   : > { %v6356_v52 = vmul.f32 -1.442695, %v777_v44  ;;  %vm918_vm9 = vcmp.eq.f32.partialorder %v917_v42, 8.507059e+37  ;;  %13171 = vst [vmem:[#allocation35_spill] sm:$0xff] %v8302_v41  ;;  %v8308_v44 = vld [vmem:[#allocation10 + $0x80] sm:$0xff]  ;;  %v8314_v46 = vld [vmem:[#allocation10 + $0x70] sm:$0xff] }
 0x17a   : > { %v8248_v33 = vadd.f32 %v982_v49, %v958_v47  ;;  %13173 = vst [vmem:[#allocation37_spill] sm:$0xff] %v8308_v44  ;;  %v8317_v47 = vld [vmem:[#allocation10 + $0x78] sm:$0xff]  ;;  %v8320_v49 = vld [vmem:[#allocation10 + $0x60] sm:$0xff]  ;;  %v8338_v57 = vld [vmem:[#allocation10 + $0x30] sm:$0xff] }
 0x17b   : > { %6672 = vpow2.f32 %v6356_v52  ;;  %13174 = vst [vmem:[#allocation38_spill] sm:$0xff] %v8311_v45  ;;  %v8323_v52 = vld [vmem:[#allocation10 + $0x68] sm:$0xff] }
 0x17c   : > { %998 = vst [vmem:[%s7841_s12 + $0x50] sm:$0x1] %v8248_v33  ;;  %v6671_v53 = vpop.eup %6670  ;;  %v8347_v42 = vld [vmem:[#allocation10 + $0x28] sm:$0xff] }
 0x17d   : > { %1035 = vst [vmem:[#allocation1 + $0x5] ss:$9 sm:$0xff] %v8248_v33  ;;  %v909_v54 = vmul.f32 %v6671_v53, %v816_v29  ;;  %vm914_vm15 = vweird.f32 %v6671_v53  ;;  %v8305_v29 = vld [vmem:[#allocation10 + $0x98] sm:$0xff] }
 0x17e   : > { %vm915_vm6 = vmor %vm913_vm5, %vm914_vm15  ;;  %13172 = vst [vmem:[#allocation36_spill] sm:$0xff] %v8305_v29 }
 0x17f   : > { %v910_v56 = vsub.f32 1.0, %v909_v54  ;;  %13175 = vst [vmem:[#allocation39_spill] sm:$0xff] %v8314_v46  ;;  %v8329_v54 = vld [vmem:[#allocation10 + $0x58] sm:$0xff] }
 0x180   : > { %13176 = vst [vmem:[#allocation40_spill] sm:$0xff] %v8317_v47 }
 0x181   : > { %v6673_v55 = vpop.eup %6672  ;;  %v911_v59 = vmul.f32 %v6671_v53, %v910_v56  ;;  %13177 = vst [vmem:[#allocation41_spill] sm:$0xff] %v8320_v49  ;;  %v8335_v56 = vld [vmem:[#allocation10 + $0x48] sm:$0xff] }
 0x182   : > { %v817_v58 = vadd.f32 1.0, %v6673_v55  ;;  %13178 = vst [vmem:[#allocation42_spill] sm:$0xff] %v8323_v52  ;;  %v8332_v55 = vld [vmem:[#allocation10 + $0x40] sm:$0xff] }
 0x183   : > { %v912_v60 = vadd.f32 %v6671_v53, %v911_v59  ;;  %13180 = vst [vmem:[#allocation44_spill] sm:$0xff] %v8329_v54  ;;  %v8344_v59 = vld [vmem:[#allocation10 + $0x20] sm:$0xff] }
 0x184   : > { %6674 = vrcp.f32 %v817_v58  ;;  %v934_v13 = vand.u32 2147483648, %v817_v58  ;;  %v932_v48 = vand.u32 2147483647, %v817_v58  ;;  %vm928_vm11 = vweird.f32 %v817_v58  ;;  %13181 = vst [vmem:[#allocation45_spill] sm:$0xff] %v8332_v55 }
 0x185   : > { %v916_v62 = vsel %vm915_vm6, %v6671_v53, %v912_v60  ;;  %v8326_v53 = vld [vmem:[#allocation10 + $0x50] sm:$0xff]  ;;  %13182 = vst [vmem:[#allocation46_spill] sm:$0xff] %v8335_v56 }
 0x186   : > { %v921_v0 = vsel %vm918_vm9, %v920_v61, %v916_v62  ;;  %v935_v15 = vor.u32 1.1754944e-38, %v934_v13  ;;  %vm933_vm15 = vcmp.eq.f32.partialorder %v932_v48, 8.507059e+37  ;;  %13179 = vst [vmem:[#allocation43_spill] sm:$0xff] %v8326_v53  ;;  %v8350_v60 = vld [vmem:[#allocation10 + $0x10] sm:$0xff]  ;;  %v8353_v61 = vld [vmem:[#allocation10 + $0x18] sm:$0xff]  ;;  %v8356_v62 = vld [vmem:[#allocation10] sm:$0xff] }
 0x187   : > { %v967_v1 = vsub.f32 1.0, %v921_v0  ;;  %v959_v6 = vmul.f32 %v944_v63, %v921_v0  ;;  %13183 = vst [vmem:[#allocation47_spill] sm:$0xff] %v8338_v57  ;;  %v8359_v63 = vld [vmem:[#allocation10 + $0x8] sm:$0xff]  ;;  %v1004_v13 = vld [vmem:[#allocation3 + $0x21] ss:$8 sm:$0x3] }
 0x188   : > { %13185 = vst [vmem:[#allocation49_spill] sm:$0xff] %v8344_v59  ;;  %v1008_v48 = vld [vmem:[#allocation3 + $0x61] ss:$8 sm:$0x3] }
 0x189   : > { %v983_v7 = vmul.f32 %v975_v4, %v967_v1  ;;  %13186 = vst [vmem:[#allocation50_spill] sm:$0xff] %v8347_v42 }
 0x18a   : > { %v6675_v5 = vpop.eup %6674  ;;  %13187 = vst [vmem:[#allocation51_spill] sm:$0xff] %v8350_v60 }
 0x18b   : > { %v924_v8 = vmul.f32 %v6675_v5, %v817_v58  ;;  %v8255_v10 = vadd.f32 %v983_v7, %v959_v6  ;;  %vm929_vm10 = vweird.f32 %v6675_v5  ;;  %v8341_v58 = vld [vmem:[#allocation10 + $0x38] sm:$0xff]  ;;  %13188 = vst [vmem:[#allocation52_spill] sm:$0xff] %v8353_v61 }
 0x18c   : > { %vm930_vm13 = vmor %vm928_vm11, %vm929_vm10  ;;  %13184 = vst [vmem:[#allocation48_spill] sm:$0xff] %v8341_v58 }
 0x18d   : > { %v925_v12 = vsub.f32 1.0, %v924_v8  ;;  %999 = vst [vmem:[%s7841_s12 + $0x60] sm:$0x1] %v8255_v10 }
 0x18e   : > { %1037 = vst [vmem:[#allocation1 + $0x6] ss:$9 sm:$0xff] %v8255_v10 }
 0x18f   : > { %v926_v14 = vmul.f32 %v6675_v5, %v925_v12  ;;  %13189 = vst [vmem:[#allocation53_spill] sm:$0xff] %v8356_v62 }
 0x190   : > { %13190 = vst [vmem:[#allocation54_spill] sm:$0xff] %v8359_v63 }
 0x191   : > { %v927_v51 = vadd.f32 %v6675_v5, %v926_v14  ;;  %v1006_v14 = vld [vmem:[#allocation3 + $0x41] ss:$8 sm:$0x3] }
 0x193   : > { %v931_v16 = vsel %vm930_vm13, %v6675_v5, %v927_v51  ;;  %v1002_v5 = vld [vmem:[#allocation3 + $0x1] ss:$8 sm:$0x3] }
 0x194   : > { %v936_v21 = vsel %vm933_vm15, %v935_v15, %v931_v16 }
 0x195   : > { %v968_v22 = vsub.f32 1.0, %v936_v21  ;;  %v960_v24 = vmul.f32 %v945_v18, %v936_v21  ;;  %v1010_v18 = vld [vmem:[#allocation3 + $0x81] ss:$8 sm:$0x3] }
 0x197   : > { %v984_v25 = vmul.f32 %v976_v23, %v968_v22 }
 0x199   : > { %v8261_v28 = vadd.f32 %v984_v25, %v960_v24  ;;  %v1012_v25 = vld [vmem:[#allocation3 + $0xa1] ss:$8 sm:$0x3] }
 0x19b   : > { %1000 = vst [vmem:[%s7841_s12 + $0x70] sm:$0x1] %v8261_v28 }
 0x19c   : > { %1039 = vst [vmem:[#allocation1 + $0x7] ss:$9 sm:$0xff] %v8261_v28 }
 0x1a3   : > { %v1040_v11 = vld [vmem:[#allocation1] sm:$0xff] }
 0x1a4   : > { %1058 = vmatmul.f32.vlgmr.msrb.gmra.mxu2 %v1040_v11  ;;  %1078 = vmatmul.f32.vlgmr.msrb.gmra.mxu3 %v1040_v11 }
 0x1a5   : > { %1720 = vmatpush.msrb.mxu2 %v8266_v30  ;;  %1740 = vmatpush.msrb.mxu3 %v8269_v31 }
 0x1a7   : > { %1721 = vmatpush.msrb.mxu2 %v8272_v32  ;;  %1741 = vmatpush.msrb.mxu3 %v8275_v34 }
 0x1a9   : > { %1722 = vmatpush.msrb.mxu2 %v8278_v35  ;;  %1742 = vmatpush.msrb.mxu3 %v8281_v36 }
 0x1ab   : > { %1723 = vmatpush.msrb.mxu2 %v8284_v37  ;;  %1743 = vmatpush.msrb.mxu3 %v8287_v19 }
 0x1ad   : > { %1724 = vmatpush.msrb.mxu2 %v8290_v20  ;;  %1744 = vmatpush.msrb.mxu3 %v8293_v38 }
 0x1af   : > { %1725 = vmatpush.msrb.mxu2 %v8296_v39  ;;  %1745 = vmatpush.msrb.mxu3 %v8299_v40 }
 0x1b1   : > { %1726 = vmatpush.msrb.mxu2 %v8302_v41  ;;  %1746 = vmatpush.msrb.mxu3 %v8305_v29 }
 0x1b3   : > { %1727 = vmatpush.msrb.mxu2 %v8308_v44  ;;  %1747 = vmatpush.msrb.mxu3 %v8311_v45 }
 0x1b5   : > { %1728 = vmatpush.msrb.mxu2 %v8314_v46  ;;  %1748 = vmatpush.msrb.mxu3 %v8317_v47 }
 0x1b7   : > { %1729 = vmatpush.msrb.mxu2 %v8320_v49  ;;  %1749 = vmatpush.msrb.mxu3 %v8323_v52 }
 0x1b9   : > { %1730 = vmatpush.msrb.mxu2 %v8326_v53  ;;  %1750 = vmatpush.msrb.mxu3 %v8329_v54 }
 0x1bb   : > { %1731 = vmatpush.msrb.mxu2 %v8332_v55  ;;  %1751 = vmatpush.msrb.mxu3 %v8335_v56 }
 0x1bd   : > { %1732 = vmatpush.msrb.mxu2 %v8338_v57  ;;  %1752 = vmatpush.msrb.mxu3 %v8341_v58 }
 0x1bf   : > { %1733 = vmatpush.msrb.mxu2 %v8344_v59  ;;  %1753 = vmatpush.msrb.mxu3 %v8347_v42 }
 0x1c1   : > { %1734 = vmatpush.msrb.mxu2 %v8350_v60  ;;  %1754 = vmatpush.msrb.mxu3 %v8353_v61 }
 0x1c3   : > { %1735 = vmatpush.msrb.mxu2 %v8356_v62  ;;  %1755 = vmatpush.msrb.mxu3 %v8359_v63  ;;  %v1014_v63 = vld [vmem:[#allocation3 + $0xc1] ss:$8 sm:$0x3] }
 0x227   : > { %v1079_v0 = vpop.f32.mrf.mxu3  ;;  %v1059_v4 = vpop.f32.mrf.mxu2 }
 0x228   : > { %v1084_v1 = vrot.slane %v1079_v0, 7 }
 0x22a   : > { %v1085_v6 = vsel %vm13059_vm1, %v1059_v4, %v1084_v1  ;;  %v1086_v7 = vsel %vm13057_vm2, %v1059_v4, %v1084_v1  ;;  %v1088_v8 = vsel %vm13056_vm3, %v1059_v4, %v1084_v1  ;;  %v1090_v12 = vsel %vm13054_vm4, %v1059_v4, %v1084_v1 }
 0x22b   : > { %v1087_v51 = vrot.slane %v1086_v7, 1  ;;  %v1089_v15 = vrot.slane %v1088_v8, 2  ;;  %v1091_v16 = vrot.slane %v1090_v12, 3  ;;  %v1092_v17 = vsel %vm13051_vm14, %v1059_v4, %v1084_v1  ;;  %v1016_v7 = vld [vmem:[#allocation3 + $0xe1] ss:$8 sm:$0x3] }
 0x22c   : > { %v1093_v21 = vrot.slane %v1092_v17, 4  ;;  %v1094_v22 = vsel %vm13050_vm7, %v1059_v4, %v1084_v1  ;;  %v1096_v23 = vsel %vm13048_vm12, %v1059_v4, %v1084_v1  ;;  %v1098_v24 = vsel %vm13045_vm8, %v1084_v1, %v1059_v4 }
 0x22d   : > { %v1095_v11 = vrot.slane %v1094_v22, 5  ;;  %v1097_v0 = vrot.slane %v1096_v23, 6  ;;  %v1099_v3 = vrot.slane %v1098_v24, 7  ;;  %v8370_v2 = vadd.f32 %v1085_v6, %v1002_v5 }
 0x22e   : > { %v8372_v8 = vadd.f32 %v1087_v51, %v1004_v13  ;;  %v8374_v12 = vadd.f32 %v1089_v15, %v1006_v14  ;;  %v8376_v62 = vadd.f32 %v1091_v16, %v1008_v48  ;;  %v8378_v17 = vadd.f32 %v1093_v21, %v1010_v18 }
 0x22f   : > { %v8380_v61 = vadd.f32 %v1095_v11, %v1012_v25  ;;  %v8382_v60 = vadd.f32 %v1097_v0, %v1014_v63  ;;  %v8384_v1 = vadd.f32 %v1099_v3, %v1016_v7  ;;  %v1124_v4 = vrot.slane %v8370_v2, 1 }
 0x230   : > { %v1125_v5 = vrot.slane %v8372_v8, 1  ;;  %v1126_v6 = vrot.slane %v8374_v12, 1  ;;  %v1127_v13 = vrot.slane %v8376_v62, 1  ;;  %v1128_v14 = vrot.slane %v8378_v17, 1 }
 0x231   : > { %v1129_v48 = vrot.slane %v8380_v61, 1  ;;  %v1130_v51 = vrot.slane %v8382_v60, 1  ;;  %v6357_v15 = vmul.f32 -1.442695, %v1124_v4  ;;  %v1131_v3 = vrot.slane %v8384_v1, 1 }
 0x232   : > { %v6358_v16 = vmul.f32 -1.442695, %v1125_v5  ;;  %v6359_v63 = vmul.f32 -1.442695, %v1126_v6  ;;  %v6360_v18 = vmul.f32 -1.442695, %v1127_v13 }
 0x233   : > { %6676 = vpow2.f32 %v6357_v15  ;;  %v6361_v21 = vmul.f32 -1.442695, %v1128_v14  ;;  %v6362_v22 = vmul.f32 -1.442695, %v1129_v48  ;;  %v6363_v23 = vmul.f32 -1.442695, %v1130_v51 }
 0x234   : > { %6678 = vpow2.f32 %v6358_v16  ;;  %v6364_v24 = vmul.f32 -1.442695, %v1131_v3 }
 0x235   : > { %6680 = vpow2.f32 %v6359_v63 }
 0x236   : > { %6682 = vpow2.f32 %v6360_v18 }
 0x237   : > { %6684 = vpow2.f32 %v6361_v21 }
 0x238   : > { %6686 = vpow2.f32 %v6362_v22 }
 0x239   : > { %v6677_v25 = vpop.eup %6676  ;;  %6688 = vpow2.f32 %v6363_v23 }
 0x23a   : > { %v6679_v11 = vpop.eup %6678  ;;  %v8394_v0 = vadd.f32 1.0, %v6677_v25  ;;  %6690 = vpow2.f32 %v6364_v24 }
 0x23b   : > { %v6681_v7 = vpop.eup %6680  ;;  %v8396_v4 = vadd.f32 1.0, %v6679_v11 }
 0x23c   : > { %v6683_v5 = vpop.eup %6682  ;;  %v8398_v6 = vadd.f32 1.0, %v6681_v7  ;;  %6692 = vrcp.f32 %v8394_v0  ;;  %v1183_v15 = vand.u32 2147483648, %v8394_v0  ;;  %vm1177_vm5 = vweird.f32 %v8394_v0 }
 0x23d   : > { %v6685_v13 = vpop.eup %6684  ;;  %v8401_v14 = vadd.f32 1.0, %v6683_v5  ;;  %6694 = vrcp.f32 %v8396_v4  ;;  %v1198_v16 = vand.u32 2147483648, %v8396_v4  ;;  %v1181_v5 = vand.u32 2147483647, %v8394_v0 }
 0x23e   : > { %v6687_v48 = vpop.eup %6686  ;;  %v8404_v51 = vadd.f32 1.0, %v6685_v13  ;;  %6696 = vrcp.f32 %v8398_v6  ;;  %v1196_v13 = vand.u32 2147483647, %v8396_v4  ;;  %v1213_v21 = vand.u32 2147483648, %v8398_v6 }
 0x23f   : > { %v6689_v63 = vpop.eup %6688  ;;  %v8413_v24 = vadd.f32 1.0, %v6687_v48  ;;  %6698 = vrcp.f32 %v8401_v14  ;;  %v1184_v11 = vor.u32 1.1754944e-38, %v1183_v15  ;;  %vm1192_vm6 = vweird.f32 %v8396_v4 }
 0x240   : > { %v6691_v23 = vpop.eup %6690  ;;  %6700 = vrcp.f32 %v8404_v51  ;;  %v8427_v22 = vadd.f32 1.0, %v6689_v63  ;;  %v8432_v3 = vor.u32 1.1754944e-38, %v1198_v16  ;;  %vm1207_vm9 = vweird.f32 %v8398_v6 }
 0x241   : > { %v8434_v18 = vadd.f32 1.0, %v6691_v23  ;;  %v1211_v59 = vand.u32 2147483647, %v8398_v6  ;;  %v1228_v63 = vand.u32 2147483648, %v8401_v14  ;;  %v1226_v15 = vand.u32 2147483647, %v8401_v14 }
 0x242   : > { %v8418_v7 = vpop.eup %6692  ;;  %v1241_v56 = vand.u32 2147483647, %v8404_v51  ;;  %6702 = vrcp.f32 %v8413_v24  ;;  %vm8447_vm11 = vcmp.eq.f32.partialorder %v1181_v5, 8.507059e+37  ;;  %v1214_v54 = vor.u32 1.1754944e-38, %v1213_v21 }
 0x243   : > { %v8425_v48 = vpop.eup %6694  ;;  %v1173_v25 = vmul.f32 %v8418_v7, %v8394_v0  ;;  %vm1178_vm10 = vweird.f32 %v8418_v7  ;;  %vm1222_vm13 = vweird.f32 %v8401_v14  ;;  %vm8456_vm0 = vcmp.eq.f32.partialorder %v1196_v13, 8.507059e+37 }
 0x244   : > { %v1188_v42 = vmul.f32 %v8425_v48, %v8396_v4  ;;  %v8441_v58 = vpop.eup %6696  ;;  %vm1193_vm15 = vweird.f32 %v8425_v48  ;;  %v1243_v5 = vand.u32 2147483648, %v8404_v51  ;;  %vm8463_vm12 = vcmp.eq.f32.partialorder %v1211_v59, 8.507059e+37  ;;  %vm8486_vm3 = vmor %vm1177_vm5, %vm1178_vm10 }
 0x245   : > { %v1174_v57 = vsub.f32 1.0, %v1173_v25  ;;  %v1203_v55 = vmul.f32 %v8441_v58, %v8398_v6  ;;  %v6699_v25 = vpop.eup %6698  ;;  %v1229_v46 = vor.u32 1.1754944e-38, %v1228_v63  ;;  %vm1208_vm7 = vweird.f32 %v8441_v58  ;;  %vm8499_vm8 = vmor %vm1192_vm6, %vm1193_vm15 }
 0x246   : > { %v1189_v23 = vsub.f32 1.0, %v1188_v42  ;;  %v6701_v42 = vpop.eup %6700  ;;  %vm8470_vm14 = vcmp.eq.f32.partialorder %v1226_v15, 8.507059e+37  ;;  %vm8475_vm4 = vcmp.eq.f32.partialorder %v1241_v56, 8.507059e+37  ;;  %v1256_v63 = vand.u32 2147483647, %v8413_v24 }
 0x247   : > { %v1175_v53 = vmul.f32 %v8418_v7, %v1174_v57  ;;  %v1204_v47 = vsub.f32 1.0, %v1203_v55  ;;  %v1218_v57 = vmul.f32 %v6699_v25, %v8401_v14  ;;  %v1233_v44 = vmul.f32 %v6701_v42, %v8404_v51 }
 0x248   : > { %v1190_v49 = vmul.f32 %v8425_v48, %v1189_v23  ;;  %vm1223_vm2 = vweird.f32 %v6699_v25  ;;  %v1244_v41 = vor.u32 1.1754944e-38, %v1243_v5  ;;  %vm1252_vm1 = vweird.f32 %v8413_v24 }
 0x249   : > { %v1176_v13 = vadd.f32 %v8418_v7, %v1175_v53  ;;  %v1205_v59 = vmul.f32 %v8441_v58, %v1204_v47  ;;  %v1219_v29 = vsub.f32 1.0, %v1218_v57  ;;  %v6703_v53 = vpop.eup %6702  ;;  %v1234_v56 = vsub.f32 1.0, %v1233_v44 }
 0x24a   : > { %v1191_v55 = vadd.f32 %v8425_v48, %v1190_v49  ;;  %6704 = vrcp.f32 %v8427_v22  ;;  %vm1238_vm5 = vweird.f32 %v6701_v42  ;;  %v1248_v57 = vmul.f32 %v6703_v53, %v8413_v24 }
 0x24b   : > { %v1180_v47 = vsel %vm8486_vm3, %v8418_v7, %v1176_v13  ;;  %v1206_v0 = vadd.f32 %v8441_v58, %v1205_v59  ;;  %v1220_v44 = vmul.f32 %v6699_v25, %v1219_v29  ;;  %vm8511_vm3 = vmor %vm1207_vm9, %vm1208_vm7  ;;  %v1235_v4 = vmul.f32 %v6701_v42, %v1234_v56 }
 0x24c   : > { %v1195_v5 = vsel %vm8499_vm8, %v8425_v48, %v1191_v55  ;;  %v1258_v13 = vand.u32 2147483648, %v8413_v24  ;;  %vm8520_vm6 = vcmp.eq.f32.partialorder %v1256_v63, 8.507059e+37  ;;  %v1271_v6 = vand.u32 2147483647, %v8427_v22  ;;  %vm8530_vm7 = vmor %vm1222_vm13, %vm1223_vm2 }
 0x24d   : > { %v1210_v29 = vsel %vm8511_vm3, %v8441_v58, %v1206_v0  ;;  %v1221_v59 = vadd.f32 %v6699_v25, %v1220_v44  ;;  %v1185_v55 = vsel %vm8447_vm11, %v1184_v11, %v1180_v47  ;;  %v1236_v56 = vadd.f32 %v6701_v42, %v1235_v4 }
 0x24e   : > { %v1249_v49 = vsub.f32 1.0, %v1248_v57  ;;  %v1273_v58 = vand.u32 2147483648, %v8427_v22  ;;  %v1200_v63 = vsel %vm8456_vm0, %v8432_v3, %v1195_v5  ;;  %vm13211_vm8 = vweird.f32 %v8404_v51 }
 0x24f   : > { %v1225_v0 = vsel %vm8530_vm7, %v6699_v25, %v1221_v59  ;;  %vm1239_vm9 = vmor %vm13211_vm8, %vm1238_vm5  ;;  %vm1253_vm10 = vweird.f32 %v6703_v53  ;;  %vm1267_vm2 = vweird.f32 %v8427_v22  ;;  %6706 = vrcp.f32 %v8434_v18 }
 0x250   : > { %v6705_v14 = vpop.eup %6704  ;;  %v1215_v11 = vsel %vm8463_vm12, %v1214_v54, %v1210_v29  ;;  %v1240_v16 = vsel %vm1239_vm9, %v6701_v42, %v1236_v56  ;;  %v1250_v47 = vmul.f32 %v6703_v53, %v1249_v49  ;;  %v1259_v52 = vor.u32 1.1754944e-38, %v1258_v13 }
 0x251   : > { %v1230_v3 = vsel %vm8470_vm14, %v1229_v46, %v1225_v0  ;;  %v1245_v25 = vsel %vm8475_vm4, %v1244_v41, %v1240_v16  ;;  %v1263_v51 = vmul.f32 %v6705_v14, %v8427_v22  ;;  %vm8552_vm0 = vcmp.eq.f32.partialorder %v1271_v6, 8.507059e+37  ;;  %vm1254_vm14 = vmor %vm1252_vm1, %vm1253_vm10 }
 0x252   : > { %v1274_v5 = vor.u32 1.1754944e-38, %v1273_v58  ;;  %v1251_v7 = vadd.f32 %v6703_v53, %v1250_v47  ;;  %vm1268_vm11 = vweird.f32 %v6705_v14  ;;  %v1286_v54 = vand.u32 2147483647, %v8434_v18 }
 0x253   : > { %v1288_v42 = vand.u32 2147483648, %v8434_v18  ;;  %v1264_v45 = vsub.f32 1.0, %v1263_v51  ;;  %v1292_v41 = vmul.f32 %v1185_v55, %v8174_v27  ;;  %v1293_v46 = vmul.f32 %v1200_v63, %v8176_v43  ;;  %vm1269_vm4 = vmor %vm1267_vm2, %vm1268_vm11 }
 0x254   : > { %v1294_v21 = vmul.f32 %v1215_v11, %v8196_v9  ;;  %v1255_v23 = vsel %vm1254_vm14, %v6703_v53, %v1251_v7  ;;  %v1295_v4 = vmul.f32 %v1230_v3, %v8217_v50  ;;  %v1296_v57 = vmul.f32 %v1245_v25, %v8238_v26 }
 0x255   : > { %v1300_v13 = vsub.f32 1.0, %v1185_v55  ;;  %v6707_v29 = vpop.eup %6706  ;;  %v1260_v59 = vsel %vm8520_vm6, %v1259_v52, %v1255_v23  ;;  %v1265_v6 = vmul.f32 %v6705_v14, %v1264_v45  ;;  %v1301_v24 = vsub.f32 1.0, %v1200_v63 }
 0x256   : > { %v1302_v15 = vsub.f32 1.0, %v1215_v11  ;;  %v1278_v56 = vmul.f32 %v6707_v29, %v8434_v18  ;;  %vm1283_vm1 = vweird.f32 %v6707_v29  ;;  %v1297_v27 = vmul.f32 %v1260_v59, %v8248_v33 }
 0x257   : > { %v1303_v43 = vsub.f32 1.0, %v1230_v3  ;;  %v1266_v9 = vadd.f32 %v6705_v14, %v1265_v6  ;;  %v1304_v53 = vsub.f32 1.0, %v1245_v25  ;;  %v1305_v49 = vsub.f32 1.0, %v1260_v59  ;;  %v13237_v59 = vld [vmem:[#allocation52_spill] sm:$0xff]  ;;  %v13238_v6 = vld [vmem:[#allocation53_spill] sm:$0xff] }
 0x258   : > { %v13214_v50 = vmax.f32 %v8370_v2, 0.0  ;;  %v1279_v48 = vsub.f32 1.0, %v1278_v56  ;;  %v13215_v55 = vmax.f32 %v8372_v8, 0.0  ;;  %v13216_v63 = vmax.f32 %v8374_v12, 0.0 }
 0x259   : > { %v13217_v33 = vmax.f32 %v8376_v62, 0.0  ;;  %v1270_v16 = vsel %vm1269_vm4, %v6705_v14, %v1266_v9  ;;  %v13218_v47 = vmax.f32 %v8378_v17, 0.0  ;;  %v13219_v52 = vmax.f32 %v8380_v61, 0.0 }
 0x25a   : > { %v1316_v26 = vmul.f32 %v13214_v50, %v1300_v13  ;;  %v1317_v58 = vmul.f32 %v13215_v55, %v1301_v24  ;;  %v1318_v0 = vmul.f32 %v13216_v63, %v1302_v15  ;;  %v1275_v8 = vsel %vm8552_vm0, %v1274_v5, %v1270_v16  ;;  %v13235_v13 = vld [vmem:[#allocation50_spill] sm:$0xff]  ;;  %v1347_v55 = vld [vmem:[#allocation3 + $0x62] ss:$8 sm:$0x3] }
 0x25b   : > { %v1319_v11 = vmul.f32 %v13217_v33, %v1303_v43  ;;  %v1320_v2 = vmul.f32 %v13218_v47, %v1304_v53  ;;  %v1321_v22 = vmul.f32 %v13219_v52, %v1305_v49  ;;  %v1280_v25 = vmul.f32 %v6707_v29, %v1279_v48  ;;  %v13239_v24 = vld [vmem:[#allocation54_spill] sm:$0xff]  ;;  %v1341_v43 = vld [vmem:[#allocation3 + $0x2] ss:$8 sm:$0x3] }
 0x25c   : > { %v8585_v3 = vadd.f32 %v1316_v26, %v1292_v41  ;;  %v8589_v12 = vadd.f32 %v1317_v58, %v1293_v46  ;;  %v8591_v51 = vadd.f32 %v1318_v0, %v1294_v21  ;;  %v1306_v62 = vsub.f32 1.0, %v1275_v8  ;;  %v1343_v26 = vld [vmem:[#allocation3 + $0x22] ss:$8 sm:$0x3] }
 0x25d   : > { %v1314_v17 = vmax.f32 %v8382_v60, 0.0  ;;  %v8594_v14 = vadd.f32 %v1319_v11, %v1295_v4  ;;  %v8596_v7 = vadd.f32 %v1320_v2, %v1296_v57  ;;  %v1281_v61 = vadd.f32 %v6707_v29, %v1280_v25  ;;  %v13233_v4 = vld [vmem:[#allocation48_spill] sm:$0xff]  ;;  %v13234_v57 = vld [vmem:[#allocation49_spill] sm:$0xff] }
 0x25e   : > { %1332 = vst [vmem:[%s7841_s12 + $0x1] sm:$0x1] %v8585_v3  ;;  %vm1282_vm12 = vweird.f32 %v8434_v18  ;;  %v8601_v44 = vadd.f32 %v1321_v22, %v1297_v27  ;;  %v1289_v5 = vor.u32 1.1754944e-38, %v1288_v42  ;;  %v1298_v60 = vmul.f32 %v1275_v8, %v8255_v10  ;;  %v1345_v48 = vld [vmem:[#allocation3 + $0x42] ss:$8 sm:$0x3] }
 0x25f   : > { %1333 = vst [vmem:[%s7841_s12 + $0x11] sm:$0x1] %v8589_v12  ;;  %vm1284_vm13 = vmor %vm1282_vm12, %vm1283_vm1  ;;  %v1322_v45 = vmul.f32 %v1314_v17, %v1306_v62  ;;  %vm1287_vm15 = vcmp.eq.f32.partialorder %v1286_v54, 8.507059e+37  ;;  %v1315_v23 = vmax.f32 %v8384_v1, 0.0  ;;  %v13232_v1 = vld [vmem:[#allocation47_spill] sm:$0xff]  ;;  %vm13240_vm5 = vcmask 1040384  }
 0x260   : > { %1334 = vst [vmem:[%s7841_s12 + $0x21] sm:$0x1] %v8591_v51  ;;  %v1285_v41 = vsel %vm1284_vm13, %v6707_v29, %v1281_v61  ;;  %v13236_v29 = vld [vmem:[#allocation51_spill] sm:$0xff]  ;;  %vm13241_vm3 = vcmask 1041409   ;;  %vm13242_vm6 = vcmask 1042434   ;;  %vm13243_vm7 = vcmask 1043459  }
 0x261   : > { %1335 = vst [vmem:[%s7841_s12 + $0x31] sm:$0x1] %v8594_v14  ;;  %v1290_v18 = vsel %vm1287_vm15, %v1289_v5, %v1285_v41  ;;  %v8611_v46 = vadd.f32 %v1322_v45, %v1298_v60  ;;  %vm13244_vm8 = vcmask 1044484   ;;  %v1349_v11 = vld [vmem:[#allocation3 + $0x82] ss:$8 sm:$0x3] }
 0x262   : > { %1336 = vst [vmem:[%s7841_s12 + $0x41] sm:$0x1] %v8596_v7  ;;  %v1307_v21 = vsub.f32 1.0, %v1290_v18  ;;  %v1299_v10 = vmul.f32 %v1290_v18, %v8261_v28  ;;  %vm13245_vm9 = vcmask 1045509   ;;  %vm13246_vm10 = vcmask 1046534  }
 0x263   : > { %1337 = vst [vmem:[%s7841_s12 + $0x51] sm:$0x1] %v8601_v44  ;;  %vm13247_vm2 = vcmask 1046528   ;;  %v1351_v22 = vld [vmem:[#allocation3 + $0xa2] ss:$8 sm:$0x3] }
 0x264   : > { %1338 = vst [vmem:[%s7841_s12 + $0x61] sm:$0x1] %v8611_v46  ;;  %v1323_v42 = vmul.f32 %v1315_v23, %v1307_v21  ;;  %v1353_v61 = vld [vmem:[#allocation3 + $0xc2] ss:$8 sm:$0x3] }
 0x265   : > { %1364 = vst [vmem:[#allocation1] ss:$9 sm:$0xff] %v8585_v3  ;;  %v1355_v5 = vld [vmem:[#allocation3 + $0xe2] ss:$8 sm:$0x3] }
 0x266   : > { %1366 = vst [vmem:[#allocation1 + $0x1] ss:$9 sm:$0xff] %v8589_v12  ;;  %v8623_v54 = vadd.f32 %v1323_v42, %v1299_v10 }
 0x267   : > { %1368 = vst [vmem:[#allocation1 + $0x2] ss:$9 sm:$0xff] %v8591_v51 }
 0x268   : > { %1370 = vst [vmem:[#allocation1 + $0x3] ss:$9 sm:$0xff] %v8594_v14 }
 0x269   : > { %1339 = vst [vmem:[%s7841_s12 + $0x71] sm:$0x1] %v8623_v54 }
 0x26a   : > { %1372 = vst [vmem:[#allocation1 + $0x4] ss:$9 sm:$0xff] %v8596_v7 }
 0x26b   : > { %1374 = vst [vmem:[#allocation1 + $0x5] ss:$9 sm:$0xff] %v8601_v44 }
 0x26c   : > { %1376 = vst [vmem:[#allocation1 + $0x6] ss:$9 sm:$0xff] %v8611_v46 }
 0x26d   : > { %1378 = vst [vmem:[#allocation1 + $0x7] ss:$9 sm:$0xff] %v8623_v54 }
 0x274   : > { %v1379_v28 = vld [vmem:[#allocation1] sm:$0xff] }
 0x275   : > { %1397 = vmatmul.f32.vlgmr.msra.gmra.mxu2 %v1379_v28  ;;  %1417 = vmatmul.f32.vlgmr.msra.gmra.mxu3 %v1379_v28 }
 0x276   : > { %2398 = vmatpush.msra.mxu2 %v8266_v30  ;;  %2418 = vmatpush.msra.mxu3 %v8269_v31  ;;  %v13220_v30 = vld [vmem:[#allocation35_spill] sm:$0xff]  ;;  %v13221_v31 = vld [vmem:[#allocation36_spill] sm:$0xff] }
 0x278   : > { %2399 = vmatpush.msra.mxu2 %v8272_v32  ;;  %2419 = vmatpush.msra.mxu3 %v8275_v34  ;;  %v13222_v32 = vld [vmem:[#allocation37_spill] sm:$0xff]  ;;  %v13223_v34 = vld [vmem:[#allocation38_spill] sm:$0xff] }
 0x27a   : > { %2400 = vmatpush.msra.mxu2 %v8278_v35  ;;  %2420 = vmatpush.msra.mxu3 %v8281_v36  ;;  %v13224_v35 = vld [vmem:[#allocation39_spill] sm:$0xff]  ;;  %v13225_v36 = vld [vmem:[#allocation40_spill] sm:$0xff] }
 0x27c   : > { %2401 = vmatpush.msra.mxu2 %v8284_v37  ;;  %2421 = vmatpush.msra.mxu3 %v8287_v19  ;;  %v13226_v37 = vld [vmem:[#allocation41_spill] sm:$0xff]  ;;  %v13227_v19 = vld [vmem:[#allocation42_spill] sm:$0xff] }
 0x27e   : > { %2402 = vmatpush.msra.mxu2 %v8290_v20  ;;  %2422 = vmatpush.msra.mxu3 %v8293_v38  ;;  %v13228_v20 = vld [vmem:[#allocation43_spill] sm:$0xff]  ;;  %v13229_v38 = vld [vmem:[#allocation44_spill] sm:$0xff] }
 0x280   : > { %2403 = vmatpush.msra.mxu2 %v8296_v39  ;;  %2423 = vmatpush.msra.mxu3 %v8299_v40  ;;  %v13230_v39 = vld [vmem:[#allocation45_spill] sm:$0xff]  ;;  %v13231_v40 = vld [vmem:[#allocation46_spill] sm:$0xff] }
 0x282   : > { %2404 = vmatpush.msra.mxu2 %v13220_v30  ;;  %2424 = vmatpush.msra.mxu3 %v13221_v31 }
 0x284   : > { %2405 = vmatpush.msra.mxu2 %v13222_v32  ;;  %2425 = vmatpush.msra.mxu3 %v13223_v34 }
 0x286   : > { %2406 = vmatpush.msra.mxu2 %v13224_v35  ;;  %2426 = vmatpush.msra.mxu3 %v13225_v36 }
 0x288   : > { %2407 = vmatpush.msra.mxu2 %v13226_v37  ;;  %2427 = vmatpush.msra.mxu3 %v13227_v19 }
 0x28a   : > { %2408 = vmatpush.msra.mxu2 %v13228_v20  ;;  %2428 = vmatpush.msra.mxu3 %v13229_v38 }
 0x28c   : > { %2409 = vmatpush.msra.mxu2 %v13230_v39  ;;  %2429 = vmatpush.msra.mxu3 %v13231_v40 }
 0x28e   : > { %2410 = vmatpush.msra.mxu2 %v13232_v1  ;;  %2430 = vmatpush.msra.mxu3 %v13233_v4 }
 0x290   : > { %2411 = vmatpush.msra.mxu2 %v13234_v57  ;;  %2431 = vmatpush.msra.mxu3 %v13235_v13 }
 0x292   : > { %2412 = vmatpush.msra.mxu2 %v13236_v29  ;;  %2432 = vmatpush.msra.mxu3 %v13237_v59 }
 0x294   : > { %2413 = vmatpush.msra.mxu2 %v13238_v6  ;;  %2433 = vmatpush.msra.mxu3 %v13239_v24 }
 0x2f8   : > { %v1418_v15 = vpop.f32.mrf.mxu3  ;;  %v1398_v27 = vpop.f32.mrf.mxu2 }
 0x2f9   : > { %v1423_v56 = vrot.slane %v1418_v15, 7 }
 0x2fb   : > { %v1424_v9 = vsel %vm13240_vm5, %v1398_v27, %v1423_v56  ;;  %v1425_v53 = vsel %vm13241_vm3, %v1398_v27, %v1423_v56  ;;  %v1427_v49 = vsel %vm13242_vm6, %v1398_v27, %v1423_v56  ;;  %v1429_v50 = vsel %vm13243_vm7, %v1398_v27, %v1423_v56 }
 0x2fc   : > { %v1426_v58 = vrot.slane %v1425_v53, 1  ;;  %v1428_v63 = vrot.slane %v1427_v49, 2  ;;  %v1430_v0 = vrot.slane %v1429_v50, 3  ;;  %v1431_v33 = vsel %vm13244_vm8, %v1398_v27, %v1423_v56 }
 0x2fd   : > { %v1432_v16 = vrot.slane %v1431_v33, 4  ;;  %v1433_v47 = vsel %vm13245_vm9, %v1398_v27, %v1423_v56  ;;  %v1435_v2 = vsel %vm13246_vm10, %v1398_v27, %v1423_v56  ;;  %v1437_v52 = vsel %vm13247_vm2, %v1423_v56, %v1398_v27 }
 0x2fe   : > { %v1434_v8 = vrot.slane %v1433_v47, 5  ;;  %v1436_v25 = vrot.slane %v1435_v2, 6  ;;  %v1438_v62 = vrot.slane %v1437_v52, 7  ;;  %v8673_v17 = vadd.f32 %v1424_v9, %v1341_v43 }
 0x2ff   : > { %v8675_v60 = vadd.f32 %v1426_v58, %v1343_v26  ;;  %v8677_v45 = vadd.f32 %v1428_v63, %v1345_v48  ;;  %v8679_v41 = vadd.f32 %v1430_v0, %v1347_v55  ;;  %v8681_v18 = vadd.f32 %v1432_v16, %v1349_v11 }
 0x300   : > { %v8683_v21 = vadd.f32 %v1434_v8, %v1351_v22  ;;  %v8685_v23 = vadd.f32 %v1436_v25, %v1353_v61  ;;  %v8687_v10 = vadd.f32 %v1438_v62, %v1355_v5  ;;  %v1463_v42 = vrot.slane %v8673_v17, 1 }
 0x301   : > { %v1464_v28 = vrot.slane %v8675_v60, 1  ;;  %v1465_v30 = vrot.slane %v8677_v45, 1  ;;  %v1466_v31 = vrot.slane %v8679_v41, 1  ;;  %v1467_v32 = vrot.slane %v8681_v18, 1 }
 0x302   : > { %v1468_v34 = vrot.slane %v8683_v21, 1  ;;  %v1469_v35 = vrot.slane %v8685_v23, 1  ;;  %v6365_v36 = vmul.f32 -1.442695, %v1463_v42  ;;  %v1470_v38 = vrot.slane %v8687_v10, 1 }
 0x303   : > { %v6366_v37 = vmul.f32 -1.442695, %v1464_v28  ;;  %v6367_v19 = vmul.f32 -1.442695, %v1465_v30  ;;  %v6368_v20 = vmul.f32 -1.442695, %v1466_v31 }
 0x304   : > { %6708 = vpow2.f32 %v6365_v36  ;;  %v6369_v39 = vmul.f32 -1.442695, %v1467_v32  ;;  %v6370_v40 = vmul.f32 -1.442695, %v1468_v34  ;;  %v6371_v1 = vmul.f32 -1.442695, %v1469_v35 }
 0x305   : > { %6710 = vpow2.f32 %v6366_v37  ;;  %v6372_v4 = vmul.f32 -1.442695, %v1470_v38  ;;  %v1647_v26 = vmax.f32 %v8673_v17, 0.0  ;;  %v1648_v48 = vmax.f32 %v8675_v60, 0.0 }
 0x306   : > { %6712 = vpow2.f32 %v6367_v19  ;;  %v1649_v55 = vmax.f32 %v8677_v45, 0.0  ;;  %v1650_v58 = vmax.f32 %v8679_v41, 0.0  ;;  %v1651_v33 = vmax.f32 %v8681_v18, 0.0 }
 0x307   : > { %6714 = vpow2.f32 %v6368_v20  ;;  %v1652_v11 = vmax.f32 %v8683_v21, 0.0  ;;  %v1653_v18 = vmax.f32 %v8685_v23, 0.0 }
 0x308   : > { %6716 = vpow2.f32 %v6369_v39 }
 0x309   : > { %6718 = vpow2.f32 %v6370_v40 }
 0x30a   : > { %v6709_v57 = vpop.eup %6708  ;;  %6720 = vpow2.f32 %v6371_v1 }
 0x30b   : > { %v6711_v13 = vpop.eup %6710  ;;  %v8697_v29 = vadd.f32 1.0, %v6709_v57  ;;  %6722 = vpow2.f32 %v6372_v4 }
 0x30c   : > { %v6713_v59 = vpop.eup %6712  ;;  %v8699_v6 = vadd.f32 1.0, %v6711_v13 }
 0x30d   : > { %v6715_v24 = vpop.eup %6714  ;;  %v8701_v15 = vadd.f32 1.0, %v6713_v59  ;;  %6724 = vrcp.f32 %v8697_v29  ;;  %v1522_v53 = vand.u32 2147483648, %v8697_v29  ;;  %vm1516_vm0 = vweird.f32 %v8697_v29 }
 0x30e   : > { %v6717_v56 = vpop.eup %6716  ;;  %v8704_v27 = vadd.f32 1.0, %v6715_v24  ;;  %6726 = vrcp.f32 %v8699_v6  ;;  %v1537_v49 = vand.u32 2147483648, %v8699_v6  ;;  %v1520_v47 = vand.u32 2147483647, %v8697_v29 }
 0x30f   : > { %v6719_v43 = vpop.eup %6718  ;;  %v8707_v9 = vadd.f32 1.0, %v6717_v56  ;;  %6728 = vrcp.f32 %v8701_v15  ;;  %v1535_v2 = vand.u32 2147483647, %v8699_v6  ;;  %v1552_v52 = vand.u32 2147483648, %v8701_v15 }
 0x310   : > { %v6721_v50 = vpop.eup %6720  ;;  %v8716_v0 = vadd.f32 1.0, %v6719_v43  ;;  %6730 = vrcp.f32 %v8704_v27  ;;  %v1523_v62 = vor.u32 1.1754944e-38, %v1522_v53  ;;  %vm1531_vm11 = vweird.f32 %v8699_v6 }
 0x311   : > { %v6723_v63 = vpop.eup %6722  ;;  %6732 = vrcp.f32 %v8707_v9  ;;  %v8730_v8 = vadd.f32 1.0, %v6721_v50  ;;  %v8735_v61 = vor.u32 1.1754944e-38, %v1537_v49  ;;  %vm1546_vm14 = vweird.f32 %v8701_v15 }
 0x312   : > { %v8737_v5 = vadd.f32 1.0, %v6723_v63  ;;  %v1550_v28 = vand.u32 2147483647, %v8701_v15  ;;  %v1567_v30 = vand.u32 2147483648, %v8704_v27  ;;  %v1565_v34 = vand.u32 2147483647, %v8704_v27 }
 0x313   : > { %v8721_v16 = vpop.eup %6724  ;;  %v1580_v35 = vand.u32 2147483647, %v8707_v9  ;;  %6734 = vrcp.f32 %v8716_v0  ;;  %vm8750_vm4 = vcmp.eq.f32.partialorder %v1520_v47, 8.507059e+37  ;;  %v1553_v20 = vor.u32 1.1754944e-38, %v1552_v52 }
 0x314   : > { %v8728_v22 = vpop.eup %6726  ;;  %v1512_v25 = vmul.f32 %v8721_v16, %v8697_v29  ;;  %vm1517_vm1 = vweird.f32 %v8721_v16  ;;  %vm1561_vm12 = vweird.f32 %v8704_v27  ;;  %vm8759_vm15 = vcmp.eq.f32.partialorder %v1535_v2, 8.507059e+37 }
 0x315   : > { %v1527_v42 = vmul.f32 %v8728_v22, %v8699_v6  ;;  %v8744_v31 = vpop.eup %6728  ;;  %vm1532_vm13 = vweird.f32 %v8728_v22  ;;  %v1582_v1 = vand.u32 2147483648, %v8707_v9  ;;  %vm8766_vm3 = vcmp.eq.f32.partialorder %v1550_v28, 8.507059e+37  ;;  %vm8789_vm9 = vmor %vm1516_vm0, %vm1517_vm1 }
 0x316   : > { %v1513_v32 = vsub.f32 1.0, %v1512_v25  ;;  %v1542_v19 = vmul.f32 %v8744_v31, %v8701_v15  ;;  %v6731_v38 = vpop.eup %6730  ;;  %v1568_v56 = vor.u32 1.1754944e-38, %v1567_v30  ;;  %vm1547_vm6 = vweird.f32 %v8744_v31  ;;  %vm8802_vm5 = vmor %vm1531_vm11, %vm1532_vm13 }
 0x317   : > { %v1528_v37 = vsub.f32 1.0, %v1527_v42  ;;  %v6733_v4 = vpop.eup %6732  ;;  %v1557_v24 = vmul.f32 %v6731_v38, %v8704_v27  ;;  %vm8773_vm7 = vcmp.eq.f32.partialorder %v1565_v34, 8.507059e+37  ;;  %vm8778_vm8 = vcmp.eq.f32.partialorder %v1580_v35, 8.507059e+37  ;;  %vm8814_vm1 = vmor %vm1546_vm14, %vm1547_vm6 }
 0x318   : > { %v1514_v39 = vmul.f32 %v8721_v16, %v1513_v32  ;;  %v1543_v13 = vsub.f32 1.0, %v1542_v19  ;;  %v1572_v49 = vmul.f32 %v6733_v4, %v8707_v9  ;;  %v1595_v52 = vand.u32 2147483647, %v8716_v0 }
 0x319   : > { %v1529_v57 = vmul.f32 %v8728_v22, %v1528_v37  ;;  %v1558_v2 = vsub.f32 1.0, %v1557_v24  ;;  %v6735_v25 = vpop.eup %6734  ;;  %vm1562_vm10 = vweird.f32 %v6731_v38  ;;  %v1583_v30 = vor.u32 1.1754944e-38, %v1582_v1 }
 0x31a   : > { %v1515_v43 = vadd.f32 %v8721_v16, %v1514_v39  ;;  %v1544_v47 = vmul.f32 %v8744_v31, %v1543_v13  ;;  %v1573_v28 = vsub.f32 1.0, %v1572_v49  ;;  %vm1591_vm2 = vweird.f32 %v8716_v0  ;;  %vm8833_vm14 = vmor %vm1561_vm12, %vm1562_vm10 }
 0x31b   : > { %v1530_v63 = vadd.f32 %v8728_v22, %v1529_v57  ;;  %6736 = vrcp.f32 %v8730_v8  ;;  %v1559_v35 = vmul.f32 %v6731_v38, %v1558_v2  ;;  %vm1577_vm0 = vweird.f32 %v6733_v4 }
 0x31c   : > { %v1519_v32 = vsel %vm8789_vm9, %v8721_v16, %v1515_v43  ;;  %v1545_v34 = vadd.f32 %v8744_v31, %v1544_v47  ;;  %v1574_v6 = vmul.f32 %v6733_v4, %v1573_v28  ;;  %v1587_v19 = vmul.f32 %v6735_v25, %v8716_v0 }
 0x31d   : > { %v1534_v37 = vsel %vm8802_vm5, %v8728_v22, %v1530_v63  ;;  %v1597_v39 = vand.u32 2147483648, %v8716_v0  ;;  %v1560_v57 = vadd.f32 %v6731_v38, %v1559_v35  ;;  %vm8823_vm11 = vcmp.eq.f32.partialorder %v1595_v52, 8.507059e+37  ;;  %v8963_v52 = vld [vmem:[#allocation10 + $0xb8] sm:$0xff] }
 0x31e   : > { %v1549_v1 = vsel %vm8814_vm1, %v8744_v31, %v1545_v34  ;;  %v1610_v15 = vand.u32 2147483647, %v8730_v8  ;;  %v1524_v13 = vsel %vm8750_vm4, %v1523_v62, %v1519_v32  ;;  %v1575_v43 = vadd.f32 %v6733_v4, %v1574_v6 }
 0x31f   : > { %v1588_v49 = vsub.f32 1.0, %v1587_v19  ;;  %v1612_v31 = vand.u32 2147483648, %v8730_v8  ;;  %v1539_v63 = vsel %vm8759_vm15, %v8735_v61, %v1534_v37  ;;  %v1564_v47 = vsel %vm8833_vm14, %v6731_v38, %v1560_v57 }
 0x320   : > { %vm13268_vm4 = vweird.f32 %v8707_v9  ;;  %vm1592_vm5 = vweird.f32 %v6735_v25  ;;  %vm1606_vm12 = vweird.f32 %v8730_v8  ;;  %6738 = vrcp.f32 %v8737_v5 }
 0x321   : > { %vm1578_vm13 = vmor %vm13268_vm4, %vm1577_vm0  ;;  %v6737_v27 = vpop.eup %6736  ;;  %v1554_v62 = vsel %vm8766_vm3, %v1553_v20, %v1549_v1  ;;  %v1589_v2 = vmul.f32 %v6735_v25, %v1588_v49  ;;  %v1598_v40 = vor.u32 1.1754944e-38, %v1597_v39  ;;  %v1569_v61 = vsel %vm8773_vm7, %v1568_v56, %v1564_v47 }
 0x322   : > { %v1579_v36 = vsel %vm1578_vm13, %v6733_v4, %v1575_v43  ;;  %v1602_v9 = vmul.f32 %v6737_v27, %v8730_v8  ;;  %vm8855_vm15 = vcmp.eq.f32.partialorder %v1610_v15, 8.507059e+37  ;;  %v1613_v42 = vor.u32 1.1754944e-38, %v1612_v31  ;;  %vm1593_vm3 = vmor %vm1591_vm2, %vm1592_vm5 }
 0x323   : > { %v1584_v38 = vsel %vm8778_vm8, %v1583_v30, %v1579_v36  ;;  %v1590_v28 = vadd.f32 %v6735_v25, %v1589_v2  ;;  %vm1607_vm6 = vweird.f32 %v6737_v27  ;;  %v1625_v20 = vand.u32 2147483647, %v8737_v5  ;;  %v8945_v36 = vld [vmem:[#allocation10 + $0xe8] sm:$0xff]  ;;  %v8948_v2 = vld [vmem:[#allocation10 + $0xd0] sm:$0xff] }
 0x324   : > { %v1627_v4 = vand.u32 2147483648, %v8737_v5  ;;  %v1603_v59 = vsub.f32 1.0, %v1602_v9  ;;  %v1631_v56 = vmul.f32 %v1524_v13, %v8585_v3  ;;  %v1632_v53 = vmul.f32 %v1539_v63, %v8589_v12  ;;  %vm1608_vm8 = vmor %vm1606_vm12, %vm1607_vm6  ;;  %v8960_v9 = vld [vmem:[#allocation10 + $0xb0] sm:$0xff] }
 0x325   : > { %v1633_v50 = vmul.f32 %v1554_v62, %v8591_v51  ;;  %v1594_v30 = vsel %vm1593_vm3, %v6735_v25, %v1590_v28  ;;  %v1634_v32 = vmul.f32 %v1569_v61, %v8594_v14  ;;  %v1635_v29 = vmul.f32 %v1584_v38, %v8596_v7  ;;  %v8969_v28 = vld [vmem:[#allocation10 + $0xa8] sm:$0xff] }
 0x326   : > { %v1639_v34 = vsub.f32 1.0, %v1524_v13  ;;  %v6739_v35 = vpop.eup %6738  ;;  %v1599_v37 = vsel %vm8823_vm11, %v1598_v40, %v1594_v30  ;;  %v1604_v16 = vmul.f32 %v6737_v27, %v1603_v59  ;;  %v1640_v0 = vsub.f32 1.0, %v1539_v63  ;;  %v8951_v40 = vld [vmem:[#allocation10 + $0xd8] sm:$0xff]  ;;  %13271 = vst [vmem:[#allocation35_spill] sm:$0xff] %v8969_v28  ;;  %v8978_v59 = vld [vmem:[#allocation10 + $0x80] sm:$0xff] }
 0x327   : > { %v1641_v6 = vsub.f32 1.0, %v1554_v62  ;;  %v1617_v19 = vmul.f32 %v6739_v35, %v8737_v5  ;;  %vm1622_vm7 = vweird.f32 %v6739_v35  ;;  %v1636_v3 = vmul.f32 %v1599_v37, %v8601_v44  ;;  %v8942_v62 = vld [vmem:[#allocation10 + $0xe0] sm:$0xff]  ;;  %13274 = vst [vmem:[#allocation38_spill] sm:$0xff] %v8978_v59 }
 0x328   : > { %v1642_v12 = vsub.f32 1.0, %v1569_v61  ;;  %v1605_v51 = vadd.f32 %v6737_v27, %v1604_v16  ;;  %v1643_v25 = vsub.f32 1.0, %v1584_v38  ;;  %v1644_v39 = vsub.f32 1.0, %v1599_v37  ;;  %v8954_v61 = vld [vmem:[#allocation10 + $0xc0] sm:$0xff]  ;;  %v8957_v38 = vld [vmem:[#allocation10 + $0xc8] sm:$0xff]  ;;  %v9008_v16 = vld [vmem:[#allocation10 + $0x30] sm:$0xff] }
 0x329   : > { %v1655_v14 = vmul.f32 %v1647_v26, %v1639_v34  ;;  %v1618_v7 = vsub.f32 1.0, %v1617_v19  ;;  %v1656_v1 = vmul.f32 %v1648_v48, %v1640_v0  ;;  %v1657_v57 = vmul.f32 %v1649_v55, %v1641_v6  ;;  %v8990_v30 = vld [vmem:[#allocation10 + $0x60] sm:$0xff]  ;;  %v8999_v34 = vld [vmem:[#allocation10 + $0x58] sm:$0xff]  ;;  %v9005_v37 = vld [vmem:[#allocation10 + $0x48] sm:$0xff]  ;;  %13284 = vst [vmem:[#allocation48_spill] sm:$0xff] %v9008_v16 }
 0x32a   : > { %v1658_v44 = vmul.f32 %v1650_v58, %v1642_v12  ;;  %v1609_v22 = vsel %vm1608_vm8, %v6737_v27, %v1605_v51  ;;  %v1659_v17 = vmul.f32 %v1651_v33, %v1643_v25  ;;  %v1660_v26 = vmul.f32 %v1652_v11, %v1644_v39  ;;  %v8939_v27 = vld [vmem:[#allocation10 + $0xf8] sm:$0xff]  ;;  %13278 = vst [vmem:[#allocation42_spill] sm:$0xff] %v8990_v30  ;;  %v9014_v6 = vld [vmem:[#allocation10 + $0x20] sm:$0xff]  ;;  %v9017_v19 = vld [vmem:[#allocation10 + $0x28] sm:$0xff] }
 0x32b   : > { %v8888_v8 = vadd.f32 %v1655_v14, %v1631_v56  ;;  %v1614_v60 = vsel %vm8855_vm15, %v1613_v42, %v1609_v22  ;;  %v1619_v48 = vmul.f32 %v6739_v35, %v1618_v7  ;;  %v8892_v45 = vadd.f32 %v1656_v1, %v1632_v53  ;;  %v8966_v42 = vld [vmem:[#allocation10 + $0xa0] sm:$0xff]  ;;  %v8981_v56 = vld [vmem:[#allocation10 + $0x88] sm:$0xff]  ;;  %v8984_v53 = vld [vmem:[#allocation10 + $0x70] sm:$0xff]  ;;  %13281 = vst [vmem:[#allocation45_spill] sm:$0xff] %v8999_v34 }
 0x32c   : > { %v8894_v55 = vadd.f32 %v1657_v57, %v1633_v50  ;;  %v1645_v41 = vsub.f32 1.0, %v1614_v60  ;;  %v8897_v58 = vadd.f32 %v1658_v44, %v1634_v32  ;;  %v8899_v33 = vadd.f32 %v1659_v17, %v1635_v29  ;;  %13275 = vst [vmem:[#allocation39_spill] sm:$0xff] %v8981_v56  ;;  %v8987_v50 = vld [vmem:[#allocation10 + $0x78] sm:$0xff]  ;;  %v8993_v32 = vld [vmem:[#allocation10 + $0x68] sm:$0xff]  ;;  %v8996_v29 = vld [vmem:[#allocation10 + $0x50] sm:$0xff] }
 0x32d   : > { %1671 = vst [vmem:[%s7841_s12 + $0x2] sm:$0x1] %v8888_v8  ;;  %v1620_v21 = vadd.f32 %v6739_v35, %v1619_v48  ;;  %vm1621_vm9 = vweird.f32 %v8737_v5  ;;  %v8904_v11 = vadd.f32 %v1660_v26, %v1636_v3  ;;  %v1628_v15 = vor.u32 1.1754944e-38, %v1627_v4  ;;  %v8975_v4 = vld [vmem:[#allocation10 + $0x98] sm:$0xff]  ;;  %v9020_v3 = vld [vmem:[#allocation10 + $0x10] sm:$0xff]  ;;  %v9026_v51 = vld [vmem:[#allocation10] sm:$0xff] }
 0x32e   : > { %1672 = vst [vmem:[%s7841_s12 + $0x12] sm:$0x1] %v8892_v45  ;;  %vm1623_vm10 = vmor %vm1621_vm9, %vm1622_vm7  ;;  %v1637_v23 = vmul.f32 %v1614_v60, %v8611_v46  ;;  %v1661_v13 = vmul.f32 %v1653_v18, %v1645_v41  ;;  %vm1626_vm2 = vcmp.eq.f32.partialorder %v1625_v20, 8.507059e+37  ;;  %v1654_v31 = vmax.f32 %v8687_v10, 0.0  ;;  %v8936_v10 = vld [vmem:[#allocation10 + $0xf0] sm:$0xff]  ;;  %v9011_v0 = vld [vmem:[#allocation10 + $0x38] sm:$0xff] }
 0x32f   : > { %1673 = vst [vmem:[%s7841_s12 + $0x22] sm:$0x1] %v8894_v55  ;;  %v1624_v24 = vsel %vm1623_vm10, %v6739_v35, %v1620_v21  ;;  %v8972_v20 = vld [vmem:[#allocation10 + $0x90] sm:$0xff]  ;;  %v9002_v35 = vld [vmem:[#allocation10 + $0x40] sm:$0xff]  ;;  %v9023_v12 = vld [vmem:[#allocation10 + $0x18] sm:$0xff]  ;;  %vm13292_vm0 = vcmask 1040384  }
 0x330   : > { %1674 = vst [vmem:[%s7841_s12 + $0x32] sm:$0x1] %v8897_v58  ;;  %v1629_v5 = vsel %vm1626_vm2, %v1628_v15, %v1624_v24  ;;  %v8914_v43 = vadd.f32 %v1661_v13, %v1637_v23  ;;  %v9029_v25 = vld [vmem:[#allocation10 + $0x8] sm:$0xff]  ;;  %vm13293_vm1 = vcmask 1041409   ;;  %vm13294_vm11 = vcmask 1042434  }
 0x331   : > { %1675 = vst [vmem:[%s7841_s12 + $0x42] sm:$0x1] %v8899_v33  ;;  %v1646_v49 = vsub.f32 1.0, %v1629_v5  ;;  %v1638_v46 = vmul.f32 %v1629_v5, %v8623_v54  ;;  %v1680_v1 = vld [vmem:[#allocation3 + $0x3] ss:$8 sm:$0x3] }
 0x332   : > { %1676 = vst [vmem:[%s7841_s12 + $0x52] sm:$0x1] %v8904_v11  ;;  %vm13295_vm14 = vcmask 1043459   ;;  %v1682_v26 = vld [vmem:[#allocation3 + $0x23] ss:$8 sm:$0x3] }
 0x333   : > { %1677 = vst [vmem:[%s7841_s12 + $0x62] sm:$0x1] %v8914_v43  ;;  %v1662_v63 = vmul.f32 %v1654_v31, %v1646_v49  ;;  %v1684_v60 = vld [vmem:[#allocation3 + $0x43] ss:$8 sm:$0x3]  ;;  %vm13296_vm4 = vcmask 1044484  }
 0x334   : > { %1703 = vst [vmem:[#allocation1] ss:$9 sm:$0xff] %v8888_v8  ;;  %v1686_v48 = vld [vmem:[#allocation3 + $0x63] ss:$8 sm:$0x3]  ;;  %vm13297_vm13 = vcmask 1045509  }
 0x335   : > { %1705 = vst [vmem:[#allocation1 + $0x1] ss:$9 sm:$0xff] %v8892_v45  ;;  %v8926_v47 = vadd.f32 %v1662_v63, %v1638_v46  ;;  %v1688_v23 = vld [vmem:[#allocation3 + $0x83] ss:$8 sm:$0x3]  ;;  %vm13298_vm5 = vcmask 1046534  }
 0x336   : > { %1707 = vst [vmem:[#allocation1 + $0x2] ss:$9 sm:$0xff] %v8894_v55  ;;  %vm13299_vm12 = vcmask 1046528   ;;  %v1690_v31 = vld [vmem:[#allocation3 + $0xa3] ss:$8 sm:$0x3] }
 0x337   : > { %1709 = vst [vmem:[#allocation1 + $0x3] ss:$9 sm:$0xff] %v8897_v58 }
 0x338   : > { %1678 = vst [vmem:[%s7841_s12 + $0x72] sm:$0x1] %v8926_v47 }
 0x339   : > { %1711 = vst [vmem:[#allocation1 + $0x4] ss:$9 sm:$0xff] %v8899_v33 }
 0x33a   : > { %1713 = vst [vmem:[#allocation1 + $0x5] ss:$9 sm:$0xff] %v8904_v11 }
 0x33b   : > { %1715 = vst [vmem:[#allocation1 + $0x6] ss:$9 sm:$0xff] %v8914_v43 }
 0x33c   : > { %1717 = vst [vmem:[#allocation1 + $0x7] ss:$9 sm:$0xff] %v8926_v47 }
 0x33d   : > { %13272 = vst [vmem:[#allocation36_spill] sm:$0xff] %v8972_v20 }
 0x33e   : > { %13273 = vst [vmem:[#allocation37_spill] sm:$0xff] %v8975_v4 }
 0x33f   : > { %13276 = vst [vmem:[#allocation40_spill] sm:$0xff] %v8984_v53 }
 0x340   : > { %13277 = vst [vmem:[#allocation41_spill] sm:$0xff] %v8987_v50 }
 0x341   : > { %13279 = vst [vmem:[#allocation43_spill] sm:$0xff] %v8993_v32 }
 0x342   : > { %13280 = vst [vmem:[#allocation44_spill] sm:$0xff] %v8996_v29 }
 0x343   : > { %v1718_v54 = vld [vmem:[#allocation1] sm:$0xff]  ;;  %13282 = vst [vmem:[#allocation46_spill] sm:$0xff] %v9002_v35 }
 0x344   : > { %1736 = vmatmul.f32.vlgmr.msrb.gmra.mxu2 %v1718_v54  ;;  %1756 = vmatmul.f32.vlgmr.msrb.gmra.mxu3 %v1718_v54  ;;  %13283 = vst [vmem:[#allocation47_spill] sm:$0xff] %v9005_v37 }
 0x345   : > { %3076 = vmatpush.msrb.mxu2 %v8936_v10  ;;  %3096 = vmatpush.msrb.mxu3 %v8939_v27  ;;  %13285 = vst [vmem:[#allocation49_spill] sm:$0xff] %v9011_v0 }
 0x346   : > { %13286 = vst [vmem:[#allocation50_spill] sm:$0xff] %v9014_v6 }
 0x347   : > { %3077 = vmatpush.msrb.mxu2 %v8942_v62  ;;  %3097 = vmatpush.msrb.mxu3 %v8945_v36  ;;  %13287 = vst [vmem:[#allocation51_spill] sm:$0xff] %v9017_v19 }
 0x348   : > { %13288 = vst [vmem:[#allocation52_spill] sm:$0xff] %v9020_v3 }
 0x349   : > { %3078 = vmatpush.msrb.mxu2 %v8948_v2  ;;  %3098 = vmatpush.msrb.mxu3 %v8951_v40  ;;  %13289 = vst [vmem:[#allocation53_spill] sm:$0xff] %v9023_v12 }
 0x34a   : > { %13290 = vst [vmem:[#allocation54_spill] sm:$0xff] %v9026_v51 }
 0x34b   : > { %3079 = vmatpush.msrb.mxu2 %v8954_v61  ;;  %3099 = vmatpush.msrb.mxu3 %v8957_v38  ;;  %13291 = vst [vmem:[#allocation55_spill] sm:$0xff] %v9029_v25 }
 0x34d   : > { %3080 = vmatpush.msrb.mxu2 %v8960_v9  ;;  %3100 = vmatpush.msrb.mxu3 %v8963_v52 }
 0x34f   : > { %3081 = vmatpush.msrb.mxu2 %v8966_v42  ;;  %3101 = vmatpush.msrb.mxu3 %v8969_v28 }
 0x351   : > { %3082 = vmatpush.msrb.mxu2 %v8972_v20  ;;  %3102 = vmatpush.msrb.mxu3 %v8975_v4 }
 0x353   : > { %3083 = vmatpush.msrb.mxu2 %v8978_v59  ;;  %3103 = vmatpush.msrb.mxu3 %v8981_v56 }
 0x355   : > { %3084 = vmatpush.msrb.mxu2 %v8984_v53  ;;  %3104 = vmatpush.msrb.mxu3 %v8987_v50 }
 0x357   : > { %3085 = vmatpush.msrb.mxu2 %v8990_v30  ;;  %3105 = vmatpush.msrb.mxu3 %v8993_v32 }
 0x359   : > { %3086 = vmatpush.msrb.mxu2 %v8996_v29  ;;  %3106 = vmatpush.msrb.mxu3 %v8999_v34 }
 0x35b   : > { %3087 = vmatpush.msrb.mxu2 %v9002_v35  ;;  %3107 = vmatpush.msrb.mxu3 %v9005_v37 }
 0x35d   : > { %3088 = vmatpush.msrb.mxu2 %v9008_v16  ;;  %3108 = vmatpush.msrb.mxu3 %v9011_v0 }
 0x35f   : > { %3089 = vmatpush.msrb.mxu2 %v9014_v6  ;;  %3109 = vmatpush.msrb.mxu3 %v9017_v19 }
 0x361   : > { %3090 = vmatpush.msrb.mxu2 %v9020_v3  ;;  %3110 = vmatpush.msrb.mxu3 %v9023_v12 }
 0x363   : > { %3091 = vmatpush.msrb.mxu2 %v9026_v51  ;;  %3111 = vmatpush.msrb.mxu3 %v9029_v25  ;;  %v1692_v25 = vld [vmem:[#allocation3 + $0xc3] ss:$8 sm:$0x3] }
 0x3c7   : > { %v1757_v39 = vpop.f32.mrf.mxu3  ;;  %v1737_v7 = vpop.f32.mrf.mxu2 }
 0x3c8   : > { %v1762_v14 = vrot.slane %v1757_v39, 7 }
 0x3ca   : > { %v1763_v57 = vsel %vm13292_vm0, %v1737_v7, %v1762_v14  ;;  %v1764_v44 = vsel %vm13293_vm1, %v1737_v7, %v1762_v14  ;;  %v1766_v22 = vsel %vm13294_vm11, %v1737_v7, %v1762_v14  ;;  %v1768_v17 = vsel %vm13295_vm14, %v1737_v7, %v1762_v14 }
 0x3cb   : > { %v1765_v41 = vrot.slane %v1764_v44, 1  ;;  %v1767_v18 = vrot.slane %v1766_v22, 2  ;;  %v1769_v21 = vrot.slane %v1768_v17, 3  ;;  %v1770_v15 = vsel %vm13296_vm4, %v1737_v7, %v1762_v14  ;;  %v1694_v44 = vld [vmem:[#allocation3 + $0xe3] ss:$8 sm:$0x3] }
 0x3cc   : > { %v1771_v13 = vrot.slane %v1770_v15, 4  ;;  %v1772_v24 = vsel %vm13297_vm13, %v1737_v7, %v1762_v14  ;;  %v1774_v5 = vsel %vm13298_vm5, %v1737_v7, %v1762_v14  ;;  %v1776_v49 = vsel %vm13299_vm12, %v1762_v14, %v1737_v7 }
 0x3cd   : > { %v1773_v46 = vrot.slane %v1772_v24, 5  ;;  %v1775_v63 = vrot.slane %v1774_v5, 6  ;;  %v1777_v54 = vrot.slane %v1776_v49, 7  ;;  %v9040_v39 = vadd.f32 %v1763_v57, %v1680_v1 }
 0x3ce   : > { %v9042_v22 = vadd.f32 %v1765_v41, %v1682_v26  ;;  %v9044_v17 = vadd.f32 %v1767_v18, %v1684_v60  ;;  %v9046_v51 = vadd.f32 %v1769_v21, %v1686_v48  ;;  %v9048_v15 = vadd.f32 %v1771_v13, %v1688_v23 }
 0x3cf   : > { %v9050_v12 = vadd.f32 %v1773_v46, %v1690_v31  ;;  %v9052_v3 = vadd.f32 %v1775_v63, %v1692_v25  ;;  %v9054_v14 = vadd.f32 %v1777_v54, %v1694_v44  ;;  %v1802_v7 = vrot.slane %v9040_v39, 1 }
 0x3d0   : > { %v1803_v1 = vrot.slane %v9042_v22, 1  ;;  %v1804_v57 = vrot.slane %v9044_v17, 1  ;;  %v1805_v26 = vrot.slane %v9046_v51, 1  ;;  %v1806_v60 = vrot.slane %v9048_v15, 1 }
 0x3d1   : > { %v1807_v48 = vrot.slane %v9050_v12, 1  ;;  %v1808_v41 = vrot.slane %v9052_v3, 1  ;;  %v6373_v18 = vmul.f32 -1.442695, %v1802_v7  ;;  %v1809_v13 = vrot.slane %v9054_v14, 1 }
 0x3d2   : > { %v6374_v21 = vmul.f32 -1.442695, %v1803_v1  ;;  %v6375_v25 = vmul.f32 -1.442695, %v1804_v57  ;;  %v6376_v23 = vmul.f32 -1.442695, %v1805_v26 }
 0x3d3   : > { %6740 = vpow2.f32 %v6373_v18  ;;  %v6377_v24 = vmul.f32 -1.442695, %v1806_v60  ;;  %v6378_v5 = vmul.f32 -1.442695, %v1807_v48  ;;  %v6379_v49 = vmul.f32 -1.442695, %v1808_v41 }
 0x3d4   : > { %6742 = vpow2.f32 %v6374_v21  ;;  %v6380_v31 = vmul.f32 -1.442695, %v1809_v13  ;;  %vm13312_vm0 = vcmask 523264  }
 0x3d5   : > { %6744 = vpow2.f32 %v6375_v25  ;;  %vm13313_vm9 = vmmov %vm13312_vm0 }
 0x3d6   : > { %6746 = vpow2.f32 %v6376_v23 }
 0x3d7   : > { %6748 = vpow2.f32 %v6377_v24 }
 0x3d8   : > { %6750 = vpow2.f32 %v6378_v5 }
 0x3d9   : > { %v6741_v46 = vpop.eup %6740  ;;  %6752 = vpow2.f32 %v6379_v49 }
 0x3da   : > { %v6743_v63 = vpop.eup %6742  ;;  %v9064_v54 = vadd.f32 1.0, %v6741_v46  ;;  %6754 = vpow2.f32 %v6380_v31 }
 0x3db   : > { %v6745_v44 = vpop.eup %6744  ;;  %v9066_v7 = vadd.f32 1.0, %v6743_v63 }
 0x3dc   : > { %v6747_v1 = vpop.eup %6746  ;;  %v9068_v57 = vadd.f32 1.0, %v6745_v44  ;;  %6756 = vrcp.f32 %v9064_v54  ;;  %v1861_v18 = vand.u32 2147483648, %v9064_v54  ;;  %vm1855_vm15 = vweird.f32 %v9064_v54 }
 0x3dd   : > { %v6749_v26 = vpop.eup %6748  ;;  %v9071_v60 = vadd.f32 1.0, %v6747_v1  ;;  %6758 = vrcp.f32 %v9066_v7  ;;  %v1876_v21 = vand.u32 2147483648, %v9066_v7  ;;  %v1859_v1 = vand.u32 2147483647, %v9064_v54 }
 0x3de   : > { %v6751_v48 = vpop.eup %6750  ;;  %v9074_v41 = vadd.f32 1.0, %v6749_v26  ;;  %6760 = vrcp.f32 %v9068_v57  ;;  %v1874_v26 = vand.u32 2147483647, %v9066_v7  ;;  %v1891_v24 = vand.u32 2147483648, %v9068_v57 }
 0x3df   : > { %v6753_v25 = vpop.eup %6752  ;;  %v9083_v31 = vadd.f32 1.0, %v6751_v48  ;;  %6762 = vrcp.f32 %v9071_v60  ;;  %v9101_v63 = vor.u32 1.1754944e-38, %v1861_v18  ;;  %vm1870_vm6 = vweird.f32 %v9066_v7 }
 0x3e0   : > { %v6755_v49 = vpop.eup %6754  ;;  %6764 = vrcp.f32 %v9074_v41  ;;  %v9097_v5 = vadd.f32 1.0, %v6753_v25  ;;  %v9104_v13 = vor.u32 1.1754944e-38, %v1876_v21  ;;  %vm1885_vm3 = vweird.f32 %v9068_v57 }
 0x3e1   : > { %v9106_v23 = vadd.f32 1.0, %v6755_v49  ;;  %v1889_v6 = vand.u32 2147483647, %v9068_v57  ;;  %v1906_v25 = vand.u32 2147483648, %v9071_v60  ;;  %v1904_v18 = vand.u32 2147483647, %v9071_v60 }
 0x3e2   : > { %v9088_v44 = vpop.eup %6756  ;;  %v1919_v37 = vand.u32 2147483647, %v9074_v41  ;;  %6766 = vrcp.f32 %v9083_v31  ;;  %vm9119_vm8 = vcmp.eq.f32.partialorder %v1859_v1, 8.507059e+37  ;;  %v1892_v34 = vor.u32 1.1754944e-38, %v1891_v24 }
 0x3e3   : > { %v9095_v48 = vpop.eup %6758  ;;  %v1851_v46 = vmul.f32 %v9088_v44, %v9064_v54  ;;  %vm1856_vm7 = vweird.f32 %v9088_v44  ;;  %vm9130_vm2 = vcmp.eq.f32.partialorder %v1874_v26, 8.507059e+37  ;;  %vm9137_vm1 = vcmp.eq.f32.partialorder %v1889_v6, 8.507059e+37 }
 0x3e4   : > { %v1866_v19 = vmul.f32 %v9095_v48, %v9066_v7  ;;  %v9113_v0 = vpop.eup %6760  ;;  %vm1871_vm10 = vweird.f32 %v9095_v48  ;;  %v1907_v26 = vor.u32 1.1754944e-38, %v1906_v25  ;;  %vm9145_vm14 = vcmp.eq.f32.partialorder %v1904_v18, 8.507059e+37  ;;  %vm9162_vm13 = vmor %vm1855_vm15, %vm1856_vm7 }
 0x3e5   : > { %v1852_v16 = vsub.f32 1.0, %v1851_v46  ;;  %v1881_v35 = vmul.f32 %v9113_v0, %v9068_v57  ;;  %v9126_v46 = vpop.eup %6762  ;;  %vm1886_vm11 = vweird.f32 %v9113_v0  ;;  %vm9150_vm4 = vcmp.eq.f32.partialorder %v1919_v37, 8.507059e+37  ;;  %vm9178_vm15 = vmor %vm1870_vm6, %vm1871_vm10 }
 0x3e6   : > { %v1867_v49 = vsub.f32 1.0, %v1866_v19  ;;  %v1921_v19 = vand.u32 2147483648, %v9074_v41  ;;  %v6765_v1 = vpop.eup %6764  ;;  %v1934_v25 = vand.u32 2147483647, %v9083_v31  ;;  %vm1901_vm5 = vweird.f32 %v9126_v46 }
 0x3e7   : > { %v1853_v29 = vmul.f32 %v9088_v44, %v1852_v16  ;;  %v1882_v30 = vsub.f32 1.0, %v1881_v35  ;;  %v1896_v16 = vmul.f32 %v9126_v46, %v9071_v60  ;;  %v1911_v59 = vmul.f32 %v6765_v1, %v9074_v41 }
 0x3e8   : > { %v1868_v24 = vmul.f32 %v9095_v48, %v1867_v49  ;;  %v6767_v20 = vpop.eup %6766  ;;  %v1922_v28 = vor.u32 1.1754944e-38, %v1921_v19  ;;  %vm1930_vm12 = vweird.f32 %v9083_v31  ;;  %6768 = vrcp.f32 %v9097_v5 }
 0x3e9   : > { %v1854_v53 = vadd.f32 %v9088_v44, %v1853_v29  ;;  %v1883_v49 = vmul.f32 %v9113_v0, %v1882_v30  ;;  %v1897_v4 = vsub.f32 1.0, %v1896_v16  ;;  %v398_v29 = vld [vmem:[%s7822_s0 + $0x78] sm:$0xff]  ;;  %v1912_v37 = vsub.f32 1.0, %v1911_v59 }
 0x3ea   : > { %v1869_v6 = vadd.f32 %v9095_v48, %v1868_v24  ;;  %6332 = vmatmul.msk.f32.gmra.mxu0 %vm13312_vm0, %v398_v29  ;;  %6348 = vmatmul.msk.f32.gmra.mxu1 %vm13313_vm9, %v398_v29  ;;  %vm1916_vm7 = vweird.f32 %v6765_v1  ;;  %vm9191_vm9 = vmor %vm1885_vm3, %vm1886_vm11  ;;  %v1936_v16 = vand.u32 2147483648, %v9083_v31  ;;  %vm9201_vm6 = vcmp.eq.f32.partialorder %v1934_v25, 8.507059e+37 }
 0x3eb   : > { %v1858_v30 = vsel %vm9162_vm13, %v9088_v44, %v1854_v53  ;;  %v1884_v59 = vadd.f32 %v9113_v0, %v1883_v49  ;;  %v1898_v19 = vmul.f32 %v9126_v46, %v1897_v4  ;;  %v1913_v7 = vmul.f32 %v6765_v1, %v1912_v37 }
 0x3ec   : > { %v1873_v24 = vsel %vm9178_vm15, %v9095_v48, %v1869_v6  ;;  %v1926_v44 = vmul.f32 %v6767_v20, %v9083_v31  ;;  %v1949_v57 = vand.u32 2147483647, %v9097_v5  ;;  %v1863_v6 = vsel %vm9119_vm8, %v9101_v63, %v1858_v30 }
 0x3ed   : > { %v1888_v4 = vsel %vm9191_vm9, %v9113_v0, %v1884_v59  ;;  %v1899_v49 = vadd.f32 %v9126_v46, %v1898_v19  ;;  %vm13320_vm3 = vweird.f32 %v9071_v60  ;;  %v1914_v0 = vadd.f32 %v6765_v1, %v1913_v7 }
 0x3ee   : > { %vm9213_vm10 = vmor %vm13320_vm3, %vm1901_vm5  ;;  %v1927_v18 = vsub.f32 1.0, %v1926_v44  ;;  %v1951_v25 = vand.u32 2147483648, %v9097_v5  ;;  %v1878_v37 = vsel %vm9130_vm2, %v9104_v13, %v1873_v24  ;;  %vm13323_vm8 = vweird.f32 %v9074_v41  ;;  %v6769_v60 = vpop.eup %6768 }
 0x3ef   : > { %v1903_v63 = vsel %vm9213_vm10, %v9126_v46, %v1899_v49  ;;  %vm1917_vm0 = vmor %vm13323_vm8, %vm1916_vm7  ;;  %vm1931_vm11 = vweird.f32 %v6767_v20  ;;  %vm1945_vm13 = vweird.f32 %v9097_v5  ;;  %6770 = vrcp.f32 %v9106_v23 }
 0x3f0   : > { %v1893_v21 = vsel %vm9137_vm1, %v1892_v34, %v1888_v4  ;;  %v1918_v30 = vsel %vm1917_vm0, %v6765_v1, %v1914_v0  ;;  %v1928_v32 = vmul.f32 %v6767_v20, %v1927_v18  ;;  %v1937_v13 = vor.u32 1.1754944e-38, %v1936_v16  ;;  %vm1932_vm1 = vmor %vm1930_vm12, %vm1931_vm11 }
 0x3f1   : > { %v1908_v54 = vsel %vm9145_vm14, %v1907_v26, %v1903_v63  ;;  %v1923_v46 = vsel %vm9150_vm4, %v1922_v28, %v1918_v30  ;;  %v1941_v41 = vmul.f32 %v6769_v60, %v9097_v5  ;;  %vm9236_vm2 = vcmp.eq.f32.partialorder %v1949_v57, 8.507059e+37 }
 0x3f2   : > { %v1952_v19 = vor.u32 1.1754944e-38, %v1951_v25  ;;  %v1929_v24 = vadd.f32 %v6767_v20, %v1928_v32  ;;  %vm1946_vm5 = vweird.f32 %v6769_v60  ;;  %v1964_v50 = vand.u32 2147483647, %v9106_v23 }
 0x3f3   : > { %v1966_v34 = vand.u32 2147483648, %v9106_v23  ;;  %v1942_v56 = vsub.f32 1.0, %v1941_v41  ;;  %v1970_v28 = vmul.f32 %v1863_v6, %v8888_v8  ;;  %v1971_v1 = vmul.f32 %v1878_v37, %v8892_v45  ;;  %vm1947_vm4 = vmor %vm1945_vm13, %vm1946_vm5 }
 0x3f4   : > { %v1972_v26 = vmul.f32 %v1893_v21, %v8894_v55  ;;  %v1933_v35 = vsel %vm1932_vm1, %v6767_v20, %v1929_v24  ;;  %v1973_v53 = vmul.f32 %v1908_v54, %v8897_v58  ;;  %v1974_v7 = vmul.f32 %v1923_v46, %v8899_v33 }
 0x3f5   : > { %v1978_v44 = vsub.f32 1.0, %v1863_v6  ;;  %v6771_v16 = vpop.eup %6770  ;;  %v1938_v4 = vsel %vm9201_vm6, %v1937_v13, %v1933_v35  ;;  %v1943_v49 = vmul.f32 %v6769_v60, %v1942_v56  ;;  %v1979_v31 = vsub.f32 1.0, %v1878_v37  ;;  %v13344_v35 = vld [vmem:[#allocation47_spill] sm:$0xff] }
 0x3f6   : > { %v1980_v57 = vsub.f32 1.0, %v1893_v21  ;;  %v1956_v29 = vmul.f32 %v6771_v16, %v9106_v23  ;;  %vm1961_vm14 = vweird.f32 %v6771_v16  ;;  %v1975_v8 = vmul.f32 %v1938_v4, %v8904_v11 }
 0x3f7   : > { %v1981_v45 = vsub.f32 1.0, %v1908_v54  ;;  %v1944_v55 = vadd.f32 %v6769_v60, %v1943_v49  ;;  %v1982_v20 = vsub.f32 1.0, %v1923_v46  ;;  %v1983_v0 = vsub.f32 1.0, %v1938_v4  ;;  %v13349_v4 = vld [vmem:[#allocation52_spill] sm:$0xff]  ;;  %v13350_v49 = vld [vmem:[#allocation53_spill] sm:$0xff] }
 0x3f8   : > { %v13326_v58 = vmax.f32 %v9040_v39, 0.0  ;;  %v1957_v48 = vsub.f32 1.0, %v1956_v29  ;;  %v13327_v6 = vmax.f32 %v9042_v22, 0.0  ;;  %v13328_v25 = vmax.f32 %v9044_v17, 0.0 }
 0x3f9   : > { %v13329_v11 = vmax.f32 %v9046_v51, 0.0  ;;  %v1948_v21 = vsel %vm1947_vm4, %v6769_v60, %v1944_v55  ;;  %v13330_v30 = vmax.f32 %v9048_v15, 0.0  ;;  %v13331_v32 = vmax.f32 %v9050_v12, 0.0 }
 0x3fa   : > { %v1994_v33 = vmul.f32 %v13326_v58, %v1978_v44  ;;  %v1995_v18 = vmul.f32 %v13327_v6, %v1979_v31  ;;  %v1996_v37 = vmul.f32 %v13328_v25, %v1980_v57  ;;  %v1953_v22 = vsel %vm9236_vm2, %v1952_v19, %v1948_v21  ;;  %v13347_v44 = vld [vmem:[#allocation50_spill] sm:$0xff]  ;;  %v13352_v57 = vld [vmem:[#allocation55_spill] sm:$0xff] }
 0x3fb   : > { %v1997_v63 = vmul.f32 %v13329_v11, %v1981_v45  ;;  %v1998_v39 = vmul.f32 %v13330_v30, %v1982_v20  ;;  %v1999_v5 = vmul.f32 %v13331_v32, %v1983_v0  ;;  %v1958_v54 = vmul.f32 %v6771_v16, %v1957_v48  ;;  %v13351_v31 = vld [vmem:[#allocation54_spill] sm:$0xff]  ;;  %v13353_v45 = vld [vmem:[#allocation33_spill] sm:$0xff]  ;;  %v2019_v6 = vld [vmem:[#allocation3 + $0x4] ss:$8 sm:$0x3] }
 0x3fc   : > { %v9269_v13 = vadd.f32 %v1994_v33, %v1970_v28  ;;  %v9273_v17 = vadd.f32 %v1995_v18, %v1971_v1  ;;  %v9275_v46 = vadd.f32 %v1996_v37, %v1972_v26  ;;  %v1984_v51 = vsub.f32 1.0, %v1953_v22  ;;  %v13354_v20 = vld [vmem:[#allocation34_spill] sm:$0xff]  ;;  %v2023_v21 = vld [vmem:[#allocation3 + $0x44] ss:$8 sm:$0x3] }
 0x3fd   : > { %v1992_v15 = vmax.f32 %v9052_v3, 0.0  ;;  %v9278_v60 = vadd.f32 %v1997_v63, %v1973_v53  ;;  %v9280_v41 = vadd.f32 %v1998_v39, %v1974_v7  ;;  %v1959_v12 = vadd.f32 %v6771_v16, %v1958_v54  ;;  %v13345_v53 = vld [vmem:[#allocation48_spill] sm:$0xff]  ;;  %v13346_v7 = vld [vmem:[#allocation49_spill] sm:$0xff] }
 0x3fe   : > { %2010 = vst [vmem:[%s7841_s12 + $0x3] sm:$0x1] %v9269_v13  ;;  %vm1960_vm12 = vweird.f32 %v9106_v23  ;;  %v9285_v59 = vadd.f32 %v1999_v5, %v1975_v8  ;;  %v1967_v19 = vor.u32 1.1754944e-38, %v1966_v34  ;;  %v1976_v3 = vmul.f32 %v1953_v22, %v8914_v43  ;;  %v2021_v63 = vld [vmem:[#allocation3 + $0x24] ss:$8 sm:$0x3] }
 0x3ff   : > { %2011 = vst [vmem:[%s7841_s12 + $0x13] sm:$0x1] %v9273_v17  ;;  %vm1962_vm15 = vmor %vm1960_vm12, %vm1961_vm14  ;;  %v2000_v24 = vmul.f32 %v1992_v15, %v1984_v51  ;;  %vm1965_vm7 = vcmp.eq.f32.partialorder %v1964_v50, 8.507059e+37  ;;  %v1993_v26 = vmax.f32 %v9054_v14, 0.0  ;;  %v13343_v14 = vld [vmem:[#allocation46_spill] sm:$0xff]  ;;  %vm13355_vm9 = vcmask 1040384  }
 0x400   : > { %2012 = vst [vmem:[%s7841_s12 + $0x23] sm:$0x1] %v9275_v46  ;;  %v1963_v56 = vsel %vm1962_vm15, %v6771_v16, %v1959_v12  ;;  %v13348_v16 = vld [vmem:[#allocation51_spill] sm:$0xff]  ;;  %vm13356_vm6 = vcmask 1041409   ;;  %vm13357_vm3 = vcmask 1042434   ;;  %vm13358_vm10 = vcmask 1043459  }
 0x401   : > { %2013 = vst [vmem:[%s7841_s12 + $0x33] sm:$0x1] %v9278_v60  ;;  %v1968_v23 = vsel %vm1965_vm7, %v1967_v19, %v1963_v56  ;;  %v9295_v28 = vadd.f32 %v2000_v24, %v1976_v3  ;;  %v2025_v30 = vld [vmem:[#allocation3 + $0x64] ss:$8 sm:$0x3]  ;;  %vm13359_vm8 = vcmask 1044484  }
 0x402   : > { %2014 = vst [vmem:[%s7841_s12 + $0x43] sm:$0x1] %v9280_v41  ;;  %v1985_v1 = vsub.f32 1.0, %v1968_v23  ;;  %v1977_v43 = vmul.f32 %v1968_v23, %v8926_v47  ;;  %v2027_v54 = vld [vmem:[#allocation3 + $0x84] ss:$8 sm:$0x3] }
 0x403   : > { %2015 = vst [vmem:[%s7841_s12 + $0x53] sm:$0x1] %v9285_v59  ;;  %vm13360_vm0 = vcmask 1045509   ;;  %vm13361_vm11 = vcmask 1046534   ;;  %vm13362_vm13 = vcmask 1046528  }
 0x404   : > { %2016 = vst [vmem:[%s7841_s12 + $0x63] sm:$0x1] %v9295_v28  ;;  %v2001_v34 = vmul.f32 %v1993_v26, %v1985_v1  ;;  %v2029_v3 = vld [vmem:[#allocation3 + $0xa4] ss:$8 sm:$0x3] }
 0x405   : > { %2042 = vst [vmem:[#allocation1] ss:$9 sm:$0xff] %v9269_v13  ;;  %v2031_v26 = vld [vmem:[#allocation3 + $0xc4] ss:$8 sm:$0x3] }
 0x406   : > { %2044 = vst [vmem:[#allocation1 + $0x1] ss:$9 sm:$0xff] %v9273_v17  ;;  %v9307_v50 = vadd.f32 %v2001_v34, %v1977_v43  ;;  %v2033_v43 = vld [vmem:[#allocation3 + $0xe4] ss:$8 sm:$0x3] }
 0x407   : > { %2046 = vst [vmem:[#allocation1 + $0x2] ss:$9 sm:$0xff] %v9275_v46 }
 0x408   : > { %2048 = vst [vmem:[#allocation1 + $0x3] ss:$9 sm:$0xff] %v9278_v60 }
 0x409   : > { %2017 = vst [vmem:[%s7841_s12 + $0x73] sm:$0x1] %v9307_v50 }
 0x40a   : > { %2050 = vst [vmem:[#allocation1 + $0x4] ss:$9 sm:$0xff] %v9280_v41 }
 0x40b   : > { %2052 = vst [vmem:[#allocation1 + $0x5] ss:$9 sm:$0xff] %v9285_v59 }
 0x40c   : > { %2054 = vst [vmem:[#allocation1 + $0x6] ss:$9 sm:$0xff] %v9295_v28 }
 0x40d   : > { %2056 = vst [vmem:[#allocation1 + $0x7] ss:$9 sm:$0xff] %v9307_v50 }
 0x414   : > { %v2057_v47 = vld [vmem:[#allocation1] sm:$0xff] }
 0x415   : > { %2075 = vmatmul.f32.vlgmr.msrb.gmra.mxu0 %v2057_v47  ;;  %2095 = vmatmul.f32.vlgmr.msrb.gmra.mxu1 %v2057_v47 }
 0x416   : > { %3415 = vmatpush.msrb.mxu0 %v8936_v10  ;;  %3435 = vmatpush.msrb.mxu1 %v8939_v27  ;;  %v13332_v10 = vld [vmem:[#allocation35_spill] sm:$0xff]  ;;  %v13333_v27 = vld [vmem:[#allocation36_spill] sm:$0xff] }
 0x418   : > { %3416 = vmatpush.msrb.mxu0 %v8942_v62  ;;  %3436 = vmatpush.msrb.mxu1 %v8945_v36  ;;  %v13334_v62 = vld [vmem:[#allocation37_spill] sm:$0xff]  ;;  %v13335_v36 = vld [vmem:[#allocation38_spill] sm:$0xff] }
 0x41a   : > { %3417 = vmatpush.msrb.mxu0 %v8948_v2  ;;  %3437 = vmatpush.msrb.mxu1 %v8951_v40  ;;  %v13336_v2 = vld [vmem:[#allocation39_spill] sm:$0xff]  ;;  %v13337_v40 = vld [vmem:[#allocation40_spill] sm:$0xff] }
 0x41c   : > { %3418 = vmatpush.msrb.mxu0 %v8954_v61  ;;  %3438 = vmatpush.msrb.mxu1 %v8957_v38  ;;  %v13338_v61 = vld [vmem:[#allocation41_spill] sm:$0xff]  ;;  %v13339_v38 = vld [vmem:[#allocation42_spill] sm:$0xff] }
 0x41e   : > { %3419 = vmatpush.msrb.mxu0 %v8960_v9  ;;  %3439 = vmatpush.msrb.mxu1 %v8963_v52  ;;  %v13340_v9 = vld [vmem:[#allocation43_spill] sm:$0xff]  ;;  %v13341_v52 = vld [vmem:[#allocation44_spill] sm:$0xff] }
 0x420   : > { %3420 = vmatpush.msrb.mxu0 %v8966_v42  ;;  %3440 = vmatpush.msrb.mxu1 %v13332_v10  ;;  %v13342_v42 = vld [vmem:[#allocation45_spill] sm:$0xff] }
 0x422   : > { %3421 = vmatpush.msrb.mxu0 %v13333_v27  ;;  %3441 = vmatpush.msrb.mxu1 %v13334_v62 }
 0x424   : > { %3422 = vmatpush.msrb.mxu0 %v13335_v36  ;;  %3442 = vmatpush.msrb.mxu1 %v13336_v2 }
 0x426   : > { %3423 = vmatpush.msrb.mxu0 %v13337_v40  ;;  %3443 = vmatpush.msrb.mxu1 %v13338_v61 }
 0x428   : > { %3424 = vmatpush.msrb.mxu0 %v13339_v38  ;;  %3444 = vmatpush.msrb.mxu1 %v13340_v9 }
 0x42a   : > { %3425 = vmatpush.msrb.mxu0 %v13341_v52  ;;  %3445 = vmatpush.msrb.mxu1 %v13342_v42 }
 0x42c   : > { %3426 = vmatpush.msrb.mxu0 %v13343_v14  ;;  %3446 = vmatpush.msrb.mxu1 %v13344_v35 }
 0x42e   : > { %3427 = vmatpush.msrb.mxu0 %v13345_v53  ;;  %3447 = vmatpush.msrb.mxu1 %v13346_v7 }
 0x430   : > { %3428 = vmatpush.msrb.mxu0 %v13347_v44  ;;  %3448 = vmatpush.msrb.mxu1 %v13348_v16 }
 0x432   : > { %3429 = vmatpush.msrb.mxu0 %v13349_v4  ;;  %3449 = vmatpush.msrb.mxu1 %v13350_v49 }
 0x434   : > { %3430 = vmatpush.msrb.mxu0 %v13351_v31  ;;  %3450 = vmatpush.msrb.mxu1 %v13352_v57 }
 0x467   : > { %v532_v29 = vpop.f32.mrf.mxu0  ;;  %v597_v8 = vpop.f32.mrf.mxu1 }
 0x468   : > { %v533_v55 = vadd.f32 %v532_v29, %v13353_v45  ;;  %v598_v0 = vadd.f32 %v597_v8, %v13354_v20 }
 0x46a   : > { %630 = vst [vmem:[#allocation3 + $0xf0] sm:$0xff] %v533_v55 }
 0x46b   : > { %631 = vst [vmem:[#allocation3 + $0xf8] sm:$0xff] %v598_v0 }
 0x492   : > { %v2096_v58 = vpop.f32.mrf.mxu1  ;;  %v2076_v48 = vpop.f32.mrf.mxu0 }
 0x493   : > { %v2101_v33 = vrot.slane %v2096_v58, 7 }
 0x495   : > { %v2102_v18 = vsel %vm13355_vm9, %v2076_v48, %v2101_v33  ;;  %v2103_v25 = vsel %vm13356_vm6, %v2076_v48, %v2101_v33  ;;  %v2105_v37 = vsel %vm13357_vm3, %v2076_v48, %v2101_v33  ;;  %v2107_v11 = vsel %vm13358_vm10, %v2076_v48, %v2101_v33 }
 0x496   : > { %v2104_v39 = vrot.slane %v2103_v25, 1  ;;  %v2106_v32 = vrot.slane %v2105_v37, 2  ;;  %v2108_v5 = vrot.slane %v2107_v11, 3  ;;  %v2109_v22 = vsel %vm13359_vm8, %v2076_v48, %v2101_v33 }
 0x497   : > { %v2110_v51 = vrot.slane %v2109_v22, 4  ;;  %v2111_v15 = vsel %vm13360_vm0, %v2076_v48, %v2101_v33  ;;  %v2113_v12 = vsel %vm13361_vm11, %v2076_v48, %v2101_v33  ;;  %v2115_v19 = vsel %vm13362_vm13, %v2101_v33, %v2076_v48 }
 0x498   : > { %v2112_v24 = vrot.slane %v2111_v15, 5  ;;  %v2114_v56 = vrot.slane %v2113_v12, 6  ;;  %v2116_v23 = vrot.slane %v2115_v19, 7  ;;  %v9359_v1 = vadd.f32 %v2102_v18, %v2019_v6 }
 0x499   : > { %v9361_v34 = vadd.f32 %v2104_v39, %v2021_v63  ;;  %v9363_v47 = vadd.f32 %v2106_v32, %v2023_v21  ;;  %v9365_v10 = vadd.f32 %v2108_v5, %v2025_v30  ;;  %v9367_v27 = vadd.f32 %v2110_v51, %v2027_v54 }
 0x49a   : > { %v9369_v62 = vadd.f32 %v2112_v24, %v2029_v3  ;;  %v9371_v36 = vadd.f32 %v2114_v56, %v2031_v26  ;;  %v9373_v2 = vadd.f32 %v2116_v23, %v2033_v43  ;;  %v2141_v40 = vrot.slane %v9359_v1, 1 }
 0x49b   : > { %v2142_v61 = vrot.slane %v9361_v34, 1  ;;  %v2143_v38 = vrot.slane %v9363_v47, 1  ;;  %v2144_v9 = vrot.slane %v9365_v10, 1  ;;  %v2145_v52 = vrot.slane %v9367_v27, 1 }
 0x49c   : > { %v2146_v42 = vrot.slane %v9369_v62, 1  ;;  %v2147_v14 = vrot.slane %v9371_v36, 1  ;;  %v6381_v35 = vmul.f32 -1.442695, %v2141_v40  ;;  %v2148_v16 = vrot.slane %v9373_v2, 1 }
 0x49d   : > { %v6382_v53 = vmul.f32 -1.442695, %v2142_v61  ;;  %v6383_v7 = vmul.f32 -1.442695, %v2143_v38  ;;  %v6384_v44 = vmul.f32 -1.442695, %v2144_v9 }
 0x49e   : > { %6772 = vpow2.f32 %v6381_v35  ;;  %v6385_v4 = vmul.f32 -1.442695, %v2145_v52  ;;  %v6386_v49 = vmul.f32 -1.442695, %v2146_v42  ;;  %v6387_v31 = vmul.f32 -1.442695, %v2147_v14 }
 0x49f   : > { %6774 = vpow2.f32 %v6382_v53  ;;  %v6388_v57 = vmul.f32 -1.442695, %v2148_v16  ;;  %v2325_v63 = vmax.f32 %v9359_v1, 0.0  ;;  %v2326_v21 = vmax.f32 %v9361_v34, 0.0 }
 0x4a0   : > { %6776 = vpow2.f32 %v6383_v7  ;;  %v2327_v30 = vmax.f32 %v9363_v47, 0.0  ;;  %v2328_v39 = vmax.f32 %v9365_v10, 0.0  ;;  %v2329_v22 = vmax.f32 %v9367_v27, 0.0 }
 0x4a1   : > { %6778 = vpow2.f32 %v6384_v44  ;;  %v2330_v54 = vmax.f32 %v9369_v62, 0.0  ;;  %v2331_v27 = vmax.f32 %v9371_v36, 0.0 }
 0x4a2   : > { %6780 = vpow2.f32 %v6385_v4 }
 0x4a3   : > { %6782 = vpow2.f32 %v6386_v49 }
 0x4a4   : > { %v6773_v29 = vpop.eup %6772  ;;  %6784 = vpow2.f32 %v6387_v31 }
 0x4a5   : > { %v6775_v8 = vpop.eup %6774  ;;  %v9383_v45 = vadd.f32 1.0, %v6773_v29  ;;  %6786 = vpow2.f32 %v6388_v57 }
 0x4a6   : > { %v6777_v55 = vpop.eup %6776  ;;  %v9385_v20 = vadd.f32 1.0, %v6775_v8 }
 0x4a7   : > { %v6779_v0 = vpop.eup %6778  ;;  %v9387_v58 = vadd.f32 1.0, %v6777_v55  ;;  %6788 = vrcp.f32 %v9383_v45  ;;  %v2200_v25 = vand.u32 2147483648, %v9383_v45  ;;  %vm2194_vm2 = vweird.f32 %v9383_v45 }
 0x4a8   : > { %v6781_v33 = vpop.eup %6780  ;;  %v9390_v48 = vadd.f32 1.0, %v6779_v0  ;;  %6790 = vrcp.f32 %v9385_v20  ;;  %v2215_v37 = vand.u32 2147483648, %v9385_v20  ;;  %v2198_v15 = vand.u32 2147483647, %v9383_v45 }
 0x4a9   : > { %v6783_v6 = vpop.eup %6782  ;;  %v9393_v18 = vadd.f32 1.0, %v6781_v33  ;;  %6792 = vrcp.f32 %v9387_v58  ;;  %v2213_v12 = vand.u32 2147483647, %v9385_v20  ;;  %v2230_v19 = vand.u32 2147483648, %v9387_v58 }
 0x4aa   : > { %v6785_v11 = vpop.eup %6784  ;;  %v9402_v5 = vadd.f32 1.0, %v6783_v6  ;;  %6794 = vrcp.f32 %v9390_v48  ;;  %v2201_v23 = vor.u32 1.1754944e-38, %v2200_v25  ;;  %vm2209_vm5 = vweird.f32 %v9385_v20 }
 0x4ab   : > { %v6787_v32 = vpop.eup %6786  ;;  %6796 = vrcp.f32 %v9393_v18  ;;  %v9416_v24 = vadd.f32 1.0, %v6785_v11  ;;  %v9421_v26 = vor.u32 1.1754944e-38, %v2215_v37  ;;  %vm2224_vm1 = vweird.f32 %v9387_v58 }
 0x4ac   : > { %v9423_v43 = vadd.f32 1.0, %v6787_v32  ;;  %v2228_v61 = vand.u32 2147483647, %v9387_v58  ;;  %v2245_v38 = vand.u32 2147483648, %v9390_v48  ;;  %v2243_v42 = vand.u32 2147483647, %v9390_v48 }
 0x4ad   : > { %v9407_v51 = vpop.eup %6788  ;;  %v2258_v14 = vand.u32 2147483647, %v9393_v18  ;;  %6798 = vrcp.f32 %v9402_v5  ;;  %vm9436_vm4 = vcmp.eq.f32.partialorder %v2198_v15, 8.507059e+37  ;;  %v2231_v44 = vor.u32 1.1754944e-38, %v2230_v19 }
 0x4ae   : > { %v9414_v3 = vpop.eup %6790  ;;  %v2190_v56 = vmul.f32 %v9407_v51, %v9383_v45  ;;  %vm2195_vm14 = vweird.f32 %v9407_v51  ;;  %vm2239_vm12 = vweird.f32 %v9390_v48  ;;  %vm9445_vm7 = vcmp.eq.f32.partialorder %v2213_v12, 8.507059e+37 }
 0x4af   : > { %v2205_v40 = vmul.f32 %v9414_v3, %v9385_v20  ;;  %v9430_v9 = vpop.eup %6792  ;;  %vm2210_vm15 = vweird.f32 %v9414_v3  ;;  %v2260_v31 = vand.u32 2147483648, %v9393_v18  ;;  %vm9452_vm6 = vcmp.eq.f32.partialorder %v2228_v61, 8.507059e+37  ;;  %vm9475_vm0 = vmor %vm2194_vm2, %vm2195_vm14 }
 0x4b0   : > { %v2191_v52 = vsub.f32 1.0, %v2190_v56  ;;  %v2220_v7 = vmul.f32 %v9430_v9, %v9387_v58  ;;  %v6795_v16 = vpop.eup %6794  ;;  %v2246_v33 = vor.u32 1.1754944e-38, %v2245_v38  ;;  %vm2225_vm3 = vweird.f32 %v9430_v9  ;;  %vm9488_vm9 = vmor %vm2209_vm5, %vm2210_vm15 }
 0x4b1   : > { %v2206_v53 = vsub.f32 1.0, %v2205_v40  ;;  %v6797_v57 = vpop.eup %6796  ;;  %v2235_v0 = vmul.f32 %v6795_v16, %v9390_v48  ;;  %vm9459_vm10 = vcmp.eq.f32.partialorder %v2243_v42, 8.507059e+37  ;;  %vm9464_vm8 = vcmp.eq.f32.partialorder %v2258_v14, 8.507059e+37  ;;  %vm9500_vm14 = vmor %vm2224_vm1, %vm2225_vm3 }
 0x4b2   : > { %v2192_v4 = vmul.f32 %v9407_v51, %v2191_v52  ;;  %v2221_v8 = vsub.f32 1.0, %v2220_v7  ;;  %v2250_v37 = vmul.f32 %v6797_v57, %v9393_v18  ;;  %v2273_v19 = vand.u32 2147483647, %v9402_v5 }
 0x4b3   : > { %v2207_v29 = vmul.f32 %v9414_v3, %v2206_v53  ;;  %v2236_v12 = vsub.f32 1.0, %v2235_v0  ;;  %v6799_v56 = vpop.eup %6798  ;;  %vm2240_vm11 = vweird.f32 %v6795_v16  ;;  %v2261_v38 = vor.u32 1.1754944e-38, %v2260_v31 }
 0x4b4   : > { %v2193_v6 = vadd.f32 %v9407_v51, %v2192_v4  ;;  %v2222_v15 = vmul.f32 %v9430_v9, %v2221_v8  ;;  %v2251_v61 = vsub.f32 1.0, %v2250_v37  ;;  %vm2269_vm13 = vweird.f32 %v9402_v5  ;;  %vm9519_vm1 = vmor %vm2239_vm12, %vm2240_vm11 }
 0x4b5   : > { %v2208_v32 = vadd.f32 %v9414_v3, %v2207_v29  ;;  %6800 = vrcp.f32 %v9416_v24  ;;  %v2237_v14 = vmul.f32 %v6795_v16, %v2236_v12  ;;  %vm2255_vm2 = vweird.f32 %v6797_v57 }
 0x4b6   : > { %v2197_v52 = vsel %vm9475_vm0, %v9407_v51, %v2193_v6  ;;  %v2223_v42 = vadd.f32 %v9430_v9, %v2222_v15  ;;  %v2252_v20 = vmul.f32 %v6797_v57, %v2251_v61  ;;  %v2265_v7 = vmul.f32 %v6799_v56, %v9402_v5 }
 0x4b7   : > { %v2212_v53 = vsel %vm9488_vm9, %v9414_v3, %v2208_v32  ;;  %v2275_v4 = vand.u32 2147483648, %v9402_v5  ;;  %v2238_v29 = vadd.f32 %v6795_v16, %v2237_v14  ;;  %vm9509_vm5 = vcmp.eq.f32.partialorder %v2273_v19, 8.507059e+37  ;;  %v9649_v19 = vld [vmem:[#allocation10 + $0xb8] sm:$0xff] }
 0x4b8   : > { %v2227_v31 = vsel %vm9500_vm14, %v9430_v9, %v2223_v42  ;;  %v2288_v58 = vand.u32 2147483647, %v9416_v24  ;;  %v2202_v8 = vsel %vm9436_vm4, %v2201_v23, %v2197_v52  ;;  %v2253_v6 = vadd.f32 %v6797_v57, %v2252_v20 }
 0x4b9   : > { %v2266_v37 = vsub.f32 1.0, %v2265_v7  ;;  %v2290_v9 = vand.u32 2147483648, %v9416_v24  ;;  %v2217_v32 = vsel %vm9445_vm7, %v9421_v26, %v2212_v53  ;;  %v2242_v15 = vsel %vm9519_vm1, %v6795_v16, %v2238_v29 }
 0x4ba   : > { %vm13383_vm4 = vweird.f32 %v9393_v18  ;;  %vm2270_vm9 = vweird.f32 %v6799_v56  ;;  %vm2284_vm12 = vweird.f32 %v9416_v24  ;;  %6802 = vrcp.f32 %v9423_v43 }
 0x4bb   : > { %vm2256_vm15 = vmor %vm13383_vm4, %vm2255_vm2  ;;  %v6801_v48 = vpop.eup %6800  ;;  %v2232_v23 = vsel %vm9452_vm6, %v2231_v44, %v2227_v31  ;;  %v2267_v12 = vmul.f32 %v6799_v56, %v2266_v37  ;;  %v2276_v49 = vor.u32 1.1754944e-38, %v2275_v4  ;;  %v2247_v26 = vsel %vm9459_vm10, %v2246_v33, %v2242_v15 }
 0x4bc   : > { %v2257_v35 = vsel %vm2256_vm15, %v6797_v57, %v2253_v6  ;;  %v2280_v18 = vmul.f32 %v6801_v48, %v9416_v24  ;;  %vm9541_vm7 = vcmp.eq.f32.partialorder %v2288_v58, 8.507059e+37  ;;  %v2291_v40 = vor.u32 1.1754944e-38, %v2290_v9  ;;  %vm2271_vm6 = vmor %vm2269_vm13, %vm2270_vm9 }
 0x4bd   : > { %v2262_v16 = vsel %vm9464_vm8, %v2261_v38, %v2257_v35  ;;  %v2268_v61 = vadd.f32 %v6799_v56, %v2267_v12  ;;  %vm2285_vm3 = vweird.f32 %v6801_v48  ;;  %v2303_v44 = vand.u32 2147483647, %v9423_v43  ;;  %v9631_v35 = vld [vmem:[#allocation10 + $0xe8] sm:$0xff]  ;;  %v9634_v12 = vld [vmem:[#allocation10 + $0xd0] sm:$0xff] }
 0x4be   : > { %v2305_v57 = vand.u32 2147483648, %v9423_v43  ;;  %v2281_v55 = vsub.f32 1.0, %v2280_v18  ;;  %v2309_v33 = vmul.f32 %v2202_v8, %v9269_v13  ;;  %v2310_v25 = vmul.f32 %v2217_v32, %v9273_v17  ;;  %vm2286_vm8 = vmor %vm2284_vm12, %vm2285_vm3  ;;  %v9646_v18 = vld [vmem:[#allocation10 + $0xb0] sm:$0xff] }
 0x4bf   : > { %v2311_v11 = vmul.f32 %v2232_v23, %v9275_v46  ;;  %v2272_v38 = vsel %vm2271_vm6, %v6799_v56, %v2268_v61  ;;  %v2312_v52 = vmul.f32 %v2247_v26, %v9278_v60  ;;  %v2313_v45 = vmul.f32 %v2262_v16, %v9280_v41  ;;  %v9655_v61 = vld [vmem:[#allocation10 + $0xa8] sm:$0xff] }
 0x4c0   : > { %v2317_v42 = vsub.f32 1.0, %v2202_v8  ;;  %v6803_v14 = vpop.eup %6802  ;;  %v2277_v53 = vsel %vm9509_vm5, %v2276_v49, %v2272_v38  ;;  %v2282_v51 = vmul.f32 %v6801_v48, %v2281_v55  ;;  %v2318_v5 = vsub.f32 1.0, %v2217_v32  ;;  %v9637_v49 = vld [vmem:[#allocation10 + $0xd8] sm:$0xff]  ;;  %v9664_v55 = vld [vmem:[#allocation10 + $0x80] sm:$0xff] }
 0x4c1   : > { %v2319_v20 = vsub.f32 1.0, %v2232_v23  ;;  %v2295_v7 = vmul.f32 %v6803_v14, %v9423_v43  ;;  %vm2300_vm10 = vweird.f32 %v6803_v14  ;;  %v2314_v13 = vmul.f32 %v2277_v53, %v9285_v59  ;;  %v9628_v23 = vld [vmem:[#allocation10 + $0xe0] sm:$0xff]  ;;  %13388 = vst [vmem:[#allocation37_spill] sm:$0xff] %v9664_v55 }
 0x4c2   : > { %v2320_v17 = vsub.f32 1.0, %v2247_v26  ;;  %v2283_v46 = vadd.f32 %v6801_v48, %v2282_v51  ;;  %v2321_v56 = vsub.f32 1.0, %v2262_v16  ;;  %v2322_v4 = vsub.f32 1.0, %v2277_v53  ;;  %v9640_v26 = vld [vmem:[#allocation10 + $0xc0] sm:$0xff]  ;;  %v9643_v16 = vld [vmem:[#allocation10 + $0xc8] sm:$0xff]  ;;  %v9694_v51 = vld [vmem:[#allocation10 + $0x30] sm:$0xff] }
 0x4c3   : > { %v2333_v60 = vmul.f32 %v2325_v63, %v2317_v42  ;;  %v2296_v41 = vsub.f32 1.0, %v2295_v7  ;;  %v2334_v31 = vmul.f32 %v2326_v21, %v2318_v5  ;;  %v2335_v29 = vmul.f32 %v2327_v30, %v2319_v20  ;;  %v9676_v38 = vld [vmem:[#allocation10 + $0x60] sm:$0xff]  ;;  %v9685_v42 = vld [vmem:[#allocation10 + $0x58] sm:$0xff]  ;;  %v9691_v53 = vld [vmem:[#allocation10 + $0x48] sm:$0xff]  ;;  %13398 = vst [vmem:[#allocation47_spill] sm:$0xff] %v9694_v51 }
 0x4c4   : > { %v2336_v59 = vmul.f32 %v2328_v39, %v2320_v17  ;;  %v2287_v3 = vsel %vm2286_vm8, %v6801_v48, %v2283_v46  ;;  %v2337_v1 = vmul.f32 %v2329_v22, %v2321_v56  ;;  %v2338_v63 = vmul.f32 %v2330_v54, %v2322_v4  ;;  %v9625_v48 = vld [vmem:[#allocation10 + $0xf8] sm:$0xff]  ;;  %13392 = vst [vmem:[#allocation41_spill] sm:$0xff] %v9676_v38  ;;  %v9700_v20 = vld [vmem:[#allocation10 + $0x20] sm:$0xff]  ;;  %v9703_v7 = vld [vmem:[#allocation10 + $0x28] sm:$0xff] }
 0x4c5   : > { %v9574_v24 = vadd.f32 %v2333_v60, %v2309_v33  ;;  %v2292_v34 = vsel %vm9541_vm7, %v2291_v40, %v2287_v3  ;;  %v2297_v21 = vmul.f32 %v6803_v14, %v2296_v41  ;;  %v9578_v47 = vadd.f32 %v2334_v31, %v2310_v25  ;;  %v9652_v40 = vld [vmem:[#allocation10 + $0xa0] sm:$0xff]  ;;  %v9667_v33 = vld [vmem:[#allocation10 + $0x88] sm:$0xff]  ;;  %v9670_v25 = vld [vmem:[#allocation10 + $0x70] sm:$0xff]  ;;  %13395 = vst [vmem:[#allocation44_spill] sm:$0xff] %v9685_v42 }
 0x4c6   : > { %v9580_v30 = vadd.f32 %v2335_v29, %v2311_v11  ;;  %v2323_v10 = vsub.f32 1.0, %v2292_v34  ;;  %v9583_v39 = vadd.f32 %v2336_v59, %v2312_v52  ;;  %v9585_v22 = vadd.f32 %v2337_v1, %v2313_v45  ;;  %13389 = vst [vmem:[#allocation38_spill] sm:$0xff] %v9667_v33  ;;  %v9673_v11 = vld [vmem:[#allocation10 + $0x78] sm:$0xff]  ;;  %v9679_v52 = vld [vmem:[#allocation10 + $0x68] sm:$0xff]  ;;  %v9682_v45 = vld [vmem:[#allocation10 + $0x50] sm:$0xff] }
 0x4c7   : > { %2349 = vst [vmem:[%s7841_s12 + $0x4] sm:$0x1] %v9574_v24  ;;  %v2298_v62 = vadd.f32 %v6803_v14, %v2297_v21  ;;  %vm2299_vm0 = vweird.f32 %v9423_v43  ;;  %v9590_v54 = vadd.f32 %v2338_v63, %v2314_v13  ;;  %v2306_v58 = vor.u32 1.1754944e-38, %v2305_v57  ;;  %v9661_v57 = vld [vmem:[#allocation10 + $0x98] sm:$0xff]  ;;  %v9706_v13 = vld [vmem:[#allocation10 + $0x10] sm:$0xff]  ;;  %v9712_v46 = vld [vmem:[#allocation10] sm:$0xff] }
 0x4c8   : > { %2350 = vst [vmem:[%s7841_s12 + $0x14] sm:$0x1] %v9578_v47  ;;  %vm2301_vm11 = vmor %vm2299_vm0, %vm2300_vm10  ;;  %v2315_v36 = vmul.f32 %v2292_v34, %v9295_v28  ;;  %v2339_v8 = vmul.f32 %v2331_v27, %v2323_v10  ;;  %vm2304_vm13 = vcmp.eq.f32.partialorder %v2303_v44, 8.507059e+37  ;;  %v2332_v9 = vmax.f32 %v9373_v2, 0.0  ;;  %v9622_v2 = vld [vmem:[#allocation10 + $0xf0] sm:$0xff]  ;;  %v9697_v5 = vld [vmem:[#allocation10 + $0x38] sm:$0xff] }
 0x4c9   : > { %2351 = vst [vmem:[%s7841_s12 + $0x24] sm:$0x1] %v9580_v30  ;;  %v2302_v0 = vsel %vm2301_vm11, %v6803_v14, %v2298_v62  ;;  %v9658_v44 = vld [vmem:[#allocation10 + $0x90] sm:$0xff]  ;;  %v9688_v14 = vld [vmem:[#allocation10 + $0x40] sm:$0xff]  ;;  %v9709_v17 = vld [vmem:[#allocation10 + $0x18] sm:$0xff]  ;;  %vm13406_vm2 = vcmask 1040384  }
 0x4ca   : > { %2352 = vst [vmem:[%s7841_s12 + $0x34] sm:$0x1] %v9583_v39  ;;  %v2307_v43 = vsel %vm2304_vm13, %v2306_v58, %v2302_v0  ;;  %v9600_v6 = vadd.f32 %v2339_v8, %v2315_v36  ;;  %v9715_v56 = vld [vmem:[#allocation10 + $0x8] sm:$0xff]  ;;  %vm13407_vm14 = vcmask 1041409   ;;  %vm13408_vm5 = vcmask 1042434  }
 0x4cb   : > { %2353 = vst [vmem:[%s7841_s12 + $0x44] sm:$0x1] %v9585_v22  ;;  %v2324_v37 = vsub.f32 1.0, %v2307_v43  ;;  %v2316_v28 = vmul.f32 %v2307_v43, %v9307_v50  ;;  %v2358_v31 = vld [vmem:[#allocation3 + $0x5] ss:$8 sm:$0x3] }
 0x4cc   : > { %2354 = vst [vmem:[%s7841_s12 + $0x54] sm:$0x1] %v9590_v54  ;;  %vm13409_vm1 = vcmask 1043459   ;;  %v2360_v63 = vld [vmem:[#allocation3 + $0x25] ss:$8 sm:$0x3] }
 0x4cd   : > { %2355 = vst [vmem:[%s7841_s12 + $0x64] sm:$0x1] %v9600_v6  ;;  %v2340_v32 = vmul.f32 %v2332_v9, %v2324_v37  ;;  %v2362_v34 = vld [vmem:[#allocation3 + $0x45] ss:$8 sm:$0x3]  ;;  %vm13410_vm4 = vcmask 1044484  }
 0x4ce   : > { %2381 = vst [vmem:[#allocation1] ss:$9 sm:$0xff] %v9574_v24  ;;  %v2364_v21 = vld [vmem:[#allocation3 + $0x65] ss:$8 sm:$0x3]  ;;  %vm13411_vm15 = vcmask 1045509  }
 0x4cf   : > { %2383 = vst [vmem:[#allocation1 + $0x1] ss:$9 sm:$0xff] %v9578_v47  ;;  %v9612_v15 = vadd.f32 %v2340_v32, %v2316_v28  ;;  %v2366_v36 = vld [vmem:[#allocation3 + $0x85] ss:$8 sm:$0x3]  ;;  %vm13412_vm9 = vcmask 1046534  }
 0x4d0   : > { %2385 = vst [vmem:[#allocation1 + $0x2] ss:$9 sm:$0xff] %v9580_v30  ;;  %vm13413_vm12 = vcmask 1046528   ;;  %v2368_v9 = vld [vmem:[#allocation3 + $0xa5] ss:$8 sm:$0x3] }
 0x4d1   : > { %2387 = vst [vmem:[#allocation1 + $0x3] ss:$9 sm:$0xff] %v9583_v39 }
 0x4d2   : > { %2356 = vst [vmem:[%s7841_s12 + $0x74] sm:$0x1] %v9612_v15 }
 0x4d3   : > { %2389 = vst [vmem:[#allocation1 + $0x4] ss:$9 sm:$0xff] %v9585_v22 }
 0x4d4   : > { %2391 = vst [vmem:[#allocation1 + $0x5] ss:$9 sm:$0xff] %v9590_v54 }
 0x4d5   : > { %2393 = vst [vmem:[#allocation1 + $0x6] ss:$9 sm:$0xff] %v9600_v6 }
 0x4d6   : > { %2395 = vst [vmem:[#allocation1 + $0x7] ss:$9 sm:$0xff] %v9612_v15 }
 0x4d7   : > { %13386 = vst [vmem:[#allocation35_spill] sm:$0xff] %v9658_v44 }
 0x4d8   : > { %13387 = vst [vmem:[#allocation36_spill] sm:$0xff] %v9661_v57 }
 0x4d9   : > { %13390 = vst [vmem:[#allocation39_spill] sm:$0xff] %v9670_v25 }
 0x4da   : > { %13391 = vst [vmem:[#allocation40_spill] sm:$0xff] %v9673_v11 }
 0x4db   : > { %13393 = vst [vmem:[#allocation42_spill] sm:$0xff] %v9679_v52 }
 0x4dc   : > { %13394 = vst [vmem:[#allocation43_spill] sm:$0xff] %v9682_v45 }
 0x4dd   : > { %v2396_v50 = vld [vmem:[#allocation1] sm:$0xff]  ;;  %13396 = vst [vmem:[#allocation45_spill] sm:$0xff] %v9688_v14 }
 0x4de   : > { %2414 = vmatmul.f32.vlgmr.msra.gmra.mxu2 %v2396_v50  ;;  %2434 = vmatmul.f32.vlgmr.msra.gmra.mxu3 %v2396_v50  ;;  %13397 = vst [vmem:[#allocation46_spill] sm:$0xff] %v9691_v53 }
 0x4df   : > { %3754 = vmatpush.msra.mxu2 %v9622_v2  ;;  %3774 = vmatpush.msra.mxu3 %v9625_v48  ;;  %13399 = vst [vmem:[#allocation48_spill] sm:$0xff] %v9697_v5 }
 0x4e0   : > { %13400 = vst [vmem:[#allocation49_spill] sm:$0xff] %v9700_v20 }
 0x4e1   : > { %3755 = vmatpush.msra.mxu2 %v9628_v23  ;;  %3775 = vmatpush.msra.mxu3 %v9631_v35  ;;  %13401 = vst [vmem:[#allocation50_spill] sm:$0xff] %v9703_v7 }
 0x4e2   : > { %13402 = vst [vmem:[#allocation51_spill] sm:$0xff] %v9706_v13 }
 0x4e3   : > { %3756 = vmatpush.msra.mxu2 %v9634_v12  ;;  %3776 = vmatpush.msra.mxu3 %v9637_v49  ;;  %13403 = vst [vmem:[#allocation52_spill] sm:$0xff] %v9709_v17 }
 0x4e4   : > { %13404 = vst [vmem:[#allocation53_spill] sm:$0xff] %v9712_v46 }
 0x4e5   : > { %3757 = vmatpush.msra.mxu2 %v9640_v26  ;;  %3777 = vmatpush.msra.mxu3 %v9643_v16  ;;  %13405 = vst [vmem:[#allocation54_spill] sm:$0xff] %v9715_v56 }
 0x4e7   : > { %3758 = vmatpush.msra.mxu2 %v9646_v18  ;;  %3778 = vmatpush.msra.mxu3 %v9649_v19 }
 0x4e9   : > { %3759 = vmatpush.msra.mxu2 %v9652_v40  ;;  %3779 = vmatpush.msra.mxu3 %v9655_v61 }
 0x4eb   : > { %3760 = vmatpush.msra.mxu2 %v9658_v44  ;;  %3780 = vmatpush.msra.mxu3 %v9661_v57 }
 0x4ed   : > { %3761 = vmatpush.msra.mxu2 %v9664_v55  ;;  %3781 = vmatpush.msra.mxu3 %v9667_v33 }
 0x4ef   : > { %3762 = vmatpush.msra.mxu2 %v9670_v25  ;;  %3782 = vmatpush.msra.mxu3 %v9673_v11 }
 0x4f1   : > { %3763 = vmatpush.msra.mxu2 %v9676_v38  ;;  %3783 = vmatpush.msra.mxu3 %v9679_v52 }
 0x4f3   : > { %3764 = vmatpush.msra.mxu2 %v9682_v45  ;;  %3784 = vmatpush.msra.mxu3 %v9685_v42 }
 0x4f5   : > { %3765 = vmatpush.msra.mxu2 %v9688_v14  ;;  %3785 = vmatpush.msra.mxu3 %v9691_v53 }
 0x4f7   : > { %3766 = vmatpush.msra.mxu2 %v9694_v51  ;;  %3786 = vmatpush.msra.mxu3 %v9697_v5 }
 0x4f9   : > { %3767 = vmatpush.msra.mxu2 %v9700_v20  ;;  %3787 = vmatpush.msra.mxu3 %v9703_v7 }
 0x4fb   : > { %3768 = vmatpush.msra.mxu2 %v9706_v13  ;;  %3788 = vmatpush.msra.mxu3 %v9709_v17 }
 0x4fd   : > { %3769 = vmatpush.msra.mxu2 %v9712_v46  ;;  %3789 = vmatpush.msra.mxu3 %v9715_v56  ;;  %v2370_v56 = vld [vmem:[#allocation3 + $0xc5] ss:$8 sm:$0x3] }
 0x561   : > { %v2435_v4 = vpop.f32.mrf.mxu3  ;;  %v2415_v41 = vpop.f32.mrf.mxu2 }
 0x562   : > { %v2440_v60 = vrot.slane %v2435_v4, 7 }
 0x564   : > { %v2441_v29 = vsel %vm13406_vm2, %v2415_v41, %v2440_v60  ;;  %v2442_v59 = vsel %vm13407_vm14, %v2415_v41, %v2440_v60  ;;  %v2444_v3 = vsel %vm13408_vm5, %v2415_v41, %v2440_v60  ;;  %v2446_v1 = vsel %vm13409_vm1, %v2415_v41, %v2440_v60 }
 0x565   : > { %v2443_v10 = vrot.slane %v2442_v59, 1  ;;  %v2445_v27 = vrot.slane %v2444_v3, 2  ;;  %v2447_v62 = vrot.slane %v2446_v1, 3  ;;  %v2448_v58 = vsel %vm13410_vm4, %v2415_v41, %v2440_v60  ;;  %v2372_v59 = vld [vmem:[#allocation3 + $0xe5] ss:$8 sm:$0x3] }
 0x566   : > { %v2449_v8 = vrot.slane %v2448_v58, 4  ;;  %v2450_v0 = vsel %vm13411_vm15, %v2415_v41, %v2440_v60  ;;  %v2452_v43 = vsel %vm13412_vm9, %v2415_v41, %v2440_v60  ;;  %v2454_v37 = vsel %vm13413_vm12, %v2440_v60, %v2415_v41 }
 0x567   : > { %v2451_v28 = vrot.slane %v2450_v0, 5  ;;  %v2453_v32 = vrot.slane %v2452_v43, 6  ;;  %v2455_v50 = vrot.slane %v2454_v37, 7  ;;  %v9726_v4 = vadd.f32 %v2441_v29, %v2358_v31 }
 0x568   : > { %v9728_v3 = vadd.f32 %v2443_v10, %v2360_v63  ;;  %v9730_v1 = vadd.f32 %v2445_v27, %v2362_v34  ;;  %v9732_v46 = vadd.f32 %v2447_v62, %v2364_v21  ;;  %v9734_v58 = vadd.f32 %v2449_v8, %v2366_v36 }
 0x569   : > { %v9736_v17 = vadd.f32 %v2451_v28, %v2368_v9  ;;  %v9738_v13 = vadd.f32 %v2453_v32, %v2370_v56  ;;  %v9740_v60 = vadd.f32 %v2455_v50, %v2372_v59  ;;  %v2480_v41 = vrot.slane %v9726_v4, 1 }
 0x56a   : > { %v2481_v31 = vrot.slane %v9728_v3, 1  ;;  %v2482_v29 = vrot.slane %v9730_v1, 1  ;;  %v2483_v63 = vrot.slane %v9732_v46, 1  ;;  %v2484_v34 = vrot.slane %v9734_v58, 1 }
 0x56b   : > { %v2485_v21 = vrot.slane %v9736_v17, 1  ;;  %v2486_v10 = vrot.slane %v9738_v13, 1  ;;  %v6389_v27 = vmul.f32 -1.442695, %v2480_v41  ;;  %v2487_v8 = vrot.slane %v9740_v60, 1 }
 0x56c   : > { %v6390_v62 = vmul.f32 -1.442695, %v2481_v31  ;;  %v6391_v56 = vmul.f32 -1.442695, %v2482_v29  ;;  %v6392_v36 = vmul.f32 -1.442695, %v2483_v63 }
 0x56d   : > { %6804 = vpow2.f32 %v6389_v27  ;;  %v6393_v0 = vmul.f32 -1.442695, %v2484_v34  ;;  %v6394_v43 = vmul.f32 -1.442695, %v2485_v21  ;;  %v6395_v37 = vmul.f32 -1.442695, %v2486_v10 }
 0x56e   : > { %6806 = vpow2.f32 %v6390_v62  ;;  %v6396_v9 = vmul.f32 -1.442695, %v2487_v8 }
 0x56f   : > { %6808 = vpow2.f32 %v6391_v56 }
 0x570   : > { %6810 = vpow2.f32 %v6392_v36 }
 0x571   : > { %6812 = vpow2.f32 %v6393_v0 }
 0x572   : > { %6814 = vpow2.f32 %v6394_v43 }
 0x573   : > { %v6805_v28 = vpop.eup %6804  ;;  %6816 = vpow2.f32 %v6395_v37 }
 0x574   : > { %v6807_v32 = vpop.eup %6806  ;;  %v9750_v50 = vadd.f32 1.0, %v6805_v28  ;;  %6818 = vpow2.f32 %v6396_v9 }
 0x575   : > { %v6809_v59 = vpop.eup %6808  ;;  %v9752_v41 = vadd.f32 1.0, %v6807_v32 }
 0x576   : > { %v6811_v31 = vpop.eup %6810  ;;  %v9754_v29 = vadd.f32 1.0, %v6809_v59  ;;  %6820 = vrcp.f32 %v9750_v50  ;;  %v2539_v27 = vand.u32 2147483648, %v9750_v50  ;;  %vm2533_vm7 = vweird.f32 %v9750_v50 }
 0x577   : > { %v6813_v63 = vpop.eup %6812  ;;  %v9757_v34 = vadd.f32 1.0, %v6811_v31  ;;  %6822 = vrcp.f32 %v9752_v41  ;;  %v2554_v62 = vand.u32 2147483648, %v9752_v41  ;;  %v2537_v31 = vand.u32 2147483647, %v9750_v50 }
 0x578   : > { %v6815_v21 = vpop.eup %6814  ;;  %v9760_v10 = vadd.f32 1.0, %v6813_v63  ;;  %6824 = vrcp.f32 %v9754_v29  ;;  %v2552_v63 = vand.u32 2147483647, %v9752_v41  ;;  %v2569_v0 = vand.u32 2147483648, %v9754_v29 }
 0x579   : > { %v6817_v56 = vpop.eup %6816  ;;  %v9769_v9 = vadd.f32 1.0, %v6815_v21  ;;  %6826 = vrcp.f32 %v9757_v34  ;;  %v2540_v32 = vor.u32 1.1754944e-38, %v2539_v27  ;;  %vm2548_vm3 = vweird.f32 %v9752_v41 }
 0x57a   : > { %v6819_v37 = vpop.eup %6818  ;;  %6828 = vrcp.f32 %v9760_v10  ;;  %v9783_v43 = vadd.f32 1.0, %v6817_v56  ;;  %v9788_v8 = vor.u32 1.1754944e-38, %v2554_v62  ;;  %vm2563_vm6 = vweird.f32 %v9754_v29 }
 0x57b   : > { %v9790_v36 = vadd.f32 1.0, %v6819_v37  ;;  %v2567_v20 = vand.u32 2147483647, %v9754_v29  ;;  %v2584_v56 = vand.u32 2147483648, %v9757_v34  ;;  %v2582_v27 = vand.u32 2147483647, %v9757_v34 }
 0x57c   : > { %v9774_v59 = vpop.eup %6820  ;;  %v2597_v53 = vand.u32 2147483647, %v9760_v10  ;;  %6830 = vrcp.f32 %v9769_v9  ;;  %vm9803_vm8 = vcmp.eq.f32.partialorder %v2537_v31, 8.507059e+37  ;;  %v2570_v42 = vor.u32 1.1754944e-38, %v2569_v0 }
 0x57d   : > { %v9781_v21 = vpop.eup %6822  ;;  %v2529_v28 = vmul.f32 %v9774_v59, %v9750_v50  ;;  %vm2534_vm10 = vweird.f32 %v9774_v59  ;;  %vm2578_vm0 = vweird.f32 %v9757_v34  ;;  %vm9812_vm13 = vcmp.eq.f32.partialorder %v2552_v63, 8.507059e+37 }
 0x57e   : > { %v2544_v7 = vmul.f32 %v9781_v21, %v9752_v41  ;;  %v9797_v5 = vpop.eup %6824  ;;  %vm2549_vm11 = vweird.f32 %v9781_v21  ;;  %v2599_v31 = vand.u32 2147483648, %v9760_v10  ;;  %vm9819_vm14 = vcmp.eq.f32.partialorder %v2567_v20, 8.507059e+37  ;;  %vm9842_vm15 = vmor %vm2533_vm7, %vm2534_vm10 }
 0x57f   : > { %v2530_v51 = vsub.f32 1.0, %v2529_v28  ;;  %v2559_v14 = vmul.f32 %v9797_v5, %v9754_v29  ;;  %v6827_v28 = vpop.eup %6826  ;;  %v2585_v25 = vor.u32 1.1754944e-38, %v2584_v56  ;;  %vm2564_vm5 = vweird.f32 %v9797_v5  ;;  %vm9855_vm2 = vmor %vm2548_vm3, %vm2549_vm11 }
 0x580   : > { %v2545_v37 = vsub.f32 1.0, %v2544_v7  ;;  %v6829_v7 = vpop.eup %6828  ;;  %vm9826_vm1 = vcmp.eq.f32.partialorder %v2582_v27, 8.507059e+37  ;;  %vm9831_vm4 = vcmp.eq.f32.partialorder %v2597_v53, 8.507059e+37  ;;  %v2612_v56 = vand.u32 2147483647, %v9769_v9  ;;  %vm9867_vm10 = vmor %vm2563_vm6, %vm2564_vm5 }
 0x581   : > { %v2531_v45 = vmul.f32 %v9774_v59, %v2530_v51  ;;  %v2560_v11 = vsub.f32 1.0, %v2559_v14  ;;  %v2574_v51 = vmul.f32 %v6827_v28, %v9757_v34  ;;  %v2589_v55 = vmul.f32 %v6829_v7, %v9760_v10 }
 0x582   : > { %v2546_v38 = vmul.f32 %v9781_v21, %v2545_v37  ;;  %vm2579_vm9 = vweird.f32 %v6827_v28  ;;  %v2600_v44 = vor.u32 1.1754944e-38, %v2599_v31  ;;  %vm2608_vm12 = vweird.f32 %v9769_v9 }
 0x583   : > { %v2532_v63 = vadd.f32 %v9774_v59, %v2531_v45  ;;  %v2561_v20 = vmul.f32 %v9797_v5, %v2560_v11  ;;  %v2575_v57 = vsub.f32 1.0, %v2574_v51  ;;  %v6831_v45 = vpop.eup %6830  ;;  %v2590_v53 = vsub.f32 1.0, %v2589_v55  ;;  %vm9886_vm6 = vmor %vm2578_vm0, %vm2579_vm9 }
 0x584   : > { %v2547_v14 = vadd.f32 %v9781_v21, %v2546_v38  ;;  %6832 = vrcp.f32 %v9783_v43  ;;  %vm2594_vm7 = vweird.f32 %v6829_v7  ;;  %v2604_v51 = vmul.f32 %v6831_v45, %v9769_v9 }
 0x585   : > { %v2536_v11 = vsel %vm9842_vm15, %v9774_v59, %v2532_v63  ;;  %v2562_v50 = vadd.f32 %v9797_v5, %v2561_v20  ;;  %v2576_v55 = vmul.f32 %v6827_v28, %v2575_v57  ;;  %v2591_v41 = vmul.f32 %v6829_v7, %v2590_v53 }
 0x586   : > { %v2551_v31 = vsel %vm9855_vm2, %v9781_v21, %v2547_v14  ;;  %v2614_v63 = vand.u32 2147483648, %v9769_v9  ;;  %vm9876_vm3 = vcmp.eq.f32.partialorder %v2612_v56, 8.507059e+37  ;;  %v2627_v29 = vand.u32 2147483647, %v9783_v43 }
 0x587   : > { %v2566_v57 = vsel %vm9867_vm10, %v9797_v5, %v2562_v50  ;;  %v2577_v20 = vadd.f32 %v6827_v28, %v2576_v55  ;;  %v2541_v14 = vsel %vm9803_vm8, %v2540_v32, %v2536_v11  ;;  %v2592_v53 = vadd.f32 %v6829_v7, %v2591_v41 }
 0x588   : > { %v2605_v38 = vsub.f32 1.0, %v2604_v51  ;;  %v2629_v5 = vand.u32 2147483648, %v9783_v43  ;;  %v2556_v56 = vsel %vm9812_vm13, %v9788_v8, %v2551_v31  ;;  %vm13434_vm8 = vweird.f32 %v9760_v10 }
 0x589   : > { %v2581_v50 = vsel %vm9886_vm6, %v6827_v28, %v2577_v20  ;;  %vm2595_vm11 = vmor %vm13434_vm8, %vm2594_vm7  ;;  %vm2609_vm2 = vweird.f32 %v6831_v45  ;;  %vm2623_vm0 = vweird.f32 %v9783_v43  ;;  %6834 = vrcp.f32 %v9790_v36 }
 0x58a   : > { %v6833_v34 = vpop.eup %6832  ;;  %v2571_v32 = vsel %vm9819_vm14, %v2570_v42, %v2566_v57  ;;  %v2596_v62 = vsel %vm2595_vm11, %v6829_v7, %v2592_v53  ;;  %v2606_v11 = vmul.f32 %v6831_v45, %v2605_v38  ;;  %v2615_v52 = vor.u32 1.1754944e-38, %v2614_v63  ;;  %vm2610_vm14 = vmor %vm2608_vm12, %vm2609_vm2 }
 0x58b   : > { %v2586_v8 = vsel %vm9826_vm1, %v2585_v25, %v2581_v50  ;;  %v2601_v28 = vsel %vm9831_vm4, %v2600_v44, %v2596_v62  ;;  %v2619_v10 = vmul.f32 %v6833_v34, %v9783_v43  ;;  %vm9908_vm13 = vcmp.eq.f32.partialorder %v2627_v29, 8.507059e+37 }
 0x58c   : > { %v2630_v31 = vor.u32 1.1754944e-38, %v2629_v5  ;;  %v2607_v59 = vadd.f32 %v6831_v45, %v2606_v11  ;;  %vm2624_vm5 = vweird.f32 %v6833_v34  ;;  %v2642_v42 = vand.u32 2147483647, %v9790_v36 }
 0x58d   : > { %v2644_v7 = vand.u32 2147483648, %v9790_v36  ;;  %v2620_v33 = vsub.f32 1.0, %v2619_v10  ;;  %v2648_v44 = vmul.f32 %v2541_v14, %v9574_v24  ;;  %v2649_v25 = vmul.f32 %v2556_v56, %v9578_v47  ;;  %vm2625_vm4 = vmor %vm2623_vm0, %vm2624_vm5 }
 0x58e   : > { %v2650_v0 = vmul.f32 %v2571_v32, %v9580_v30  ;;  %v2611_v37 = vsel %vm2610_vm14, %v6831_v45, %v2607_v59  ;;  %v2651_v41 = vmul.f32 %v2586_v8, %v9583_v39  ;;  %v2652_v51 = vmul.f32 %v2601_v28, %v9585_v22 }
 0x58f   : > { %v2656_v63 = vsub.f32 1.0, %v2541_v14  ;;  %v6835_v57 = vpop.eup %6834  ;;  %v2616_v20 = vsel %vm9876_vm3, %v2615_v52, %v2611_v37  ;;  %v2621_v29 = vmul.f32 %v6833_v34, %v2620_v33  ;;  %v2657_v9 = vsub.f32 1.0, %v2556_v56 }
 0x590   : > { %v2658_v27 = vsub.f32 1.0, %v2571_v32  ;;  %v2634_v53 = vmul.f32 %v6835_v57, %v9790_v36  ;;  %vm2639_vm1 = vweird.f32 %v6835_v57  ;;  %v2653_v24 = vmul.f32 %v2616_v20, %v9590_v54 }
 0x591   : > { %v2659_v47 = vsub.f32 1.0, %v2586_v8  ;;  %v2622_v30 = vadd.f32 %v6833_v34, %v2621_v29  ;;  %v2660_v45 = vsub.f32 1.0, %v2601_v28  ;;  %v2661_v38 = vsub.f32 1.0, %v2616_v20  ;;  %v13460_v20 = vld [vmem:[#allocation52_spill] sm:$0xff]  ;;  %v13461_v29 = vld [vmem:[#allocation53_spill] sm:$0xff] }
 0x592   : > { %v13437_v39 = vmax.f32 %v9726_v4, 0.0  ;;  %v2635_v21 = vsub.f32 1.0, %v2634_v53  ;;  %v13438_v14 = vmax.f32 %v9728_v3, 0.0  ;;  %v13439_v56 = vmax.f32 %v9730_v1, 0.0 }
 0x593   : > { %v13440_v54 = vmax.f32 %v9732_v46, 0.0  ;;  %v2626_v62 = vsel %vm2625_vm4, %v6833_v34, %v2622_v30  ;;  %v13441_v11 = vmax.f32 %v9734_v58, 0.0  ;;  %v13442_v52 = vmax.f32 %v9736_v17, 0.0 }
 0x594   : > { %v2672_v22 = vmul.f32 %v13437_v39, %v2656_v63  ;;  %v2673_v5 = vmul.f32 %v13438_v14, %v2657_v9  ;;  %v2674_v50 = vmul.f32 %v13439_v56, %v2658_v27  ;;  %v2631_v3 = vsel %vm9908_vm13, %v2630_v31, %v2626_v62  ;;  %v13458_v63 = vld [vmem:[#allocation50_spill] sm:$0xff]  ;;  %v2703_v14 = vld [vmem:[#allocation3 + $0x66] ss:$8 sm:$0x3] }
 0x595   : > { %v2675_v32 = vmul.f32 %v13440_v54, %v2659_v47  ;;  %v2676_v4 = vmul.f32 %v13441_v11, %v2660_v45  ;;  %v2677_v43 = vmul.f32 %v13442_v52, %v2661_v38  ;;  %v2636_v28 = vmul.f32 %v6835_v57, %v2635_v21  ;;  %v13462_v9 = vld [vmem:[#allocation54_spill] sm:$0xff]  ;;  %v2697_v47 = vld [vmem:[#allocation3 + $0x6] ss:$8 sm:$0x3] }
 0x596   : > { %v9941_v8 = vadd.f32 %v2672_v22, %v2648_v44  ;;  %v9945_v1 = vadd.f32 %v2673_v5, %v2649_v25  ;;  %v9947_v10 = vadd.f32 %v2674_v50, %v2650_v0  ;;  %v2662_v46 = vsub.f32 1.0, %v2631_v3  ;;  %v2699_v22 = vld [vmem:[#allocation3 + $0x26] ss:$8 sm:$0x3] }
 0x597   : > { %v2670_v58 = vmax.f32 %v9738_v13, 0.0  ;;  %v9950_v34 = vadd.f32 %v2675_v32, %v2651_v41  ;;  %v9952_v59 = vadd.f32 %v2676_v4, %v2652_v51  ;;  %v2637_v17 = vadd.f32 %v6835_v57, %v2636_v28  ;;  %v13456_v41 = vld [vmem:[#allocation48_spill] sm:$0xff]  ;;  %v13457_v51 = vld [vmem:[#allocation49_spill] sm:$0xff] }
 0x598   : > { %2688 = vst [vmem:[%s7841_s12 + $0x5] sm:$0x1] %v9941_v8  ;;  %vm2638_vm15 = vweird.f32 %v9790_v36  ;;  %v9957_v55 = vadd.f32 %v2677_v43, %v2653_v24  ;;  %v2645_v31 = vor.u32 1.1754944e-38, %v2644_v7  ;;  %v2654_v13 = vmul.f32 %v2631_v3, %v9600_v6  ;;  %v2701_v21 = vld [vmem:[#allocation3 + $0x46] ss:$8 sm:$0x3] }
 0x599   : > { %2689 = vst [vmem:[%s7841_s12 + $0x15] sm:$0x1] %v9945_v1  ;;  %vm2640_vm9 = vmor %vm2638_vm15, %vm2639_vm1  ;;  %v2678_v33 = vmul.f32 %v2670_v58, %v2662_v46  ;;  %vm2643_vm12 = vcmp.eq.f32.partialorder %v2642_v42, 8.507059e+37  ;;  %v2671_v37 = vmax.f32 %v9740_v60, 0.0  ;;  %v13455_v60 = vld [vmem:[#allocation47_spill] sm:$0xff]  ;;  %vm13463_vm7 = vcmask 1040384  }
 0x59a   : > { %2690 = vst [vmem:[%s7841_s12 + $0x25] sm:$0x1] %v9947_v10  ;;  %v2641_v44 = vsel %vm2640_vm9, %v6835_v57, %v2637_v17  ;;  %v13459_v57 = vld [vmem:[#allocation51_spill] sm:$0xff]  ;;  %vm13464_vm10 = vcmask 1041409   ;;  %vm13465_vm3 = vcmask 1042434   ;;  %vm13466_vm6 = vcmask 1043459  }
 0x59b   : > { %2691 = vst [vmem:[%s7841_s12 + $0x35] sm:$0x1] %v9950_v34  ;;  %v2646_v36 = vsel %vm2643_vm12, %v2645_v31, %v2641_v44  ;;  %v9967_v25 = vadd.f32 %v2678_v33, %v2654_v13  ;;  %vm13467_vm8 = vcmask 1044484   ;;  %v2705_v32 = vld [vmem:[#allocation3 + $0x86] ss:$8 sm:$0x3] }
 0x59c   : > { %2692 = vst [vmem:[%s7841_s12 + $0x45] sm:$0x1] %v9952_v59  ;;  %v2663_v0 = vsub.f32 1.0, %v2646_v36  ;;  %v2655_v6 = vmul.f32 %v2646_v36, %v9612_v15  ;;  %vm13468_vm11 = vcmask 1045509   ;;  %vm13469_vm2 = vcmask 1046534  }
 0x59d   : > { %2693 = vst [vmem:[%s7841_s12 + $0x55] sm:$0x1] %v9957_v55  ;;  %vm13470_vm0 = vcmask 1046528   ;;  %v2707_v43 = vld [vmem:[#allocation3 + $0xa6] ss:$8 sm:$0x3] }
 0x59e   : > { %2694 = vst [vmem:[%s7841_s12 + $0x65] sm:$0x1] %v9967_v25  ;;  %v2679_v7 = vmul.f32 %v2671_v37, %v2663_v0  ;;  %v2709_v17 = vld [vmem:[#allocation3 + $0xc6] ss:$8 sm:$0x3] }
 0x59f   : > { %2720 = vst [vmem:[#allocation1] ss:$9 sm:$0xff] %v9941_v8  ;;  %v2711_v31 = vld [vmem:[#allocation3 + $0xe6] ss:$8 sm:$0x3] }
 0x5a0   : > { %2722 = vst [vmem:[#allocation1 + $0x1] ss:$9 sm:$0xff] %v9945_v1  ;;  %v9979_v42 = vadd.f32 %v2679_v7, %v2655_v6 }
 0x5a1   : > { %2724 = vst [vmem:[#allocation1 + $0x2] ss:$9 sm:$0xff] %v9947_v10 }
 0x5a2   : > { %2726 = vst [vmem:[#allocation1 + $0x3] ss:$9 sm:$0xff] %v9950_v34 }
 0x5a3   : > { %2695 = vst [vmem:[%s7841_s12 + $0x75] sm:$0x1] %v9979_v42 }
 0x5a4   : > { %2728 = vst [vmem:[#allocation1 + $0x4] ss:$9 sm:$0xff] %v9952_v59 }
 0x5a5   : > { %2730 = vst [vmem:[#allocation1 + $0x5] ss:$9 sm:$0xff] %v9957_v55 }
 0x5a6   : > { %2732 = vst [vmem:[#allocation1 + $0x6] ss:$9 sm:$0xff] %v9967_v25 }
 0x5a7   : > { %2734 = vst [vmem:[#allocation1 + $0x7] ss:$9 sm:$0xff] %v9979_v42 }
 0x5ae   : > { %v2735_v15 = vld [vmem:[#allocation1] sm:$0xff] }
 0x5af   : > { %2753 = vmatmul.f32.vlgmr.msra.gmra.mxu0 %v2735_v15  ;;  %2773 = vmatmul.f32.vlgmr.msra.gmra.mxu1 %v2735_v15 }
 0x5b0   : > { %4093 = vmatpush.msra.mxu0 %v9622_v2  ;;  %4113 = vmatpush.msra.mxu1 %v9625_v48  ;;  %v13443_v2 = vld [vmem:[#allocation35_spill] sm:$0xff]  ;;  %v13444_v48 = vld [vmem:[#allocation36_spill] sm:$0xff] }
 0x5b2   : > { %4094 = vmatpush.msra.mxu0 %v9628_v23  ;;  %4114 = vmatpush.msra.mxu1 %v9631_v35  ;;  %v13445_v23 = vld [vmem:[#allocation37_spill] sm:$0xff]  ;;  %v13446_v35 = vld [vmem:[#allocation38_spill] sm:$0xff] }
 0x5b4   : > { %4095 = vmatpush.msra.mxu0 %v9634_v12  ;;  %4115 = vmatpush.msra.mxu1 %v9637_v49  ;;  %v13447_v12 = vld [vmem:[#allocation39_spill] sm:$0xff]  ;;  %v13448_v49 = vld [vmem:[#allocation40_spill] sm:$0xff] }
 0x5b6   : > { %4096 = vmatpush.msra.mxu0 %v9640_v26  ;;  %4116 = vmatpush.msra.mxu1 %v9643_v16  ;;  %v13449_v26 = vld [vmem:[#allocation41_spill] sm:$0xff]  ;;  %v13450_v16 = vld [vmem:[#allocation42_spill] sm:$0xff] }
 0x5b8   : > { %4097 = vmatpush.msra.mxu0 %v9646_v18  ;;  %4117 = vmatpush.msra.mxu1 %v9649_v19  ;;  %v13451_v18 = vld [vmem:[#allocation43_spill] sm:$0xff]  ;;  %v13452_v19 = vld [vmem:[#allocation44_spill] sm:$0xff] }
 0x5ba   : > { %4098 = vmatpush.msra.mxu0 %v9652_v40  ;;  %4118 = vmatpush.msra.mxu1 %v9655_v61  ;;  %v13453_v40 = vld [vmem:[#allocation45_spill] sm:$0xff]  ;;  %v13454_v61 = vld [vmem:[#allocation46_spill] sm:$0xff] }
 0x5bc   : > { %4099 = vmatpush.msra.mxu0 %v13443_v2  ;;  %4119 = vmatpush.msra.mxu1 %v13444_v48 }
 0x5be   : > { %4100 = vmatpush.msra.mxu0 %v13445_v23  ;;  %4120 = vmatpush.msra.mxu1 %v13446_v35 }
 0x5c0   : > { %4101 = vmatpush.msra.mxu0 %v13447_v12  ;;  %4121 = vmatpush.msra.mxu1 %v13448_v49 }
 0x5c2   : > { %4102 = vmatpush.msra.mxu0 %v13449_v26  ;;  %4122 = vmatpush.msra.mxu1 %v13450_v16 }
 0x5c4   : > { %4103 = vmatpush.msra.mxu0 %v13451_v18  ;;  %4123 = vmatpush.msra.mxu1 %v13452_v19 }
 0x5c6   : > { %4104 = vmatpush.msra.mxu0 %v13453_v40  ;;  %4124 = vmatpush.msra.mxu1 %v13454_v61 }
 0x5c8   : > { %4105 = vmatpush.msra.mxu0 %v13455_v60  ;;  %4125 = vmatpush.msra.mxu1 %v13456_v41 }
 0x5ca   : > { %4106 = vmatpush.msra.mxu0 %v13457_v51  ;;  %4126 = vmatpush.msra.mxu1 %v13458_v63 }
 0x5cc   : > { %4107 = vmatpush.msra.mxu0 %v13459_v57  ;;  %4127 = vmatpush.msra.mxu1 %v13460_v20 }
 0x5ce   : > { %4108 = vmatpush.msra.mxu0 %v13461_v29  ;;  %4128 = vmatpush.msra.mxu1 %v13462_v9 }
 0x62c   : > { %v2774_v27 = vpop.f32.mrf.mxu1  ;;  %v2754_v24 = vpop.f32.mrf.mxu0 }
 0x62d   : > { %v2779_v53 = vrot.slane %v2774_v27, 7 }
 0x62f   : > { %v2780_v30 = vsel %vm13463_vm7, %v2754_v24, %v2779_v53  ;;  %v2781_v45 = vsel %vm13464_vm10, %v2754_v24, %v2779_v53  ;;  %v2783_v38 = vsel %vm13465_vm3, %v2754_v24, %v2779_v53  ;;  %v2785_v39 = vsel %vm13466_vm6, %v2754_v24, %v2779_v53 }
 0x630   : > { %v2782_v5 = vrot.slane %v2781_v45, 1  ;;  %v2784_v56 = vrot.slane %v2783_v38, 2  ;;  %v2786_v50 = vrot.slane %v2785_v39, 3  ;;  %v2787_v54 = vsel %vm13467_vm8, %v2754_v24, %v2779_v53 }
 0x631   : > { %v2788_v62 = vrot.slane %v2787_v54, 4  ;;  %v2789_v11 = vsel %vm13468_vm11, %v2754_v24, %v2779_v53  ;;  %v2791_v4 = vsel %vm13469_vm2, %v2754_v24, %v2779_v53  ;;  %v2793_v52 = vsel %vm13470_vm0, %v2779_v53, %v2754_v24 }
 0x632   : > { %v2790_v3 = vrot.slane %v2789_v11, 5  ;;  %v2792_v28 = vrot.slane %v2791_v4, 6  ;;  %v2794_v46 = vrot.slane %v2793_v52, 7  ;;  %v10029_v58 = vadd.f32 %v2780_v30, %v2697_v47 }
 0x633   : > { %v10031_v13 = vadd.f32 %v2782_v5, %v2699_v22  ;;  %v10033_v33 = vadd.f32 %v2784_v56, %v2701_v21  ;;  %v10035_v44 = vadd.f32 %v2786_v50, %v2703_v14  ;;  %v10037_v36 = vadd.f32 %v2788_v62, %v2705_v32 }
 0x634   : > { %v10039_v0 = vadd.f32 %v2790_v3, %v2707_v43  ;;  %v10041_v37 = vadd.f32 %v2792_v28, %v2709_v17  ;;  %v10043_v6 = vadd.f32 %v2794_v46, %v2711_v31  ;;  %v2819_v7 = vrot.slane %v10029_v58, 1 }
 0x635   : > { %v2820_v15 = vrot.slane %v10031_v13, 1  ;;  %v2821_v2 = vrot.slane %v10033_v33, 1  ;;  %v2822_v48 = vrot.slane %v10035_v44, 1  ;;  %v2823_v23 = vrot.slane %v10037_v36, 1 }
 0x636   : > { %v2824_v35 = vrot.slane %v10039_v0, 1  ;;  %v2825_v12 = vrot.slane %v10041_v37, 1  ;;  %v6397_v49 = vmul.f32 -1.442695, %v2819_v7  ;;  %v2826_v19 = vrot.slane %v10043_v6, 1 }
 0x637   : > { %v6398_v26 = vmul.f32 -1.442695, %v2820_v15  ;;  %v6399_v16 = vmul.f32 -1.442695, %v2821_v2  ;;  %v6400_v18 = vmul.f32 -1.442695, %v2822_v48 }
 0x638   : > { %6836 = vpow2.f32 %v6397_v49  ;;  %v6401_v40 = vmul.f32 -1.442695, %v2823_v23  ;;  %v6402_v61 = vmul.f32 -1.442695, %v2824_v35  ;;  %v6403_v60 = vmul.f32 -1.442695, %v2825_v12 }
 0x639   : > { %6838 = vpow2.f32 %v6398_v26  ;;  %v6404_v41 = vmul.f32 -1.442695, %v2826_v19  ;;  %v3003_v22 = vmax.f32 %v10029_v58, 0.0  ;;  %v3004_v21 = vmax.f32 %v10031_v13, 0.0 }
 0x63a   : > { %6840 = vpow2.f32 %v6399_v16  ;;  %v3005_v14 = vmax.f32 %v10033_v33, 0.0  ;;  %v3006_v5 = vmax.f32 %v10035_v44, 0.0  ;;  %v3007_v54 = vmax.f32 %v10037_v36, 0.0 }
 0x63b   : > { %6842 = vpow2.f32 %v6400_v18  ;;  %v3008_v32 = vmax.f32 %v10039_v0, 0.0  ;;  %v3009_v36 = vmax.f32 %v10041_v37, 0.0 }
 0x63c   : > { %6844 = vpow2.f32 %v6401_v40 }
 0x63d   : > { %6846 = vpow2.f32 %v6402_v61 }
 0x63e   : > { %v6837_v51 = vpop.eup %6836  ;;  %6848 = vpow2.f32 %v6403_v60 }
 0x63f   : > { %v6839_v63 = vpop.eup %6838  ;;  %v10053_v57 = vadd.f32 1.0, %v6837_v51  ;;  %6850 = vpow2.f32 %v6404_v41 }
 0x640   : > { %v6841_v20 = vpop.eup %6840  ;;  %v10055_v29 = vadd.f32 1.0, %v6839_v63 }
 0x641   : > { %v6843_v9 = vpop.eup %6842  ;;  %v10057_v27 = vadd.f32 1.0, %v6841_v20  ;;  %6852 = vrcp.f32 %v10053_v57  ;;  %v2878_v45 = vand.u32 2147483648, %v10053_v57  ;;  %vm2872_vm13 = vweird.f32 %v10053_v57 }
 0x642   : > { %v6845_v53 = vpop.eup %6844  ;;  %v10060_v24 = vadd.f32 1.0, %v6843_v9  ;;  %6854 = vrcp.f32 %v10055_v29  ;;  %v2893_v38 = vand.u32 2147483648, %v10055_v29  ;;  %v2876_v11 = vand.u32 2147483647, %v10053_v57 }
 0x643   : > { %v6847_v47 = vpop.eup %6846  ;;  %v10063_v30 = vadd.f32 1.0, %v6845_v53  ;;  %6856 = vrcp.f32 %v10057_v27  ;;  %v2891_v4 = vand.u32 2147483647, %v10055_v29  ;;  %v2908_v52 = vand.u32 2147483648, %v10057_v27 }
 0x644   : > { %v6849_v39 = vpop.eup %6848  ;;  %v10072_v50 = vadd.f32 1.0, %v6847_v47  ;;  %6858 = vrcp.f32 %v10060_v24  ;;  %v2879_v46 = vor.u32 1.1754944e-38, %v2878_v45  ;;  %vm2887_vm5 = vweird.f32 %v10055_v29 }
 0x645   : > { %v6851_v56 = vpop.eup %6850  ;;  %6860 = vrcp.f32 %v10063_v30  ;;  %v10086_v3 = vadd.f32 1.0, %v6849_v39  ;;  %v10091_v17 = vor.u32 1.1754944e-38, %v2893_v38  ;;  %vm2902_vm14 = vweird.f32 %v10057_v27 }
 0x646   : > { %v10093_v31 = vadd.f32 1.0, %v6851_v56  ;;  %v2906_v15 = vand.u32 2147483647, %v10057_v27  ;;  %v2923_v2 = vand.u32 2147483648, %v10060_v24  ;;  %v2921_v35 = vand.u32 2147483647, %v10060_v24 }
 0x647   : > { %v10077_v62 = vpop.eup %6852  ;;  %v2936_v12 = vand.u32 2147483647, %v10063_v30  ;;  %6862 = vrcp.f32 %v10072_v50  ;;  %vm10106_vm4 = vcmp.eq.f32.partialorder %v2876_v11, 8.507059e+37  ;;  %v2909_v18 = vor.u32 1.1754944e-38, %v2908_v52 }
 0x648   : > { %v10084_v43 = vpop.eup %6854  ;;  %v2868_v28 = vmul.f32 %v10077_v62, %v10053_v57  ;;  %vm2873_vm1 = vweird.f32 %v10077_v62  ;;  %vm2917_vm15 = vweird.f32 %v10060_v24  ;;  %vm10115_vm12 = vcmp.eq.f32.partialorder %v2891_v4, 8.507059e+37 }
 0x649   : > { %v2883_v7 = vmul.f32 %v10084_v43, %v10055_v29  ;;  %v10100_v48 = vpop.eup %6856  ;;  %vm2888_vm9 = vweird.f32 %v10084_v43  ;;  %v2938_v60 = vand.u32 2147483648, %v10063_v30  ;;  %vm10122_vm10 = vcmp.eq.f32.partialorder %v2906_v15, 8.507059e+37  ;;  %vm10145_vm11 = vmor %vm2872_vm13, %vm2873_vm1 }
 0x64a   : > { %v2869_v23 = vsub.f32 1.0, %v2868_v28  ;;  %v2898_v16 = vmul.f32 %v10100_v48, %v10057_v27  ;;  %v6859_v19 = vpop.eup %6858  ;;  %v2924_v53 = vor.u32 1.1754944e-38, %v2923_v2  ;;  %vm2903_vm3 = vweird.f32 %v10100_v48  ;;  %vm10158_vm7 = vmor %vm2887_vm5, %vm2888_vm9 }
 0x64b   : > { %v2884_v26 = vsub.f32 1.0, %v2883_v7  ;;  %v6861_v41 = vpop.eup %6860  ;;  %v2913_v9 = vmul.f32 %v6859_v19, %v10060_v24  ;;  %vm10129_vm6 = vcmp.eq.f32.partialorder %v2921_v35, 8.507059e+37  ;;  %vm10134_vm8 = vcmp.eq.f32.partialorder %v2936_v12, 8.507059e+37  ;;  %vm10170_vm1 = vmor %vm2902_vm14, %vm2903_vm3 }
 0x64c   : > { %v2870_v40 = vmul.f32 %v10077_v62, %v2869_v23  ;;  %v2899_v63 = vsub.f32 1.0, %v2898_v16  ;;  %v2928_v38 = vmul.f32 %v6861_v41, %v10063_v30  ;;  %v2951_v52 = vand.u32 2147483647, %v10072_v50 }
 0x64d   : > { %v2885_v51 = vmul.f32 %v10084_v43, %v2884_v26  ;;  %v2914_v4 = vsub.f32 1.0, %v2913_v9  ;;  %v6863_v28 = vpop.eup %6862  ;;  %vm2918_vm2 = vweird.f32 %v6859_v19  ;;  %v2939_v2 = vor.u32 1.1754944e-38, %v2938_v60 }
 0x64e   : > { %v2871_v47 = vadd.f32 %v10077_v62, %v2870_v40  ;;  %v2900_v11 = vmul.f32 %v10100_v48, %v2899_v63  ;;  %v2929_v15 = vsub.f32 1.0, %v2928_v38  ;;  %vm2947_vm0 = vweird.f32 %v10072_v50  ;;  %vm10189_vm14 = vmor %vm2917_vm15, %vm2918_vm2 }
 0x64f   : > { %v2886_v56 = vadd.f32 %v10084_v43, %v2885_v51  ;;  %6864 = vrcp.f32 %v10086_v3  ;;  %v2915_v12 = vmul.f32 %v6859_v19, %v2914_v4  ;;  %vm2933_vm13 = vweird.f32 %v6861_v41 }
 0x650   : > { %v2875_v23 = vsel %vm10145_vm11, %v10077_v62, %v2871_v47  ;;  %v2901_v35 = vadd.f32 %v10100_v48, %v2900_v11  ;;  %v2930_v29 = vmul.f32 %v6861_v41, %v2929_v15  ;;  %v2943_v16 = vmul.f32 %v6863_v28, %v10072_v50 }
 0x651   : > { %v2890_v26 = vsel %vm10158_vm7, %v10084_v43, %v2886_v56  ;;  %v2953_v40 = vand.u32 2147483648, %v10072_v50  ;;  %v2916_v51 = vadd.f32 %v6859_v19, %v2915_v12  ;;  %vm10179_vm5 = vcmp.eq.f32.partialorder %v2951_v52, 8.507059e+37  ;;  %v10319_v52 = vld [vmem:[#allocation10 + $0xb8] sm:$0xff] }
 0x652   : > { %v2905_v60 = vsel %vm10170_vm1, %v10100_v48, %v2901_v35  ;;  %v2966_v27 = vand.u32 2147483647, %v10086_v3  ;;  %v2880_v63 = vsel %vm10106_vm4, %v2879_v46, %v2875_v23  ;;  %v2931_v47 = vadd.f32 %v6861_v41, %v2930_v29 }
 0x653   : > { %v2944_v38 = vsub.f32 1.0, %v2943_v16  ;;  %v2968_v48 = vand.u32 2147483648, %v10086_v3  ;;  %v2895_v56 = vsel %vm10115_vm12, %v10091_v17, %v2890_v26  ;;  %v2920_v11 = vsel %vm10189_vm14, %v6859_v19, %v2916_v51 }
 0x654   : > { %vm13491_vm4 = vweird.f32 %v10063_v30  ;;  %vm2948_vm7 = vweird.f32 %v6863_v28  ;;  %vm2962_vm15 = vweird.f32 %v10086_v3  ;;  %6866 = vrcp.f32 %v10093_v31 }
 0x655   : > { %vm2934_vm9 = vmor %vm13491_vm4, %vm2933_vm13  ;;  %v6865_v24 = vpop.eup %6864  ;;  %v2910_v46 = vsel %vm10122_vm10, %v2909_v18, %v2905_v60  ;;  %v2945_v4 = vmul.f32 %v6863_v28, %v2944_v38  ;;  %v2954_v61 = vor.u32 1.1754944e-38, %v2953_v40  ;;  %v2925_v17 = vsel %vm10129_vm6, %v2924_v53, %v2920_v11 }
 0x656   : > { %v2935_v49 = vsel %vm2934_vm9, %v6861_v41, %v2931_v47  ;;  %v2958_v30 = vmul.f32 %v6865_v24, %v10086_v3  ;;  %vm10211_vm12 = vcmp.eq.f32.partialorder %v2966_v27, 8.507059e+37  ;;  %v2969_v7 = vor.u32 1.1754944e-38, %v2968_v48  ;;  %vm2949_vm10 = vmor %vm2947_vm0, %vm2948_vm7 }
 0x657   : > { %v2940_v19 = vsel %vm10134_vm8, %v2939_v2, %v2935_v49  ;;  %v2946_v15 = vadd.f32 %v6863_v28, %v2945_v4  ;;  %vm2963_vm3 = vweird.f32 %v6865_v24  ;;  %v2981_v18 = vand.u32 2147483647, %v10093_v31  ;;  %v10301_v49 = vld [vmem:[#allocation10 + $0xe8] sm:$0xff]  ;;  %v10304_v4 = vld [vmem:[#allocation10 + $0xd0] sm:$0xff] }
 0x658   : > { %v2983_v41 = vand.u32 2147483648, %v10093_v31  ;;  %v2959_v20 = vsub.f32 1.0, %v2958_v30  ;;  %v2987_v53 = vmul.f32 %v2880_v63, %v9941_v8  ;;  %v2988_v45 = vmul.f32 %v2895_v56, %v9945_v1  ;;  %vm2964_vm8 = vmor %vm2962_vm15, %vm2963_vm3  ;;  %v10316_v30 = vld [vmem:[#allocation10 + $0xb0] sm:$0xff] }
 0x659   : > { %v2989_v39 = vmul.f32 %v2910_v46, %v9947_v10  ;;  %v2950_v2 = vsel %vm2949_vm10, %v6863_v28, %v2946_v15  ;;  %v2990_v23 = vmul.f32 %v2925_v17, %v9950_v34  ;;  %v2991_v57 = vmul.f32 %v2940_v19, %v9952_v59  ;;  %v10325_v15 = vld [vmem:[#allocation10 + $0xa8] sm:$0xff] }
 0x65a   : > { %v2995_v35 = vsub.f32 1.0, %v2880_v63  ;;  %v6867_v12 = vpop.eup %6866  ;;  %v2955_v26 = vsel %vm10179_vm5, %v2954_v61, %v2950_v2  ;;  %v2960_v62 = vmul.f32 %v6865_v24, %v2959_v20  ;;  %v2996_v50 = vsub.f32 1.0, %v2895_v56  ;;  %v10307_v61 = vld [vmem:[#allocation10 + $0xd8] sm:$0xff]  ;;  %v10334_v20 = vld [vmem:[#allocation10 + $0x80] sm:$0xff] }
 0x65b   : > { %v2997_v29 = vsub.f32 1.0, %v2910_v46  ;;  %v2973_v16 = vmul.f32 %v6867_v12, %v10093_v31  ;;  %vm2978_vm6 = vweird.f32 %v6867_v12  ;;  %v2992_v8 = vmul.f32 %v2955_v26, %v9957_v55  ;;  %v10298_v46 = vld [vmem:[#allocation10 + $0xe0] sm:$0xff]  ;;  %13496 = vst [vmem:[#allocation34_spill] sm:$0xff] %v10334_v20 }
 0x65c   : > { %v2998_v1 = vsub.f32 1.0, %v2925_v17  ;;  %v2961_v10 = vadd.f32 %v6865_v24, %v2960_v62  ;;  %v2999_v28 = vsub.f32 1.0, %v2940_v19  ;;  %v3000_v40 = vsub.f32 1.0, %v2955_v26  ;;  %v10310_v17 = vld [vmem:[#allocation10 + $0xc0] sm:$0xff]  ;;  %v10313_v19 = vld [vmem:[#allocation10 + $0xc8] sm:$0xff]  ;;  %v10364_v62 = vld [vmem:[#allocation10 + $0x30] sm:$0xff] }
 0x65d   : > { %v3011_v34 = vmul.f32 %v3003_v22, %v2995_v35  ;;  %v2974_v59 = vsub.f32 1.0, %v2973_v16  ;;  %v3012_v60 = vmul.f32 %v3004_v21, %v2996_v50  ;;  %v3013_v51 = vmul.f32 %v3005_v14, %v2997_v29  ;;  %v10346_v2 = vld [vmem:[#allocation10 + $0x60] sm:$0xff]  ;;  %v10355_v35 = vld [vmem:[#allocation10 + $0x58] sm:$0xff]  ;;  %v10361_v26 = vld [vmem:[#allocation10 + $0x48] sm:$0xff]  ;;  %13506 = vst [vmem:[#allocation44_spill] sm:$0xff] %v10364_v62 }
 0x65e   : > { %v3014_v55 = vmul.f32 %v3006_v5, %v2998_v1  ;;  %v2965_v43 = vsel %vm2964_vm8, %v6865_v24, %v2961_v10  ;;  %v3015_v58 = vmul.f32 %v3007_v54, %v2999_v28  ;;  %v3016_v22 = vmul.f32 %v3008_v32, %v3000_v40  ;;  %v10295_v24 = vld [vmem:[#allocation10 + $0xf8] sm:$0xff]  ;;  %13500 = vst [vmem:[#allocation38_spill] sm:$0xff] %v10346_v2  ;;  %v10370_v29 = vld [vmem:[#allocation10 + $0x20] sm:$0xff]  ;;  %v10373_v16 = vld [vmem:[#allocation10 + $0x28] sm:$0xff] }
 0x65f   : > { %v10244_v3 = vadd.f32 %v3011_v34, %v2987_v53  ;;  %v2970_v13 = vsel %vm10211_vm12, %v2969_v7, %v2965_v43  ;;  %v2975_v21 = vmul.f32 %v6867_v12, %v2974_v59  ;;  %v10248_v33 = vadd.f32 %v3012_v60, %v2988_v45  ;;  %v10322_v7 = vld [vmem:[#allocation10 + $0xa0] sm:$0xff]  ;;  %v10337_v53 = vld [vmem:[#allocation10 + $0x88] sm:$0xff]  ;;  %v10340_v45 = vld [vmem:[#allocation10 + $0x70] sm:$0xff]  ;;  %13503 = vst [vmem:[#allocation41_spill] sm:$0xff] %v10355_v35 }
 0x660   : > { %v10250_v14 = vadd.f32 %v3013_v51, %v2989_v39  ;;  %v3001_v44 = vsub.f32 1.0, %v2970_v13  ;;  %v10253_v5 = vadd.f32 %v3014_v55, %v2990_v23  ;;  %v10255_v54 = vadd.f32 %v3015_v58, %v2991_v57  ;;  %13497 = vst [vmem:[#allocation35_spill] sm:$0xff] %v10337_v53  ;;  %v10343_v39 = vld [vmem:[#allocation10 + $0x78] sm:$0xff]  ;;  %v10349_v23 = vld [vmem:[#allocation10 + $0x68] sm:$0xff]  ;;  %v10352_v57 = vld [vmem:[#allocation10 + $0x50] sm:$0xff] }
 0x661   : > { %3027 = vst [vmem:[%s7841_s12 + $0x6] sm:$0x1] %v10244_v3  ;;  %v2976_v0 = vadd.f32 %v6867_v12, %v2975_v21  ;;  %vm2977_vm11 = vweird.f32 %v10093_v31  ;;  %v10260_v32 = vadd.f32 %v3016_v22, %v2992_v8  ;;  %v2984_v27 = vor.u32 1.1754944e-38, %v2983_v41  ;;  %v10331_v41 = vld [vmem:[#allocation10 + $0x98] sm:$0xff]  ;;  %v10376_v8 = vld [vmem:[#allocation10 + $0x10] sm:$0xff]  ;;  %v10382_v10 = vld [vmem:[#allocation10] sm:$0xff] }
 0x662   : > { %3028 = vst [vmem:[%s7841_s12 + $0x16] sm:$0x1] %v10248_v33  ;;  %vm2979_vm2 = vmor %vm2977_vm11, %vm2978_vm6  ;;  %v2993_v37 = vmul.f32 %v2970_v13, %v9967_v25  ;;  %v3017_v63 = vmul.f32 %v3009_v36, %v3001_v44  ;;  %vm2982_vm0 = vcmp.eq.f32.partialorder %v2981_v18, 8.507059e+37  ;;  %v3010_v48 = vmax.f32 %v10043_v6, 0.0  ;;  %v10292_v6 = vld [vmem:[#allocation10 + $0xf0] sm:$0xff]  ;;  %v10367_v50 = vld [vmem:[#allocation10 + $0x38] sm:$0xff] }
 0x663   : > { %3029 = vst [vmem:[%s7841_s12 + $0x26] sm:$0x1] %v10250_v14  ;;  %v2980_v9 = vsel %vm2979_vm2, %v6867_v12, %v2976_v0  ;;  %v10328_v18 = vld [vmem:[#allocation10 + $0x90] sm:$0xff]  ;;  %v10358_v12 = vld [vmem:[#allocation10 + $0x40] sm:$0xff]  ;;  %v10379_v1 = vld [vmem:[#allocation10 + $0x18] sm:$0xff]  ;;  %vm13514_vm13 = vcmask 1040384  }
 0x664   : > { %3030 = vst [vmem:[%s7841_s12 + $0x36] sm:$0x1] %v10253_v5  ;;  %v2985_v31 = vsel %vm2982_vm0, %v2984_v27, %v2980_v9  ;;  %v10270_v47 = vadd.f32 %v3017_v63, %v2993_v37  ;;  %v10385_v28 = vld [vmem:[#allocation10 + $0x8] sm:$0xff]  ;;  %vm13515_vm1 = vcmask 1041409   ;;  %vm13516_vm5 = vcmask 1042434  }
 0x665   : > { %3031 = vst [vmem:[%s7841_s12 + $0x46] sm:$0x1] %v10255_v54  ;;  %v3002_v38 = vsub.f32 1.0, %v2985_v31  ;;  %v2994_v25 = vmul.f32 %v2985_v31, %v9979_v42  ;;  %v3036_v60 = vld [vmem:[#allocation3 + $0x7] ss:$8 sm:$0x3] }
 0x666   : > { %3032 = vst [vmem:[%s7841_s12 + $0x56] sm:$0x1] %v10260_v32  ;;  %vm13517_vm14 = vcmask 1043459   ;;  %v3038_v22 = vld [vmem:[#allocation3 + $0x27] ss:$8 sm:$0x3] }
 0x667   : > { %3033 = vst [vmem:[%s7841_s12 + $0x66] sm:$0x1] %v10270_v47  ;;  %v3018_v56 = vmul.f32 %v3010_v48, %v3002_v38  ;;  %v3040_v13 = vld [vmem:[#allocation3 + $0x47] ss:$8 sm:$0x3]  ;;  %vm13518_vm4 = vcmask 1044484  }
 0x668   : > { %3059 = vst [vmem:[#allocation1] ss:$9 sm:$0xff] %v10244_v3  ;;  %v3042_v21 = vld [vmem:[#allocation3 + $0x67] ss:$8 sm:$0x3]  ;;  %vm13519_vm9 = vcmask 1045509  }
 0x669   : > { %3061 = vst [vmem:[#allocation1 + $0x1] ss:$9 sm:$0xff] %v10248_v33  ;;  %v10282_v11 = vadd.f32 %v3018_v56, %v2994_v25  ;;  %v3044_v37 = vld [vmem:[#allocation3 + $0x87] ss:$8 sm:$0x3]  ;;  %vm13520_vm7 = vcmask 1046534  }
 0x66a   : > { %3063 = vst [vmem:[#allocation1 + $0x2] ss:$9 sm:$0xff] %v10250_v14  ;;  %vm13521_vm15 = vcmask 1046528   ;;  %v3046_v48 = vld [vmem:[#allocation3 + $0xa7] ss:$8 sm:$0x3] }
 0x66b   : > { %3065 = vst [vmem:[#allocation1 + $0x3] ss:$9 sm:$0xff] %v10253_v5 }
 0x66c   : > { %3034 = vst [vmem:[%s7841_s12 + $0x76] sm:$0x1] %v10282_v11 }
 0x66d   : > { %3067 = vst [vmem:[#allocation1 + $0x4] ss:$9 sm:$0xff] %v10255_v54 }
 0x66e   : > { %3069 = vst [vmem:[#allocation1 + $0x5] ss:$9 sm:$0xff] %v10260_v32 }
 0x66f   : > { %3071 = vst [vmem:[#allocation1 + $0x6] ss:$9 sm:$0xff] %v10270_v47 }
 0x670   : > { %3073 = vst [vmem:[#allocation1 + $0x7] ss:$9 sm:$0xff] %v10282_v11 }
 0x671   : > { %13494 = vst [vmem:[#allocation55_spill] sm:$0xff] %v10328_v18 }
 0x672   : > { %13495 = vst [vmem:[#allocation33_spill] sm:$0xff] %v10331_v41 }
 0x673   : > { %13498 = vst [vmem:[#allocation36_spill] sm:$0xff] %v10340_v45 }
 0x674   : > { %13499 = vst [vmem:[#allocation37_spill] sm:$0xff] %v10343_v39 }
 0x675   : > { %13501 = vst [vmem:[#allocation39_spill] sm:$0xff] %v10349_v23 }
 0x676   : > { %13502 = vst [vmem:[#allocation40_spill] sm:$0xff] %v10352_v57 }
 0x677   : > { %v3074_v42 = vld [vmem:[#allocation1] sm:$0xff]  ;;  %13504 = vst [vmem:[#allocation42_spill] sm:$0xff] %v10358_v12 }
 0x678   : > { %3092 = vmatmul.f32.vlgmr.msrb.gmra.mxu2 %v3074_v42  ;;  %3112 = vmatmul.f32.vlgmr.msrb.gmra.mxu3 %v3074_v42  ;;  %13505 = vst [vmem:[#allocation43_spill] sm:$0xff] %v10361_v26 }
 0x679   : > { %4432 = vmatpush.msrb.mxu2 %v10292_v6  ;;  %4452 = vmatpush.msrb.mxu3 %v10295_v24  ;;  %13507 = vst [vmem:[#allocation45_spill] sm:$0xff] %v10367_v50 }
 0x67a   : > { %13508 = vst [vmem:[#allocation46_spill] sm:$0xff] %v10370_v29 }
 0x67b   : > { %4433 = vmatpush.msrb.mxu2 %v10298_v46  ;;  %4453 = vmatpush.msrb.mxu3 %v10301_v49  ;;  %13509 = vst [vmem:[#allocation47_spill] sm:$0xff] %v10373_v16 }
 0x67c   : > { %13510 = vst [vmem:[#allocation48_spill] sm:$0xff] %v10376_v8 }
 0x67d   : > { %4434 = vmatpush.msrb.mxu2 %v10304_v4  ;;  %4454 = vmatpush.msrb.mxu3 %v10307_v61  ;;  %13511 = vst [vmem:[#allocation49_spill] sm:$0xff] %v10379_v1 }
 0x67e   : > { %13512 = vst [vmem:[#allocation50_spill] sm:$0xff] %v10382_v10 }
 0x67f   : > { %4435 = vmatpush.msrb.mxu2 %v10310_v17  ;;  %4455 = vmatpush.msrb.mxu3 %v10313_v19  ;;  %13513 = vst [vmem:[#allocation51_spill] sm:$0xff] %v10385_v28 }
 0x681   : > { %4436 = vmatpush.msrb.mxu2 %v10316_v30  ;;  %4456 = vmatpush.msrb.mxu3 %v10319_v52 }
 0x683   : > { %4437 = vmatpush.msrb.mxu2 %v10322_v7  ;;  %4457 = vmatpush.msrb.mxu3 %v10325_v15 }
 0x685   : > { %4438 = vmatpush.msrb.mxu2 %v10328_v18  ;;  %4458 = vmatpush.msrb.mxu3 %v10331_v41 }
 0x687   : > { %4439 = vmatpush.msrb.mxu2 %v10334_v20  ;;  %4459 = vmatpush.msrb.mxu3 %v10337_v53 }
 0x689   : > { %4440 = vmatpush.msrb.mxu2 %v10340_v45  ;;  %4460 = vmatpush.msrb.mxu3 %v10343_v39 }
 0x68b   : > { %4441 = vmatpush.msrb.mxu2 %v10346_v2  ;;  %4461 = vmatpush.msrb.mxu3 %v10349_v23 }
 0x68d   : > { %4442 = vmatpush.msrb.mxu2 %v10352_v57  ;;  %4462 = vmatpush.msrb.mxu3 %v10355_v35 }
 0x68f   : > { %4443 = vmatpush.msrb.mxu2 %v10358_v12  ;;  %4463 = vmatpush.msrb.mxu3 %v10361_v26 }
 0x691   : > { %4444 = vmatpush.msrb.mxu2 %v10364_v62  ;;  %4464 = vmatpush.msrb.mxu3 %v10367_v50 }
 0x693   : > { %4445 = vmatpush.msrb.mxu2 %v10370_v29  ;;  %4465 = vmatpush.msrb.mxu3 %v10373_v16 }
 0x695   : > { %4446 = vmatpush.msrb.mxu2 %v10376_v8  ;;  %4466 = vmatpush.msrb.mxu3 %v10379_v1 }
 0x697   : > { %4447 = vmatpush.msrb.mxu2 %v10382_v10  ;;  %4467 = vmatpush.msrb.mxu3 %v10385_v28  ;;  %v3048_v28 = vld [vmem:[#allocation3 + $0xc7] ss:$8 sm:$0x3] }
 0x6fb   : > { %v3113_v40 = vpop.f32.mrf.mxu3  ;;  %v3093_v59 = vpop.f32.mrf.mxu2 }
 0x6fc   : > { %v3118_v34 = vrot.slane %v3113_v40, 7 }
 0x6fe   : > { %v3119_v51 = vsel %vm13514_vm13, %v3093_v59, %v3118_v34  ;;  %v3120_v55 = vsel %vm13515_vm1, %v3093_v59, %v3118_v34  ;;  %v3122_v43 = vsel %vm13516_vm5, %v3093_v59, %v3118_v34  ;;  %v3124_v58 = vsel %vm13517_vm14, %v3093_v59, %v3118_v34 }
 0x6ff   : > { %v3121_v44 = vrot.slane %v3120_v55, 1  ;;  %v3123_v36 = vrot.slane %v3122_v43, 2  ;;  %v3125_v0 = vrot.slane %v3124_v58, 3  ;;  %v3126_v27 = vsel %vm13518_vm4, %v3093_v59, %v3118_v34  ;;  %v3050_v55 = vld [vmem:[#allocation3 + $0xe7] ss:$8 sm:$0x3] }
 0x700   : > { %v3127_v63 = vrot.slane %v3126_v27, 4  ;;  %v3128_v9 = vsel %vm13519_vm9, %v3093_v59, %v3118_v34  ;;  %v3130_v31 = vsel %vm13520_vm7, %v3093_v59, %v3118_v34  ;;  %v3132_v38 = vsel %vm13521_vm15, %v3118_v34, %v3093_v59 }
 0x701   : > { %v3129_v25 = vrot.slane %v3128_v9, 5  ;;  %v3131_v56 = vrot.slane %v3130_v31, 6  ;;  %v3133_v42 = vrot.slane %v3132_v38, 7  ;;  %v10396_v40 = vadd.f32 %v3119_v51, %v3036_v60 }
 0x702   : > { %v10398_v43 = vadd.f32 %v3121_v44, %v3038_v22  ;;  %v10400_v58 = vadd.f32 %v3123_v36, %v3040_v13  ;;  %v10402_v10 = vadd.f32 %v3125_v0, %v3042_v21  ;;  %v10404_v27 = vadd.f32 %v3127_v63, %v3044_v37 }
 0x703   : > { %v10406_v1 = vadd.f32 %v3129_v25, %v3046_v48  ;;  %v10408_v8 = vadd.f32 %v3131_v56, %v3048_v28  ;;  %v10410_v34 = vadd.f32 %v3133_v42, %v3050_v55  ;;  %v3158_v59 = vrot.slane %v10396_v40, 1 }
 0x704   : > { %v3159_v60 = vrot.slane %v10398_v43, 1  ;;  %v3160_v51 = vrot.slane %v10400_v58, 1  ;;  %v3161_v22 = vrot.slane %v10402_v10, 1  ;;  %v3162_v13 = vrot.slane %v10404_v27, 1 }
 0x705   : > { %v3163_v21 = vrot.slane %v10406_v1, 1  ;;  %v3164_v44 = vrot.slane %v10408_v8, 1  ;;  %v6405_v36 = vmul.f32 -1.442695, %v3158_v59  ;;  %v3165_v63 = vrot.slane %v10410_v34, 1 }
 0x706   : > { %v6406_v0 = vmul.f32 -1.442695, %v3159_v60  ;;  %v6407_v28 = vmul.f32 -1.442695, %v3160_v51  ;;  %v6408_v37 = vmul.f32 -1.442695, %v3161_v22 }
 0x707   : > { %6868 = vpow2.f32 %v6405_v36  ;;  %v6409_v9 = vmul.f32 -1.442695, %v3162_v13  ;;  %v6410_v31 = vmul.f32 -1.442695, %v3163_v21  ;;  %v6411_v38 = vmul.f32 -1.442695, %v3164_v44 }
 0x708   : > { %6870 = vpow2.f32 %v6406_v0  ;;  %v6412_v48 = vmul.f32 -1.442695, %v3165_v63 }
 0x709   : > { %6872 = vpow2.f32 %v6407_v28 }
 0x70a   : > { %6874 = vpow2.f32 %v6408_v37 }
 0x70b   : > { %6876 = vpow2.f32 %v6409_v9 }
 0x70c   : > { %6878 = vpow2.f32 %v6410_v31 }
 0x70d   : > { %v6869_v25 = vpop.eup %6868  ;;  %6880 = vpow2.f32 %v6411_v38 }
 0x70e   : > { %v6871_v56 = vpop.eup %6870  ;;  %v10420_v42 = vadd.f32 1.0, %v6869_v25  ;;  %6882 = vpow2.f32 %v6412_v48 }
 0x70f   : > { %v6873_v55 = vpop.eup %6872  ;;  %v10422_v59 = vadd.f32 1.0, %v6871_v56 }
 0x710   : > { %v6875_v60 = vpop.eup %6874  ;;  %v10424_v51 = vadd.f32 1.0, %v6873_v55  ;;  %6884 = vrcp.f32 %v10420_v42  ;;  %v3217_v36 = vand.u32 2147483648, %v10420_v42  ;;  %vm3211_vm12 = vweird.f32 %v10420_v42 }
 0x711   : > { %v6877_v22 = vpop.eup %6876  ;;  %v10427_v13 = vadd.f32 1.0, %v6875_v60  ;;  %6886 = vrcp.f32 %v10422_v59  ;;  %v3232_v0 = vand.u32 2147483648, %v10422_v59  ;;  %v3215_v60 = vand.u32 2147483647, %v10420_v42 }
 0x712   : > { %v6879_v21 = vpop.eup %6878  ;;  %v10430_v44 = vadd.f32 1.0, %v6877_v22  ;;  %6888 = vrcp.f32 %v10424_v51  ;;  %v3230_v22 = vand.u32 2147483647, %v10422_v59  ;;  %v3247_v9 = vand.u32 2147483648, %v10424_v51 }
 0x713   : > { %v6881_v28 = vpop.eup %6880  ;;  %v10439_v48 = vadd.f32 1.0, %v6879_v21  ;;  %6890 = vrcp.f32 %v10427_v13  ;;  %v3218_v56 = vor.u32 1.1754944e-38, %v3217_v36  ;;  %vm3226_vm3 = vweird.f32 %v10422_v59 }
 0x714   : > { %v6883_v38 = vpop.eup %6882  ;;  %6892 = vrcp.f32 %v10430_v44  ;;  %v10453_v31 = vadd.f32 1.0, %v6881_v28  ;;  %v10458_v63 = vor.u32 1.1754944e-38, %v3232_v0  ;;  %vm3241_vm10 = vweird.f32 %v10424_v51 }
 0x715   : > { %v10460_v37 = vadd.f32 1.0, %v6883_v38  ;;  %v3245_v29 = vand.u32 2147483647, %v10424_v51  ;;  %v3262_v28 = vand.u32 2147483648, %v10427_v13  ;;  %v3260_v36 = vand.u32 2147483647, %v10427_v13 }
 0x716   : > { %v10444_v55 = vpop.eup %6884  ;;  %v3275_v26 = vand.u32 2147483647, %v10430_v44  ;;  %6894 = vrcp.f32 %v10439_v48  ;;  %vm10473_vm8 = vcmp.eq.f32.partialorder %v3215_v60, 8.507059e+37  ;;  %v3248_v35 = vor.u32 1.1754944e-38, %v3247_v9 }
 0x717   : > { %v10451_v21 = vpop.eup %6886  ;;  %v3207_v25 = vmul.f32 %v10444_v55, %v10420_v42  ;;  %vm3212_vm6 = vweird.f32 %v10444_v55  ;;  %vm3256_vm11 = vweird.f32 %v10427_v13  ;;  %vm10482_vm0 = vcmp.eq.f32.partialorder %v3230_v22, 8.507059e+37 }
 0x718   : > { %v3222_v16 = vmul.f32 %v10451_v21, %v10422_v59  ;;  %v10467_v50 = vpop.eup %6888  ;;  %vm3227_vm2 = vweird.f32 %v10451_v21  ;;  %v3277_v60 = vand.u32 2147483648, %v10430_v44  ;;  %vm10489_vm1 = vcmp.eq.f32.partialorder %v3245_v29, 8.507059e+37  ;;  %vm10512_vm9 = vmor %vm3211_vm12, %vm3212_vm6 }
 0x719   : > { %v3208_v62 = vsub.f32 1.0, %v3207_v25  ;;  %v3237_v12 = vmul.f32 %v10467_v50, %v10424_v51  ;;  %v6891_v25 = vpop.eup %6890  ;;  %v3263_v45 = vor.u32 1.1754944e-38, %v3262_v28  ;;  %vm3242_vm5 = vweird.f32 %v10467_v50  ;;  %vm10525_vm13 = vmor %vm3226_vm3, %vm3227_vm2 }
 0x71a   : > { %v3223_v38 = vsub.f32 1.0, %v3222_v16  ;;  %v6893_v16 = vpop.eup %6892  ;;  %vm10496_vm14 = vcmp.eq.f32.partialorder %v3260_v36, 8.507059e+37  ;;  %vm10501_vm4 = vcmp.eq.f32.partialorder %v3275_v26, 8.507059e+37  ;;  %v3290_v28 = vand.u32 2147483647, %v10439_v48  ;;  %vm10537_vm6 = vmor %vm3241_vm10, %vm3242_vm5 }
 0x71b   : > { %v3209_v57 = vmul.f32 %v10444_v55, %v3208_v62  ;;  %v3238_v39 = vsub.f32 1.0, %v3237_v12  ;;  %v3252_v62 = vmul.f32 %v6891_v25, %v10427_v13  ;;  %v3267_v20 = vmul.f32 %v6893_v16, %v10430_v44 }
 0x71c   : > { %v3224_v2 = vmul.f32 %v10451_v21, %v3223_v38  ;;  %vm3257_vm7 = vweird.f32 %v6891_v25  ;;  %v3278_v18 = vor.u32 1.1754944e-38, %v3277_v60  ;;  %vm3286_vm15 = vweird.f32 %v10439_v48 }
 0x71d   : > { %v3210_v22 = vadd.f32 %v10444_v55, %v3209_v57  ;;  %v3239_v29 = vmul.f32 %v10467_v50, %v3238_v39  ;;  %v3253_v41 = vsub.f32 1.0, %v3252_v62  ;;  %v6895_v57 = vpop.eup %6894  ;;  %v3268_v26 = vsub.f32 1.0, %v3267_v20  ;;  %vm10556_vm10 = vmor %vm3256_vm11, %vm3257_vm7 }
 0x71e   : > { %v3225_v12 = vadd.f32 %v10451_v21, %v3224_v2  ;;  %6896 = vrcp.f32 %v10453_v31  ;;  %vm3272_vm12 = vweird.f32 %v6893_v16  ;;  %v3282_v62 = vmul.f32 %v6895_v57, %v10439_v48 }
 0x71f   : > { %v3214_v39 = vsel %vm10512_vm9, %v10444_v55, %v3210_v22  ;;  %v3240_v42 = vadd.f32 %v10467_v50, %v3239_v29  ;;  %v3254_v20 = vmul.f32 %v6891_v25, %v3253_v41  ;;  %v3269_v59 = vmul.f32 %v6893_v16, %v3268_v26 }
 0x720   : > { %v3229_v60 = vsel %vm10525_vm13, %v10451_v21, %v3225_v12  ;;  %v3292_v22 = vand.u32 2147483648, %v10439_v48  ;;  %vm10546_vm3 = vcmp.eq.f32.partialorder %v3290_v28, 8.507059e+37  ;;  %v3305_v51 = vand.u32 2147483647, %v10453_v31 }
 0x721   : > { %v3244_v41 = vsel %vm10537_vm6, %v10467_v50, %v3240_v42  ;;  %v3255_v29 = vadd.f32 %v6891_v25, %v3254_v20  ;;  %v3219_v12 = vsel %vm10473_vm8, %v3218_v56, %v3214_v39  ;;  %v3270_v26 = vadd.f32 %v6893_v16, %v3269_v59 }
 0x722   : > { %v3283_v2 = vsub.f32 1.0, %v3282_v62  ;;  %v3307_v50 = vand.u32 2147483648, %v10453_v31  ;;  %v3234_v28 = vsel %vm10482_vm0, %v10458_v63, %v3229_v60  ;;  %vm13542_vm8 = vweird.f32 %v10430_v44 }
 0x723   : > { %v3259_v42 = vsel %vm10556_vm10, %v6891_v25, %v3255_v29  ;;  %vm3273_vm2 = vmor %vm13542_vm8, %vm3272_vm12  ;;  %vm3287_vm13 = vweird.f32 %v6895_v57  ;;  %vm3301_vm11 = vweird.f32 %v10453_v31  ;;  %6898 = vrcp.f32 %v10460_v37 }
 0x724   : > { %v6897_v13 = vpop.eup %6896  ;;  %v3249_v56 = vsel %vm10489_vm1, %v3248_v35, %v3244_v41  ;;  %v3274_v0 = vsel %vm3273_vm2, %v6893_v16, %v3270_v26  ;;  %v3284_v39 = vmul.f32 %v6895_v57, %v3283_v2  ;;  %v3293_v23 = vor.u32 1.1754944e-38, %v3292_v22  ;;  %vm3288_vm1 = vmor %vm3286_vm15, %vm3287_vm13 }
 0x725   : > { %v3264_v63 = vsel %vm10496_vm14, %v3263_v45, %v3259_v42  ;;  %v3279_v25 = vsel %vm10501_vm4, %v3278_v18, %v3274_v0  ;;  %v3297_v44 = vmul.f32 %v6897_v13, %v10453_v31  ;;  %vm10578_vm0 = vcmp.eq.f32.partialorder %v3305_v51, 8.507059e+37 }
 0x726   : > { %v3308_v60 = vor.u32 1.1754944e-38, %v3307_v50  ;;  %v3285_v55 = vadd.f32 %v6895_v57, %v3284_v39  ;;  %vm3302_vm5 = vweird.f32 %v6897_v13  ;;  %v3320_v35 = vand.u32 2147483647, %v10460_v37 }
 0x727   : > { %v3322_v16 = vand.u32 2147483648, %v10460_v37  ;;  %v3298_v53 = vsub.f32 1.0, %v3297_v44  ;;  %v3326_v18 = vmul.f32 %v3219_v12, %v10244_v3  ;;  %v3327_v45 = vmul.f32 %v3234_v28, %v10248_v33  ;;  %vm3303_vm4 = vmor %vm3301_vm11, %vm3302_vm5 }
 0x728   : > { %v3328_v9 = vmul.f32 %v3249_v56, %v10250_v14  ;;  %v3289_v38 = vsel %vm3288_vm1, %v6895_v57, %v3285_v55  ;;  %v3329_v59 = vmul.f32 %v3264_v63, %v10253_v5  ;;  %v3330_v62 = vmul.f32 %v3279_v25, %v10255_v54 }
 0x729   : > { %v3334_v22 = vsub.f32 1.0, %v3219_v12  ;;  %v6899_v41 = vpop.eup %6898  ;;  %v3294_v29 = vsel %vm10546_vm3, %v3293_v23, %v3289_v38  ;;  %v3299_v51 = vmul.f32 %v6897_v13, %v3298_v53  ;;  %v3335_v48 = vsub.f32 1.0, %v3234_v28 }
 0x72a   : > { %v3336_v36 = vsub.f32 1.0, %v3249_v56  ;;  %v3312_v26 = vmul.f32 %v6899_v41, %v10460_v37  ;;  %vm3317_vm14 = vweird.f32 %v6899_v41  ;;  %v3331_v3 = vmul.f32 %v3294_v29, %v10260_v32 }
 0x72b   : > { %v3337_v33 = vsub.f32 1.0, %v3264_v63  ;;  %v3300_v14 = vadd.f32 %v6897_v13, %v3299_v51  ;;  %v3338_v57 = vsub.f32 1.0, %v3279_v25  ;;  %v3339_v2 = vsub.f32 1.0, %v3294_v29  ;;  %v13568_v29 = vld [vmem:[#allocation49_spill] sm:$0xff]  ;;  %v13569_v51 = vld [vmem:[#allocation50_spill] sm:$0xff] }
 0x72c   : > { %v13545_v5 = vmax.f32 %v10396_v40, 0.0  ;;  %v3313_v21 = vsub.f32 1.0, %v3312_v26  ;;  %v13546_v12 = vmax.f32 %v10398_v43, 0.0  ;;  %v13547_v28 = vmax.f32 %v10400_v58, 0.0 }
 0x72d   : > { %v13548_v32 = vmax.f32 %v10402_v10, 0.0  ;;  %v3304_v0 = vsel %vm3303_vm4, %v6897_v13, %v3300_v14  ;;  %v13549_v39 = vmax.f32 %v10404_v27, 0.0  ;;  %v13550_v23 = vmax.f32 %v10406_v1, 0.0 }
 0x72e   : > { %v3350_v54 = vmul.f32 %v13545_v5, %v3334_v22  ;;  %v3351_v50 = vmul.f32 %v13546_v12, %v3335_v48  ;;  %v3352_v42 = vmul.f32 %v13547_v28, %v3336_v36  ;;  %v3309_v43 = vsel %vm10578_vm0, %v3308_v60, %v3304_v0  ;;  %v13566_v22 = vld [vmem:[#allocation47_spill] sm:$0xff]  ;;  %v3381_v12 = vld [vmem:[#allocation3 + $0x70] ss:$8 sm:$0x3] }
 0x72f   : > { %v3353_v56 = vmul.f32 %v13548_v32, %v3337_v33  ;;  %v3354_v40 = vmul.f32 %v13549_v39, %v3338_v57  ;;  %v3355_v31 = vmul.f32 %v13550_v23, %v3339_v2  ;;  %v3314_v25 = vmul.f32 %v6899_v41, %v3313_v21  ;;  %v13570_v48 = vld [vmem:[#allocation51_spill] sm:$0xff]  ;;  %v3375_v33 = vld [vmem:[#allocation3 + $0x10] ss:$8 sm:$0x3] }
 0x730   : > { %v10611_v63 = vadd.f32 %v3350_v54, %v3326_v18  ;;  %v10615_v58 = vadd.f32 %v3351_v50, %v3327_v45  ;;  %v10617_v44 = vadd.f32 %v3352_v42, %v3328_v9  ;;  %v3340_v10 = vsub.f32 1.0, %v3309_v43  ;;  %v3377_v54 = vld [vmem:[#allocation3 + $0x30] ss:$8 sm:$0x3] }
 0x731   : > { %v3348_v27 = vmax.f32 %v10408_v8, 0.0  ;;  %v10620_v13 = vadd.f32 %v3353_v56, %v3329_v59  ;;  %v10622_v55 = vadd.f32 %v3354_v40, %v3330_v62  ;;  %v3315_v1 = vadd.f32 %v6899_v41, %v3314_v25  ;;  %v13564_v59 = vld [vmem:[#allocation45_spill] sm:$0xff]  ;;  %v13565_v62 = vld [vmem:[#allocation46_spill] sm:$0xff] }
 0x732   : > { %3366 = vst [vmem:[%s7841_s12 + $0x7] sm:$0x1] %v10611_v63  ;;  %vm3316_vm9 = vweird.f32 %v10460_v37  ;;  %v10627_v20 = vadd.f32 %v3355_v31, %v3331_v3  ;;  %v3323_v60 = vor.u32 1.1754944e-38, %v3322_v16  ;;  %v3332_v8 = vmul.f32 %v3309_v43, %v10270_v47  ;;  %v3379_v21 = vld [vmem:[#allocation3 + $0x50] ss:$8 sm:$0x3] }
 0x733   : > { %3367 = vst [vmem:[%s7841_s12 + $0x17] sm:$0x1] %v10615_v58  ;;  %vm3318_vm7 = vmor %vm3316_vm9, %vm3317_vm14  ;;  %v3356_v53 = vmul.f32 %v3348_v27, %v3340_v10  ;;  %vm3321_vm15 = vcmp.eq.f32.partialorder %v3320_v35, 8.507059e+37  ;;  %v3349_v38 = vmax.f32 %v10410_v34, 0.0  ;;  %v13563_v34 = vld [vmem:[#allocation44_spill] sm:$0xff]  ;;  %vm13571_vm12 = vcmask 1040384  }
 0x734   : > { %3368 = vst [vmem:[%s7841_s12 + $0x27] sm:$0x1] %v10617_v44  ;;  %v3319_v18 = vsel %vm3318_vm7, %v6899_v41, %v3315_v1  ;;  %v13567_v41 = vld [vmem:[#allocation48_spill] sm:$0xff]  ;;  %vm13572_vm6 = vcmask 1041409   ;;  %vm13573_vm3 = vcmask 1042434   ;;  %vm13574_vm10 = vcmask 1043459  }
 0x735   : > { %3369 = vst [vmem:[%s7841_s12 + $0x37] sm:$0x1] %v10620_v13  ;;  %v3324_v37 = vsel %vm3321_vm15, %v3323_v60, %v3319_v18  ;;  %v10637_v45 = vadd.f32 %v3356_v53, %v3332_v8  ;;  %vm13575_vm8 = vcmask 1044484   ;;  %v3383_v56 = vld [vmem:[#allocation3 + $0x90] ss:$8 sm:$0x3] }
 0x736   : > { %3370 = vst [vmem:[%s7841_s12 + $0x47] sm:$0x1] %v10622_v55  ;;  %v3341_v9 = vsub.f32 1.0, %v3324_v37  ;;  %v3333_v47 = vmul.f32 %v3324_v37, %v10282_v11  ;;  %vm13576_vm2 = vcmask 1045509   ;;  %vm13577_vm13 = vcmask 1046534  }
 0x737   : > { %3371 = vst [vmem:[%s7841_s12 + $0x57] sm:$0x1] %v10627_v20  ;;  %vm13578_vm11 = vcmask 1046528   ;;  %v3385_v31 = vld [vmem:[#allocation3 + $0xb0] ss:$8 sm:$0x3] }
 0x738   : > { %3372 = vst [vmem:[%s7841_s12 + $0x67] sm:$0x1] %v10637_v45  ;;  %v3357_v16 = vmul.f32 %v3349_v38, %v3341_v9  ;;  %v3387_v1 = vld [vmem:[#allocation3 + $0xd0] ss:$8 sm:$0x3] }
 0x739   : > { %3398 = vst [vmem:[#allocation1] ss:$9 sm:$0xff] %v10611_v63  ;;  %v3389_v60 = vld [vmem:[#allocation3 + $0xf0] ss:$8 sm:$0x3] }
 0x73a   : > { %3400 = vst [vmem:[#allocation1 + $0x1] ss:$9 sm:$0xff] %v10615_v58  ;;  %v10649_v35 = vadd.f32 %v3357_v16, %v3333_v47 }
 0x73b   : > { %3402 = vst [vmem:[#allocation1 + $0x2] ss:$9 sm:$0xff] %v10617_v44 }
 0x73c   : > { %3404 = vst [vmem:[#allocation1 + $0x3] ss:$9 sm:$0xff] %v10620_v13 }
 0x73d   : > { %3373 = vst [vmem:[%s7841_s12 + $0x77] sm:$0x1] %v10649_v35 }
 0x73e   : > { %3406 = vst [vmem:[#allocation1 + $0x4] ss:$9 sm:$0xff] %v10622_v55 }
 0x73f   : > { %3408 = vst [vmem:[#allocation1 + $0x5] ss:$9 sm:$0xff] %v10627_v20 }
 0x740   : > { %3410 = vst [vmem:[#allocation1 + $0x6] ss:$9 sm:$0xff] %v10637_v45 }
 0x741   : > { %3412 = vst [vmem:[#allocation1 + $0x7] ss:$9 sm:$0xff] %v10649_v35 }
 0x748   : > { %v3413_v11 = vld [vmem:[#allocation1] sm:$0xff] }
 0x749   : > { %3431 = vmatmul.f32.vlgmr.msrb.gmra.mxu0 %v3413_v11  ;;  %3451 = vmatmul.f32.vlgmr.msrb.gmra.mxu1 %v3413_v11 }
 0x74a   : > { %4771 = vmatpush.msrb.mxu0 %v10292_v6  ;;  %4791 = vmatpush.msrb.mxu1 %v10295_v24  ;;  %v13551_v6 = vld [vmem:[#allocation55_spill] sm:$0xff]  ;;  %v13552_v24 = vld [vmem:[#allocation33_spill] sm:$0xff] }
 0x74c   : > { %4772 = vmatpush.msrb.mxu0 %v10298_v46  ;;  %4792 = vmatpush.msrb.mxu1 %v10301_v49  ;;  %v13553_v46 = vld [vmem:[#allocation34_spill] sm:$0xff]  ;;  %v13554_v49 = vld [vmem:[#allocation35_spill] sm:$0xff] }
 0x74e   : > { %4773 = vmatpush.msrb.mxu0 %v10304_v4  ;;  %4793 = vmatpush.msrb.mxu1 %v10307_v61  ;;  %v13555_v4 = vld [vmem:[#allocation36_spill] sm:$0xff]  ;;  %v13556_v61 = vld [vmem:[#allocation37_spill] sm:$0xff] }
 0x750   : > { %4774 = vmatpush.msrb.mxu0 %v10310_v17  ;;  %4794 = vmatpush.msrb.mxu1 %v10313_v19  ;;  %v13557_v17 = vld [vmem:[#allocation38_spill] sm:$0xff]  ;;  %v13558_v19 = vld [vmem:[#allocation39_spill] sm:$0xff] }
 0x752   : > { %4775 = vmatpush.msrb.mxu0 %v10316_v30  ;;  %4795 = vmatpush.msrb.mxu1 %v10319_v52  ;;  %v13559_v30 = vld [vmem:[#allocation40_spill] sm:$0xff]  ;;  %v13560_v52 = vld [vmem:[#allocation41_spill] sm:$0xff] }
 0x754   : > { %4776 = vmatpush.msrb.mxu0 %v10322_v7  ;;  %4796 = vmatpush.msrb.mxu1 %v10325_v15  ;;  %v13561_v7 = vld [vmem:[#allocation42_spill] sm:$0xff]  ;;  %v13562_v15 = vld [vmem:[#allocation43_spill] sm:$0xff] }
 0x756   : > { %4777 = vmatpush.msrb.mxu0 %v13551_v6  ;;  %4797 = vmatpush.msrb.mxu1 %v13552_v24 }
 0x758   : > { %4778 = vmatpush.msrb.mxu0 %v13553_v46  ;;  %4798 = vmatpush.msrb.mxu1 %v13554_v49 }
 0x75a   : > { %4779 = vmatpush.msrb.mxu0 %v13555_v4  ;;  %4799 = vmatpush.msrb.mxu1 %v13556_v61 }
 0x75c   : > { %4780 = vmatpush.msrb.mxu0 %v13557_v17  ;;  %4800 = vmatpush.msrb.mxu1 %v13558_v19 }
 0x75e   : > { %4781 = vmatpush.msrb.mxu0 %v13559_v30  ;;  %4801 = vmatpush.msrb.mxu1 %v13560_v52 }
 0x760   : > { %4782 = vmatpush.msrb.mxu0 %v13561_v7  ;;  %4802 = vmatpush.msrb.mxu1 %v13562_v15 }
 0x762   : > { %4783 = vmatpush.msrb.mxu0 %v13563_v34  ;;  %4803 = vmatpush.msrb.mxu1 %v13564_v59 }
 0x764   : > { %4784 = vmatpush.msrb.mxu0 %v13565_v62  ;;  %4804 = vmatpush.msrb.mxu1 %v13566_v22 }
 0x766   : > { %4785 = vmatpush.msrb.mxu0 %v13567_v41  ;;  %4805 = vmatpush.msrb.mxu1 %v13568_v29 }
 0x768   : > { %4786 = vmatpush.msrb.mxu0 %v13569_v51  ;;  %4806 = vmatpush.msrb.mxu1 %v13570_v48 }
 0x7c6   : > { %v3452_v36 = vpop.f32.mrf.mxu1  ;;  %v3432_v3 = vpop.f32.mrf.mxu0 }
 0x7c7   : > { %v3457_v26 = vrot.slane %v3452_v36, 7 }
 0x7c9   : > { %v3458_v14 = vsel %vm13571_vm12, %v3432_v3, %v3457_v26  ;;  %v3459_v57 = vsel %vm13572_vm6, %v3432_v3, %v3457_v26  ;;  %v3461_v2 = vsel %vm13573_vm3, %v3432_v3, %v3457_v26  ;;  %v3463_v5 = vsel %vm13574_vm10, %v3432_v3, %v3457_v26 }
 0x7ca   : > { %v3460_v50 = vrot.slane %v3459_v57, 1  ;;  %v3462_v28 = vrot.slane %v3461_v2, 2  ;;  %v3464_v42 = vrot.slane %v3463_v5, 3  ;;  %v3465_v32 = vsel %vm13575_vm8, %v3432_v3, %v3457_v26 }
 0x7cb   : > { %v3466_v0 = vrot.slane %v3465_v32, 4  ;;  %v3467_v39 = vsel %vm13576_vm2, %v3432_v3, %v3457_v26  ;;  %v3469_v40 = vsel %vm13577_vm13, %v3432_v3, %v3457_v26  ;;  %v3471_v23 = vsel %vm13578_vm11, %v3457_v26, %v3432_v3 }
 0x7cc   : > { %v3468_v43 = vrot.slane %v3467_v39, 5  ;;  %v3470_v25 = vrot.slane %v3469_v40, 6  ;;  %v3472_v10 = vrot.slane %v3471_v23, 7  ;;  %v10699_v27 = vadd.f32 %v3458_v14, %v3375_v33 }
 0x7cd   : > { %v10701_v8 = vadd.f32 %v3460_v50, %v3377_v54  ;;  %v10703_v53 = vadd.f32 %v3462_v28, %v3379_v21  ;;  %v10705_v18 = vadd.f32 %v3464_v42, %v3381_v12  ;;  %v10707_v37 = vadd.f32 %v3466_v0, %v3383_v56 }
 0x7ce   : > { %v10709_v9 = vadd.f32 %v3468_v43, %v3385_v31  ;;  %v10711_v38 = vadd.f32 %v3470_v25, %v3387_v1  ;;  %v10713_v47 = vadd.f32 %v3472_v10, %v3389_v60  ;;  %v3497_v16 = vrot.slane %v10699_v27, 1 }
 0x7cf   : > { %v3498_v11 = vrot.slane %v10701_v8, 1  ;;  %v3499_v6 = vrot.slane %v10703_v53, 1  ;;  %v3500_v24 = vrot.slane %v10705_v18, 1  ;;  %v3501_v46 = vrot.slane %v10707_v37, 1 }
 0x7d0   : > { %v3502_v49 = vrot.slane %v10709_v9, 1  ;;  %v3503_v4 = vrot.slane %v10711_v38, 1  ;;  %v6413_v61 = vmul.f32 -1.442695, %v3497_v16  ;;  %v3504_v52 = vrot.slane %v10713_v47, 1 }
 0x7d1   : > { %v6414_v17 = vmul.f32 -1.442695, %v3498_v11  ;;  %v6415_v19 = vmul.f32 -1.442695, %v3499_v6  ;;  %v6416_v30 = vmul.f32 -1.442695, %v3500_v24 }
 0x7d2   : > { %6900 = vpow2.f32 %v6413_v61  ;;  %v6417_v7 = vmul.f32 -1.442695, %v3501_v46  ;;  %v6418_v15 = vmul.f32 -1.442695, %v3502_v49  ;;  %v6419_v34 = vmul.f32 -1.442695, %v3503_v4 }
 0x7d3   : > { %6902 = vpow2.f32 %v6414_v17  ;;  %v6420_v59 = vmul.f32 -1.442695, %v3504_v52  ;;  %v3681_v54 = vmax.f32 %v10699_v27, 0.0  ;;  %v3682_v21 = vmax.f32 %v10701_v8, 0.0 }
 0x7d4   : > { %6904 = vpow2.f32 %v6415_v19  ;;  %v3683_v12 = vmax.f32 %v10703_v53, 0.0  ;;  %v3684_v50 = vmax.f32 %v10705_v18, 0.0  ;;  %v3685_v32 = vmax.f32 %v10707_v37, 0.0 }
 0x7d5   : > { %6906 = vpow2.f32 %v6416_v30  ;;  %v3686_v56 = vmax.f32 %v10709_v9, 0.0  ;;  %v3687_v37 = vmax.f32 %v10711_v38, 0.0 }
 0x7d6   : > { %6908 = vpow2.f32 %v6417_v7 }
 0x7d7   : > { %6910 = vpow2.f32 %v6418_v15 }
 0x7d8   : > { %v6901_v62 = vpop.eup %6900  ;;  %6912 = vpow2.f32 %v6419_v34 }
 0x7d9   : > { %v6903_v22 = vpop.eup %6902  ;;  %v10723_v41 = vadd.f32 1.0, %v6901_v62  ;;  %6914 = vpow2.f32 %v6420_v59 }
 0x7da   : > { %v6905_v29 = vpop.eup %6904  ;;  %v10725_v51 = vadd.f32 1.0, %v6903_v22 }
 0x7db   : > { %v6907_v48 = vpop.eup %6906  ;;  %v10727_v36 = vadd.f32 1.0, %v6905_v29  ;;  %6916 = vrcp.f32 %v10723_v41  ;;  %v3556_v57 = vand.u32 2147483648, %v10723_v41  ;;  %vm3550_vm0 = vweird.f32 %v10723_v41 }
 0x7dc   : > { %v6909_v26 = vpop.eup %6908  ;;  %v10730_v3 = vadd.f32 1.0, %v6907_v48  ;;  %6918 = vrcp.f32 %v10725_v51  ;;  %v3571_v2 = vand.u32 2147483648, %v10725_v51  ;;  %v3554_v39 = vand.u32 2147483647, %v10723_v41 }
 0x7dd   : > { %v6911_v33 = vpop.eup %6910  ;;  %v10733_v14 = vadd.f32 1.0, %v6909_v26  ;;  %6920 = vrcp.f32 %v10727_v36  ;;  %v3569_v40 = vand.u32 2147483647, %v10725_v51  ;;  %v3586_v23 = vand.u32 2147483648, %v10727_v36 }
 0x7de   : > { %v6913_v5 = vpop.eup %6912  ;;  %v10742_v42 = vadd.f32 1.0, %v6911_v33  ;;  %6922 = vrcp.f32 %v10730_v3  ;;  %v3557_v10 = vor.u32 1.1754944e-38, %v3556_v57  ;;  %vm3565_vm5 = vweird.f32 %v10725_v51 }
 0x7df   : > { %v6915_v28 = vpop.eup %6914  ;;  %6924 = vrcp.f32 %v10733_v14  ;;  %v10756_v43 = vadd.f32 1.0, %v6913_v5  ;;  %v10761_v1 = vor.u32 1.1754944e-38, %v3571_v2  ;;  %vm3580_vm1 = vweird.f32 %v10727_v36 }
 0x7e0   : > { %v10763_v60 = vadd.f32 1.0, %v6915_v28  ;;  %v3584_v11 = vand.u32 2147483647, %v10727_v36  ;;  %v3601_v6 = vand.u32 2147483648, %v10730_v3  ;;  %v3599_v49 = vand.u32 2147483647, %v10730_v3 }
 0x7e1   : > { %v10747_v0 = vpop.eup %6916  ;;  %v3614_v4 = vand.u32 2147483647, %v10733_v14  ;;  %6926 = vrcp.f32 %v10742_v42  ;;  %vm10776_vm4 = vcmp.eq.f32.partialorder %v3554_v39, 8.507059e+37  ;;  %v3587_v30 = vor.u32 1.1754944e-38, %v3586_v23 }
 0x7e2   : > { %v10754_v31 = vpop.eup %6918  ;;  %v3546_v25 = vmul.f32 %v10747_v0, %v10723_v41  ;;  %vm3551_vm14 = vweird.f32 %v10747_v0  ;;  %vm3595_vm9 = vweird.f32 %v10730_v3  ;;  %vm10785_vm15 = vcmp.eq.f32.partialorder %v3569_v40, 8.507059e+37 }
 0x7e3   : > { %v3561_v16 = vmul.f32 %v10754_v31, %v10725_v51  ;;  %v10770_v24 = vpop.eup %6920  ;;  %vm3566_vm7 = vweird.f32 %v10754_v31  ;;  %v3616_v34 = vand.u32 2147483648, %v10733_v14  ;;  %vm10792_vm6 = vcmp.eq.f32.partialorder %v3584_v11, 8.507059e+37  ;;  %vm10815_vm2 = vmor %vm3550_vm0, %vm3551_vm14 }
 0x7e4   : > { %v3547_v46 = vsub.f32 1.0, %v3546_v25  ;;  %v3576_v19 = vmul.f32 %v10770_v24, %v10727_v36  ;;  %v6923_v52 = vpop.eup %6922  ;;  %v3602_v26 = vor.u32 1.1754944e-38, %v3601_v6  ;;  %vm3581_vm3 = vweird.f32 %v10770_v24  ;;  %vm10828_vm12 = vmor %vm3565_vm5, %vm3566_vm7 }
 0x7e5   : > { %v3562_v17 = vsub.f32 1.0, %v3561_v16  ;;  %v6925_v59 = vpop.eup %6924  ;;  %v3591_v48 = vmul.f32 %v6923_v52, %v10730_v3  ;;  %vm10799_vm10 = vcmp.eq.f32.partialorder %v3599_v49, 8.507059e+37  ;;  %vm10804_vm8 = vcmp.eq.f32.partialorder %v3614_v4, 8.507059e+37  ;;  %vm10840_vm14 = vmor %vm3580_vm1, %vm3581_vm3 }
 0x7e6   : > { %v3548_v7 = vmul.f32 %v10747_v0, %v3547_v46  ;;  %v3577_v22 = vsub.f32 1.0, %v3576_v19  ;;  %v3606_v2 = vmul.f32 %v6925_v59, %v10733_v14  ;;  %v3629_v23 = vand.u32 2147483647, %v10742_v42 }
 0x7e7   : > { %v3563_v62 = vmul.f32 %v10754_v31, %v3562_v17  ;;  %v3592_v40 = vsub.f32 1.0, %v3591_v48  ;;  %v6927_v25 = vpop.eup %6926  ;;  %vm3596_vm13 = vweird.f32 %v6923_v52  ;;  %v3617_v6 = vor.u32 1.1754944e-38, %v3616_v34 }
 0x7e8   : > { %v3549_v33 = vadd.f32 %v10747_v0, %v3548_v7  ;;  %v3578_v39 = vmul.f32 %v10770_v24, %v3577_v22  ;;  %v3607_v11 = vsub.f32 1.0, %v3606_v2  ;;  %vm3625_vm11 = vweird.f32 %v10742_v42  ;;  %vm10859_vm1 = vmor %vm3595_vm9, %vm3596_vm13 }
 0x7e9   : > { %v3564_v28 = vadd.f32 %v10754_v31, %v3563_v62  ;;  %6928 = vrcp.f32 %v10756_v43  ;;  %v3593_v4 = vmul.f32 %v6923_v52, %v3592_v40  ;;  %vm3611_vm0 = vweird.f32 %v6925_v59 }
 0x7ea   : > { %v3553_v46 = vsel %vm10815_vm2, %v10747_v0, %v3549_v33  ;;  %v3579_v49 = vadd.f32 %v10770_v24, %v3578_v39  ;;  %v3608_v51 = vmul.f32 %v6925_v59, %v3607_v11  ;;  %v3621_v19 = vmul.f32 %v6927_v25, %v10742_v42 }
 0x7eb   : > { %v3568_v17 = vsel %vm10828_vm12, %v10754_v31, %v3564_v28  ;;  %v3631_v7 = vand.u32 2147483648, %v10742_v42  ;;  %v3594_v62 = vadd.f32 %v6923_v52, %v3593_v4  ;;  %vm10849_vm5 = vcmp.eq.f32.partialorder %v3629_v23, 8.507059e+37  ;;  %v10989_v23 = vld [vmem:[#allocation10 + $0xb8] sm:$0xff] }
 0x7ec   : > { %v3583_v34 = vsel %vm10840_vm14, %v10770_v24, %v3579_v49  ;;  %v3644_v36 = vand.u32 2147483647, %v10756_v43  ;;  %v3558_v22 = vsel %vm10776_vm4, %v3557_v10, %v3553_v46  ;;  %v3609_v33 = vadd.f32 %v6925_v59, %v3608_v51 }
 0x7ed   : > { %v3622_v2 = vsub.f32 1.0, %v3621_v19  ;;  %v3646_v24 = vand.u32 2147483648, %v10756_v43  ;;  %v3573_v28 = vsel %vm10785_vm15, %v10761_v1, %v3568_v17  ;;  %v3598_v39 = vsel %vm10859_vm1, %v6923_v52, %v3594_v62 }
 0x7ee   : > { %vm13599_vm4 = vweird.f32 %v10733_v14  ;;  %vm3626_vm12 = vweird.f32 %v6927_v25  ;;  %vm3640_vm9 = vweird.f32 %v10756_v43  ;;  %6930 = vrcp.f32 %v10763_v60 }
 0x7ef   : > { %vm3612_vm7 = vmor %vm13599_vm4, %vm3611_vm0  ;;  %v6929_v3 = vpop.eup %6928  ;;  %v3588_v10 = vsel %vm10792_vm6, %v3587_v30, %v3583_v34  ;;  %v3623_v40 = vmul.f32 %v6927_v25, %v3622_v2  ;;  %v3632_v15 = vor.u32 1.1754944e-38, %v3631_v7  ;;  %v3603_v1 = vsel %vm10799_vm10, %v3602_v26, %v3598_v39 }
 0x7f0   : > { %v3613_v61 = vsel %vm3612_vm7, %v6925_v59, %v3609_v33  ;;  %v3636_v14 = vmul.f32 %v6929_v3, %v10756_v43  ;;  %vm10881_vm15 = vcmp.eq.f32.partialorder %v3644_v36, 8.507059e+37  ;;  %v3647_v16 = vor.u32 1.1754944e-38, %v3646_v24  ;;  %vm3627_vm6 = vmor %vm3625_vm11, %vm3626_vm12 }
 0x7f1   : > { %v3618_v52 = vsel %vm10804_vm8, %v3617_v6, %v3613_v61  ;;  %v3624_v11 = vadd.f32 %v6927_v25, %v3623_v40  ;;  %vm3641_vm3 = vweird.f32 %v6929_v3  ;;  %v3659_v30 = vand.u32 2147483647, %v10763_v60  ;;  %v10971_v61 = vld [vmem:[#allocation10 + $0xe8] sm:$0xff]  ;;  %v10974_v40 = vld [vmem:[#allocation10 + $0xd0] sm:$0xff] }
 0x7f2   : > { %v3661_v59 = vand.u32 2147483648, %v10763_v60  ;;  %v3637_v29 = vsub.f32 1.0, %v3636_v14  ;;  %v3665_v26 = vmul.f32 %v3558_v22, %v10611_v63  ;;  %v3666_v57 = vmul.f32 %v3573_v28, %v10615_v58  ;;  %vm3642_vm8 = vmor %vm3640_vm9, %vm3641_vm3  ;;  %v10986_v14 = vld [vmem:[#allocation10 + $0xb0] sm:$0xff] }
 0x7f3   : > { %v3667_v5 = vmul.f32 %v3588_v10, %v10617_v44  ;;  %v3628_v6 = vsel %vm3627_vm6, %v6927_v25, %v3624_v11  ;;  %v3668_v46 = vmul.f32 %v3603_v1, %v10620_v13  ;;  %v3669_v41 = vmul.f32 %v3618_v52, %v10622_v55  ;;  %v10995_v11 = vld [vmem:[#allocation10 + $0xa8] sm:$0xff] }
 0x7f4   : > { %v3673_v49 = vsub.f32 1.0, %v3558_v22  ;;  %v6931_v4 = vpop.eup %6930  ;;  %v3633_v17 = vsel %vm10849_vm5, %v3632_v15, %v3628_v6  ;;  %v3638_v0 = vmul.f32 %v6929_v3, %v3637_v29  ;;  %v3674_v42 = vsub.f32 1.0, %v3573_v28  ;;  %v10977_v15 = vld [vmem:[#allocation10 + $0xd8] sm:$0xff]  ;;  %v11004_v29 = vld [vmem:[#allocation10 + $0x80] sm:$0xff] }
 0x7f5   : > { %v3675_v51 = vsub.f32 1.0, %v3588_v10  ;;  %v3651_v19 = vmul.f32 %v6931_v4, %v10763_v60  ;;  %vm3656_vm10 = vweird.f32 %v6931_v4  ;;  %v3670_v63 = vmul.f32 %v3633_v17, %v10627_v20  ;;  %v10968_v10 = vld [vmem:[#allocation10 + $0xe0] sm:$0xff]  ;;  %13604 = vst [vmem:[#allocation54_spill] sm:$0xff] %v11004_v29 }
 0x7f6   : > { %v3676_v58 = vsub.f32 1.0, %v3603_v1  ;;  %v3639_v44 = vadd.f32 %v6929_v3, %v3638_v0  ;;  %v3677_v25 = vsub.f32 1.0, %v3618_v52  ;;  %v3678_v7 = vsub.f32 1.0, %v3633_v17  ;;  %v10980_v1 = vld [vmem:[#allocation10 + $0xc0] sm:$0xff]  ;;  %v10983_v52 = vld [vmem:[#allocation10 + $0xc8] sm:$0xff]  ;;  %v11034_v0 = vld [vmem:[#allocation10 + $0x30] sm:$0xff] }
 0x7f7   : > { %v3689_v13 = vmul.f32 %v3681_v54, %v3673_v49  ;;  %v3652_v55 = vsub.f32 1.0, %v3651_v19  ;;  %v3690_v34 = vmul.f32 %v3682_v21, %v3674_v42  ;;  %v3691_v62 = vmul.f32 %v3683_v12, %v3675_v51  ;;  %v11016_v6 = vld [vmem:[#allocation10 + $0x60] sm:$0xff]  ;;  %v11025_v49 = vld [vmem:[#allocation10 + $0x58] sm:$0xff]  ;;  %v11031_v17 = vld [vmem:[#allocation10 + $0x48] sm:$0xff]  ;;  %13614 = vst [vmem:[#allocation41_spill] sm:$0xff] %v11034_v0 }
 0x7f8   : > { %v3692_v20 = vmul.f32 %v3684_v50, %v3676_v58  ;;  %v3643_v31 = vsel %vm3642_vm8, %v6929_v3, %v3639_v44  ;;  %v3693_v27 = vmul.f32 %v3685_v32, %v3677_v25  ;;  %v3694_v54 = vmul.f32 %v3686_v56, %v3678_v7  ;;  %v10965_v3 = vld [vmem:[#allocation10 + $0xf8] sm:$0xff]  ;;  %13608 = vst [vmem:[#allocation35_spill] sm:$0xff] %v11016_v6  ;;  %v11040_v51 = vld [vmem:[#allocation10 + $0x20] sm:$0xff]  ;;  %v11043_v19 = vld [vmem:[#allocation10 + $0x28] sm:$0xff] }
 0x7f9   : > { %v10914_v43 = vadd.f32 %v3689_v13, %v3665_v26  ;;  %v3648_v8 = vsel %vm10881_vm15, %v3647_v16, %v3643_v31  ;;  %v3653_v21 = vmul.f32 %v6931_v4, %v3652_v55  ;;  %v10918_v53 = vadd.f32 %v3690_v34, %v3666_v57  ;;  %v10992_v16 = vld [vmem:[#allocation10 + $0xa0] sm:$0xff]  ;;  %v11007_v26 = vld [vmem:[#allocation10 + $0x88] sm:$0xff]  ;;  %v11010_v57 = vld [vmem:[#allocation10 + $0x70] sm:$0xff]  ;;  %13611 = vst [vmem:[#allocation38_spill] sm:$0xff] %v11025_v49 }
 0x7fa   : > { %v10920_v12 = vadd.f32 %v3691_v62, %v3667_v5  ;;  %v3679_v18 = vsub.f32 1.0, %v3648_v8  ;;  %v10923_v50 = vadd.f32 %v3692_v20, %v3668_v46  ;;  %v10925_v32 = vadd.f32 %v3693_v27, %v3669_v41  ;;  %13605 = vst [vmem:[#allocation55_spill] sm:$0xff] %v11007_v26  ;;  %v11013_v5 = vld [vmem:[#allocation10 + $0x78] sm:$0xff]  ;;  %v11019_v46 = vld [vmem:[#allocation10 + $0x68] sm:$0xff]  ;;  %v11022_v41 = vld [vmem:[#allocation10 + $0x50] sm:$0xff] }
 0x7fb   : > { %3705 = vst [vmem:[%s7841_s12 + $0x8] sm:$0x1] %v10914_v43  ;;  %v3654_v9 = vadd.f32 %v6931_v4, %v3653_v21  ;;  %vm3655_vm2 = vweird.f32 %v10763_v60  ;;  %v10930_v56 = vadd.f32 %v3694_v54, %v3670_v63  ;;  %v3662_v36 = vor.u32 1.1754944e-38, %v3661_v59  ;;  %v11001_v59 = vld [vmem:[#allocation10 + $0x98] sm:$0xff]  ;;  %v11046_v63 = vld [vmem:[#allocation10 + $0x10] sm:$0xff]  ;;  %v11052_v44 = vld [vmem:[#allocation10] sm:$0xff] }
 0x7fc   : > { %3706 = vst [vmem:[%s7841_s12 + $0x18] sm:$0x1] %v10918_v53  ;;  %vm3657_vm13 = vmor %vm3655_vm2, %vm3656_vm10  ;;  %v3671_v38 = vmul.f32 %v3648_v8, %v10637_v45  ;;  %v3695_v22 = vmul.f32 %v3687_v37, %v3679_v18  ;;  %vm3660_vm11 = vcmp.eq.f32.partialorder %v3659_v30, 8.507059e+37  ;;  %v3688_v24 = vmax.f32 %v10713_v47, 0.0  ;;  %v10962_v47 = vld [vmem:[#allocation10 + $0xf0] sm:$0xff]  ;;  %v11037_v42 = vld [vmem:[#allocation10 + $0x38] sm:$0xff] }
 0x7fd   : > { %3707 = vst [vmem:[%s7841_s12 + $0x28] sm:$0x1] %v10920_v12  ;;  %v3658_v48 = vsel %vm3657_vm13, %v6931_v4, %v3654_v9  ;;  %v10998_v30 = vld [vmem:[#allocation10 + $0x90] sm:$0xff]  ;;  %v11028_v4 = vld [vmem:[#allocation10 + $0x40] sm:$0xff]  ;;  %v11049_v58 = vld [vmem:[#allocation10 + $0x18] sm:$0xff]  ;;  %vm13622_vm0 = vcmask 1040384  }
 0x7fe   : > { %3708 = vst [vmem:[%s7841_s12 + $0x38] sm:$0x1] %v10923_v50  ;;  %v3663_v60 = vsel %vm3660_vm11, %v3662_v36, %v3658_v48  ;;  %v10940_v33 = vadd.f32 %v3695_v22, %v3671_v38  ;;  %v11055_v25 = vld [vmem:[#allocation10 + $0x8] sm:$0xff]  ;;  %vm13623_vm14 = vcmask 1041409   ;;  %vm13624_vm5 = vcmask 1042434  }
 0x7ff   : > { %3709 = vst [vmem:[%s7841_s12 + $0x48] sm:$0x1] %v10925_v32  ;;  %v3680_v2 = vsub.f32 1.0, %v3663_v60  ;;  %v3672_v45 = vmul.f32 %v3663_v60, %v10649_v35  ;;  %v3714_v34 = vld [vmem:[#allocation3 + $0x11] ss:$8 sm:$0x3] }
 0x800   : > { %3710 = vst [vmem:[%s7841_s12 + $0x58] sm:$0x1] %v10930_v56  ;;  %vm13625_vm1 = vcmask 1043459   ;;  %v3716_v54 = vld [vmem:[#allocation3 + $0x31] ss:$8 sm:$0x3] }
 0x801   : > { %3711 = vst [vmem:[%s7841_s12 + $0x68] sm:$0x1] %v10940_v33  ;;  %v3696_v28 = vmul.f32 %v3688_v24, %v3680_v2  ;;  %v3718_v8 = vld [vmem:[#allocation3 + $0x51] ss:$8 sm:$0x3]  ;;  %vm13626_vm4 = vcmask 1044484  }
 0x802   : > { %3737 = vst [vmem:[#allocation1] ss:$9 sm:$0xff] %v10914_v43  ;;  %v3720_v21 = vld [vmem:[#allocation3 + $0x71] ss:$8 sm:$0x3]  ;;  %vm13627_vm7 = vcmask 1045509  }
 0x803   : > { %3739 = vst [vmem:[#allocation1 + $0x1] ss:$9 sm:$0xff] %v10918_v53  ;;  %v10952_v39 = vadd.f32 %v3696_v28, %v3672_v45  ;;  %v3722_v38 = vld [vmem:[#allocation3 + $0x91] ss:$8 sm:$0x3]  ;;  %vm13628_vm12 = vcmask 1046534  }
 0x804   : > { %3741 = vst [vmem:[#allocation1 + $0x2] ss:$9 sm:$0xff] %v10920_v12  ;;  %vm13629_vm9 = vcmask 1046528   ;;  %v3724_v24 = vld [vmem:[#allocation3 + $0xb1] ss:$8 sm:$0x3] }
 0x805   : > { %3743 = vst [vmem:[#allocation1 + $0x3] ss:$9 sm:$0xff] %v10923_v50 }
 0x806   : > { %3712 = vst [vmem:[%s7841_s12 + $0x78] sm:$0x1] %v10952_v39 }
 0x807   : > { %3745 = vst [vmem:[#allocation1 + $0x4] ss:$9 sm:$0xff] %v10925_v32 }
 0x808   : > { %3747 = vst [vmem:[#allocation1 + $0x5] ss:$9 sm:$0xff] %v10930_v56 }
 0x809   : > { %3749 = vst [vmem:[#allocation1 + $0x6] ss:$9 sm:$0xff] %v10940_v33 }
 0x80a   : > { %3751 = vst [vmem:[#allocation1 + $0x7] ss:$9 sm:$0xff] %v10952_v39 }
 0x80b   : > { %13602 = vst [vmem:[#allocation52_spill] sm:$0xff] %v10998_v30 }
 0x80c   : > { %13603 = vst [vmem:[#allocation53_spill] sm:$0xff] %v11001_v59 }
 0x80d   : > { %13606 = vst [vmem:[#allocation33_spill] sm:$0xff] %v11010_v57 }
 0x80e   : > { %13607 = vst [vmem:[#allocation34_spill] sm:$0xff] %v11013_v5 }
 0x80f   : > { %13609 = vst [vmem:[#allocation36_spill] sm:$0xff] %v11019_v46 }
 0x810   : > { %13610 = vst [vmem:[#allocation37_spill] sm:$0xff] %v11022_v41 }
 0x811   : > { %v3752_v35 = vld [vmem:[#allocation1] sm:$0xff]  ;;  %13612 = vst [vmem:[#allocation39_spill] sm:$0xff] %v11028_v4 }
 0x812   : > { %3770 = vmatmul.f32.vlgmr.msra.gmra.mxu2 %v3752_v35  ;;  %3790 = vmatmul.f32.vlgmr.msra.gmra.mxu3 %v3752_v35  ;;  %13613 = vst [vmem:[#allocation40_spill] sm:$0xff] %v11031_v17 }
 0x813   : > { %5110 = vmatpush.msra.mxu2 %v10962_v47  ;;  %5130 = vmatpush.msra.mxu3 %v10965_v3  ;;  %13615 = vst [vmem:[#allocation42_spill] sm:$0xff] %v11037_v42 }
 0x814   : > { %13616 = vst [vmem:[#allocation43_spill] sm:$0xff] %v11040_v51 }
 0x815   : > { %5111 = vmatpush.msra.mxu2 %v10968_v10  ;;  %5131 = vmatpush.msra.mxu3 %v10971_v61  ;;  %13617 = vst [vmem:[#allocation44_spill] sm:$0xff] %v11043_v19 }
 0x816   : > { %13618 = vst [vmem:[#allocation45_spill] sm:$0xff] %v11046_v63 }
 0x817   : > { %5112 = vmatpush.msra.mxu2 %v10974_v40  ;;  %5132 = vmatpush.msra.mxu3 %v10977_v15  ;;  %13619 = vst [vmem:[#allocation46_spill] sm:$0xff] %v11049_v58 }
 0x818   : > { %13620 = vst [vmem:[#allocation47_spill] sm:$0xff] %v11052_v44 }
 0x819   : > { %5113 = vmatpush.msra.mxu2 %v10980_v1  ;;  %5133 = vmatpush.msra.mxu3 %v10983_v52  ;;  %13621 = vst [vmem:[#allocation48_spill] sm:$0xff] %v11055_v25 }
 0x81b   : > { %5114 = vmatpush.msra.mxu2 %v10986_v14  ;;  %5134 = vmatpush.msra.mxu3 %v10989_v23 }
 0x81d   : > { %5115 = vmatpush.msra.mxu2 %v10992_v16  ;;  %5135 = vmatpush.msra.mxu3 %v10995_v11 }
 0x81f   : > { %5116 = vmatpush.msra.mxu2 %v10998_v30  ;;  %5136 = vmatpush.msra.mxu3 %v11001_v59 }
 0x821   : > { %5117 = vmatpush.msra.mxu2 %v11004_v29  ;;  %5137 = vmatpush.msra.mxu3 %v11007_v26 }
 0x823   : > { %5118 = vmatpush.msra.mxu2 %v11010_v57  ;;  %5138 = vmatpush.msra.mxu3 %v11013_v5 }
 0x825   : > { %5119 = vmatpush.msra.mxu2 %v11016_v6  ;;  %5139 = vmatpush.msra.mxu3 %v11019_v46 }
 0x827   : > { %5120 = vmatpush.msra.mxu2 %v11022_v41  ;;  %5140 = vmatpush.msra.mxu3 %v11025_v49 }
 0x829   : > { %5121 = vmatpush.msra.mxu2 %v11028_v4  ;;  %5141 = vmatpush.msra.mxu3 %v11031_v17 }
 0x82b   : > { %5122 = vmatpush.msra.mxu2 %v11034_v0  ;;  %5142 = vmatpush.msra.mxu3 %v11037_v42 }
 0x82d   : > { %5123 = vmatpush.msra.mxu2 %v11040_v51  ;;  %5143 = vmatpush.msra.mxu3 %v11043_v19 }
 0x82f   : > { %5124 = vmatpush.msra.mxu2 %v11046_v63  ;;  %5144 = vmatpush.msra.mxu3 %v11049_v58 }
 0x831   : > { %5125 = vmatpush.msra.mxu2 %v11052_v44  ;;  %5145 = vmatpush.msra.mxu3 %v11055_v25  ;;  %v3726_v25 = vld [vmem:[#allocation3 + $0xd1] ss:$8 sm:$0x3] }
 0x895   : > { %v3791_v7 = vpop.f32.mrf.mxu3  ;;  %v3771_v55 = vpop.f32.mrf.mxu2 }
 0x896   : > { %v3796_v13 = vrot.slane %v3791_v7, 7 }
 0x898   : > { %v3797_v62 = vsel %vm13622_vm0, %v3771_v55, %v3796_v13  ;;  %v3798_v20 = vsel %vm13623_vm14, %v3771_v55, %v3796_v13  ;;  %v3800_v31 = vsel %vm13624_vm5, %v3771_v55, %v3796_v13  ;;  %v3802_v27 = vsel %vm13625_vm1, %v3771_v55, %v3796_v13 }
 0x899   : > { %v3799_v18 = vrot.slane %v3798_v20, 1  ;;  %v3801_v37 = vrot.slane %v3800_v31, 2  ;;  %v3803_v9 = vrot.slane %v3802_v27, 3  ;;  %v3804_v36 = vsel %vm13626_vm4, %v3771_v55, %v3796_v13  ;;  %v3728_v20 = vld [vmem:[#allocation3 + $0xf1] ss:$8 sm:$0x3] }
 0x89a   : > { %v3805_v22 = vrot.slane %v3804_v36, 4  ;;  %v3806_v48 = vsel %vm13627_vm7, %v3771_v55, %v3796_v13  ;;  %v3808_v60 = vsel %vm13628_vm12, %v3771_v55, %v3796_v13  ;;  %v3810_v2 = vsel %vm13629_vm9, %v3796_v13, %v3771_v55 }
 0x89b   : > { %v3807_v45 = vrot.slane %v3806_v48, 5  ;;  %v3809_v28 = vrot.slane %v3808_v60, 6  ;;  %v3811_v35 = vrot.slane %v3810_v2, 7  ;;  %v11066_v7 = vadd.f32 %v3797_v62, %v3714_v34 }
 0x89c   : > { %v11068_v31 = vadd.f32 %v3799_v18, %v3716_v54  ;;  %v11070_v27 = vadd.f32 %v3801_v37, %v3718_v8  ;;  %v11072_v44 = vadd.f32 %v3803_v9, %v3720_v21  ;;  %v11074_v36 = vadd.f32 %v3805_v22, %v3722_v38 }
 0x89d   : > { %v11076_v58 = vadd.f32 %v3807_v45, %v3724_v24  ;;  %v11078_v63 = vadd.f32 %v3809_v28, %v3726_v25  ;;  %v11080_v13 = vadd.f32 %v3811_v35, %v3728_v20  ;;  %v3836_v55 = vrot.slane %v11066_v7, 1 }
 0x89e   : > { %v3837_v34 = vrot.slane %v11068_v31, 1  ;;  %v3838_v62 = vrot.slane %v11070_v27, 1  ;;  %v3839_v54 = vrot.slane %v11072_v44, 1  ;;  %v3840_v8 = vrot.slane %v11074_v36, 1 }
 0x89f   : > { %v3841_v21 = vrot.slane %v11076_v58, 1  ;;  %v3842_v18 = vrot.slane %v11078_v63, 1  ;;  %v6421_v37 = vmul.f32 -1.442695, %v3836_v55  ;;  %v3843_v22 = vrot.slane %v11080_v13, 1 }
 0x8a0   : > { %v6422_v9 = vmul.f32 -1.442695, %v3837_v34  ;;  %v6423_v25 = vmul.f32 -1.442695, %v3838_v62  ;;  %v6424_v38 = vmul.f32 -1.442695, %v3839_v54 }
 0x8a1   : > { %6932 = vpow2.f32 %v6421_v37  ;;  %v6425_v48 = vmul.f32 -1.442695, %v3840_v8  ;;  %v6426_v60 = vmul.f32 -1.442695, %v3841_v21  ;;  %v6427_v2 = vmul.f32 -1.442695, %v3842_v18 }
 0x8a2   : > { %6934 = vpow2.f32 %v6422_v9  ;;  %v6428_v24 = vmul.f32 -1.442695, %v3843_v22 }
 0x8a3   : > { %6936 = vpow2.f32 %v6423_v25 }
 0x8a4   : > { %6938 = vpow2.f32 %v6424_v38 }
 0x8a5   : > { %6940 = vpow2.f32 %v6425_v48 }
 0x8a6   : > { %6942 = vpow2.f32 %v6426_v60 }
 0x8a7   : > { %v6933_v45 = vpop.eup %6932  ;;  %6944 = vpow2.f32 %v6427_v2 }
 0x8a8   : > { %v6935_v28 = vpop.eup %6934  ;;  %v11090_v35 = vadd.f32 1.0, %v6933_v45  ;;  %6946 = vpow2.f32 %v6428_v24 }
 0x8a9   : > { %v6937_v20 = vpop.eup %6936  ;;  %v11092_v55 = vadd.f32 1.0, %v6935_v28 }
 0x8aa   : > { %v6939_v34 = vpop.eup %6938  ;;  %v11094_v62 = vadd.f32 1.0, %v6937_v20  ;;  %6948 = vrcp.f32 %v11090_v35  ;;  %v3895_v37 = vand.u32 2147483648, %v11090_v35  ;;  %vm3889_vm15 = vweird.f32 %v11090_v35 }
 0x8ab   : > { %v6941_v54 = vpop.eup %6940  ;;  %v11097_v8 = vadd.f32 1.0, %v6939_v34  ;;  %6950 = vrcp.f32 %v11092_v55  ;;  %v3910_v9 = vand.u32 2147483648, %v11092_v55  ;;  %v3893_v34 = vand.u32 2147483647, %v11090_v35 }
 0x8ac   : > { %v6943_v21 = vpop.eup %6942  ;;  %v11100_v18 = vadd.f32 1.0, %v6941_v54  ;;  %6952 = vrcp.f32 %v11094_v62  ;;  %v3908_v54 = vand.u32 2147483647, %v11092_v55  ;;  %v3925_v48 = vand.u32 2147483648, %v11094_v62 }
 0x8ad   : > { %v6945_v25 = vpop.eup %6944  ;;  %v11109_v24 = vadd.f32 1.0, %v6943_v21  ;;  %6954 = vrcp.f32 %v11097_v8  ;;  %v3896_v28 = vor.u32 1.1754944e-38, %v3895_v37  ;;  %vm3904_vm3 = vweird.f32 %v11092_v55 }
 0x8ae   : > { %v6947_v2 = vpop.eup %6946  ;;  %6956 = vrcp.f32 %v11100_v18  ;;  %v11123_v60 = vadd.f32 1.0, %v6945_v25  ;;  %v11128_v22 = vor.u32 1.1754944e-38, %v3910_v9  ;;  %vm3919_vm6 = vweird.f32 %v11094_v62 }
 0x8af   : > { %v11130_v38 = vadd.f32 1.0, %v6947_v2  ;;  %v3923_v51 = vand.u32 2147483647, %v11094_v62  ;;  %v3940_v25 = vand.u32 2147483648, %v11097_v8  ;;  %v3938_v37 = vand.u32 2147483647, %v11097_v8 }
 0x8b0   : > { %v11114_v20 = vpop.eup %6948  ;;  %v3953_v17 = vand.u32 2147483647, %v11100_v18  ;;  %6958 = vrcp.f32 %v11109_v24  ;;  %vm11143_vm8 = vcmp.eq.f32.partialorder %v3893_v34, 8.507059e+37  ;;  %v3926_v49 = vor.u32 1.1754944e-38, %v3925_v48 }
 0x8b1   : > { %v11121_v21 = vpop.eup %6950  ;;  %v3885_v45 = vmul.f32 %v11114_v20, %v11090_v35  ;;  %vm3890_vm10 = vweird.f32 %v11114_v20  ;;  %vm3934_vm2 = vweird.f32 %v11097_v8  ;;  %vm11152_vm11 = vcmp.eq.f32.partialorder %v3908_v54, 8.507059e+37 }
 0x8b2   : > { %v3900_v19 = vmul.f32 %v11121_v21, %v11092_v55  ;;  %v11137_v42 = vpop.eup %6952  ;;  %vm3905_vm13 = vweird.f32 %v11121_v21  ;;  %v3955_v34 = vand.u32 2147483648, %v11100_v18  ;;  %vm11159_vm14 = vcmp.eq.f32.partialorder %v3923_v51, 8.507059e+37  ;;  %vm11182_vm7 = vmor %vm3889_vm15, %vm3890_vm10 }
 0x8b3   : > { %v3886_v0 = vsub.f32 1.0, %v3885_v45  ;;  %v3915_v4 = vmul.f32 %v11137_v42, %v11094_v62  ;;  %v6955_v45 = vpop.eup %6954  ;;  %v3941_v57 = vor.u32 1.1754944e-38, %v3940_v25  ;;  %vm3920_vm5 = vweird.f32 %v11137_v42  ;;  %vm11195_vm0 = vmor %vm3904_vm3, %vm3905_vm13 }
 0x8b4   : > { %v3901_v2 = vsub.f32 1.0, %v3900_v19  ;;  %v6957_v19 = vpop.eup %6956  ;;  %vm11166_vm1 = vcmp.eq.f32.partialorder %v3938_v37, 8.507059e+37  ;;  %vm11171_vm4 = vcmp.eq.f32.partialorder %v3953_v17, 8.507059e+37  ;;  %v3968_v25 = vand.u32 2147483647, %v11109_v24  ;;  %vm11207_vm10 = vmor %vm3919_vm6, %vm3920_vm5 }
 0x8b5   : > { %v3887_v41 = vmul.f32 %v11114_v20, %v3886_v0  ;;  %v3916_v5 = vsub.f32 1.0, %v3915_v4  ;;  %v3930_v0 = vmul.f32 %v6955_v45, %v11097_v8  ;;  %v3945_v29 = vmul.f32 %v6957_v19, %v11100_v18 }
 0x8b6   : > { %v3902_v6 = vmul.f32 %v11121_v21, %v3901_v2  ;;  %vm3935_vm12 = vweird.f32 %v6955_v45  ;;  %v3956_v30 = vor.u32 1.1754944e-38, %v3955_v34  ;;  %vm3964_vm9 = vweird.f32 %v11109_v24 }
 0x8b7   : > { %v3888_v54 = vadd.f32 %v11114_v20, %v3887_v41  ;;  %v3917_v51 = vmul.f32 %v11137_v42, %v3916_v5  ;;  %v3931_v59 = vsub.f32 1.0, %v3930_v0  ;;  %v6959_v41 = vpop.eup %6958  ;;  %v3946_v17 = vsub.f32 1.0, %v3945_v29  ;;  %vm11226_vm6 = vmor %vm3934_vm2, %vm3935_vm12 }
 0x8b8   : > { %v3903_v4 = vadd.f32 %v11121_v21, %v3902_v6  ;;  %6960 = vrcp.f32 %v11123_v60  ;;  %vm3950_vm15 = vweird.f32 %v6957_v19  ;;  %v3960_v0 = vmul.f32 %v6959_v41, %v11109_v24 }
 0x8b9   : > { %v3892_v5 = vsel %vm11182_vm7, %v11114_v20, %v3888_v54  ;;  %v3918_v35 = vadd.f32 %v11137_v42, %v3917_v51  ;;  %v3932_v29 = vmul.f32 %v6955_v45, %v3931_v59  ;;  %v3947_v55 = vmul.f32 %v6957_v19, %v3946_v17 }
 0x8ba   : > { %v3907_v34 = vsel %vm11195_vm0, %v11121_v21, %v3903_v4  ;;  %v3970_v54 = vand.u32 2147483648, %v11109_v24  ;;  %vm11216_vm3 = vcmp.eq.f32.partialorder %v3968_v25, 8.507059e+37  ;;  %v3983_v62 = vand.u32 2147483647, %v11123_v60 }
 0x8bb   : > { %v3922_v59 = vsel %vm11207_vm10, %v11137_v42, %v3918_v35  ;;  %v3933_v51 = vadd.f32 %v6955_v45, %v3932_v29  ;;  %v3897_v4 = vsel %vm11143_vm8, %v3896_v28, %v3892_v5  ;;  %v3948_v17 = vadd.f32 %v6957_v19, %v3947_v55 }
 0x8bc   : > { %v3961_v6 = vsub.f32 1.0, %v3960_v0  ;;  %v3985_v42 = vand.u32 2147483648, %v11123_v60  ;;  %v3912_v25 = vsel %vm11152_vm11, %v11128_v22, %v3907_v34  ;;  %vm13650_vm8 = vweird.f32 %v11100_v18 }
 0x8bd   : > { %v3937_v35 = vsel %vm11226_vm6, %v6955_v45, %v3933_v51  ;;  %vm3951_vm13 = vmor %vm13650_vm8, %vm3950_vm15  ;;  %vm3965_vm0 = vweird.f32 %v6959_v41  ;;  %vm3979_vm2 = vweird.f32 %v11123_v60  ;;  %6962 = vrcp.f32 %v11130_v38 }
 0x8be   : > { %v6961_v8 = vpop.eup %6960  ;;  %v3927_v28 = vsel %vm11159_vm14, %v3926_v49, %v3922_v59  ;;  %v3952_v9 = vsel %vm3951_vm13, %v6957_v19, %v3948_v17  ;;  %v3962_v5 = vmul.f32 %v6959_v41, %v3961_v6  ;;  %v3971_v46 = vor.u32 1.1754944e-38, %v3970_v54  ;;  %vm3966_vm14 = vmor %vm3964_vm9, %vm3965_vm0 }
 0x8bf   : > { %v3942_v22 = vsel %vm11166_vm1, %v3941_v57, %v3937_v35  ;;  %v3957_v45 = vsel %vm11171_vm4, %v3956_v30, %v3952_v9  ;;  %v3975_v18 = vmul.f32 %v6961_v8, %v11123_v60  ;;  %vm11248_vm11 = vcmp.eq.f32.partialorder %v3983_v62, 8.507059e+37 }
 0x8c0   : > { %v3986_v34 = vor.u32 1.1754944e-38, %v3985_v42  ;;  %v3963_v20 = vadd.f32 %v6959_v41, %v3962_v5  ;;  %vm3980_vm5 = vweird.f32 %v6961_v8  ;;  %v3998_v49 = vand.u32 2147483647, %v11130_v38 }
 0x8c1   : > { %v4000_v19 = vand.u32 2147483648, %v11130_v38  ;;  %v3976_v26 = vsub.f32 1.0, %v3975_v18  ;;  %v4004_v30 = vmul.f32 %v3897_v4, %v10914_v43  ;;  %v4005_v57 = vmul.f32 %v3912_v25, %v10918_v53  ;;  %vm3981_vm4 = vmor %vm3979_vm2, %vm3980_vm5 }
 0x8c2   : > { %v4006_v48 = vmul.f32 %v3927_v28, %v10920_v12  ;;  %v3967_v2 = vsel %vm3966_vm14, %v6959_v41, %v3963_v20  ;;  %v4007_v55 = vmul.f32 %v3942_v22, %v10923_v50  ;;  %v4008_v0 = vmul.f32 %v3957_v45, %v10925_v32 }
 0x8c3   : > { %v4012_v54 = vsub.f32 1.0, %v3897_v4  ;;  %v6963_v59 = vpop.eup %6962  ;;  %v3972_v51 = vsel %vm11216_vm3, %v3971_v46, %v3967_v2  ;;  %v3977_v62 = vmul.f32 %v6961_v8, %v3976_v26  ;;  %v4013_v24 = vsub.f32 1.0, %v3912_v25 }
 0x8c4   : > { %v4014_v37 = vsub.f32 1.0, %v3927_v28  ;;  %v3990_v17 = vmul.f32 %v6963_v59, %v11130_v38  ;;  %vm3995_vm1 = vweird.f32 %v6963_v59  ;;  %v4009_v43 = vmul.f32 %v3972_v51, %v10930_v56 }
 0x8c5   : > { %v4015_v53 = vsub.f32 1.0, %v3942_v22  ;;  %v3978_v12 = vadd.f32 %v6961_v8, %v3977_v62  ;;  %v4016_v41 = vsub.f32 1.0, %v3957_v45  ;;  %v4017_v6 = vsub.f32 1.0, %v3972_v51  ;;  %v13676_v51 = vld [vmem:[#allocation46_spill] sm:$0xff]  ;;  %v13677_v62 = vld [vmem:[#allocation47_spill] sm:$0xff] }
 0x8c6   : > { %v13653_v50 = vmax.f32 %v11066_v7, 0.0  ;;  %v3991_v21 = vsub.f32 1.0, %v3990_v17  ;;  %v13654_v4 = vmax.f32 %v11068_v31, 0.0  ;;  %v13655_v25 = vmax.f32 %v11070_v27, 0.0 }
 0x8c7   : > { %v13656_v56 = vmax.f32 %v11072_v44, 0.0  ;;  %v3982_v9 = vsel %vm3981_vm4, %v6961_v8, %v3978_v12  ;;  %v13657_v5 = vmax.f32 %v11074_v36, 0.0  ;;  %v13658_v46 = vmax.f32 %v11076_v58, 0.0 }
 0x8c8   : > { %v4028_v32 = vmul.f32 %v13653_v50, %v4012_v54  ;;  %v4029_v42 = vmul.f32 %v13654_v4, %v4013_v24  ;;  %v4030_v35 = vmul.f32 %v13655_v25, %v4014_v37  ;;  %v3987_v31 = vsel %vm11248_vm11, %v3986_v34, %v3982_v9  ;;  %v13674_v54 = vld [vmem:[#allocation44_spill] sm:$0xff]  ;;  %v4059_v4 = vld [vmem:[#allocation3 + $0x72] ss:$8 sm:$0x3] }
 0x8c9   : > { %v4031_v28 = vmul.f32 %v13656_v56, %v4015_v53  ;;  %v4032_v7 = vmul.f32 %v13657_v5, %v4016_v41  ;;  %v4033_v60 = vmul.f32 %v13658_v46, %v4017_v6  ;;  %v3992_v45 = vmul.f32 %v6963_v59, %v3991_v21  ;;  %v13678_v24 = vld [vmem:[#allocation48_spill] sm:$0xff]  ;;  %v4053_v53 = vld [vmem:[#allocation3 + $0x12] ss:$8 sm:$0x3] }
 0x8ca   : > { %v11281_v22 = vadd.f32 %v4028_v32, %v4004_v30  ;;  %v11285_v27 = vadd.f32 %v4029_v42, %v4005_v57  ;;  %v11287_v18 = vadd.f32 %v4030_v35, %v4006_v48  ;;  %v4018_v44 = vsub.f32 1.0, %v3987_v31  ;;  %v4055_v32 = vld [vmem:[#allocation3 + $0x32] ss:$8 sm:$0x3] }
 0x8cb   : > { %v4026_v36 = vmax.f32 %v11078_v63, 0.0  ;;  %v11290_v8 = vadd.f32 %v4031_v28, %v4007_v55  ;;  %v11292_v20 = vadd.f32 %v4032_v7, %v4008_v0  ;;  %v3993_v58 = vadd.f32 %v6963_v59, %v3992_v45  ;;  %v13672_v55 = vld [vmem:[#allocation42_spill] sm:$0xff]  ;;  %v13673_v0 = vld [vmem:[#allocation43_spill] sm:$0xff] }
 0x8cc   : > { %4044 = vst [vmem:[%s7841_s12 + $0x9] sm:$0x1] %v11281_v22  ;;  %vm3994_vm7 = vweird.f32 %v11130_v38  ;;  %v11297_v29 = vadd.f32 %v4033_v60, %v4009_v43  ;;  %v4001_v34 = vor.u32 1.1754944e-38, %v4000_v19  ;;  %v4010_v63 = vmul.f32 %v3987_v31, %v10940_v33  ;;  %v4057_v21 = vld [vmem:[#allocation3 + $0x52] ss:$8 sm:$0x3] }
 0x8cd   : > { %4045 = vst [vmem:[%s7841_s12 + $0x19] sm:$0x1] %v11285_v27  ;;  %vm3996_vm12 = vmor %vm3994_vm7, %vm3995_vm1  ;;  %v4034_v26 = vmul.f32 %v4026_v36, %v4018_v44  ;;  %vm3999_vm9 = vcmp.eq.f32.partialorder %v3998_v49, 8.507059e+37  ;;  %v4027_v2 = vmax.f32 %v11080_v13, 0.0  ;;  %v13671_v13 = vld [vmem:[#allocation41_spill] sm:$0xff]  ;;  %vm13679_vm15 = vcmask 1040384  }
 0x8ce   : > { %4046 = vst [vmem:[%s7841_s12 + $0x29] sm:$0x1] %v11287_v18  ;;  %v3997_v30 = vsel %vm3996_vm12, %v6963_v59, %v3993_v58  ;;  %v13675_v59 = vld [vmem:[#allocation45_spill] sm:$0xff]  ;;  %vm13680_vm10 = vcmask 1041409   ;;  %vm13681_vm3 = vcmask 1042434   ;;  %vm13682_vm6 = vcmask 1043459  }
 0x8cf   : > { %4047 = vst [vmem:[%s7841_s12 + $0x39] sm:$0x1] %v11290_v8  ;;  %v4002_v38 = vsel %vm3999_vm9, %v4001_v34, %v3997_v30  ;;  %v11307_v57 = vadd.f32 %v4034_v26, %v4010_v63  ;;  %vm13683_vm8 = vcmask 1044484   ;;  %v4061_v28 = vld [vmem:[#allocation3 + $0x92] ss:$8 sm:$0x3] }
 0x8d0   : > { %4048 = vst [vmem:[%s7841_s12 + $0x49] sm:$0x1] %v11292_v20  ;;  %v4019_v48 = vsub.f32 1.0, %v4002_v38  ;;  %v4011_v33 = vmul.f32 %v4002_v38, %v10952_v39  ;;  %vm13684_vm13 = vcmask 1045509   ;;  %vm13685_vm0 = vcmask 1046534  }
 0x8d1   : > { %4049 = vst [vmem:[%s7841_s12 + $0x59] sm:$0x1] %v11297_v29  ;;  %vm13686_vm2 = vcmask 1046528   ;;  %v4063_v60 = vld [vmem:[#allocation3 + $0xb2] ss:$8 sm:$0x3] }
 0x8d2   : > { %4050 = vst [vmem:[%s7841_s12 + $0x69] sm:$0x1] %v11307_v57  ;;  %v4035_v19 = vmul.f32 %v4027_v2, %v4019_v48  ;;  %v4065_v58 = vld [vmem:[#allocation3 + $0xd2] ss:$8 sm:$0x3] }
 0x8d3   : > { %4076 = vst [vmem:[#allocation1] ss:$9 sm:$0xff] %v11281_v22  ;;  %v4067_v34 = vld [vmem:[#allocation3 + $0xf2] ss:$8 sm:$0x3] }
 0x8d4   : > { %4078 = vst [vmem:[#allocation1 + $0x1] ss:$9 sm:$0xff] %v11285_v27  ;;  %v11319_v49 = vadd.f32 %v4035_v19, %v4011_v33 }
 0x8d5   : > { %4080 = vst [vmem:[#allocation1 + $0x2] ss:$9 sm:$0xff] %v11287_v18 }
 0x8d6   : > { %4082 = vst [vmem:[#allocation1 + $0x3] ss:$9 sm:$0xff] %v11290_v8 }
 0x8d7   : > { %4051 = vst [vmem:[%s7841_s12 + $0x79] sm:$0x1] %v11319_v49 }
 0x8d8   : > { %4084 = vst [vmem:[#allocation1 + $0x4] ss:$9 sm:$0xff] %v11292_v20 }
 0x8d9   : > { %4086 = vst [vmem:[#allocation1 + $0x5] ss:$9 sm:$0xff] %v11297_v29 }
 0x8da   : > { %4088 = vst [vmem:[#allocation1 + $0x6] ss:$9 sm:$0xff] %v11307_v57 }
 0x8db   : > { %4090 = vst [vmem:[#allocation1 + $0x7] ss:$9 sm:$0xff] %v11319_v49 }
 0x8e2   : > { %v4091_v39 = vld [vmem:[#allocation1] sm:$0xff] }
 0x8e3   : > { %4109 = vmatmul.f32.vlgmr.msra.gmra.mxu0 %v4091_v39  ;;  %4129 = vmatmul.f32.vlgmr.msra.gmra.mxu1 %v4091_v39 }
 0x8e4   : > { %5449 = vmatpush.msra.mxu0 %v10962_v47  ;;  %5469 = vmatpush.msra.mxu1 %v10965_v3  ;;  %v13659_v47 = vld [vmem:[#allocation52_spill] sm:$0xff]  ;;  %v13660_v3 = vld [vmem:[#allocation53_spill] sm:$0xff] }
 0x8e6   : > { %5450 = vmatpush.msra.mxu0 %v10968_v10  ;;  %5470 = vmatpush.msra.mxu1 %v10971_v61  ;;  %v13661_v10 = vld [vmem:[#allocation54_spill] sm:$0xff]  ;;  %v13662_v61 = vld [vmem:[#allocation55_spill] sm:$0xff] }
 0x8e8   : > { %5451 = vmatpush.msra.mxu0 %v10974_v40  ;;  %5471 = vmatpush.msra.mxu1 %v10977_v15  ;;  %v13663_v40 = vld [vmem:[#allocation33_spill] sm:$0xff]  ;;  %v13664_v15 = vld [vmem:[#allocation34_spill] sm:$0xff] }
 0x8ea   : > { %5452 = vmatpush.msra.mxu0 %v10980_v1  ;;  %5472 = vmatpush.msra.mxu1 %v10983_v52  ;;  %v13665_v1 = vld [vmem:[#allocation35_spill] sm:$0xff]  ;;  %v13666_v52 = vld [vmem:[#allocation36_spill] sm:$0xff] }
 0x8ec   : > { %5453 = vmatpush.msra.mxu0 %v10986_v14  ;;  %5473 = vmatpush.msra.mxu1 %v10989_v23  ;;  %v13667_v14 = vld [vmem:[#allocation37_spill] sm:$0xff]  ;;  %v13668_v23 = vld [vmem:[#allocation38_spill] sm:$0xff] }
 0x8ee   : > { %5454 = vmatpush.msra.mxu0 %v10992_v16  ;;  %5474 = vmatpush.msra.mxu1 %v10995_v11  ;;  %v13669_v16 = vld [vmem:[#allocation39_spill] sm:$0xff]  ;;  %v13670_v11 = vld [vmem:[#allocation40_spill] sm:$0xff] }
 0x8f0   : > { %5455 = vmatpush.msra.mxu0 %v13659_v47  ;;  %5475 = vmatpush.msra.mxu1 %v13660_v3 }
 0x8f2   : > { %5456 = vmatpush.msra.mxu0 %v13661_v10  ;;  %5476 = vmatpush.msra.mxu1 %v13662_v61 }
 0x8f4   : > { %5457 = vmatpush.msra.mxu0 %v13663_v40  ;;  %5477 = vmatpush.msra.mxu1 %v13664_v15 }
 0x8f6   : > { %5458 = vmatpush.msra.mxu0 %v13665_v1  ;;  %5478 = vmatpush.msra.mxu1 %v13666_v52 }
 0x8f8   : > { %5459 = vmatpush.msra.mxu0 %v13667_v14  ;;  %5479 = vmatpush.msra.mxu1 %v13668_v23 }
 0x8fa   : > { %5460 = vmatpush.msra.mxu0 %v13669_v16  ;;  %5480 = vmatpush.msra.mxu1 %v13670_v11 }
 0x8fc   : > { %5461 = vmatpush.msra.mxu0 %v13671_v13  ;;  %5481 = vmatpush.msra.mxu1 %v13672_v55 }
 0x8fe   : > { %5462 = vmatpush.msra.mxu0 %v13673_v0  ;;  %5482 = vmatpush.msra.mxu1 %v13674_v54 }
 0x900   : > { %5463 = vmatpush.msra.mxu0 %v13675_v59  ;;  %5483 = vmatpush.msra.mxu1 %v13676_v51 }
 0x902   : > { %5464 = vmatpush.msra.mxu0 %v13677_v62  ;;  %5484 = vmatpush.msra.mxu1 %v13678_v24 }
 0x960   : > { %v4130_v37 = vpop.f32.mrf.mxu1  ;;  %v4110_v43 = vpop.f32.mrf.mxu0 }
 0x961   : > { %v4135_v17 = vrot.slane %v4130_v37, 7 }
 0x963   : > { %v4136_v12 = vsel %vm13679_vm15, %v4110_v43, %v4135_v17  ;;  %v4137_v41 = vsel %vm13680_vm10, %v4110_v43, %v4135_v17  ;;  %v4139_v6 = vsel %vm13681_vm3, %v4110_v43, %v4135_v17  ;;  %v4141_v50 = vsel %vm13682_vm6, %v4110_v43, %v4135_v17 }
 0x964   : > { %v4138_v42 = vrot.slane %v4137_v41, 1  ;;  %v4140_v25 = vrot.slane %v4139_v6, 2  ;;  %v4142_v35 = vrot.slane %v4141_v50, 3  ;;  %v4143_v56 = vsel %vm13683_vm8, %v4110_v43, %v4135_v17 }
 0x965   : > { %v4144_v9 = vrot.slane %v4143_v56, 4  ;;  %v4145_v5 = vsel %vm13684_vm13, %v4110_v43, %v4135_v17  ;;  %v4147_v7 = vsel %vm13685_vm0, %v4110_v43, %v4135_v17  ;;  %v4149_v46 = vsel %vm13686_vm2, %v4135_v17, %v4110_v43 }
 0x966   : > { %v4146_v31 = vrot.slane %v4145_v5, 5  ;;  %v4148_v45 = vrot.slane %v4147_v7, 6  ;;  %v4150_v44 = vrot.slane %v4149_v46, 7  ;;  %v11369_v36 = vadd.f32 %v4136_v12, %v4053_v53 }
 0x967   : > { %v11371_v63 = vadd.f32 %v4138_v42, %v4055_v32  ;;  %v11373_v26 = vadd.f32 %v4140_v25, %v4057_v21  ;;  %v11375_v30 = vadd.f32 %v4142_v35, %v4059_v4  ;;  %v11377_v38 = vadd.f32 %v4144_v9, %v4061_v28 }
 0x968   : > { %v11379_v48 = vadd.f32 %v4146_v31, %v4063_v60  ;;  %v11381_v2 = vadd.f32 %v4148_v45, %v4065_v58  ;;  %v11383_v33 = vadd.f32 %v4150_v44, %v4067_v34  ;;  %v4175_v19 = vrot.slane %v11369_v36, 1 }
 0x969   : > { %v4176_v39 = vrot.slane %v11371_v63, 1  ;;  %v4177_v47 = vrot.slane %v11373_v26, 1  ;;  %v4178_v3 = vrot.slane %v11375_v30, 1  ;;  %v4179_v10 = vrot.slane %v11377_v38, 1 }
 0x96a   : > { %v4180_v61 = vrot.slane %v11379_v48, 1  ;;  %v4181_v40 = vrot.slane %v11381_v2, 1  ;;  %v6429_v15 = vmul.f32 -1.442695, %v4175_v19  ;;  %v4182_v23 = vrot.slane %v11383_v33, 1 }
 0x96b   : > { %v6430_v1 = vmul.f32 -1.442695, %v4176_v39  ;;  %v6431_v52 = vmul.f32 -1.442695, %v4177_v47  ;;  %v6432_v14 = vmul.f32 -1.442695, %v4178_v3 }
 0x96c   : > { %6964 = vpow2.f32 %v6429_v15  ;;  %v6433_v16 = vmul.f32 -1.442695, %v4179_v10  ;;  %v6434_v11 = vmul.f32 -1.442695, %v4180_v61  ;;  %v6435_v13 = vmul.f32 -1.442695, %v4181_v40 }
 0x96d   : > { %6966 = vpow2.f32 %v6430_v1  ;;  %v6436_v55 = vmul.f32 -1.442695, %v4182_v23  ;;  %v4359_v32 = vmax.f32 %v11369_v36, 0.0  ;;  %v4360_v21 = vmax.f32 %v11371_v63, 0.0 }
 0x96e   : > { %6968 = vpow2.f32 %v6431_v52  ;;  %v4361_v4 = vmax.f32 %v11373_v26, 0.0  ;;  %v4362_v42 = vmax.f32 %v11375_v30, 0.0  ;;  %v4363_v56 = vmax.f32 %v11377_v38, 0.0 }
 0x96f   : > { %6970 = vpow2.f32 %v6432_v14  ;;  %v4364_v28 = vmax.f32 %v11379_v48, 0.0  ;;  %v4365_v38 = vmax.f32 %v11381_v2, 0.0 }
 0x970   : > { %6972 = vpow2.f32 %v6433_v16 }
 0x971   : > { %6974 = vpow2.f32 %v6434_v11 }
 0x972   : > { %v6965_v0 = vpop.eup %6964  ;;  %6976 = vpow2.f32 %v6435_v13 }
 0x973   : > { %v6967_v54 = vpop.eup %6966  ;;  %v11393_v59 = vadd.f32 1.0, %v6965_v0  ;;  %6978 = vpow2.f32 %v6436_v55 }
 0x974   : > { %v6969_v51 = vpop.eup %6968  ;;  %v11395_v62 = vadd.f32 1.0, %v6967_v54 }
 0x975   : > { %v6971_v24 = vpop.eup %6970  ;;  %v11397_v37 = vadd.f32 1.0, %v6969_v51  ;;  %6980 = vrcp.f32 %v11393_v59  ;;  %v4234_v41 = vand.u32 2147483648, %v11393_v59  ;;  %vm4228_vm11 = vweird.f32 %v11393_v59 }
 0x976   : > { %v6973_v17 = vpop.eup %6972  ;;  %v11400_v43 = vadd.f32 1.0, %v6971_v24  ;;  %6982 = vrcp.f32 %v11395_v62  ;;  %v4249_v6 = vand.u32 2147483648, %v11395_v62  ;;  %v4232_v5 = vand.u32 2147483647, %v11393_v59 }
 0x977   : > { %v6975_v53 = vpop.eup %6974  ;;  %v11403_v12 = vadd.f32 1.0, %v6973_v17  ;;  %6984 = vrcp.f32 %v11397_v37  ;;  %v4247_v7 = vand.u32 2147483647, %v11395_v62  ;;  %v4264_v46 = vand.u32 2147483648, %v11397_v37 }
 0x978   : > { %v6977_v50 = vpop.eup %6976  ;;  %v11412_v35 = vadd.f32 1.0, %v6975_v53  ;;  %6986 = vrcp.f32 %v11400_v43  ;;  %v4235_v44 = vor.u32 1.1754944e-38, %v4234_v41  ;;  %vm4243_vm5 = vweird.f32 %v11395_v62 }
 0x979   : > { %v6979_v25 = vpop.eup %6978  ;;  %6988 = vrcp.f32 %v11403_v12  ;;  %v11426_v31 = vadd.f32 1.0, %v6977_v50  ;;  %v11431_v58 = vor.u32 1.1754944e-38, %v4249_v6  ;;  %vm4258_vm14 = vweird.f32 %v11397_v37 }
 0x97a   : > { %v11433_v34 = vadd.f32 1.0, %v6979_v25  ;;  %v4262_v39 = vand.u32 2147483647, %v11397_v37  ;;  %v4279_v47 = vand.u32 2147483648, %v11400_v43  ;;  %v4277_v61 = vand.u32 2147483647, %v11400_v43 }
 0x97b   : > { %v11417_v9 = vpop.eup %6980  ;;  %v4292_v40 = vand.u32 2147483647, %v11403_v12  ;;  %6990 = vrcp.f32 %v11412_v35  ;;  %vm11446_vm4 = vcmp.eq.f32.partialorder %v4232_v5, 8.507059e+37  ;;  %v4265_v14 = vor.u32 1.1754944e-38, %v4264_v46 }
 0x97c   : > { %v11424_v60 = vpop.eup %6982  ;;  %v4224_v45 = vmul.f32 %v11417_v9, %v11393_v59  ;;  %vm4229_vm1 = vweird.f32 %v11417_v9  ;;  %vm4273_vm7 = vweird.f32 %v11400_v43  ;;  %vm11455_vm9 = vcmp.eq.f32.partialorder %v4247_v7, 8.507059e+37 }
 0x97d   : > { %v4239_v19 = vmul.f32 %v11424_v60, %v11395_v62  ;;  %v11440_v3 = vpop.eup %6984  ;;  %vm4244_vm12 = vweird.f32 %v11424_v60  ;;  %v4294_v13 = vand.u32 2147483648, %v11403_v12  ;;  %vm11462_vm10 = vcmp.eq.f32.partialorder %v4262_v39, 8.507059e+37  ;;  %vm11485_vm13 = vmor %vm4228_vm11, %vm4229_vm1 }
 0x97e   : > { %v4225_v10 = vsub.f32 1.0, %v4224_v45  ;;  %v4254_v52 = vmul.f32 %v11440_v3, %v11397_v37  ;;  %v6987_v23 = vpop.eup %6986  ;;  %v4280_v17 = vor.u32 1.1754944e-38, %v4279_v47  ;;  %vm4259_vm3 = vweird.f32 %v11440_v3  ;;  %vm11498_vm15 = vmor %vm4243_vm5, %vm4244_vm12 }
 0x97f   : > { %v4240_v1 = vsub.f32 1.0, %v4239_v19  ;;  %v6989_v55 = vpop.eup %6988  ;;  %v4269_v24 = vmul.f32 %v6987_v23, %v11400_v43  ;;  %vm11469_vm6 = vcmp.eq.f32.partialorder %v4277_v61, 8.507059e+37  ;;  %vm11474_vm8 = vcmp.eq.f32.partialorder %v4292_v40, 8.507059e+37  ;;  %vm11510_vm1 = vmor %vm4258_vm14, %vm4259_vm3 }
 0x980   : > { %v4226_v16 = vmul.f32 %v11417_v9, %v4225_v10  ;;  %v4255_v54 = vsub.f32 1.0, %v4254_v52  ;;  %v4284_v6 = vmul.f32 %v6989_v55, %v11403_v12  ;;  %v4307_v46 = vand.u32 2147483647, %v11412_v35 }
 0x981   : > { %v4241_v0 = vmul.f32 %v11424_v60, %v4240_v1  ;;  %v4270_v7 = vsub.f32 1.0, %v4269_v24  ;;  %v6991_v45 = vpop.eup %6990  ;;  %vm4274_vm0 = vweird.f32 %v6987_v23  ;;  %v4295_v47 = vor.u32 1.1754944e-38, %v4294_v13 }
 0x982   : > { %v4227_v53 = vadd.f32 %v11417_v9, %v4226_v16  ;;  %v4256_v5 = vmul.f32 %v11440_v3, %v4255_v54  ;;  %v4285_v39 = vsub.f32 1.0, %v4284_v6  ;;  %vm4303_vm2 = vweird.f32 %v11412_v35  ;;  %vm11529_vm14 = vmor %vm4273_vm7, %vm4274_vm0 }
 0x983   : > { %v4242_v25 = vadd.f32 %v11424_v60, %v4241_v0  ;;  %6992 = vrcp.f32 %v11426_v31  ;;  %v4271_v40 = vmul.f32 %v6987_v23, %v4270_v7  ;;  %vm4289_vm11 = vweird.f32 %v6989_v55 }
 0x984   : > { %v4231_v10 = vsel %vm11485_vm13, %v11417_v9, %v4227_v53  ;;  %v4257_v61 = vadd.f32 %v11440_v3, %v4256_v5  ;;  %v4286_v62 = vmul.f32 %v6989_v55, %v4285_v39  ;;  %v4299_v52 = vmul.f32 %v6991_v45, %v11412_v35 }
 0x985   : > { %v4246_v1 = vsel %vm11498_vm15, %v11424_v60, %v4242_v25  ;;  %v4309_v16 = vand.u32 2147483648, %v11412_v35  ;;  %v4272_v0 = vadd.f32 %v6987_v23, %v4271_v40  ;;  %vm11519_vm5 = vcmp.eq.f32.partialorder %v4307_v46, 8.507059e+37  ;;  %v7326_v46 = vld [vmem:[#allocation10 + $0xb8] sm:$0xff] }
 0x986   : > { %v4261_v13 = vsel %vm11510_vm1, %v11440_v3, %v4257_v61  ;;  %v4322_v37 = vand.u32 2147483647, %v11426_v31  ;;  %v4236_v54 = vsel %vm11446_vm4, %v4235_v44, %v4231_v10  ;;  %v4287_v53 = vadd.f32 %v6989_v55, %v4286_v62 }
 0x987   : > { %v4300_v6 = vsub.f32 1.0, %v4299_v52  ;;  %v4324_v3 = vand.u32 2147483648, %v11426_v31  ;;  %v4251_v25 = vsel %vm11455_vm9, %v11431_v58, %v4246_v1  ;;  %v4276_v5 = vsel %vm11529_vm14, %v6987_v23, %v4272_v0 }
 0x988   : > { %vm13707_vm4 = vweird.f32 %v11403_v12  ;;  %vm4304_vm15 = vweird.f32 %v6991_v45  ;;  %vm4318_vm7 = vweird.f32 %v11426_v31  ;;  %6994 = vrcp.f32 %v11433_v34 }
 0x989   : > { %vm4290_vm12 = vmor %vm13707_vm4, %vm4289_vm11  ;;  %v6993_v43 = vpop.eup %6992  ;;  %v4266_v44 = vsel %vm11462_vm10, %v4265_v14, %v4261_v13  ;;  %v4301_v7 = vmul.f32 %v6991_v45, %v4300_v6  ;;  %v4310_v11 = vor.u32 1.1754944e-38, %v4309_v16  ;;  %v4281_v58 = vsel %vm11469_vm6, %v4280_v17, %v4276_v5 }
 0x98a   : > { %v4291_v15 = vsel %vm4290_vm12, %v6989_v55, %v4287_v53  ;;  %v4314_v12 = vmul.f32 %v6993_v43, %v11426_v31  ;;  %vm11551_vm9 = vcmp.eq.f32.partialorder %v4322_v37, 8.507059e+37  ;;  %v4325_v19 = vor.u32 1.1754944e-38, %v4324_v3  ;;  %vm4305_vm10 = vmor %vm4303_vm2, %vm4304_vm15 }
 0x98b   : > { %v4296_v23 = vsel %vm11474_vm8, %v4295_v47, %v4291_v15  ;;  %v4302_v39 = vadd.f32 %v6991_v45, %v4301_v7  ;;  %vm4319_vm3 = vweird.f32 %v6993_v43  ;;  %v4337_v14 = vand.u32 2147483647, %v11433_v34  ;;  %v7320_v15 = vld [vmem:[#allocation10 + $0xe8] sm:$0xff]  ;;  %v7321_v7 = vld [vmem:[#allocation10 + $0xd0] sm:$0xff] }
 0x98c   : > { %v4339_v55 = vand.u32 2147483648, %v11433_v34  ;;  %v4315_v51 = vsub.f32 1.0, %v4314_v12  ;;  %v4343_v17 = vmul.f32 %v4236_v54, %v11281_v22  ;;  %v4344_v41 = vmul.f32 %v4251_v25, %v11285_v27  ;;  %vm4320_vm8 = vmor %vm4318_vm7, %vm4319_vm3  ;;  %v7325_v12 = vld [vmem:[#allocation10 + $0xb0] sm:$0xff] }
 0x98d   : > { %v4345_v50 = vmul.f32 %v4266_v44, %v11287_v18  ;;  %v4306_v47 = vsel %vm4305_vm10, %v6991_v45, %v4302_v39  ;;  %v4346_v10 = vmul.f32 %v4281_v58, %v11290_v8  ;;  %v4347_v59 = vmul.f32 %v4296_v23, %v11292_v20  ;;  %v7328_v39 = vld [vmem:[#allocation10 + $0xa8] sm:$0xff] }
 0x98e   : > { %v4351_v61 = vsub.f32 1.0, %v4236_v54  ;;  %v6995_v40 = vpop.eup %6994  ;;  %v4311_v1 = vsel %vm11519_vm5, %v4310_v11, %v4306_v47  ;;  %v4316_v9 = vmul.f32 %v6993_v43, %v4315_v51  ;;  %v4352_v35 = vsub.f32 1.0, %v4251_v25  ;;  %v7322_v11 = vld [vmem:[#allocation10 + $0xd8] sm:$0xff]  ;;  %v7331_v51 = vld [vmem:[#allocation10 + $0x80] sm:$0xff] }
 0x98f   : > { %v4353_v62 = vsub.f32 1.0, %v4266_v44  ;;  %v4329_v52 = vmul.f32 %v6995_v40, %v11433_v34  ;;  %vm4334_vm6 = vweird.f32 %v6995_v40  ;;  %v4348_v22 = vmul.f32 %v4311_v1, %v11297_v29  ;;  %v7319_v44 = vld [vmem:[#allocation10 + $0xe0] sm:$0xff] }
 0x990   : > { %v4354_v27 = vsub.f32 1.0, %v4281_v58  ;;  %v4317_v18 = vadd.f32 %v6993_v43, %v4316_v9  ;;  %v4355_v45 = vsub.f32 1.0, %v4296_v23  ;;  %v4356_v16 = vsub.f32 1.0, %v4311_v1  ;;  %v7323_v58 = vld [vmem:[#allocation10 + $0xc0] sm:$0xff]  ;;  %v7324_v23 = vld [vmem:[#allocation10 + $0xc8] sm:$0xff]  ;;  %v7341_v9 = vld [vmem:[#allocation10 + $0x30] sm:$0xff] }
 0x991   : > { %v4367_v8 = vmul.f32 %v4359_v32, %v4351_v61  ;;  %v4330_v20 = vsub.f32 1.0, %v4329_v52  ;;  %v4368_v13 = vmul.f32 %v4360_v21, %v4352_v35  ;;  %v4369_v0 = vmul.f32 %v4361_v4, %v4353_v62  ;;  %v7335_v47 = vld [vmem:[#allocation10 + $0x60] sm:$0xff]  ;;  %v7338_v61 = vld [vmem:[#allocation10 + $0x58] sm:$0xff]  ;;  %v7340_v1 = vld [vmem:[#allocation10 + $0x48] sm:$0xff] }
 0x992   : > { %v4370_v29 = vmul.f32 %v4362_v42, %v4354_v27  ;;  %v4321_v60 = vsel %vm4320_vm8, %v6993_v43, %v4317_v18  ;;  %v4371_v36 = vmul.f32 %v4363_v56, %v4355_v45  ;;  %v4372_v32 = vmul.f32 %v4364_v28, %v4356_v16  ;;  %v7318_v43 = vld [vmem:[#allocation10 + $0xf8] sm:$0xff]  ;;  %v7343_v62 = vld [vmem:[#allocation10 + $0x20] sm:$0xff]  ;;  %v7344_v52 = vld [vmem:[#allocation10 + $0x28] sm:$0xff] }
 0x993   : > { %v11584_v31 = vadd.f32 %v4367_v8, %v4343_v17  ;;  %v4326_v63 = vsel %vm11551_vm9, %v4325_v19, %v4321_v60  ;;  %v4331_v21 = vmul.f32 %v6995_v40, %v4330_v20  ;;  %v11588_v26 = vadd.f32 %v4368_v13, %v4344_v41  ;;  %v7327_v19 = vld [vmem:[#allocation10 + $0xa0] sm:$0xff]  ;;  %v7332_v17 = vld [vmem:[#allocation10 + $0x88] sm:$0xff]  ;;  %v7333_v41 = vld [vmem:[#allocation10 + $0x70] sm:$0xff] }
 0x994   : > { %v11590_v4 = vadd.f32 %v4369_v0, %v4345_v50  ;;  %v4357_v30 = vsub.f32 1.0, %v4326_v63  ;;  %v11593_v42 = vadd.f32 %v4370_v29, %v4346_v10  ;;  %v11595_v56 = vadd.f32 %v4371_v36, %v4347_v59  ;;  %v7334_v50 = vld [vmem:[#allocation10 + $0x78] sm:$0xff]  ;;  %v7336_v10 = vld [vmem:[#allocation10 + $0x68] sm:$0xff]  ;;  %v7337_v59 = vld [vmem:[#allocation10 + $0x50] sm:$0xff] }
 0x995   : > { %4383 = vst [vmem:[%s7841_s12 + $0xa] sm:$0x1] %v11584_v31  ;;  %v4332_v48 = vadd.f32 %v6995_v40, %v4331_v21  ;;  %vm4333_vm13 = vweird.f32 %v11433_v34  ;;  %v11600_v28 = vadd.f32 %v4372_v32, %v4348_v22  ;;  %v4340_v37 = vor.u32 1.1754944e-38, %v4339_v55  ;;  %v7330_v55 = vld [vmem:[#allocation10 + $0x98] sm:$0xff]  ;;  %v7345_v22 = vld [vmem:[#allocation10 + $0x10] sm:$0xff]  ;;  %v7347_v18 = vld [vmem:[#allocation10] sm:$0xff] }
 0x996   : > { %4384 = vst [vmem:[%s7841_s12 + $0x1a] sm:$0x1] %v11588_v26  ;;  %vm4335_vm0 = vmor %vm4333_vm13, %vm4334_vm6  ;;  %v4349_v2 = vmul.f32 %v4326_v63, %v11307_v57  ;;  %v4373_v54 = vmul.f32 %v4365_v38, %v4357_v30  ;;  %vm4338_vm2 = vcmp.eq.f32.partialorder %v4337_v14, 8.507059e+37  ;;  %v4366_v3 = vmax.f32 %v11383_v33, 0.0  ;;  %v7317_v33 = vld [vmem:[#allocation10 + $0xf0] sm:$0xff]  ;;  %v7342_v35 = vld [vmem:[#allocation10 + $0x38] sm:$0xff] }
 0x997   : > { %4385 = vst [vmem:[%s7841_s12 + $0x2a] sm:$0x1] %v11590_v4  ;;  %v4336_v24 = vsel %vm4335_vm0, %v6995_v40, %v4332_v48  ;;  %v7329_v14 = vld [vmem:[#allocation10 + $0x90] sm:$0xff]  ;;  %v7339_v40 = vld [vmem:[#allocation10 + $0x40] sm:$0xff]  ;;  %v7346_v27 = vld [vmem:[#allocation10 + $0x18] sm:$0xff]  ;;  %vm13710_vm11 = vcmask 1040384  }
 0x998   : > { %4386 = vst [vmem:[%s7841_s12 + $0x3a] sm:$0x1] %v11593_v42  ;;  %v4341_v34 = vsel %vm4338_vm2, %v4340_v37, %v4336_v24  ;;  %v11610_v53 = vadd.f32 %v4373_v54, %v4349_v2  ;;  %v7348_v45 = vld [vmem:[#allocation10 + $0x8] sm:$0xff]  ;;  %v4392_v13 = vld [vmem:[#allocation3 + $0x13] ss:$8 sm:$0x3] }
 0x999   : > { %4387 = vst [vmem:[%s7841_s12 + $0x4a] sm:$0x1] %v11595_v56  ;;  %v4358_v6 = vsub.f32 1.0, %v4341_v34  ;;  %v4350_v57 = vmul.f32 %v4341_v34, %v11319_v49  ;;  %vm13711_vm1 = vcmask 1041409   ;;  %vm13712_vm5 = vcmask 1042434  }
 0x99a   : > { %4388 = vst [vmem:[%s7841_s12 + $0x5a] sm:$0x1] %v11600_v28  ;;  %vm13713_vm14 = vcmask 1043459   ;;  %v4394_v32 = vld [vmem:[#allocation3 + $0x33] ss:$8 sm:$0x3] }
 0x99b   : > { %4389 = vst [vmem:[%s7841_s12 + $0x6a] sm:$0x1] %v11610_v53  ;;  %v4374_v25 = vmul.f32 %v4366_v3, %v4358_v6  ;;  %v4396_v63 = vld [vmem:[#allocation3 + $0x53] ss:$8 sm:$0x3]  ;;  %vm13714_vm4 = vcmask 1044484  }
 0x99c   : > { %4415 = vst [vmem:[#allocation1] ss:$9 sm:$0xff] %v11584_v31  ;;  %v4398_v21 = vld [vmem:[#allocation3 + $0x73] ss:$8 sm:$0x3]  ;;  %vm13715_vm12 = vcmask 1045509  }
 0x99d   : > { %4417 = vst [vmem:[#allocation1 + $0x1] ss:$9 sm:$0xff] %v11588_v26  ;;  %v11622_v5 = vadd.f32 %v4374_v25, %v4350_v57  ;;  %v4400_v2 = vld [vmem:[#allocation3 + $0x93] ss:$8 sm:$0x3]  ;;  %vm13716_vm15 = vcmask 1046534  }
 0x99e   : > { %4419 = vst [vmem:[#allocation1 + $0x2] ss:$9 sm:$0xff] %v11590_v4  ;;  %vm13717_vm7 = vcmask 1046528   ;;  %v4402_v3 = vld [vmem:[#allocation3 + $0xb3] ss:$8 sm:$0x3] }
 0x99f   : > { %4421 = vst [vmem:[#allocation1 + $0x3] ss:$9 sm:$0xff] %v11593_v42 }
 0x9a0   : > { %4390 = vst [vmem:[%s7841_s12 + $0x7a] sm:$0x1] %v11622_v5 }
 0x9a1   : > { %4423 = vst [vmem:[#allocation1 + $0x4] ss:$9 sm:$0xff] %v11595_v56 }
 0x9a2   : > { %4425 = vst [vmem:[#allocation1 + $0x5] ss:$9 sm:$0xff] %v11600_v28 }
 0x9a3   : > { %4427 = vst [vmem:[#allocation1 + $0x6] ss:$9 sm:$0xff] %v11610_v53 }
 0x9a4   : > { %4429 = vst [vmem:[#allocation1 + $0x7] ss:$9 sm:$0xff] %v11622_v5 }
 0x9ab   : > { %v4430_v49 = vld [vmem:[#allocation1] sm:$0xff] }
 0x9ac   : > { %4448 = vmatmul.f32.vlgmr.msrb.gmra.mxu2 %v4430_v49  ;;  %4468 = vmatmul.f32.vlgmr.msrb.gmra.mxu3 %v4430_v49 }
 0x9ad   : > { %5788 = vmatpush.msrb.mxu2 %v7317_v33  ;;  %5808 = vmatpush.msrb.mxu3 %v7318_v43  ;;  %v4404_v43 = vld [vmem:[#allocation3 + $0xd3] ss:$8 sm:$0x3] }
 0x9af   : > { %5789 = vmatpush.msrb.mxu2 %v7319_v44  ;;  %5809 = vmatpush.msrb.mxu3 %v7320_v15  ;;  %v4406_v44 = vld [vmem:[#allocation3 + $0xf3] ss:$8 sm:$0x3] }
 0x9b1   : > { %5790 = vmatpush.msrb.mxu2 %v7321_v7  ;;  %5810 = vmatpush.msrb.mxu3 %v7322_v11 }
 0x9b3   : > { %5791 = vmatpush.msrb.mxu2 %v7323_v58  ;;  %5811 = vmatpush.msrb.mxu3 %v7324_v23 }
 0x9b5   : > { %5792 = vmatpush.msrb.mxu2 %v7325_v12  ;;  %5812 = vmatpush.msrb.mxu3 %v7326_v46 }
 0x9b7   : > { %5793 = vmatpush.msrb.mxu2 %v7327_v19  ;;  %5813 = vmatpush.msrb.mxu3 %v7328_v39 }
 0x9b9   : > { %5794 = vmatpush.msrb.mxu2 %v7329_v14  ;;  %5814 = vmatpush.msrb.mxu3 %v7330_v55 }
 0x9bb   : > { %5795 = vmatpush.msrb.mxu2 %v7331_v51  ;;  %5815 = vmatpush.msrb.mxu3 %v7332_v17 }
 0x9bd   : > { %5796 = vmatpush.msrb.mxu2 %v7333_v41  ;;  %5816 = vmatpush.msrb.mxu3 %v7334_v50 }
 0x9bf   : > { %5797 = vmatpush.msrb.mxu2 %v7335_v47  ;;  %5817 = vmatpush.msrb.mxu3 %v7336_v10 }
 0x9c1   : > { %5798 = vmatpush.msrb.mxu2 %v7337_v59  ;;  %5818 = vmatpush.msrb.mxu3 %v7338_v61 }
 0x9c3   : > { %5799 = vmatpush.msrb.mxu2 %v7339_v40  ;;  %5819 = vmatpush.msrb.mxu3 %v7340_v1 }
 0x9c5   : > { %5800 = vmatpush.msrb.mxu2 %v7341_v9  ;;  %5820 = vmatpush.msrb.mxu3 %v7342_v35 }
 0x9c7   : > { %5801 = vmatpush.msrb.mxu2 %v7343_v62  ;;  %5821 = vmatpush.msrb.mxu3 %v7344_v52 }
 0x9c9   : > { %5802 = vmatpush.msrb.mxu2 %v7345_v22  ;;  %5822 = vmatpush.msrb.mxu3 %v7346_v27 }
 0x9cb   : > { %5803 = vmatpush.msrb.mxu2 %v7347_v18  ;;  %5823 = vmatpush.msrb.mxu3 %v7348_v45 }
 0xa2f   : > { %v4469_v16 = vpop.f32.mrf.mxu3  ;;  %v4449_v20 = vpop.f32.mrf.mxu2 }
 0xa30   : > { %v4474_v8 = vrot.slane %v4469_v16, 7 }
 0xa32   : > { %v4475_v0 = vsel %vm13710_vm11, %v4449_v20, %v4474_v8  ;;  %v4476_v29 = vsel %vm13711_vm1, %v4449_v20, %v4474_v8  ;;  %v4478_v60 = vsel %vm13712_vm5, %v4449_v20, %v4474_v8  ;;  %v4480_v36 = vsel %vm13713_vm14, %v4449_v20, %v4474_v8 }
 0xa33   : > { %v4477_v30 = vrot.slane %v4476_v29, 1  ;;  %v4479_v38 = vrot.slane %v4478_v60, 2  ;;  %v4481_v48 = vrot.slane %v4480_v36, 3  ;;  %v4482_v37 = vsel %vm13714_vm4, %v4449_v20, %v4474_v8 }
 0xa34   : > { %v4483_v54 = vrot.slane %v4482_v37, 4  ;;  %v4484_v24 = vsel %vm13715_vm12, %v4449_v20, %v4474_v8  ;;  %v4486_v34 = vsel %vm13716_vm15, %v4449_v20, %v4474_v8  ;;  %v4488_v6 = vsel %vm13717_vm7, %v4474_v8, %v4449_v20 }
 0xa35   : > { %v4485_v57 = vrot.slane %v4484_v24, 5  ;;  %v4487_v25 = vrot.slane %v4486_v34, 6  ;;  %v4489_v49 = vrot.slane %v4488_v6, 7  ;;  %v11640_v33 = vadd.f32 %v4475_v0, %v4392_v13 }
 0xa36   : > { %v11642_v15 = vadd.f32 %v4477_v30, %v4394_v32  ;;  %v11644_v7 = vadd.f32 %v4479_v38, %v4396_v63  ;;  %v11646_v11 = vadd.f32 %v4481_v48, %v4398_v21  ;;  %v11648_v58 = vadd.f32 %v4483_v54, %v4400_v2 }
 0xa37   : > { %v11650_v23 = vadd.f32 %v4485_v57, %v4402_v3  ;;  %v11652_v12 = vadd.f32 %v4487_v25, %v4404_v43  ;;  %v11654_v46 = vadd.f32 %v4489_v49, %v4406_v44  ;;  %v4514_v19 = vrot.slane %v11640_v33, 1 }
 0xa38   : > { %v4515_v39 = vrot.slane %v11642_v15, 1  ;;  %v4516_v14 = vrot.slane %v11644_v7, 1  ;;  %v4517_v55 = vrot.slane %v11646_v11, 1  ;;  %v4518_v51 = vrot.slane %v11648_v58, 1 }
 0xa39   : > { %v4519_v17 = vrot.slane %v11650_v23, 1  ;;  %v4520_v41 = vrot.slane %v11652_v12, 1  ;;  %v6437_v50 = vmul.f32 -1.442695, %v4514_v19  ;;  %v4521_v61 = vrot.slane %v11654_v46, 1 }
 0xa3a   : > { %v6438_v47 = vmul.f32 -1.442695, %v4515_v39  ;;  %v6439_v10 = vmul.f32 -1.442695, %v4516_v14  ;;  %v6440_v59 = vmul.f32 -1.442695, %v4517_v55 }
 0xa3b   : > { %6996 = vpow2.f32 %v6437_v50  ;;  %v6441_v40 = vmul.f32 -1.442695, %v4518_v51  ;;  %v6442_v1 = vmul.f32 -1.442695, %v4519_v17  ;;  %v6443_v9 = vmul.f32 -1.442695, %v4520_v41 }
 0xa3c   : > { %6998 = vpow2.f32 %v6438_v47  ;;  %v6444_v35 = vmul.f32 -1.442695, %v4521_v61  ;;  %v4698_v32 = vmax.f32 %v11640_v33, 0.0  ;;  %v4699_v63 = vmax.f32 %v11642_v15, 0.0 }
 0xa3d   : > { %7000 = vpow2.f32 %v6439_v10  ;;  %v4700_v21 = vmax.f32 %v11644_v7, 0.0  ;;  %v4701_v30 = vmax.f32 %v11646_v11, 0.0  ;;  %v4702_v37 = vmax.f32 %v11648_v58, 0.0 }
 0xa3e   : > { %7002 = vpow2.f32 %v6440_v59  ;;  %v4703_v2 = vmax.f32 %v11650_v23, 0.0  ;;  %v4704_v58 = vmax.f32 %v11652_v12, 0.0 }
 0xa3f   : > { %7004 = vpow2.f32 %v6441_v40 }
 0xa40   : > { %7006 = vpow2.f32 %v6442_v1 }
 0xa41   : > { %v6997_v62 = vpop.eup %6996  ;;  %7008 = vpow2.f32 %v6443_v9 }
 0xa42   : > { %v6999_v52 = vpop.eup %6998  ;;  %v11664_v22 = vadd.f32 1.0, %v6997_v62  ;;  %7010 = vpow2.f32 %v6444_v35 }
 0xa43   : > { %v7001_v27 = vpop.eup %7000  ;;  %v11666_v18 = vadd.f32 1.0, %v6999_v52 }
 0xa44   : > { %v7003_v45 = vpop.eup %7002  ;;  %v11668_v16 = vadd.f32 1.0, %v7001_v27  ;;  %7012 = vrcp.f32 %v11664_v22  ;;  %v4573_v29 = vand.u32 2147483648, %v11664_v22  ;;  %vm4567_vm9 = vweird.f32 %v11664_v22 }
 0xa45   : > { %v7005_v8 = vpop.eup %7004  ;;  %v11671_v20 = vadd.f32 1.0, %v7003_v45  ;;  %7014 = vrcp.f32 %v11666_v18  ;;  %v4588_v60 = vand.u32 2147483648, %v11666_v18  ;;  %v4571_v24 = vand.u32 2147483647, %v11664_v22 }
 0xa46   : > { %v7007_v13 = vpop.eup %7006  ;;  %v11674_v0 = vadd.f32 1.0, %v7005_v8  ;;  %7016 = vrcp.f32 %v11668_v16  ;;  %v4586_v34 = vand.u32 2147483647, %v11666_v18  ;;  %v4603_v6 = vand.u32 2147483648, %v11668_v16 }
 0xa47   : > { %v7009_v36 = vpop.eup %7008  ;;  %v11683_v48 = vadd.f32 1.0, %v7007_v13  ;;  %7018 = vrcp.f32 %v11671_v20  ;;  %v4574_v49 = vor.u32 1.1754944e-38, %v4573_v29  ;;  %vm4582_vm3 = vweird.f32 %v11666_v18 }
 0xa48   : > { %v7011_v38 = vpop.eup %7010  ;;  %7020 = vrcp.f32 %v11674_v0  ;;  %v11697_v57 = vadd.f32 1.0, %v7009_v36  ;;  %v11702_v43 = vor.u32 1.1754944e-38, %v4588_v60  ;;  %vm4597_vm10 = vweird.f32 %v11668_v16 }
 0xa49   : > { %v11704_v44 = vadd.f32 1.0, %v7011_v38  ;;  %v4601_v39 = vand.u32 2147483647, %v11668_v16  ;;  %v4618_v14 = vand.u32 2147483648, %v11671_v20  ;;  %v4616_v17 = vand.u32 2147483647, %v11671_v20 }
 0xa4a   : > { %v11688_v54 = vpop.eup %7012  ;;  %v4631_v41 = vand.u32 2147483647, %v11674_v0  ;;  %7022 = vrcp.f32 %v11683_v48  ;;  %vm11717_vm8 = vcmp.eq.f32.partialorder %v4571_v24, 8.507059e+37  ;;  %v4604_v59 = vor.u32 1.1754944e-38, %v4603_v6 }
 0xa4b   : > { %v11695_v3 = vpop.eup %7014  ;;  %v4563_v25 = vmul.f32 %v11688_v54, %v11664_v22  ;;  %vm4568_vm6 = vweird.f32 %v11688_v54  ;;  %vm4612_vm13 = vweird.f32 %v11671_v20  ;;  %vm11726_vm2 = vcmp.eq.f32.partialorder %v4586_v34, 8.507059e+37 }
 0xa4c   : > { %v4578_v19 = vmul.f32 %v11695_v3, %v11666_v18  ;;  %v11711_v55 = vpop.eup %7016  ;;  %vm4583_vm0 = vweird.f32 %v11695_v3  ;;  %v4633_v9 = vand.u32 2147483648, %v11674_v0  ;;  %vm11733_vm1 = vcmp.eq.f32.partialorder %v4601_v39, 8.507059e+37  ;;  %vm11756_vm12 = vmor %vm4567_vm9, %vm4568_vm6 }
 0xa4d   : > { %v4564_v51 = vsub.f32 1.0, %v4563_v25  ;;  %v4593_v10 = vmul.f32 %v11711_v55, %v11668_v16  ;;  %v7019_v61 = vpop.eup %7018  ;;  %v4619_v8 = vor.u32 1.1754944e-38, %v4618_v14  ;;  %vm4598_vm5 = vweird.f32 %v11711_v55  ;;  %vm11769_vm11 = vmor %vm4582_vm3, %vm4583_vm0 }
 0xa4e   : > { %v4579_v47 = vsub.f32 1.0, %v4578_v19  ;;  %v7021_v35 = vpop.eup %7020  ;;  %v4608_v45 = vmul.f32 %v7019_v61, %v11671_v20  ;;  %vm11740_vm14 = vcmp.eq.f32.partialorder %v4616_v17, 8.507059e+37  ;;  %vm11745_vm4 = vcmp.eq.f32.partialorder %v4631_v41, 8.507059e+37  ;;  %vm11781_vm6 = vmor %vm4597_vm10, %vm4598_vm5 }
 0xa4f   : > { %v4565_v40 = vmul.f32 %v11688_v54, %v4564_v51  ;;  %v4594_v52 = vsub.f32 1.0, %v4593_v10  ;;  %v4623_v60 = vmul.f32 %v7021_v35, %v11674_v0  ;;  %v4646_v6 = vand.u32 2147483647, %v11683_v48 }
 0xa50   : > { %v4580_v62 = vmul.f32 %v11695_v3, %v4579_v47  ;;  %v4609_v34 = vsub.f32 1.0, %v4608_v45  ;;  %v7023_v25 = vpop.eup %7022  ;;  %vm4613_vm15 = vweird.f32 %v7019_v61  ;;  %v4634_v14 = vor.u32 1.1754944e-38, %v4633_v9 }
 0xa51   : > { %v4566_v13 = vadd.f32 %v11688_v54, %v4565_v40  ;;  %v4595_v24 = vmul.f32 %v11711_v55, %v4594_v52  ;;  %v4624_v39 = vsub.f32 1.0, %v4623_v60  ;;  %vm4642_vm7 = vweird.f32 %v11683_v48  ;;  %vm11800_vm10 = vmor %vm4612_vm13, %vm4613_vm15 }
 0xa52   : > { %v4581_v38 = vadd.f32 %v11695_v3, %v4580_v62  ;;  %7024 = vrcp.f32 %v11697_v57  ;;  %v4610_v41 = vmul.f32 %v7019_v61, %v4609_v34  ;;  %vm4628_vm9 = vweird.f32 %v7021_v35 }
 0xa53   : > { %v4570_v51 = vsel %vm11756_vm12, %v11688_v54, %v4566_v13  ;;  %v4596_v17 = vadd.f32 %v11711_v55, %v4595_v24  ;;  %v4625_v18 = vmul.f32 %v7021_v35, %v4624_v39  ;;  %v4638_v10 = vmul.f32 %v7023_v25, %v11683_v48 }
 0xa54   : > { %v4585_v47 = vsel %vm11769_vm11, %v11695_v3, %v4581_v38  ;;  %v4648_v40 = vand.u32 2147483648, %v11683_v48  ;;  %v4611_v62 = vadd.f32 %v7019_v61, %v4610_v41  ;;  %vm11790_vm3 = vcmp.eq.f32.partialorder %v4646_v6, 8.507059e+37  ;;  %v4735_v6 = vld [vmem:[#allocation3 + $0x54] ss:$8 sm:$0x3] }
 0xa55   : > { %v4600_v9 = vsel %vm11781_vm6, %v11711_v55, %v4596_v17  ;;  %v4661_v16 = vand.u32 2147483647, %v11697_v57  ;;  %v4575_v52 = vsel %vm11717_vm8, %v4574_v49, %v4570_v51  ;;  %v4626_v13 = vadd.f32 %v7021_v35, %v4625_v18 }
 0xa56   : > { %v4639_v60 = vsub.f32 1.0, %v4638_v10  ;;  %v4663_v55 = vand.u32 2147483648, %v11697_v57  ;;  %v4590_v38 = vsel %vm11726_vm2, %v11702_v43, %v4585_v47  ;;  %v4615_v24 = vsel %vm11800_vm10, %v7019_v61, %v4611_v62 }
 0xa57   : > { %vm13738_vm8 = vweird.f32 %v11674_v0  ;;  %vm4643_vm11 = vweird.f32 %v7023_v25  ;;  %vm4657_vm13 = vweird.f32 %v11697_v57  ;;  %7026 = vrcp.f32 %v11704_v44 }
 0xa58   : > { %vm4629_vm0 = vmor %vm13738_vm8, %vm4628_vm9  ;;  %v7025_v20 = vpop.eup %7024  ;;  %v4605_v49 = vsel %vm11733_vm1, %v4604_v59, %v4600_v9  ;;  %v4640_v34 = vmul.f32 %v7023_v25, %v4639_v60  ;;  %v4649_v1 = vor.u32 1.1754944e-38, %v4648_v40  ;;  %v4620_v43 = vsel %vm11740_vm14, %v4619_v8, %v4615_v24 }
 0xa59   : > { %v4630_v50 = vsel %vm4629_vm0, %v7021_v35, %v4626_v13  ;;  %v4653_v0 = vmul.f32 %v7025_v20, %v11697_v57  ;;  %vm11822_vm2 = vcmp.eq.f32.partialorder %v4661_v16, 8.507059e+37  ;;  %v4664_v19 = vor.u32 1.1754944e-38, %v4663_v55  ;;  %vm4644_vm1 = vmor %vm4642_vm7, %vm4643_vm11 }
 0xa5a   : > { %v4635_v61 = vsel %vm11745_vm4, %v4634_v14, %v4630_v50  ;;  %v4641_v39 = vadd.f32 %v7023_v25, %v4640_v34  ;;  %vm4658_vm5 = vweird.f32 %v7025_v20  ;;  %v4676_v59 = vand.u32 2147483647, %v11704_v44  ;;  %v4731_v50 = vld [vmem:[#allocation3 + $0x14] ss:$8 sm:$0x3] }
 0xa5b   : > { %v4678_v35 = vand.u32 2147483648, %v11704_v44  ;;  %v4654_v27 = vsub.f32 1.0, %v4653_v0  ;;  %v4682_v8 = vmul.f32 %v4575_v52, %v11584_v31  ;;  %v4683_v29 = vmul.f32 %v4590_v38, %v11588_v26  ;;  %vm4659_vm4 = vmor %vm4657_vm13, %vm4658_vm5  ;;  %v4733_v0 = vld [vmem:[#allocation3 + $0x34] ss:$8 sm:$0x3] }
 0xa5c   : > { %v4684_v36 = vmul.f32 %v4605_v49, %v11590_v4  ;;  %v4645_v14 = vsel %vm4644_vm1, %v7023_v25, %v4641_v39  ;;  %v4685_v51 = vmul.f32 %v4620_v43, %v11593_v42  ;;  %v4686_v22 = vmul.f32 %v4635_v61, %v11595_v56 }
 0xa5d   : > { %v4690_v17 = vsub.f32 1.0, %v4575_v52  ;;  %v7027_v41 = vpop.eup %7026  ;;  %v4650_v47 = vsel %vm11790_vm3, %v4649_v1, %v4645_v14  ;;  %v4655_v54 = vmul.f32 %v7025_v20, %v4654_v27  ;;  %v4691_v48 = vsub.f32 1.0, %v4590_v38 }
 0xa5e   : > { %v4692_v18 = vsub.f32 1.0, %v4605_v49  ;;  %v4668_v10 = vmul.f32 %v7027_v41, %v11704_v44  ;;  %vm4673_vm14 = vweird.f32 %v7027_v41  ;;  %v4687_v31 = vmul.f32 %v4650_v47, %v11600_v28 }
 0xa5f   : > { %v4693_v26 = vsub.f32 1.0, %v4620_v43  ;;  %v4656_v4 = vadd.f32 %v7025_v20, %v4655_v54  ;;  %v4694_v25 = vsub.f32 1.0, %v4635_v61  ;;  %v4695_v40 = vsub.f32 1.0, %v4650_v47 }
 0xa60   : > { %v4706_v42 = vmul.f32 %v4698_v32, %v4690_v17  ;;  %v4669_v56 = vsub.f32 1.0, %v4668_v10  ;;  %v4707_v9 = vmul.f32 %v4699_v63, %v4691_v48  ;;  %v4708_v62 = vmul.f32 %v4700_v21, %v4692_v18  ;;  %v4743_v48 = vld [vmem:[#allocation3 + $0xd4] ss:$8 sm:$0x3] }
 0xa61   : > { %v4709_v28 = vmul.f32 %v4701_v30, %v4693_v26  ;;  %v4660_v3 = vsel %vm4659_vm4, %v7025_v20, %v4656_v4  ;;  %v4710_v33 = vmul.f32 %v4702_v37, %v4694_v25  ;;  %v4711_v32 = vmul.f32 %v4703_v2, %v4695_v40  ;;  %v4745_v18 = vld [vmem:[#allocation3 + $0xf4] ss:$8 sm:$0x3] }
 0xa62   : > { %v11855_v57 = vadd.f32 %v4706_v42, %v4682_v8  ;;  %v4665_v15 = vsel %vm11822_vm2, %v4664_v19, %v4660_v3  ;;  %v4670_v63 = vmul.f32 %v7027_v41, %v4669_v56  ;;  %v11859_v7 = vadd.f32 %v4707_v9, %v4683_v29  ;;  %v4737_v19 = vld [vmem:[#allocation3 + $0x74] ss:$8 sm:$0x3] }
 0xa63   : > { %v11861_v21 = vadd.f32 %v4708_v62, %v4684_v36  ;;  %v4696_v11 = vsub.f32 1.0, %v4665_v15  ;;  %v11864_v30 = vadd.f32 %v4709_v28, %v4685_v51  ;;  %v11866_v37 = vadd.f32 %v4710_v33, %v4686_v22  ;;  %v4739_v8 = vld [vmem:[#allocation3 + $0x94] ss:$8 sm:$0x3] }
 0xa64   : > { %4722 = vst [vmem:[%s7841_s12 + $0xb] sm:$0x1] %v11855_v57  ;;  %v4671_v23 = vadd.f32 %v7027_v41, %v4670_v63  ;;  %vm4672_vm12 = vweird.f32 %v11704_v44  ;;  %v11871_v2 = vadd.f32 %v4711_v32, %v4687_v31  ;;  %v4679_v16 = vor.u32 1.1754944e-38, %v4678_v35  ;;  %v4741_v22 = vld [vmem:[#allocation3 + $0xb4] ss:$8 sm:$0x3] }
 0xa65   : > { %4723 = vst [vmem:[%s7841_s12 + $0x1b] sm:$0x1] %v11859_v7  ;;  %vm4674_vm15 = vmor %vm4672_vm12, %vm4673_vm14  ;;  %v4688_v12 = vmul.f32 %v4665_v15, %v11610_v53  ;;  %v4712_v52 = vmul.f32 %v4704_v58, %v4696_v11  ;;  %vm4677_vm7 = vcmp.eq.f32.partialorder %v4676_v59, 8.507059e+37  ;;  %v4705_v55 = vmax.f32 %v11654_v46, 0.0 }
 0xa66   : > { %4724 = vst [vmem:[%s7841_s12 + $0x2b] sm:$0x1] %v11861_v21  ;;  %v4675_v45 = vsel %vm4674_vm15, %v7027_v41, %v4671_v23  ;;  %vm13741_vm9 = vcmask 1040384   ;;  %vm13742_vm6 = vcmask 1041409   ;;  %vm13743_vm3 = vcmask 1042434  }
 0xa67   : > { %4725 = vst [vmem:[%s7841_s12 + $0x3b] sm:$0x1] %v11864_v30  ;;  %v4680_v44 = vsel %vm4677_vm7, %v4679_v16, %v4675_v45  ;;  %v11881_v13 = vadd.f32 %v4712_v52, %v4688_v12  ;;  %vm13744_vm10 = vcmask 1043459   ;;  %vm13745_vm8 = vcmask 1044484  }
 0xa68   : > { %4726 = vst [vmem:[%s7841_s12 + $0x4b] sm:$0x1] %v11866_v37  ;;  %v4697_v60 = vsub.f32 1.0, %v4680_v44  ;;  %v4689_v53 = vmul.f32 %v4680_v44, %v11622_v5  ;;  %vm13746_vm0 = vcmask 1045509   ;;  %vm13747_vm11 = vcmask 1046534  }
 0xa69   : > { %4727 = vst [vmem:[%s7841_s12 + $0x5b] sm:$0x1] %v11871_v2  ;;  %vm13748_vm13 = vcmask 1046528  }
 0xa6a   : > { %4728 = vst [vmem:[%s7841_s12 + $0x6b] sm:$0x1] %v11881_v13  ;;  %v4713_v38 = vmul.f32 %v4705_v55, %v4697_v60 }
 0xa6b   : > { %4754 = vst [vmem:[#allocation1] ss:$9 sm:$0xff] %v11855_v57 }
 0xa6c   : > { %4756 = vst [vmem:[#allocation1 + $0x1] ss:$9 sm:$0xff] %v11859_v7  ;;  %v11893_v24 = vadd.f32 %v4713_v38, %v4689_v53 }
 0xa6d   : > { %4758 = vst [vmem:[#allocation1 + $0x2] ss:$9 sm:$0xff] %v11861_v21 }
 0xa6e   : > { %4760 = vst [vmem:[#allocation1 + $0x3] ss:$9 sm:$0xff] %v11864_v30 }
 0xa6f   : > { %4729 = vst [vmem:[%s7841_s12 + $0x7b] sm:$0x1] %v11893_v24 }
 0xa70   : > { %4762 = vst [vmem:[#allocation1 + $0x4] ss:$9 sm:$0xff] %v11866_v37 }
 0xa71   : > { %4764 = vst [vmem:[#allocation1 + $0x5] ss:$9 sm:$0xff] %v11871_v2 }
 0xa72   : > { %4766 = vst [vmem:[#allocation1 + $0x6] ss:$9 sm:$0xff] %v11881_v13 }
 0xa73   : > { %4768 = vst [vmem:[#allocation1 + $0x7] ss:$9 sm:$0xff] %v11893_v24 }
 0xa7a   : > { %v4769_v5 = vld [vmem:[#allocation1] sm:$0xff] }
 0xa7b   : > { %4787 = vmatmul.f32.vlgmr.msrb.gmra.mxu0 %v4769_v5  ;;  %4807 = vmatmul.f32.vlgmr.msrb.gmra.mxu1 %v4769_v5 }
 0xaf8   : > { %v4808_v46 = vpop.f32.mrf.mxu1  ;;  %v4788_v49 = vpop.f32.mrf.mxu0 }
 0xaf9   : > { %v4813_v20 = vrot.slane %v4808_v46, 7 }
 0xafb   : > { %v4814_v34 = vsel %vm13741_vm9, %v4788_v49, %v4813_v20  ;;  %v4815_v1 = vsel %vm13742_vm6, %v4788_v49, %v4813_v20  ;;  %v4817_v43 = vsel %vm13743_vm3, %v4788_v49, %v4813_v20  ;;  %v4819_v61 = vsel %vm13744_vm10, %v4788_v49, %v4813_v20 }
 0xafc   : > { %v4816_v39 = vrot.slane %v4815_v1, 1  ;;  %v4818_v59 = vrot.slane %v4817_v43, 2  ;;  %v4820_v35 = vrot.slane %v4819_v61, 3  ;;  %v4821_v27 = vsel %vm13745_vm8, %v4788_v49, %v4813_v20 }
 0xafd   : > { %v4822_v29 = vrot.slane %v4821_v27, 4  ;;  %v4823_v36 = vsel %vm13746_vm0, %v4788_v49, %v4813_v20  ;;  %v4825_v14 = vsel %vm13747_vm11, %v4788_v49, %v4813_v20  ;;  %v4827_v51 = vsel %vm13748_vm13, %v4813_v20, %v4788_v49 }
 0xafe   : > { %v4824_v17 = vrot.slane %v4823_v36, 5  ;;  %v4826_v41 = vrot.slane %v4825_v14, 6  ;;  %v4828_v47 = vrot.slane %v4827_v51, 7  ;;  %v11911_v54 = vadd.f32 %v4814_v34, %v4731_v50 }
 0xaff   : > { %v11913_v10 = vadd.f32 %v4816_v39, %v4733_v0  ;;  %v11915_v31 = vadd.f32 %v4818_v59, %v4735_v6  ;;  %v11917_v26 = vadd.f32 %v4820_v35, %v4737_v19  ;;  %v11919_v4 = vadd.f32 %v4822_v29, %v4739_v8 }
 0xb00   : > { %v11921_v25 = vadd.f32 %v4824_v17, %v4741_v22  ;;  %v11923_v40 = vadd.f32 %v4826_v41, %v4743_v48  ;;  %v11925_v42 = vadd.f32 %v4828_v47, %v4745_v18  ;;  %v4853_v56 = vrot.slane %v11911_v54, 1 }
 0xb01   : > { %v4854_v9 = vrot.slane %v11913_v10, 1  ;;  %v4855_v62 = vrot.slane %v11915_v31, 1  ;;  %v4856_v28 = vrot.slane %v11917_v26, 1  ;;  %v4857_v3 = vrot.slane %v11919_v4, 1 }
 0xb02   : > { %v4858_v33 = vrot.slane %v11921_v25, 1  ;;  %v4859_v32 = vrot.slane %v11923_v40, 1  ;;  %v6445_v15 = vmul.f32 -1.442695, %v4853_v56  ;;  %v4860_v23 = vrot.slane %v11925_v42, 1 }
 0xb03   : > { %v6446_v63 = vmul.f32 -1.442695, %v4854_v9  ;;  %v6447_v11 = vmul.f32 -1.442695, %v4855_v62  ;;  %v6448_v58 = vmul.f32 -1.442695, %v4856_v28 }
 0xb04   : > { %7028 = vpow2.f32 %v6445_v15  ;;  %v6449_v16 = vmul.f32 -1.442695, %v4857_v3  ;;  %v6450_v12 = vmul.f32 -1.442695, %v4858_v33  ;;  %v6451_v52 = vmul.f32 -1.442695, %v4859_v32 }
 0xb05   : > { %7030 = vpow2.f32 %v6446_v63  ;;  %v6452_v45 = vmul.f32 -1.442695, %v4860_v23  ;;  %v5037_v0 = vmax.f32 %v11911_v54, 0.0  ;;  %v5038_v6 = vmax.f32 %v11913_v10, 0.0 }
 0xb06   : > { %7032 = vpow2.f32 %v6447_v11  ;;  %v5039_v19 = vmax.f32 %v11915_v31, 0.0  ;;  %v5040_v39 = vmax.f32 %v11917_v26, 0.0  ;;  %v5041_v27 = vmax.f32 %v11919_v4, 0.0 }
 0xb07   : > { %7034 = vpow2.f32 %v6448_v58  ;;  %v5042_v8 = vmax.f32 %v11921_v25, 0.0  ;;  %v5043_v4 = vmax.f32 %v11923_v40, 0.0 }
 0xb08   : > { %7036 = vpow2.f32 %v6449_v16 }
 0xb09   : > { %7038 = vpow2.f32 %v6450_v12 }
 0xb0a   : > { %v7029_v44 = vpop.eup %7028  ;;  %7040 = vpow2.f32 %v6451_v52 }
 0xb0b   : > { %v7031_v60 = vpop.eup %7030  ;;  %v11935_v55 = vadd.f32 1.0, %v7029_v44  ;;  %7042 = vpow2.f32 %v6452_v45 }
 0xb0c   : > { %v7033_v53 = vpop.eup %7032  ;;  %v11937_v38 = vadd.f32 1.0, %v7031_v60 }
 0xb0d   : > { %v7035_v5 = vpop.eup %7034  ;;  %v11939_v46 = vadd.f32 1.0, %v7033_v53  ;;  %7044 = vrcp.f32 %v11935_v55  ;;  %v4912_v1 = vand.u32 2147483648, %v11935_v55  ;;  %vm4906_vm2 = vweird.f32 %v11935_v55 }
 0xb0e   : > { %v7037_v20 = vpop.eup %7036  ;;  %v11942_v49 = vadd.f32 1.0, %v7035_v5  ;;  %7046 = vrcp.f32 %v11937_v38  ;;  %v4927_v43 = vand.u32 2147483648, %v11937_v38  ;;  %v4910_v36 = vand.u32 2147483647, %v11935_v55 }
 0xb0f   : > { %v7039_v50 = vpop.eup %7038  ;;  %v11945_v34 = vadd.f32 1.0, %v7037_v20  ;;  %7048 = vrcp.f32 %v11939_v46  ;;  %v4925_v14 = vand.u32 2147483647, %v11937_v38  ;;  %v4942_v51 = vand.u32 2147483648, %v11939_v46 }
 0xb10   : > { %v7041_v61 = vpop.eup %7040  ;;  %v11954_v35 = vadd.f32 1.0, %v7039_v50  ;;  %7050 = vrcp.f32 %v11942_v49  ;;  %v4913_v47 = vor.u32 1.1754944e-38, %v4912_v1  ;;  %vm4921_vm5 = vweird.f32 %v11937_v38 }
 0xb11   : > { %v7043_v59 = vpop.eup %7042  ;;  %7052 = vrcp.f32 %v11945_v34  ;;  %v11968_v17 = vadd.f32 1.0, %v7041_v61  ;;  %v11973_v48 = vor.u32 1.1754944e-38, %v4927_v43  ;;  %vm4936_vm1 = vweird.f32 %v11939_v46 }
 0xb12   : > { %v11975_v18 = vadd.f32 1.0, %v7043_v59  ;;  %v4940_v9 = vand.u32 2147483647, %v11939_v46  ;;  %v4957_v62 = vand.u32 2147483648, %v11942_v49  ;;  %v4955_v33 = vand.u32 2147483647, %v11942_v49 }
 0xb13   : > { %v11959_v29 = vpop.eup %7044  ;;  %v4970_v32 = vand.u32 2147483647, %v11945_v34  ;;  %7054 = vrcp.f32 %v11954_v35  ;;  %vm11988_vm4 = vcmp.eq.f32.partialorder %v4910_v36, 8.507059e+37  ;;  %v4943_v58 = vor.u32 1.1754944e-38, %v4942_v51 }
 0xb14   : > { %v11966_v22 = vpop.eup %7046  ;;  %v4902_v41 = vmul.f32 %v11959_v29, %v11935_v55  ;;  %vm4907_vm14 = vweird.f32 %v11959_v29  ;;  %vm4951_vm12 = vweird.f32 %v11942_v49  ;;  %vm11997_vm7 = vcmp.eq.f32.partialorder %v4925_v14, 8.507059e+37 }
 0xb15   : > { %v4917_v56 = vmul.f32 %v11966_v22, %v11937_v38  ;;  %v11982_v28 = vpop.eup %7048  ;;  %vm4922_vm15 = vweird.f32 %v11966_v22  ;;  %v4972_v52 = vand.u32 2147483648, %v11945_v34  ;;  %vm12004_vm6 = vcmp.eq.f32.partialorder %v4940_v9, 8.507059e+37  ;;  %vm12027_vm0 = vmor %vm4906_vm2, %vm4907_vm14 }
 0xb16   : > { %v4903_v3 = vsub.f32 1.0, %v4902_v41  ;;  %v4932_v11 = vmul.f32 %v11982_v28, %v11939_v46  ;;  %v7051_v23 = vpop.eup %7050  ;;  %v4958_v20 = vor.u32 1.1754944e-38, %v4957_v62  ;;  %vm4937_vm3 = vweird.f32 %v11982_v28  ;;  %vm12040_vm9 = vmor %vm4921_vm5, %vm4922_vm15 }
 0xb17   : > { %v4918_v63 = vsub.f32 1.0, %v4917_v56  ;;  %v7053_v45 = vpop.eup %7052  ;;  %v4947_v5 = vmul.f32 %v7051_v23, %v11942_v49  ;;  %vm12011_vm10 = vcmp.eq.f32.partialorder %v4955_v33, 8.507059e+37  ;;  %vm12016_vm8 = vcmp.eq.f32.partialorder %v4970_v32, 8.507059e+37  ;;  %vm12052_vm14 = vmor %vm4936_vm1, %vm4937_vm3 }
 0xb18   : > { %v4904_v16 = vmul.f32 %v11959_v29, %v4903_v3  ;;  %v4933_v60 = vsub.f32 1.0, %v4932_v11  ;;  %v4962_v43 = vmul.f32 %v7053_v45, %v11945_v34  ;;  %v4985_v51 = vand.u32 2147483647, %v11954_v35 }
 0xb19   : > { %v4919_v44 = vmul.f32 %v11966_v22, %v4918_v63  ;;  %v4948_v14 = vsub.f32 1.0, %v4947_v5  ;;  %v7055_v41 = vpop.eup %7054  ;;  %vm4952_vm11 = vweird.f32 %v7051_v23  ;;  %v4973_v62 = vor.u32 1.1754944e-38, %v4972_v52 }
 0xb1a   : > { %v4905_v50 = vadd.f32 %v11959_v29, %v4904_v16  ;;  %v4934_v36 = vmul.f32 %v11982_v28, %v4933_v60  ;;  %v4963_v9 = vsub.f32 1.0, %v4962_v43  ;;  %vm4981_vm13 = vweird.f32 %v11954_v35  ;;  %vm12071_vm1 = vmor %vm4951_vm12, %vm4952_vm11 }
 0xb1b   : > { %v4920_v59 = vadd.f32 %v11966_v22, %v4919_v44  ;;  %7056 = vrcp.f32 %v11968_v17  ;;  %v4949_v32 = vmul.f32 %v7051_v23, %v4948_v14  ;;  %vm4967_vm2 = vweird.f32 %v7053_v45 }
 0xb1c   : > { %v4909_v3 = vsel %vm12027_vm0, %v11959_v29, %v4905_v50  ;;  %v4935_v33 = vadd.f32 %v11982_v28, %v4934_v36  ;;  %v4964_v38 = vmul.f32 %v7053_v45, %v4963_v9  ;;  %v4977_v11 = vmul.f32 %v7055_v41, %v11954_v35 }
 0xb1d   : > { %v4924_v63 = vsel %vm12040_vm9, %v11966_v22, %v4920_v59  ;;  %v4987_v16 = vand.u32 2147483648, %v11954_v35  ;;  %v4950_v44 = vadd.f32 %v7051_v23, %v4949_v32  ;;  %vm12061_vm5 = vcmp.eq.f32.partialorder %v4985_v51, 8.507059e+37  ;;  %v5074_v51 = vld [vmem:[#allocation3 + $0x55] ss:$8 sm:$0x3] }
 0xb1e   : > { %v4939_v52 = vsel %vm12052_vm14, %v11982_v28, %v4935_v33  ;;  %v5000_v46 = vand.u32 2147483647, %v11968_v17  ;;  %v4914_v60 = vsel %vm11988_vm4, %v4913_v47, %v4909_v3  ;;  %v4965_v50 = vadd.f32 %v7053_v45, %v4964_v38 }
 0xb1f   : > { %v4978_v43 = vsub.f32 1.0, %v4977_v11  ;;  %v5002_v28 = vand.u32 2147483648, %v11968_v17  ;;  %v4929_v59 = vsel %vm11997_vm7, %v11973_v48, %v4924_v63  ;;  %v4954_v36 = vsel %vm12071_vm1, %v7051_v23, %v4950_v44 }
 0xb20   : > { %vm13769_vm4 = vweird.f32 %v11945_v34  ;;  %vm4982_vm9 = vweird.f32 %v7055_v41  ;;  %vm4996_vm12 = vweird.f32 %v11968_v17  ;;  %7058 = vrcp.f32 %v11975_v18 }
 0xb21   : > { %vm4968_vm15 = vmor %vm13769_vm4, %vm4967_vm2  ;;  %v7057_v49 = vpop.eup %7056  ;;  %v4944_v47 = vsel %vm12004_vm6, %v4943_v58, %v4939_v52  ;;  %v4979_v14 = vmul.f32 %v7055_v41, %v4978_v43  ;;  %v4988_v12 = vor.u32 1.1754944e-38, %v4987_v16  ;;  %v4959_v48 = vsel %vm12011_vm10, %v4958_v20, %v4954_v36 }
 0xb22   : > { %v4969_v15 = vsel %vm4968_vm15, %v7053_v45, %v4965_v50  ;;  %v4992_v34 = vmul.f32 %v7057_v49, %v11968_v17  ;;  %vm12093_vm7 = vcmp.eq.f32.partialorder %v5000_v46, 8.507059e+37  ;;  %v5003_v56 = vor.u32 1.1754944e-38, %v5002_v28  ;;  %vm4983_vm6 = vmor %vm4981_vm13, %vm4982_vm9 }
 0xb23   : > { %v4974_v23 = vsel %vm12016_vm8, %v4973_v62, %v4969_v15  ;;  %v4980_v9 = vadd.f32 %v7055_v41, %v4979_v14  ;;  %vm4997_vm3 = vweird.f32 %v7057_v49  ;;  %v5015_v58 = vand.u32 2147483647, %v11975_v18  ;;  %v5070_v15 = vld [vmem:[#allocation3 + $0x15] ss:$8 sm:$0x3] }
 0xb24   : > { %v5017_v45 = vand.u32 2147483648, %v11975_v18  ;;  %v4993_v53 = vsub.f32 1.0, %v4992_v34  ;;  %v5021_v20 = vmul.f32 %v4914_v60, %v11855_v57  ;;  %v5022_v1 = vmul.f32 %v4929_v59, %v11859_v7  ;;  %vm4998_vm8 = vmor %vm4996_vm12, %vm4997_vm3  ;;  %v5072_v34 = vld [vmem:[#allocation3 + $0x35] ss:$8 sm:$0x3] }
 0xb25   : > { %v5023_v61 = vmul.f32 %v4944_v47, %v11861_v21  ;;  %v4984_v62 = vsel %vm4983_vm6, %v7055_v41, %v4980_v9  ;;  %v5024_v3 = vmul.f32 %v4959_v48, %v11864_v30  ;;  %v5025_v55 = vmul.f32 %v4974_v23, %v11866_v37 }
 0xb26   : > { %v5029_v33 = vsub.f32 1.0, %v4914_v60  ;;  %v7059_v32 = vpop.eup %7058  ;;  %v4989_v63 = vsel %vm12061_vm5, %v4988_v12, %v4984_v62  ;;  %v4994_v29 = vmul.f32 %v7057_v49, %v4993_v53  ;;  %v5030_v35 = vsub.f32 1.0, %v4929_v59 }
 0xb27   : > { %v5031_v38 = vsub.f32 1.0, %v4944_v47  ;;  %v5007_v11 = vmul.f32 %v7059_v32, %v11975_v18  ;;  %vm5012_vm10 = vweird.f32 %v7059_v32  ;;  %v5026_v57 = vmul.f32 %v4989_v63, %v11871_v2 }
 0xb28   : > { %v5032_v7 = vsub.f32 1.0, %v4959_v48  ;;  %v4995_v21 = vadd.f32 %v7057_v49, %v4994_v29  ;;  %v5033_v41 = vsub.f32 1.0, %v4974_v23  ;;  %v5034_v16 = vsub.f32 1.0, %v4989_v63 }
 0xb29   : > { %v5045_v30 = vmul.f32 %v5037_v0, %v5029_v33  ;;  %v5008_v37 = vsub.f32 1.0, %v5007_v11  ;;  %v5046_v52 = vmul.f32 %v5038_v6, %v5030_v35  ;;  %v5047_v44 = vmul.f32 %v5039_v19, %v5031_v38  ;;  %v5082_v35 = vld [vmem:[#allocation3 + $0xd5] ss:$8 sm:$0x3] }
 0xb2a   : > { %v5048_v2 = vmul.f32 %v5040_v39, %v5032_v7  ;;  %v4999_v22 = vsel %vm4998_vm8, %v7057_v49, %v4995_v21  ;;  %v5049_v54 = vmul.f32 %v5041_v27, %v5033_v41  ;;  %v5050_v0 = vmul.f32 %v5042_v8, %v5034_v16  ;;  %v5084_v38 = vld [vmem:[#allocation3 + $0xf5] ss:$8 sm:$0x3] }
 0xb2b   : > { %v12126_v17 = vadd.f32 %v5045_v30, %v5021_v20  ;;  %v5004_v10 = vsel %vm12093_vm7, %v5003_v56, %v4999_v22  ;;  %v5009_v6 = vmul.f32 %v7059_v32, %v5008_v37  ;;  %v12130_v31 = vadd.f32 %v5046_v52, %v5022_v1  ;;  %v5076_v56 = vld [vmem:[#allocation3 + $0x75] ss:$8 sm:$0x3] }
 0xb2c   : > { %v12132_v19 = vadd.f32 %v5047_v44, %v5023_v61  ;;  %v5035_v26 = vsub.f32 1.0, %v5004_v10  ;;  %v12135_v39 = vadd.f32 %v5048_v2, %v5024_v3  ;;  %v12137_v27 = vadd.f32 %v5049_v54, %v5025_v55  ;;  %v5078_v20 = vld [vmem:[#allocation3 + $0x95] ss:$8 sm:$0x3] }
 0xb2d   : > { %5061 = vst [vmem:[%s7841_s12 + $0xc] sm:$0x1] %v12126_v17  ;;  %v5010_v25 = vadd.f32 %v7059_v32, %v5009_v6  ;;  %vm5011_vm0 = vweird.f32 %v11975_v18  ;;  %v12142_v8 = vadd.f32 %v5050_v0, %v5026_v57  ;;  %v5018_v46 = vor.u32 1.1754944e-38, %v5017_v45  ;;  %v5080_v55 = vld [vmem:[#allocation3 + $0xb5] ss:$8 sm:$0x3] }
 0xb2e   : > { %5062 = vst [vmem:[%s7841_s12 + $0x1c] sm:$0x1] %v12130_v31  ;;  %vm5013_vm11 = vmor %vm5011_vm0, %vm5012_vm10  ;;  %v5027_v40 = vmul.f32 %v5004_v10, %v11881_v13  ;;  %v5051_v60 = vmul.f32 %v5043_v4, %v5035_v26  ;;  %vm5016_vm13 = vcmp.eq.f32.partialorder %v5015_v58, 8.507059e+37  ;;  %v5044_v28 = vmax.f32 %v11925_v42, 0.0 }
 0xb2f   : > { %5063 = vst [vmem:[%s7841_s12 + $0x2c] sm:$0x1] %v12132_v19  ;;  %v5014_v5 = vsel %vm5013_vm11, %v7059_v32, %v5010_v25  ;;  %vm13772_vm2 = vcmask 1040384   ;;  %vm13773_vm14 = vcmask 1041409   ;;  %vm13774_vm5 = vcmask 1042434  }
 0xb30   : > { %5064 = vst [vmem:[%s7841_s12 + $0x3c] sm:$0x1] %v12135_v39  ;;  %v5019_v18 = vsel %vm5016_vm13, %v5018_v46, %v5014_v5  ;;  %v12152_v50 = vadd.f32 %v5051_v60, %v5027_v40  ;;  %vm13775_vm1 = vcmask 1043459   ;;  %vm13776_vm4 = vcmask 1044484  }
 0xb31   : > { %5065 = vst [vmem:[%s7841_s12 + $0x4c] sm:$0x1] %v12137_v27  ;;  %v5036_v43 = vsub.f32 1.0, %v5019_v18  ;;  %v5028_v13 = vmul.f32 %v5019_v18, %v11893_v24  ;;  %vm13777_vm15 = vcmask 1045509   ;;  %vm13778_vm9 = vcmask 1046534  }
 0xb32   : > { %5066 = vst [vmem:[%s7841_s12 + $0x5c] sm:$0x1] %v12142_v8  ;;  %vm13779_vm12 = vcmask 1046528  }
 0xb33   : > { %5067 = vst [vmem:[%s7841_s12 + $0x6c] sm:$0x1] %v12152_v50  ;;  %v5052_v59 = vmul.f32 %v5044_v28, %v5036_v43 }
 0xb34   : > { %5093 = vst [vmem:[#allocation1] ss:$9 sm:$0xff] %v12126_v17 }
 0xb35   : > { %5095 = vst [vmem:[#allocation1 + $0x1] ss:$9 sm:$0xff] %v12130_v31  ;;  %v12164_v36 = vadd.f32 %v5052_v59, %v5028_v13 }
 0xb36   : > { %5097 = vst [vmem:[#allocation1 + $0x2] ss:$9 sm:$0xff] %v12132_v19 }
 0xb37   : > { %5099 = vst [vmem:[#allocation1 + $0x3] ss:$9 sm:$0xff] %v12135_v39 }
 0xb38   : > { %5068 = vst [vmem:[%s7841_s12 + $0x7c] sm:$0x1] %v12164_v36 }
 0xb39   : > { %5101 = vst [vmem:[#allocation1 + $0x4] ss:$9 sm:$0xff] %v12137_v27 }
 0xb3a   : > { %5103 = vst [vmem:[#allocation1 + $0x5] ss:$9 sm:$0xff] %v12142_v8 }
 0xb3b   : > { %5105 = vst [vmem:[#allocation1 + $0x6] ss:$9 sm:$0xff] %v12152_v50 }
 0xb3c   : > { %5107 = vst [vmem:[#allocation1 + $0x7] ss:$9 sm:$0xff] %v12164_v36 }
 0xb43   : > { %v5108_v24 = vld [vmem:[#allocation1] sm:$0xff] }
 0xb44   : > { %5126 = vmatmul.f32.vlgmr.msra.gmra.mxu2 %v5108_v24  ;;  %5146 = vmatmul.f32.vlgmr.msra.gmra.mxu3 %v5108_v24 }
 0xbc7   : > { %v5147_v42 = vpop.f32.mrf.mxu3  ;;  %v5127_v47 = vpop.f32.mrf.mxu2 }
 0xbc8   : > { %v5152_v49 = vrot.slane %v5147_v42, 7 }
 0xbca   : > { %v5153_v14 = vsel %vm13772_vm2, %v5127_v47, %v5152_v49  ;;  %v5154_v12 = vsel %vm13773_vm14, %v5127_v47, %v5152_v49  ;;  %v5156_v48 = vsel %vm13774_vm5, %v5127_v47, %v5152_v49  ;;  %v5158_v23 = vsel %vm13775_vm1, %v5127_v47, %v5152_v49 }
 0xbcb   : > { %v5155_v9 = vrot.slane %v5154_v12, 1  ;;  %v5157_v58 = vrot.slane %v5156_v48, 2  ;;  %v5159_v45 = vrot.slane %v5158_v23, 3  ;;  %v5160_v53 = vsel %vm13776_vm4, %v5127_v47, %v5152_v49 }
 0xbcc   : > { %v5161_v1 = vrot.slane %v5160_v53, 4  ;;  %v5162_v61 = vsel %vm13777_vm15, %v5127_v47, %v5152_v49  ;;  %v5164_v62 = vsel %vm13778_vm9, %v5127_v47, %v5152_v49  ;;  %v5166_v3 = vsel %vm13779_vm12, %v5152_v49, %v5127_v47 }
 0xbcd   : > { %v5163_v33 = vrot.slane %v5162_v61, 5  ;;  %v5165_v32 = vrot.slane %v5164_v62, 6  ;;  %v5167_v63 = vrot.slane %v5166_v3, 7  ;;  %v12182_v29 = vadd.f32 %v5153_v14, %v5070_v15 }
 0xbce   : > { %v12184_v11 = vadd.f32 %v5155_v9, %v5072_v34  ;;  %v12186_v57 = vadd.f32 %v5157_v58, %v5074_v51  ;;  %v12188_v7 = vadd.f32 %v5159_v45, %v5076_v56  ;;  %v12190_v21 = vadd.f32 %v5161_v1, %v5078_v20 }
 0xbcf   : > { %v12192_v41 = vadd.f32 %v5163_v33, %v5080_v55  ;;  %v12194_v16 = vadd.f32 %v5165_v32, %v5082_v35  ;;  %v12196_v30 = vadd.f32 %v5167_v63, %v5084_v38  ;;  %v5192_v37 = vrot.slane %v12182_v29, 1 }
 0xbd0   : > { %v5193_v52 = vrot.slane %v12184_v11, 1  ;;  %v5194_v44 = vrot.slane %v12186_v57, 1  ;;  %v5195_v2 = vrot.slane %v12188_v7, 1  ;;  %v5196_v22 = vrot.slane %v12190_v21, 1 }
 0xbd1   : > { %v5197_v54 = vrot.slane %v12192_v41, 1  ;;  %v5198_v0 = vrot.slane %v12194_v16, 1  ;;  %v6453_v10 = vmul.f32 -1.442695, %v5192_v37  ;;  %v5199_v25 = vrot.slane %v12196_v30, 1 }
 0xbd2   : > { %v6454_v6 = vmul.f32 -1.442695, %v5193_v52  ;;  %v6455_v26 = vmul.f32 -1.442695, %v5194_v44  ;;  %v6456_v4 = vmul.f32 -1.442695, %v5195_v2 }
 0xbd3   : > { %7060 = vpow2.f32 %v6453_v10  ;;  %v6457_v46 = vmul.f32 -1.442695, %v5196_v22  ;;  %v6458_v40 = vmul.f32 -1.442695, %v5197_v54  ;;  %v6459_v60 = vmul.f32 -1.442695, %v5198_v0 }
 0xbd4   : > { %7062 = vpow2.f32 %v6454_v6  ;;  %v6460_v5 = vmul.f32 -1.442695, %v5199_v25  ;;  %v5376_v34 = vmax.f32 %v12182_v29, 0.0  ;;  %v5377_v51 = vmax.f32 %v12184_v11, 0.0 }
 0xbd5   : > { %7064 = vpow2.f32 %v6455_v26  ;;  %v5378_v56 = vmax.f32 %v12186_v57, 0.0  ;;  %v5379_v9 = vmax.f32 %v12188_v7, 0.0  ;;  %v5380_v53 = vmax.f32 %v12190_v21, 0.0 }
 0xbd6   : > { %7066 = vpow2.f32 %v6456_v4  ;;  %v5381_v20 = vmax.f32 %v12192_v41, 0.0  ;;  %v5382_v21 = vmax.f32 %v12194_v16, 0.0 }
 0xbd7   : > { %7068 = vpow2.f32 %v6457_v46 }
 0xbd8   : > { %7070 = vpow2.f32 %v6458_v40 }
 0xbd9   : > { %v7061_v18 = vpop.eup %7060  ;;  %7072 = vpow2.f32 %v6459_v60 }
 0xbda   : > { %v7063_v43 = vpop.eup %7062  ;;  %v12206_v28 = vadd.f32 1.0, %v7061_v18  ;;  %7074 = vpow2.f32 %v6460_v5 }
 0xbdb   : > { %v7065_v13 = vpop.eup %7064  ;;  %v12208_v59 = vadd.f32 1.0, %v7063_v43 }
 0xbdc   : > { %v7067_v24 = vpop.eup %7066  ;;  %v12210_v42 = vadd.f32 1.0, %v7065_v13  ;;  %7076 = vrcp.f32 %v12206_v28  ;;  %v5251_v12 = vand.u32 2147483648, %v12206_v28  ;;  %vm5245_vm7 = vweird.f32 %v12206_v28 }
 0xbdd   : > { %v7069_v49 = vpop.eup %7068  ;;  %v12213_v47 = vadd.f32 1.0, %v7067_v24  ;;  %7078 = vrcp.f32 %v12208_v59  ;;  %v5266_v48 = vand.u32 2147483648, %v12208_v59  ;;  %v5249_v61 = vand.u32 2147483647, %v12206_v28 }
 0xbde   : > { %v7071_v15 = vpop.eup %7070  ;;  %v12216_v14 = vadd.f32 1.0, %v7069_v49  ;;  %7080 = vrcp.f32 %v12210_v42  ;;  %v5264_v62 = vand.u32 2147483647, %v12208_v59  ;;  %v5281_v3 = vand.u32 2147483648, %v12210_v42 }
 0xbdf   : > { %v7073_v23 = vpop.eup %7072  ;;  %v12225_v45 = vadd.f32 1.0, %v7071_v15  ;;  %7082 = vrcp.f32 %v12213_v47  ;;  %v5252_v63 = vor.u32 1.1754944e-38, %v5251_v12  ;;  %vm5260_vm3 = vweird.f32 %v12208_v59 }
 0xbe0   : > { %v7075_v58 = vpop.eup %7074  ;;  %7084 = vrcp.f32 %v12216_v14  ;;  %v12239_v33 = vadd.f32 1.0, %v7073_v23  ;;  %v12244_v35 = vor.u32 1.1754944e-38, %v5266_v48  ;;  %vm5275_vm6 = vweird.f32 %v12210_v42 }
 0xbe1   : > { %v12246_v38 = vadd.f32 1.0, %v7075_v58  ;;  %v5279_v52 = vand.u32 2147483647, %v12210_v42  ;;  %v5296_v44 = vand.u32 2147483648, %v12213_v47  ;;  %v5294_v54 = vand.u32 2147483647, %v12213_v47 }
 0xbe2   : > { %v12230_v1 = vpop.eup %7076  ;;  %v5309_v0 = vand.u32 2147483647, %v12216_v14  ;;  %7086 = vrcp.f32 %v12225_v45  ;;  %vm12259_vm8 = vcmp.eq.f32.partialorder %v5249_v61, 8.507059e+37  ;;  %v5282_v4 = vor.u32 1.1754944e-38, %v5281_v3 }
 0xbe3   : > { %v12237_v55 = vpop.eup %7078  ;;  %v5241_v32 = vmul.f32 %v12230_v1, %v12206_v28  ;;  %vm5246_vm10 = vweird.f32 %v12230_v1  ;;  %vm5290_vm0 = vweird.f32 %v12213_v47  ;;  %vm12268_vm13 = vcmp.eq.f32.partialorder %v5264_v62, 8.507059e+37 }
 0xbe4   : > { %v5256_v37 = vmul.f32 %v12237_v55, %v12208_v59  ;;  %v12253_v2 = vpop.eup %7080  ;;  %vm5261_vm11 = vweird.f32 %v12237_v55  ;;  %v5311_v60 = vand.u32 2147483648, %v12216_v14  ;;  %vm12275_vm14 = vcmp.eq.f32.partialorder %v5279_v52, 8.507059e+37  ;;  %vm12298_vm15 = vmor %vm5245_vm7, %vm5246_vm10 }
 0xbe5   : > { %v5242_v22 = vsub.f32 1.0, %v5241_v32  ;;  %v5271_v26 = vmul.f32 %v12253_v2, %v12210_v42  ;;  %v7083_v25 = vpop.eup %7082  ;;  %v5297_v49 = vor.u32 1.1754944e-38, %v5296_v44  ;;  %vm5276_vm5 = vweird.f32 %v12253_v2  ;;  %vm12311_vm2 = vmor %vm5260_vm3, %vm5261_vm11 }
 0xbe6   : > { %v5257_v6 = vsub.f32 1.0, %v5256_v37  ;;  %v7085_v5 = vpop.eup %7084  ;;  %v5286_v24 = vmul.f32 %v7083_v25, %v12213_v47  ;;  %vm12282_vm1 = vcmp.eq.f32.partialorder %v5294_v54, 8.507059e+37  ;;  %vm12287_vm4 = vcmp.eq.f32.partialorder %v5309_v0, 8.507059e+37  ;;  %vm12323_vm10 = vmor %vm5275_vm6, %vm5276_vm5 }
 0xbe7   : > { %v5243_v46 = vmul.f32 %v12230_v1, %v5242_v22  ;;  %v5272_v43 = vsub.f32 1.0, %v5271_v26  ;;  %v5301_v48 = vmul.f32 %v7085_v5, %v12216_v14  ;;  %v5324_v3 = vand.u32 2147483647, %v12225_v45 }
 0xbe8   : > { %v5258_v18 = vmul.f32 %v12237_v55, %v5257_v6  ;;  %v5287_v62 = vsub.f32 1.0, %v5286_v24  ;;  %v7087_v32 = vpop.eup %7086  ;;  %vm5291_vm9 = vweird.f32 %v7083_v25  ;;  %v5312_v44 = vor.u32 1.1754944e-38, %v5311_v60 }
 0xbe9   : > { %v5244_v15 = vadd.f32 %v12230_v1, %v5243_v46  ;;  %v5273_v61 = vmul.f32 %v12253_v2, %v5272_v43  ;;  %v5302_v52 = vsub.f32 1.0, %v5301_v48  ;;  %vm5320_vm12 = vweird.f32 %v12225_v45  ;;  %vm12342_vm6 = vmor %vm5290_vm0, %vm5291_vm9 }
 0xbea   : > { %v5259_v58 = vadd.f32 %v12237_v55, %v5258_v18  ;;  %7088 = vrcp.f32 %v12239_v33  ;;  %v5288_v0 = vmul.f32 %v7083_v25, %v5287_v62  ;;  %vm5306_vm7 = vweird.f32 %v7085_v5 }
 0xbeb   : > { %v5248_v22 = vsel %vm12298_vm15, %v12230_v1, %v5244_v15  ;;  %v5274_v54 = vadd.f32 %v12253_v2, %v5273_v61  ;;  %v5303_v59 = vmul.f32 %v7085_v5, %v5302_v52  ;;  %v5316_v26 = vmul.f32 %v7087_v32, %v12225_v45 }
 0xbec   : > { %v5263_v6 = vsel %vm12311_vm2, %v12237_v55, %v5259_v58  ;;  %v5326_v46 = vand.u32 2147483648, %v12225_v45  ;;  %v5289_v18 = vadd.f32 %v7083_v25, %v5288_v0  ;;  %vm12332_vm3 = vcmp.eq.f32.partialorder %v5324_v3, 8.507059e+37  ;;  %v5413_v3 = vld [vmem:[#allocation3 + $0x56] ss:$8 sm:$0x3] }
 0xbed   : > { %v5278_v60 = vsel %vm12323_vm10, %v12253_v2, %v5274_v54  ;;  %v5339_v42 = vand.u32 2147483647, %v12239_v33  ;;  %v5253_v43 = vsel %vm12259_vm8, %v5252_v63, %v5248_v22  ;;  %v5304_v15 = vadd.f32 %v7085_v5, %v5303_v59 }
 0xbee   : > { %v5317_v48 = vsub.f32 1.0, %v5316_v26  ;;  %v5341_v2 = vand.u32 2147483648, %v12239_v33  ;;  %v5268_v58 = vsel %vm12268_vm13, %v12244_v35, %v5263_v6  ;;  %v5293_v61 = vsel %vm12342_vm6, %v7083_v25, %v5289_v18 }
 0xbef   : > { %vm13800_vm8 = vweird.f32 %v12216_v14  ;;  %vm5321_vm2 = vweird.f32 %v7087_v32  ;;  %vm5335_vm0 = vweird.f32 %v12239_v33  ;;  %7090 = vrcp.f32 %v12246_v38 }
 0xbf0   : > { %vm5307_vm11 = vmor %vm13800_vm8, %vm5306_vm7  ;;  %v7089_v47 = vpop.eup %7088  ;;  %v5283_v63 = vsel %vm12275_vm14, %v5282_v4, %v5278_v60  ;;  %v5318_v62 = vmul.f32 %v7087_v32, %v5317_v48  ;;  %v5327_v40 = vor.u32 1.1754944e-38, %v5326_v46  ;;  %v5298_v35 = vsel %vm12282_vm1, %v5297_v49, %v5293_v61 }
 0xbf1   : > { %v5308_v10 = vsel %vm5307_vm11, %v7085_v5, %v5304_v15  ;;  %v5331_v14 = vmul.f32 %v7089_v47, %v12239_v33  ;;  %vm12364_vm13 = vcmp.eq.f32.partialorder %v5339_v42, 8.507059e+37  ;;  %v5342_v37 = vor.u32 1.1754944e-38, %v5341_v2  ;;  %vm5322_vm14 = vmor %vm5320_vm12, %vm5321_vm2 }
 0xbf2   : > { %v5313_v25 = vsel %vm12287_vm4, %v5312_v44, %v5308_v10  ;;  %v5319_v52 = vadd.f32 %v7087_v32, %v5318_v62  ;;  %vm5336_vm5 = vweird.f32 %v7089_v47  ;;  %v5354_v4 = vand.u32 2147483647, %v12246_v38  ;;  %v5409_v10 = vld [vmem:[#allocation3 + $0x16] ss:$8 sm:$0x3] }
 0xbf3   : > { %v5356_v5 = vand.u32 2147483648, %v12246_v38  ;;  %v5332_v13 = vsub.f32 1.0, %v5331_v14  ;;  %v5360_v49 = vmul.f32 %v5253_v43, %v12126_v17  ;;  %v5361_v12 = vmul.f32 %v5268_v58, %v12130_v31  ;;  %vm5337_vm4 = vmor %vm5335_vm0, %vm5336_vm5  ;;  %v5411_v14 = vld [vmem:[#allocation3 + $0x36] ss:$8 sm:$0x3] }
 0xbf4   : > { %v5362_v23 = vmul.f32 %v5283_v63, %v12132_v19  ;;  %v5323_v44 = vsel %vm5322_vm14, %v7087_v32, %v5319_v52  ;;  %v5363_v22 = vmul.f32 %v5298_v35, %v12135_v39  ;;  %v5364_v28 = vmul.f32 %v5313_v25, %v12137_v27 }
 0xbf5   : > { %v5368_v54 = vsub.f32 1.0, %v5253_v43  ;;  %v7091_v0 = vpop.eup %7090  ;;  %v5328_v6 = vsel %vm12332_vm3, %v5327_v40, %v5323_v44  ;;  %v5333_v1 = vmul.f32 %v7089_v47, %v5332_v13  ;;  %v5369_v45 = vsub.f32 1.0, %v5268_v58 }
 0xbf6   : > { %v5370_v59 = vsub.f32 1.0, %v5283_v63  ;;  %v5346_v26 = vmul.f32 %v7091_v0, %v12246_v38  ;;  %vm5351_vm1 = vweird.f32 %v7091_v0  ;;  %v5365_v17 = vmul.f32 %v5328_v6, %v12142_v8 }
 0xbf7   : > { %v5371_v31 = vsub.f32 1.0, %v5298_v35  ;;  %v5334_v19 = vadd.f32 %v7089_v47, %v5333_v1  ;;  %v5372_v32 = vsub.f32 1.0, %v5313_v25  ;;  %v5373_v46 = vsub.f32 1.0, %v5328_v6 }
 0xbf8   : > { %v5384_v39 = vmul.f32 %v5376_v34, %v5368_v54  ;;  %v5347_v27 = vsub.f32 1.0, %v5346_v26  ;;  %v5385_v60 = vmul.f32 %v5377_v51, %v5369_v45  ;;  %v5386_v18 = vmul.f32 %v5378_v56, %v5370_v59  ;;  %v5421_v45 = vld [vmem:[#allocation3 + $0xd6] ss:$8 sm:$0x3] }
 0xbf9   : > { %v5387_v8 = vmul.f32 %v5379_v9, %v5371_v31  ;;  %v5338_v55 = vsel %vm5337_vm4, %v7089_v47, %v5334_v19  ;;  %v5388_v29 = vmul.f32 %v5380_v53, %v5372_v32  ;;  %v5389_v34 = vmul.f32 %v5381_v20, %v5373_v46  ;;  %v5423_v59 = vld [vmem:[#allocation3 + $0xf6] ss:$8 sm:$0x3] }
 0xbfa   : > { %v12397_v33 = vadd.f32 %v5384_v39, %v5360_v49  ;;  %v5343_v11 = vsel %vm12364_vm13, %v5342_v37, %v5338_v55  ;;  %v5348_v51 = vmul.f32 %v7091_v0, %v5347_v27  ;;  %v12401_v57 = vadd.f32 %v5385_v60, %v5361_v12  ;;  %v5415_v37 = vld [vmem:[#allocation3 + $0x76] ss:$8 sm:$0x3] }
 0xbfb   : > { %v12403_v56 = vadd.f32 %v5386_v18, %v5362_v23  ;;  %v5374_v7 = vsub.f32 1.0, %v5343_v11  ;;  %v12406_v9 = vadd.f32 %v5387_v8, %v5363_v22  ;;  %v12408_v53 = vadd.f32 %v5388_v29, %v5364_v28  ;;  %v5417_v49 = vld [vmem:[#allocation3 + $0x96] ss:$8 sm:$0x3] }
 0xbfc   : > { %5400 = vst [vmem:[%s7841_s12 + $0xd] sm:$0x1] %v12397_v33  ;;  %v5349_v41 = vadd.f32 %v7091_v0, %v5348_v51  ;;  %vm5350_vm15 = vweird.f32 %v12246_v38  ;;  %v12413_v20 = vadd.f32 %v5389_v34, %v5365_v17  ;;  %v5357_v42 = vor.u32 1.1754944e-38, %v5356_v5  ;;  %v5419_v28 = vld [vmem:[#allocation3 + $0xb6] ss:$8 sm:$0x3] }
 0xbfd   : > { %5401 = vst [vmem:[%s7841_s12 + $0x1d] sm:$0x1] %v12401_v57  ;;  %vm5352_vm9 = vmor %vm5350_vm15, %vm5351_vm1  ;;  %v5366_v16 = vmul.f32 %v5343_v11, %v12152_v50  ;;  %v5390_v43 = vmul.f32 %v5382_v21, %v5374_v7  ;;  %vm5355_vm12 = vcmp.eq.f32.partialorder %v5354_v4, 8.507059e+37  ;;  %v5383_v2 = vmax.f32 %v12196_v30, 0.0 }
 0xbfe   : > { %5402 = vst [vmem:[%s7841_s12 + $0x2d] sm:$0x1] %v12403_v56  ;;  %v5353_v24 = vsel %vm5352_vm9, %v7091_v0, %v5349_v41  ;;  %vm13803_vm7 = vcmask 1040384   ;;  %vm13804_vm10 = vcmask 1041409   ;;  %vm13805_vm3 = vcmask 1042434  }
 0xbff   : > { %5403 = vst [vmem:[%s7841_s12 + $0x3d] sm:$0x1] %v12406_v9  ;;  %v5358_v38 = vsel %vm5355_vm12, %v5357_v42, %v5353_v24  ;;  %v12423_v15 = vadd.f32 %v5390_v43, %v5366_v16  ;;  %vm13806_vm6 = vcmask 1043459   ;;  %vm13807_vm8 = vcmask 1044484  }
 0xc00   : > { %5404 = vst [vmem:[%s7841_s12 + $0x4d] sm:$0x1] %v12408_v53  ;;  %v5375_v48 = vsub.f32 1.0, %v5358_v38  ;;  %v5367_v50 = vmul.f32 %v5358_v38, %v12164_v36  ;;  %vm13808_vm11 = vcmask 1045509   ;;  %vm13809_vm2 = vcmask 1046534  }
 0xc01   : > { %5405 = vst [vmem:[%s7841_s12 + $0x5d] sm:$0x1] %v12413_v20  ;;  %vm13810_vm0 = vcmask 1046528  }
 0xc02   : > { %5406 = vst [vmem:[%s7841_s12 + $0x6d] sm:$0x1] %v12423_v15  ;;  %v5391_v58 = vmul.f32 %v5383_v2, %v5375_v48 }
 0xc03   : > { %5432 = vst [vmem:[#allocation1] ss:$9 sm:$0xff] %v12397_v33 }
 0xc04   : > { %5434 = vst [vmem:[#allocation1 + $0x1] ss:$9 sm:$0xff] %v12401_v57  ;;  %v12435_v61 = vadd.f32 %v5391_v58, %v5367_v50 }
 0xc05   : > { %5436 = vst [vmem:[#allocation1 + $0x2] ss:$9 sm:$0xff] %v12403_v56 }
 0xc06   : > { %5438 = vst [vmem:[#allocation1 + $0x3] ss:$9 sm:$0xff] %v12406_v9 }
 0xc07   : > { %5407 = vst [vmem:[%s7841_s12 + $0x7d] sm:$0x1] %v12435_v61 }
 0xc08   : > { %5440 = vst [vmem:[#allocation1 + $0x4] ss:$9 sm:$0xff] %v12408_v53 }
 0xc09   : > { %5442 = vst [vmem:[#allocation1 + $0x5] ss:$9 sm:$0xff] %v12413_v20 }
 0xc0a   : > { %5444 = vst [vmem:[#allocation1 + $0x6] ss:$9 sm:$0xff] %v12423_v15 }
 0xc0b   : > { %5446 = vst [vmem:[#allocation1 + $0x7] ss:$9 sm:$0xff] %v12435_v61 }
 0xc12   : > { %v5447_v36 = vld [vmem:[#allocation1] sm:$0xff] }
 0xc13   : > { %5465 = vmatmul.f32.vlgmr.msra.gmra.mxu0 %v5447_v36  ;;  %5485 = vmatmul.f32.vlgmr.msra.gmra.mxu1 %v5447_v36 }
 0xc90   : > { %v5486_v30 = vpop.f32.mrf.mxu1  ;;  %v5466_v63 = vpop.f32.mrf.mxu0 }
 0xc91   : > { %v5491_v47 = vrot.slane %v5486_v30, 7 }
 0xc93   : > { %v5492_v62 = vsel %vm13803_vm7, %v5466_v63, %v5491_v47  ;;  %v5493_v40 = vsel %vm13804_vm10, %v5466_v63, %v5491_v47  ;;  %v5495_v35 = vsel %vm13805_vm3, %v5466_v63, %v5491_v47  ;;  %v5497_v25 = vsel %vm13806_vm6, %v5466_v63, %v5491_v47 }
 0xc94   : > { %v5494_v52 = vrot.slane %v5493_v40, 1  ;;  %v5496_v4 = vrot.slane %v5495_v35, 2  ;;  %v5498_v5 = vrot.slane %v5497_v25, 3  ;;  %v5499_v13 = vsel %vm13807_vm8, %v5466_v63, %v5491_v47 }
 0xc95   : > { %v5500_v12 = vrot.slane %v5499_v13, 4  ;;  %v5501_v23 = vsel %vm13808_vm11, %v5466_v63, %v5491_v47  ;;  %v5503_v44 = vsel %vm13809_vm2, %v5466_v63, %v5491_v47  ;;  %v5505_v22 = vsel %vm13810_vm0, %v5491_v47, %v5466_v63 }
 0xc96   : > { %v5502_v54 = vrot.slane %v5501_v23, 5  ;;  %v5504_v0 = vrot.slane %v5503_v44, 6  ;;  %v5506_v6 = vrot.slane %v5505_v22, 7  ;;  %v12453_v1 = vadd.f32 %v5492_v62, %v5409_v10 }
 0xc97   : > { %v12455_v26 = vadd.f32 %v5494_v52, %v5411_v14  ;;  %v12457_v17 = vadd.f32 %v5496_v4, %v5413_v3  ;;  %v12459_v31 = vadd.f32 %v5498_v5, %v5415_v37  ;;  %v12461_v19 = vadd.f32 %v5500_v12, %v5417_v49 }
 0xc98   : > { %v12463_v32 = vadd.f32 %v5502_v54, %v5419_v28  ;;  %v12465_v46 = vadd.f32 %v5504_v0, %v5421_v45  ;;  %v12467_v39 = vadd.f32 %v5506_v6, %v5423_v59  ;;  %v5531_v27 = vrot.slane %v12453_v1, 1 }
 0xc99   : > { %v5532_v60 = vrot.slane %v12455_v26, 1  ;;  %v5533_v18 = vrot.slane %v12457_v17, 1  ;;  %v5534_v8 = vrot.slane %v12459_v31, 1  ;;  %v5535_v55 = vrot.slane %v12461_v19, 1 }
 0xc9a   : > { %v5536_v29 = vrot.slane %v12463_v32, 1  ;;  %v5537_v34 = vrot.slane %v12465_v46, 1  ;;  %v6461_v11 = vmul.f32 -1.442695, %v5531_v27  ;;  %v5538_v41 = vrot.slane %v12467_v39, 1 }
 0xc9b   : > { %v6462_v51 = vmul.f32 -1.442695, %v5532_v60  ;;  %v6463_v7 = vmul.f32 -1.442695, %v5533_v18  ;;  %v6464_v21 = vmul.f32 -1.442695, %v5534_v8 }
 0xc9c   : > { %7092 = vpow2.f32 %v6461_v11  ;;  %v6465_v42 = vmul.f32 -1.442695, %v5535_v55  ;;  %v6466_v16 = vmul.f32 -1.442695, %v5536_v29  ;;  %v6467_v43 = vmul.f32 -1.442695, %v5537_v34 }
 0xc9d   : > { %7094 = vpow2.f32 %v6462_v51  ;;  %v6468_v24 = vmul.f32 -1.442695, %v5538_v41  ;;  %v5715_v14 = vmax.f32 %v12453_v1, 0.0  ;;  %v5716_v3 = vmax.f32 %v12455_v26, 0.0 }
 0xc9e   : > { %7096 = vpow2.f32 %v6463_v7  ;;  %v5717_v37 = vmax.f32 %v12457_v17, 0.0  ;;  %v5718_v52 = vmax.f32 %v12459_v31, 0.0  ;;  %v5719_v13 = vmax.f32 %v12461_v19, 0.0 }
 0xc9f   : > { %7098 = vpow2.f32 %v6464_v21  ;;  %v5720_v49 = vmax.f32 %v12463_v32, 0.0  ;;  %v5721_v19 = vmax.f32 %v12465_v46, 0.0 }
 0xca0   : > { %7100 = vpow2.f32 %v6465_v42 }
 0xca1   : > { %7102 = vpow2.f32 %v6466_v16 }
 0xca2   : > { %v7093_v38 = vpop.eup %7092  ;;  %7104 = vpow2.f32 %v6467_v43 }
 0xca3   : > { %v7095_v48 = vpop.eup %7094  ;;  %v12477_v2 = vadd.f32 1.0, %v7093_v38  ;;  %7106 = vpow2.f32 %v6468_v24 }
 0xca4   : > { %v7097_v50 = vpop.eup %7096  ;;  %v12479_v58 = vadd.f32 1.0, %v7095_v48 }
 0xca5   : > { %v7099_v36 = vpop.eup %7098  ;;  %v12481_v30 = vadd.f32 1.0, %v7097_v50  ;;  %7108 = vrcp.f32 %v12477_v2  ;;  %v5590_v40 = vand.u32 2147483648, %v12477_v2  ;;  %vm5584_vm13 = vweird.f32 %v12477_v2 }
 0xca6   : > { %v7101_v47 = vpop.eup %7100  ;;  %v12484_v63 = vadd.f32 1.0, %v7099_v36  ;;  %7110 = vrcp.f32 %v12479_v58  ;;  %v5605_v35 = vand.u32 2147483648, %v12479_v58  ;;  %v5588_v23 = vand.u32 2147483647, %v12477_v2 }
 0xca7   : > { %v7103_v10 = vpop.eup %7102  ;;  %v12487_v62 = vadd.f32 1.0, %v7101_v47  ;;  %7112 = vrcp.f32 %v12481_v30  ;;  %v5603_v44 = vand.u32 2147483647, %v12479_v58  ;;  %v5620_v22 = vand.u32 2147483648, %v12481_v30 }
 0xca8   : > { %v7105_v25 = vpop.eup %7104  ;;  %v12496_v5 = vadd.f32 1.0, %v7103_v10  ;;  %7114 = vrcp.f32 %v12484_v63  ;;  %v5591_v6 = vor.u32 1.1754944e-38, %v5590_v40  ;;  %vm5599_vm5 = vweird.f32 %v12479_v58 }
 0xca9   : > { %v7107_v4 = vpop.eup %7106  ;;  %7116 = vrcp.f32 %v12487_v62  ;;  %v12510_v54 = vadd.f32 1.0, %v7105_v25  ;;  %v12515_v45 = vor.u32 1.1754944e-38, %v5605_v35  ;;  %vm5614_vm14 = vweird.f32 %v12481_v30 }
 0xcaa   : > { %v12517_v59 = vadd.f32 1.0, %v7107_v4  ;;  %v5618_v60 = vand.u32 2147483647, %v12481_v30  ;;  %v5635_v18 = vand.u32 2147483648, %v12484_v63  ;;  %v5633_v29 = vand.u32 2147483647, %v12484_v63 }
 0xcab   : > { %v12501_v12 = vpop.eup %7108  ;;  %v5648_v34 = vand.u32 2147483647, %v12487_v62  ;;  %7118 = vrcp.f32 %v12496_v5  ;;  %vm12530_vm4 = vcmp.eq.f32.partialorder %v5588_v23, 8.507059e+37  ;;  %v5621_v21 = vor.u32 1.1754944e-38, %v5620_v22 }
 0xcac   : > { %v12508_v28 = vpop.eup %7110  ;;  %v5580_v0 = vmul.f32 %v12501_v12, %v12477_v2  ;;  %vm5585_vm1 = vweird.f32 %v12501_v12  ;;  %vm5629_vm15 = vweird.f32 %v12484_v63  ;;  %vm12539_vm12 = vcmp.eq.f32.partialorder %v5603_v44, 8.507059e+37 }
 0xcad   : > { %v5595_v27 = vmul.f32 %v12508_v28, %v12479_v58  ;;  %v12524_v8 = vpop.eup %7112  ;;  %vm5600_vm9 = vweird.f32 %v12508_v28  ;;  %v5650_v43 = vand.u32 2147483648, %v12487_v62  ;;  %vm12546_vm10 = vcmp.eq.f32.partialorder %v5618_v60, 8.507059e+37  ;;  %vm12569_vm11 = vmor %vm5584_vm13, %vm5585_vm1 }
 0xcae   : > { %v5581_v55 = vsub.f32 1.0, %v5580_v0  ;;  %v5610_v7 = vmul.f32 %v12524_v8, %v12481_v30  ;;  %v7115_v41 = vpop.eup %7114  ;;  %v5636_v47 = vor.u32 1.1754944e-38, %v5635_v18  ;;  %vm5615_vm3 = vweird.f32 %v12524_v8  ;;  %vm12582_vm7 = vmor %vm5599_vm5, %vm5600_vm9 }
 0xcaf   : > { %v5596_v51 = vsub.f32 1.0, %v5595_v27  ;;  %v7117_v24 = vpop.eup %7116  ;;  %v5625_v36 = vmul.f32 %v7115_v41, %v12484_v63  ;;  %vm12553_vm6 = vcmp.eq.f32.partialorder %v5633_v29, 8.507059e+37  ;;  %vm12558_vm8 = vcmp.eq.f32.partialorder %v5648_v34, 8.507059e+37  ;;  %vm12594_vm1 = vmor %vm5614_vm14, %vm5615_vm3 }
 0xcb0   : > { %v5582_v42 = vmul.f32 %v12501_v12, %v5581_v55  ;;  %v5611_v48 = vsub.f32 1.0, %v5610_v7  ;;  %v5640_v35 = vmul.f32 %v7117_v24, %v12487_v62  ;;  %v5663_v22 = vand.u32 2147483647, %v12496_v5 }
 0xcb1   : > { %v5597_v38 = vmul.f32 %v12508_v28, %v5596_v51  ;;  %v5626_v44 = vsub.f32 1.0, %v5625_v36  ;;  %v7119_v0 = vpop.eup %7118  ;;  %vm5630_vm2 = vweird.f32 %v7115_v41  ;;  %v5651_v18 = vor.u32 1.1754944e-38, %v5650_v43 }
 0xcb2   : > { %v5583_v10 = vadd.f32 %v12501_v12, %v5582_v42  ;;  %v5612_v23 = vmul.f32 %v12524_v8, %v5611_v48  ;;  %v5641_v60 = vsub.f32 1.0, %v5640_v35  ;;  %vm5659_vm0 = vweird.f32 %v12496_v5  ;;  %vm12613_vm14 = vmor %vm5629_vm15, %vm5630_vm2 }
 0xcb3   : > { %v5598_v4 = vadd.f32 %v12508_v28, %v5597_v38  ;;  %7120 = vrcp.f32 %v12510_v54  ;;  %v5627_v34 = vmul.f32 %v7115_v41, %v5626_v44  ;;  %vm5645_vm13 = vweird.f32 %v7117_v24 }
 0xcb4   : > { %v5587_v55 = vsel %vm12569_vm11, %v12501_v12, %v5583_v10  ;;  %v5613_v29 = vadd.f32 %v12524_v8, %v5612_v23  ;;  %v5642_v58 = vmul.f32 %v7117_v24, %v5641_v60  ;;  %v5655_v7 = vmul.f32 %v7119_v0, %v12496_v5 }
 0xcb5   : > { %v5602_v51 = vsel %vm12582_vm7, %v12508_v28, %v5598_v4  ;;  %v5665_v42 = vand.u32 2147483648, %v12496_v5  ;;  %v5628_v38 = vadd.f32 %v7115_v41, %v5627_v34  ;;  %vm12603_vm5 = vcmp.eq.f32.partialorder %v5663_v22, 8.507059e+37  ;;  %v5752_v22 = vld [vmem:[#allocation3 + $0x57] ss:$8 sm:$0x3] }
 0xcb6   : > { %v5617_v43 = vsel %vm12594_vm1, %v12524_v8, %v5613_v29  ;;  %v5678_v30 = vand.u32 2147483647, %v12510_v54  ;;  %v5592_v48 = vsel %vm12530_vm4, %v5591_v6, %v5587_v55  ;;  %v5643_v10 = vadd.f32 %v7117_v24, %v5642_v58 }
 0xcb7   : > { %v5656_v35 = vsub.f32 1.0, %v5655_v7  ;;  %v5680_v8 = vand.u32 2147483648, %v12510_v54  ;;  %v5607_v4 = vsel %vm12539_vm12, %v12515_v45, %v5602_v51  ;;  %v5632_v23 = vsel %vm12613_vm14, %v7115_v41, %v5628_v38 }
 0xcb8   : > { %vm13831_vm4 = vweird.f32 %v12487_v62  ;;  %vm5660_vm7 = vweird.f32 %v7119_v0  ;;  %vm5674_vm15 = vweird.f32 %v12510_v54  ;;  %7122 = vrcp.f32 %v12517_v59 }
 0xcb9   : > { %vm5646_vm9 = vmor %vm13831_vm4, %vm5645_vm13  ;;  %v7121_v63 = vpop.eup %7120  ;;  %v5622_v6 = vsel %vm12546_vm10, %v5621_v21, %v5617_v43  ;;  %v5657_v44 = vmul.f32 %v7119_v0, %v5656_v35  ;;  %v5666_v16 = vor.u32 1.1754944e-38, %v5665_v42  ;;  %v5637_v45 = vsel %vm12553_vm6, %v5636_v47, %v5632_v23 }
 0xcba   : > { %v5647_v11 = vsel %vm5646_vm9, %v7117_v24, %v5643_v10  ;;  %v5670_v62 = vmul.f32 %v7121_v63, %v12510_v54  ;;  %vm12635_vm12 = vcmp.eq.f32.partialorder %v5678_v30, 8.507059e+37  ;;  %v5681_v27 = vor.u32 1.1754944e-38, %v5680_v8  ;;  %vm5661_vm10 = vmor %vm5659_vm0, %vm5660_vm7 }
 0xcbb   : > { %v5652_v41 = vsel %vm12558_vm8, %v5651_v18, %v5647_v11  ;;  %v5658_v60 = vadd.f32 %v7119_v0, %v5657_v44  ;;  %vm5675_vm3 = vweird.f32 %v7121_v63  ;;  %v5693_v21 = vand.u32 2147483647, %v12517_v59  ;;  %v5748_v11 = vld [vmem:[#allocation3 + $0x17] ss:$8 sm:$0x3] }
 0xcbc   : > { %v5695_v24 = vand.u32 2147483648, %v12517_v59  ;;  %v5671_v50 = vsub.f32 1.0, %v5670_v62  ;;  %v5699_v47 = vmul.f32 %v5592_v48, %v12397_v33  ;;  %v5700_v40 = vmul.f32 %v5607_v4, %v12401_v57  ;;  %vm5676_vm8 = vmor %vm5674_vm15, %vm5675_vm3  ;;  %v5750_v62 = vld [vmem:[#allocation3 + $0x37] ss:$8 sm:$0x3] }
 0xcbd   : > { %v5701_v25 = vmul.f32 %v5622_v6, %v12403_v56  ;;  %v5662_v18 = vsel %vm5661_vm10, %v7119_v0, %v5658_v60  ;;  %v5702_v55 = vmul.f32 %v5637_v45, %v12406_v9  ;;  %v5703_v2 = vmul.f32 %v5652_v41, %v12408_v53 }
 0xcbe   : > { %v5707_v29 = vsub.f32 1.0, %v5592_v48  ;;  %v7123_v34 = vpop.eup %7122  ;;  %v5667_v51 = vsel %vm12603_vm5, %v5666_v16, %v5662_v18  ;;  %v5672_v12 = vmul.f32 %v7121_v63, %v5671_v50  ;;  %v5708_v5 = vsub.f32 1.0, %v5607_v4 }
 0xcbf   : > { %v5709_v58 = vsub.f32 1.0, %v5622_v6  ;;  %v5685_v7 = vmul.f32 %v7123_v34, %v12517_v59  ;;  %vm5690_vm6 = vweird.f32 %v7123_v34  ;;  %v5704_v33 = vmul.f32 %v5667_v51, %v12413_v20 }
 0xcc0   : > { %v5710_v57 = vsub.f32 1.0, %v5637_v45  ;;  %v5673_v56 = vadd.f32 %v7121_v63, %v5672_v12  ;;  %v5711_v0 = vsub.f32 1.0, %v5652_v41  ;;  %v5712_v42 = vsub.f32 1.0, %v5667_v51 }
 0xcc1   : > { %v5723_v9 = vmul.f32 %v5715_v14, %v5707_v29  ;;  %v5686_v53 = vsub.f32 1.0, %v5685_v7  ;;  %v5724_v43 = vmul.f32 %v5716_v3, %v5708_v5  ;;  %v5725_v38 = vmul.f32 %v5717_v37, %v5709_v58  ;;  %v5760_v5 = vld [vmem:[#allocation3 + $0xd7] ss:$8 sm:$0x3] }
 0xcc2   : > { %v5726_v20 = vmul.f32 %v5718_v52, %v5710_v57  ;;  %v5677_v28 = vsel %vm5676_vm8, %v7121_v63, %v5673_v56  ;;  %v5727_v1 = vmul.f32 %v5719_v13, %v5711_v0  ;;  %v5728_v14 = vmul.f32 %v5720_v49, %v5712_v42  ;;  %v5762_v58 = vld [vmem:[#allocation3 + $0xf7] ss:$8 sm:$0x3] }
 0xcc3   : > { %v12668_v54 = vadd.f32 %v5723_v9, %v5699_v47  ;;  %v5682_v26 = vsel %vm12635_vm12, %v5681_v27, %v5677_v28  ;;  %v5687_v3 = vmul.f32 %v7123_v34, %v5686_v53  ;;  %v12672_v17 = vadd.f32 %v5724_v43, %v5700_v40  ;;  %v5754_v27 = vld [vmem:[#allocation3 + $0x77] ss:$8 sm:$0x3] }
 0xcc4   : > { %v12674_v37 = vadd.f32 %v5725_v38, %v5701_v25  ;;  %v5713_v31 = vsub.f32 1.0, %v5682_v26  ;;  %v12677_v52 = vadd.f32 %v5726_v20, %v5702_v55  ;;  %v12679_v13 = vadd.f32 %v5727_v1, %v5703_v2  ;;  %v5756_v47 = vld [vmem:[#allocation3 + $0x97] ss:$8 sm:$0x3] }
 0xcc5   : > { %5739 = vst [vmem:[%s7841_s12 + $0xe] sm:$0x1] %v12668_v54  ;;  %v5688_v32 = vadd.f32 %v7123_v34, %v5687_v3  ;;  %vm5689_vm11 = vweird.f32 %v12517_v59  ;;  %v12684_v49 = vadd.f32 %v5728_v14, %v5704_v33  ;;  %v5696_v30 = vor.u32 1.1754944e-38, %v5695_v24  ;;  %v5758_v2 = vld [vmem:[#allocation3 + $0xb7] ss:$8 sm:$0x3] }
 0xcc6   : > { %5740 = vst [vmem:[%s7841_s12 + $0x1e] sm:$0x1] %v12672_v17  ;;  %vm5691_vm2 = vmor %vm5689_vm11, %vm5690_vm6  ;;  %v5705_v46 = vmul.f32 %v5682_v26, %v12423_v15  ;;  %v5729_v48 = vmul.f32 %v5721_v19, %v5713_v31  ;;  %vm5694_vm0 = vcmp.eq.f32.partialorder %v5693_v21, 8.507059e+37  ;;  %v5722_v8 = vmax.f32 %v12467_v39, 0.0 }
 0xcc7   : > { %5741 = vst [vmem:[%s7841_s12 + $0x2e] sm:$0x1] %v12674_v37  ;;  %v5692_v36 = vsel %vm5691_vm2, %v7123_v34, %v5688_v32  ;;  %vm13834_vm13 = vcmask 1040384   ;;  %vm13835_vm1 = vcmask 1041409   ;;  %vm13836_vm5 = vcmask 1042434  }
 0xcc8   : > { %5742 = vst [vmem:[%s7841_s12 + $0x3e] sm:$0x1] %v12677_v52  ;;  %v5697_v59 = vsel %vm5694_vm0, %v5696_v30, %v5692_v36  ;;  %v12694_v10 = vadd.f32 %v5729_v48, %v5705_v46  ;;  %vm13837_vm14 = vcmask 1043459   ;;  %vm13838_vm4 = vcmask 1044484  }
 0xcc9   : > { %5743 = vst [vmem:[%s7841_s12 + $0x4e] sm:$0x1] %v12679_v13  ;;  %v5714_v35 = vsub.f32 1.0, %v5697_v59  ;;  %v5706_v15 = vmul.f32 %v5697_v59, %v12435_v61  ;;  %vm13839_vm9 = vcmask 1045509   ;;  %vm13840_vm7 = vcmask 1046534  }
 0xcca   : > { %5744 = vst [vmem:[%s7841_s12 + $0x5e] sm:$0x1] %v12684_v49  ;;  %vm13841_vm15 = vcmask 1046528  }
 0xccb   : > { %5745 = vst [vmem:[%s7841_s12 + $0x6e] sm:$0x1] %v12694_v10  ;;  %v5730_v4 = vmul.f32 %v5722_v8, %v5714_v35 }
 0xccc   : > { %5771 = vst [vmem:[#allocation1] ss:$9 sm:$0xff] %v12668_v54 }
 0xccd   : > { %5773 = vst [vmem:[#allocation1 + $0x1] ss:$9 sm:$0xff] %v12672_v17  ;;  %v12706_v23 = vadd.f32 %v5730_v4, %v5706_v15 }
 0xcce   : > { %5775 = vst [vmem:[#allocation1 + $0x2] ss:$9 sm:$0xff] %v12674_v37 }
 0xccf   : > { %5777 = vst [vmem:[#allocation1 + $0x3] ss:$9 sm:$0xff] %v12677_v52 }
 0xcd0   : > { %5746 = vst [vmem:[%s7841_s12 + $0x7e] sm:$0x1] %v12706_v23 }
 0xcd1   : > { %5779 = vst [vmem:[#allocation1 + $0x4] ss:$9 sm:$0xff] %v12679_v13 }
 0xcd2   : > { %5781 = vst [vmem:[#allocation1 + $0x5] ss:$9 sm:$0xff] %v12684_v49 }
 0xcd3   : > { %5783 = vst [vmem:[#allocation1 + $0x6] ss:$9 sm:$0xff] %v12694_v10 }
 0xcd4   : > { %5785 = vst [vmem:[#allocation1 + $0x7] ss:$9 sm:$0xff] %v12706_v23 }
 0xcdb   : > { %v5786_v61 = vld [vmem:[#allocation1] sm:$0xff] }
 0xcdc   : > { %5804 = vmatmul.f32.vlgmr.msrb.gmra.mxu2 %v5786_v61  ;;  %5824 = vmatmul.f32.vlgmr.msrb.gmra.mxu3 %v5786_v61 }
 0xd5f   : > { %v5825_v39 = vpop.f32.mrf.mxu3  ;;  %v5805_v6 = vpop.f32.mrf.mxu2 }
 0xd60   : > { %v5830_v63 = vrot.slane %v5825_v39, 7 }
 0xd62   : > { %v5831_v44 = vsel %vm13834_vm13, %v5805_v6, %v5830_v63  ;;  %v5832_v16 = vsel %vm13835_vm1, %v5805_v6, %v5830_v63  ;;  %v5834_v45 = vsel %vm13836_vm5, %v5805_v6, %v5830_v63  ;;  %v5836_v41 = vsel %vm13837_vm14, %v5805_v6, %v5830_v63 }
 0xd63   : > { %v5833_v60 = vrot.slane %v5832_v16, 1  ;;  %v5835_v21 = vrot.slane %v5834_v45, 2  ;;  %v5837_v24 = vrot.slane %v5836_v41, 3  ;;  %v5838_v50 = vsel %vm13838_vm4, %v5805_v6, %v5830_v63 }
 0xd64   : > { %v5839_v40 = vrot.slane %v5838_v50, 4  ;;  %v5840_v25 = vsel %vm13839_vm9, %v5805_v6, %v5830_v63  ;;  %v5842_v18 = vsel %vm13840_vm7, %v5805_v6, %v5830_v63  ;;  %v5844_v55 = vsel %vm13841_vm15, %v5830_v63, %v5805_v6 }
 0xd65   : > { %v5841_v29 = vrot.slane %v5840_v25, 5  ;;  %v5843_v34 = vrot.slane %v5842_v18, 6  ;;  %v5845_v51 = vrot.slane %v5844_v55, 7  ;;  %v12724_v12 = vadd.f32 %v5831_v44, %v5748_v11 }
 0xd66   : > { %v12726_v7 = vadd.f32 %v5833_v60, %v5750_v62  ;;  %v12728_v33 = vadd.f32 %v5835_v21, %v5752_v22  ;;  %v12730_v57 = vadd.f32 %v5837_v24, %v5754_v27  ;;  %v12732_v56 = vadd.f32 %v5839_v40, %v5756_v47 }
 0xd67   : > { %v12734_v0 = vadd.f32 %v5841_v29, %v5758_v2  ;;  %v12736_v42 = vadd.f32 %v5843_v34, %v5760_v5  ;;  %v12738_v9 = vadd.f32 %v5845_v51, %v5762_v58  ;;  %v5870_v53 = vrot.slane %v12724_v12, 1 }
 0xd68   : > { %v5871_v43 = vrot.slane %v12726_v7, 1  ;;  %v5872_v38 = vrot.slane %v12728_v33, 1  ;;  %v5873_v20 = vrot.slane %v12730_v57, 1  ;;  %v5874_v28 = vrot.slane %v12732_v56, 1 }
 0xd69   : > { %v5875_v1 = vrot.slane %v12734_v0, 1  ;;  %v5876_v14 = vrot.slane %v12736_v42, 1  ;;  %v6469_v26 = vmul.f32 -1.442695, %v5870_v53  ;;  %v5877_v32 = vrot.slane %v12738_v9, 1 }
 0xd6a   : > { %v6470_v3 = vmul.f32 -1.442695, %v5871_v43  ;;  %v6471_v31 = vmul.f32 -1.442695, %v5872_v38  ;;  %v6472_v19 = vmul.f32 -1.442695, %v5873_v20 }
 0xd6b   : > { %7124 = vpow2.f32 %v6469_v26  ;;  %v6473_v30 = vmul.f32 -1.442695, %v5874_v28  ;;  %v6474_v46 = vmul.f32 -1.442695, %v5875_v1  ;;  %v6475_v48 = vmul.f32 -1.442695, %v5876_v14 }
 0xd6c   : > { %7126 = vpow2.f32 %v6470_v3  ;;  %v6476_v36 = vmul.f32 -1.442695, %v5877_v32  ;;  %v6054_v62 = vmax.f32 %v12724_v12, 0.0  ;;  %v6055_v22 = vmax.f32 %v12726_v7, 0.0 }
 0xd6d   : > { %7128 = vpow2.f32 %v6471_v31  ;;  %v6056_v27 = vmax.f32 %v12728_v33, 0.0  ;;  %v6057_v60 = vmax.f32 %v12730_v57, 0.0  ;;  %v6058_v50 = vmax.f32 %v12732_v56, 0.0 }
 0xd6e   : > { %7130 = vpow2.f32 %v6472_v19  ;;  %v6059_v47 = vmax.f32 %v12734_v0, 0.0  ;;  %v6060_v57 = vmax.f32 %v12736_v42, 0.0 }
 0xd6f   : > { %7132 = vpow2.f32 %v6473_v30 }
 0xd70   : > { %7134 = vpow2.f32 %v6474_v46 }
 0xd71   : > { %v7125_v59 = vpop.eup %7124  ;;  %7136 = vpow2.f32 %v6475_v48 }
 0xd72   : > { %v7127_v35 = vpop.eup %7126  ;;  %v12748_v8 = vadd.f32 1.0, %v7125_v59  ;;  %7138 = vpow2.f32 %v6476_v36 }
 0xd73   : > { %v7129_v15 = vpop.eup %7128  ;;  %v12750_v4 = vadd.f32 1.0, %v7127_v35 }
 0xd74   : > { %v7131_v61 = vpop.eup %7130  ;;  %v12752_v39 = vadd.f32 1.0, %v7129_v15  ;;  %7140 = vrcp.f32 %v12748_v8  ;;  %v5929_v16 = vand.u32 2147483648, %v12748_v8  ;;  %vm5923_vm12 = vweird.f32 %v12748_v8 }
 0xd75   : > { %v7133_v63 = vpop.eup %7132  ;;  %v12755_v6 = vadd.f32 1.0, %v7131_v61  ;;  %7142 = vrcp.f32 %v12750_v4  ;;  %v5944_v45 = vand.u32 2147483648, %v12750_v4  ;;  %v5927_v25 = vand.u32 2147483647, %v12748_v8 }
 0xd76   : > { %v7135_v11 = vpop.eup %7134  ;;  %v12758_v44 = vadd.f32 1.0, %v7133_v63  ;;  %7144 = vrcp.f32 %v12752_v39  ;;  %v5942_v18 = vand.u32 2147483647, %v12750_v4  ;;  %v5959_v55 = vand.u32 2147483648, %v12752_v39 }
 0xd77   : > { %v7137_v41 = vpop.eup %7136  ;;  %v12767_v24 = vadd.f32 1.0, %v7135_v11  ;;  %7146 = vrcp.f32 %v12755_v6  ;;  %v5930_v51 = vor.u32 1.1754944e-38, %v5929_v16  ;;  %vm5938_vm3 = vweird.f32 %v12750_v4 }
 0xd78   : > { %v7139_v21 = vpop.eup %7138  ;;  %7148 = vrcp.f32 %v12758_v44  ;;  %v12781_v29 = vadd.f32 1.0, %v7137_v41  ;;  %v12786_v5 = vor.u32 1.1754944e-38, %v5944_v45  ;;  %vm5953_vm10 = vweird.f32 %v12752_v39 }
 0xd79   : > { %v12788_v58 = vadd.f32 1.0, %v7139_v21  ;;  %v5957_v43 = vand.u32 2147483647, %v12752_v39  ;;  %v5974_v38 = vand.u32 2147483648, %v12755_v6  ;;  %v5972_v1 = vand.u32 2147483647, %v12755_v6 }
 0xd7a   : > { %v12772_v40 = vpop.eup %7140  ;;  %v5987_v14 = vand.u32 2147483647, %v12758_v44  ;;  %7150 = vrcp.f32 %v12767_v24  ;;  %vm12801_vm8 = vcmp.eq.f32.partialorder %v5927_v25, 8.507059e+37  ;;  %v5960_v19 = vor.u32 1.1754944e-38, %v5959_v55 }
 0xd7b   : > { %v12779_v2 = vpop.eup %7142  ;;  %v5919_v34 = vmul.f32 %v12772_v40, %v12748_v8  ;;  %vm5924_vm6 = vweird.f32 %v12772_v40  ;;  %vm5968_vm11 = vweird.f32 %v12755_v6  ;;  %vm12810_vm0 = vcmp.eq.f32.partialorder %v5942_v18, 8.507059e+37 }
 0xd7c   : > { %v5934_v53 = vmul.f32 %v12779_v2, %v12750_v4  ;;  %v12795_v20 = vpop.eup %7144  ;;  %vm5939_vm2 = vweird.f32 %v12779_v2  ;;  %v5989_v48 = vand.u32 2147483648, %v12758_v44  ;;  %vm12817_vm1 = vcmp.eq.f32.partialorder %v5957_v43, 8.507059e+37  ;;  %vm12840_vm9 = vmor %vm5923_vm12, %vm5924_vm6 }
 0xd7d   : > { %v5920_v28 = vsub.f32 1.0, %v5919_v34  ;;  %v5949_v31 = vmul.f32 %v12795_v20, %v12752_v39  ;;  %v7147_v32 = vpop.eup %7146  ;;  %v5975_v63 = vor.u32 1.1754944e-38, %v5974_v38  ;;  %vm5954_vm5 = vweird.f32 %v12795_v20  ;;  %vm12853_vm13 = vmor %vm5938_vm3, %vm5939_vm2 }
 0xd7e   : > { %v5935_v3 = vsub.f32 1.0, %v5934_v53  ;;  %v7149_v36 = vpop.eup %7148  ;;  %v5964_v61 = vmul.f32 %v7147_v32, %v12755_v6  ;;  %vm12824_vm14 = vcmp.eq.f32.partialorder %v5972_v1, 8.507059e+37  ;;  %vm12829_vm4 = vcmp.eq.f32.partialorder %v5987_v14, 8.507059e+37  ;;  %vm12865_vm6 = vmor %vm5953_vm10, %vm5954_vm5 }
 0xd7f   : > { %v5921_v30 = vmul.f32 %v12772_v40, %v5920_v28  ;;  %v5950_v35 = vsub.f32 1.0, %v5949_v31  ;;  %v5979_v45 = vmul.f32 %v7149_v36, %v12758_v44  ;;  %v6002_v55 = vand.u32 2147483647, %v12767_v24 }
 0xd80   : > { %v5936_v59 = vmul.f32 %v12779_v2, %v5935_v3  ;;  %v5965_v18 = vsub.f32 1.0, %v5964_v61  ;;  %v7151_v34 = vpop.eup %7150  ;;  %vm5969_vm7 = vweird.f32 %v7147_v32  ;;  %v5990_v38 = vor.u32 1.1754944e-38, %v5989_v48 }
 0xd81   : > { %v5922_v11 = vadd.f32 %v12772_v40, %v5921_v30  ;;  %v5951_v25 = vmul.f32 %v12795_v20, %v5950_v35  ;;  %v5980_v43 = vsub.f32 1.0, %v5979_v45  ;;  %vm5998_vm15 = vweird.f32 %v12767_v24  ;;  %vm12884_vm10 = vmor %vm5968_vm11, %vm5969_vm7 }
 0xd82   : > { %v5937_v21 = vadd.f32 %v12779_v2, %v5936_v59  ;;  %7152 = vrcp.f32 %v12781_v29  ;;  %v5966_v14 = vmul.f32 %v7147_v32, %v5965_v18  ;;  %vm5984_vm12 = vweird.f32 %v7149_v36 }
 0xd83   : > { %v5926_v28 = vsel %vm12840_vm9, %v12772_v40, %v5922_v11  ;;  %v5952_v1 = vadd.f32 %v12795_v20, %v5951_v25  ;;  %v5981_v4 = vmul.f32 %v7149_v36, %v5980_v43  ;;  %v5994_v31 = vmul.f32 %v7151_v34, %v12767_v24 }
 0xd84   : > { %v5941_v3 = vsel %vm12853_vm13, %v12779_v2, %v5937_v21  ;;  %v6004_v30 = vand.u32 2147483648, %v12767_v24  ;;  %v5967_v59 = vadd.f32 %v7147_v32, %v5966_v14  ;;  %vm12874_vm3 = vcmp.eq.f32.partialorder %v6002_v55, 8.507059e+37 }
 0xd85   : > { %v5956_v48 = vsel %vm12865_vm6, %v12795_v20, %v5952_v1  ;;  %v6017_v39 = vand.u32 2147483647, %v12781_v29  ;;  %v5931_v35 = vsel %vm12801_vm8, %v5930_v51, %v5926_v28  ;;  %v5982_v11 = vadd.f32 %v7149_v36, %v5981_v4 }
 0xd86   : > { %v5995_v45 = vsub.f32 1.0, %v5994_v31  ;;  %v6019_v20 = vand.u32 2147483648, %v12781_v29  ;;  %v5946_v21 = vsel %vm12810_vm0, %v12786_v5, %v5941_v3  ;;  %v5971_v25 = vsel %vm12884_vm10, %v7147_v32, %v5967_v59 }
 0xd87   : > { %vm13862_vm8 = vweird.f32 %v12758_v44  ;;  %vm5999_vm13 = vweird.f32 %v7151_v34  ;;  %vm6013_vm11 = vweird.f32 %v12781_v29  ;;  %7154 = vrcp.f32 %v12788_v58 }
 0xd88   : > { %vm5985_vm2 = vmor %vm13862_vm8, %vm5984_vm12  ;;  %v7153_v6 = vpop.eup %7152  ;;  %v5961_v51 = vsel %vm12817_vm1, %v5960_v19, %v5956_v48  ;;  %v5996_v18 = vmul.f32 %v7151_v34, %v5995_v45  ;;  %v6005_v46 = vor.u32 1.1754944e-38, %v6004_v30  ;;  %v5976_v5 = vsel %vm12824_vm14, %v5975_v63, %v5971_v25 }
 0xd89   : > { %v5986_v26 = vsel %vm5985_vm2, %v7149_v36, %v5982_v11  ;;  %v6009_v44 = vmul.f32 %v7153_v6, %v12781_v29  ;;  %vm12906_vm0 = vcmp.eq.f32.partialorder %v6017_v39, 8.507059e+37  ;;  %v6020_v53 = vor.u32 1.1754944e-38, %v6019_v20  ;;  %vm6000_vm1 = vmor %vm5998_vm15, %vm5999_vm13 }
 0xd8a   : > { %v5991_v32 = vsel %vm12829_vm4, %v5990_v38, %v5986_v26  ;;  %v5997_v43 = vadd.f32 %v7151_v34, %v5996_v18  ;;  %vm6014_vm5 = vweird.f32 %v7153_v6  ;;  %v6032_v19 = vand.u32 2147483647, %v12788_v58 }
 0xd8b   : > { %v6034_v36 = vand.u32 2147483648, %v12788_v58  ;;  %v6010_v15 = vsub.f32 1.0, %v6009_v44  ;;  %v6038_v63 = vmul.f32 %v5931_v35, %v12668_v54  ;;  %v6039_v16 = vmul.f32 %v5946_v21, %v12672_v17  ;;  %vm6015_vm4 = vmor %vm6013_vm11, %vm6014_vm5 }
 0xd8c   : > { %v6040_v41 = vmul.f32 %v5961_v51, %v12674_v37  ;;  %v6001_v38 = vsel %vm6000_vm1, %v7151_v34, %v5997_v43  ;;  %v6041_v28 = vmul.f32 %v5976_v5, %v12677_v52  ;;  %v6042_v8 = vmul.f32 %v5991_v32, %v12679_v13 }
 0xd8d   : > { %v6046_v1 = vsub.f32 1.0, %v5931_v35  ;;  %v7155_v14 = vpop.eup %7154  ;;  %v6006_v3 = vsel %vm12874_vm3, %v6005_v46, %v6001_v38  ;;  %v6011_v40 = vmul.f32 %v7153_v6, %v6010_v15  ;;  %v6047_v24 = vsub.f32 1.0, %v5946_v21 }
 0xd8e   : > { %v6048_v4 = vsub.f32 1.0, %v5961_v51  ;;  %v6024_v31 = vmul.f32 %v7155_v14, %v12788_v58  ;;  %vm6029_vm14 = vweird.f32 %v7155_v14  ;;  %v6043_v54 = vmul.f32 %v6006_v3, %v12684_v49 }
 0xd8f   : > { %v6049_v17 = vsub.f32 1.0, %v5976_v5  ;;  %v6012_v37 = vadd.f32 %v7153_v6, %v6011_v40  ;;  %v6050_v34 = vsub.f32 1.0, %v5991_v32  ;;  %v6051_v30 = vsub.f32 1.0, %v6006_v3 }
 0xd90   : > { %v6062_v52 = vmul.f32 %v6054_v62, %v6046_v1  ;;  %v6025_v13 = vsub.f32 1.0, %v6024_v31  ;;  %v6063_v48 = vmul.f32 %v6055_v22, %v6047_v24  ;;  %v6064_v59 = vmul.f32 %v6056_v27, %v6048_v4 }
 0xd91   : > { %v6065_v49 = vmul.f32 %v6057_v60, %v6049_v17  ;;  %v6016_v2 = vsel %vm6015_vm4, %v7153_v6, %v6012_v37  ;;  %v6066_v12 = vmul.f32 %v6058_v50, %v6050_v34  ;;  %v6067_v62 = vmul.f32 %v6059_v47, %v6051_v30 }
 0xd92   : > { %v6070_v29 = vadd.f32 %v6062_v52, %v6038_v63  ;;  %v6021_v7 = vsel %vm12906_vm0, %v6020_v53, %v6016_v2  ;;  %v6026_v39 = vmul.f32 %v7155_v14, %v6025_v13  ;;  %v6071_v22 = vadd.f32 %v6063_v48, %v6039_v16 }
 0xd93   : > { %v6072_v33 = vadd.f32 %v6064_v59, %v6040_v41  ;;  %v6052_v27 = vsub.f32 1.0, %v6021_v7  ;;  %v6073_v60 = vadd.f32 %v6065_v49, %v6041_v28  ;;  %v6074_v35 = vadd.f32 %v6066_v12, %v6042_v8 }
 0xd94   : > { %6078 = vst [vmem:[%s7841_s12 + $0xf] sm:$0x1] %v6070_v29  ;;  %v6027_v56 = vadd.f32 %v7155_v14, %v6026_v39  ;;  %vm6028_vm9 = vweird.f32 %v12788_v58  ;;  %v6075_v0 = vadd.f32 %v6067_v62, %v6043_v54  ;;  %v6035_v50 = vor.u32 1.1754944e-38, %v6034_v36 }
 0xd95   : > { %6079 = vst [vmem:[%s7841_s12 + $0x1f] sm:$0x1] %v6071_v22  ;;  %vm6030_vm7 = vmor %vm6028_vm9, %vm6029_vm14  ;;  %v6044_v47 = vmul.f32 %v6021_v7, %v12694_v10  ;;  %v6068_v61 = vmul.f32 %v6060_v57, %v6052_v27  ;;  %vm6033_vm15 = vcmp.eq.f32.partialorder %v6032_v19, 8.507059e+37  ;;  %v6061_v58 = vmax.f32 %v12738_v9, 0.0 }
 0xd96   : > { %6080 = vst [vmem:[%s7841_s12 + $0x2f] sm:$0x1] %v6072_v33  ;;  %v6031_v11 = vsel %vm6030_vm7, %v7155_v14, %v6027_v56 }
 0xd97   : > { %6081 = vst [vmem:[%s7841_s12 + $0x3f] sm:$0x1] %v6073_v60  ;;  %v6036_v42 = vsel %vm6033_vm15, %v6035_v50, %v6031_v11  ;;  %v6076_v45 = vadd.f32 %v6068_v61, %v6044_v47 }
 0xd98   : > { %6082 = vst [vmem:[%s7841_s12 + $0x4f] sm:$0x1] %v6074_v35  ;;  %v6053_v20 = vsub.f32 1.0, %v6036_v42  ;;  %v6045_v21 = vmul.f32 %v6036_v42, %v12706_v23 }
 0xd99   : > { %6083 = vst [vmem:[%s7841_s12 + $0x5f] sm:$0x1] %v6075_v0 }
 0xd9a   : > { %6084 = vst [vmem:[%s7841_s12 + $0x6f] sm:$0x1] %v6076_v45  ;;  %v6069_v25 = vmul.f32 %v6061_v58, %v6053_v20 }
 0xd9b   : > { %6094 = vst [vmem:[#allocation1] ss:$9 sm:$0xff] %v6070_v29 }
 0xd9c   : > { %6096 = vst [vmem:[#allocation1 + $0x1] ss:$9 sm:$0xff] %v6071_v22  ;;  %v6077_v10 = vadd.f32 %v6069_v25, %v6045_v21 }
 0xd9d   : > { %6098 = vst [vmem:[#allocation1 + $0x2] ss:$9 sm:$0xff] %v6072_v33 }
 0xd9e   : > { %6100 = vst [vmem:[#allocation1 + $0x3] ss:$9 sm:$0xff] %v6073_v60 }
 0xd9f   : > { %6085 = vst [vmem:[%s7841_s12 + $0x7f] sm:$0x1] %v6077_v10 }
 0xda0   : > { %6102 = vst [vmem:[#allocation1 + $0x4] ss:$9 sm:$0xff] %v6074_v35 }
 0xda1   : > { %6104 = vst [vmem:[#allocation1 + $0x5] ss:$9 sm:$0xff] %v6075_v0 }
 0xda2   : > { %6106 = vst [vmem:[#allocation1 + $0x6] ss:$9 sm:$0xff] %v6076_v45 }
 0xda3   : > { %6108 = vst [vmem:[#allocation1 + $0x7] ss:$9 sm:$0xff] %v6077_v10 }
 0xdaa   : > { %v6109_v6 = vld [vmem:[#allocation1] sm:$0xff] }
 0xdab   : > { %6111 = vst [vmem:[#allocation2] sm:$0xff] %v6109_v6 }
 0xdac   : > { %s13865_s6 = sld [smem:[#allocation25_spill]]  ;;  %s6479_s17 = sshll.u32 %s7557_s24, 1 }
 0xdad   : > { %s6138_s13 = sshll.u32 %s7841_s12, 4  ;;  %s13867_s18 = sld [smem:[#allocation60_spill]]  ;;  %s6139_s13 = int_to_ptr.vmem [resolvable:$true] %s6138_s13 }
 0xdae   : > { %s7586_s11 = smov 256   ;;  %s7587_s3 = smov 512  }
 0xdaf   : > { %6509 = sst [smem:[#allocation17]] (%p7746_p7), %s7586_s11  ;;  %s7588_s24 = smov 2  }
 0xdb0   : > { %6510 = sst [smem:[#allocation17 + $0x1]] (%p7746_p7), %s7587_s3  ;;  %s7589_s10 = smov 128  }
 0xdb1   : > { %6511 = sst [smem:[#allocation17 + $0x2]] (%p7746_p7), %s7588_s24  ;;  %s7590_s5 = smov 8  }
 0xdb2   : > { %s6485_s25 = sshll.u32 %s13865_s6, 5  ;;  %6512 = sst [smem:[#allocation17 + $0x3]] (%p7746_p7), %s7589_s10 }
 0xdb3   : > { %s6125_s2 = sadd.s32 %s6485_s25, %s6479_s17  ;;  %6513 = sst [smem:[#allocation17 + $0x4]] (%p7746_p7), %s7589_s10 }
 0xdb4   : > { %s6481_s14 = sshll.u32 %s6125_s2, 3  ;;  %6514 = sst [smem:[#allocation17 + $0x5]] (%p7746_p7), %s7590_s5 }
 0xdb5   : > { %s6127_s7 = scalar_lea.hbm %s13867_s18, %s6481_s14  ;;  %s7591_s1 = smov [#allocation16]  }
 0xdb6   : > { %s6140_s30 = sshll.u32 %s6127_s7, 4  ;;  %s7592_s0 = smov 0   ;;  %s6141_s30 = int_to_ptr.hbm [resolvable:$true] %s6140_s30 }
 0xdb7   : > { %6515 = dma.general (%p7746_p7), %s6139_s13, 2048, %s6141_s30, %s6113_s29, %s7591_s1, [#allocation17], %s7592_s0, 0  }
 0xdb8 PF: > { %s13868_s26 = sld [smem:[#allocation24_spill]]  ;;  %p6537_p6 = scmp.ge.s32.totalorder %s7573_s28, 2 }
 0xdba   : > { %p6528_p13 = pnand %p6537_p6, %p7754_p10 }
 0xdbc   : > { %p6529_p0 = pneg %p6528_p13 }
 0xdbe   : > { %s6168_s8 = sand.u32 1, %s13868_s26  }
 0xdbf   : > { %s6169_s12 = scalar_lea.sflag [#allocation6], %s6168_s8 }
 0xdc0   : > { %7528 = dma.done.wait (%p6529_p0), %s6169_s12, 2048  }
 0xdc1   : > { %7530 = vsyncadd (%p6529_p0), %s6169_s12, 4294965248  ;;  %s23_s28 = sadd.s32 1, %s7573_s28   ;;  %s13870_s6 = sld [smem:[#allocation29_spill]] }
 0xdc2   : > { %p20_p4 = scmp.ge.s32.totalorder %s23_s28, 6   ;;  %s13871_s29 = sld [smem:[#allocation30_spill]] }
 0xdc3   : > { %s13872_s24 = sld [smem:[#allocation26_spill]]  ;;  %s13875_s18 = smov %s7537_s19 }
 0xdc4   : > { %s13873_s26 = sld [smem:[#allocation27_spill]]  ;;  %s13876_s19 = smov %s7541_s20 }
 0xdc5   : > { %s13874_s17 = sld [smem:[#allocation28_spill]]  ;;  %s13878_s21 = smov %s7549_s22 }
 0xdc6   : > { %s13879_s22 = smov %s7553_s23  ;;  %s13881_s25 = smov %s7569_s27 }
 0xdc7   : > { %s13877_s20 = smov %s13870_s6  ;;  %22 = sbr.rel (!%p20_p4) target bundleno = 17 (0x11), region = 361 }
 0xdc8   : > { %s13880_s23 = smov %s13871_s29 }
 0xdcb   : > { %s13882_s27 = smov %s13874_s17 }
 0xdcc   :  { %6175 = vsyncpa [#allocation5], 1 }
 0xdcd   :  { %6177 = vsyncpa [#allocation5 + $0x1], 1 }
 0xdce   :  { %6178 = vsyncpa [#allocation8], 1 }
 0xdcf   :  { %6179 = vsyncpa [#allocation11], 1 }
 0xdd0   :  { %6180 = vsyncpa [#allocation6], 1 }
 0xdd1   :  { %6182 = vsyncpa [#allocation6 + $0x1], 1 }

</bundles_post_ra>
